<compile_context>
chip_gen: v7x
topology: tpu7x:2x2x1
jax: 0.10.0
libtpu: 0.0.40
codegen_flags: <defaults>
</compile_context>

<pallas_src>
import functools

import jax
import jax.numpy as jnp
from jax.experimental import pallas as pl
from jax.experimental.pallas import tpu as pltpu

BN_EPS = 1e-5
NEG_SLOPE = 0.2
LANE = 128


# ------------------------------ Pallas kernels ------------------------------

def _conv1_lrelu_kernel(x_ref, w_ref, b_ref, o_ref):
    y = jnp.dot(x_ref[...], w_ref[...], preferred_element_type=jnp.float32)
    y = y + b_ref[...]
    o_ref[...] = jnp.maximum(y, NEG_SLOPE * y).astype(o_ref.dtype)


def _make_trunk_head_kernel(n_sigmoid, n_spatial, batch, c2):
    """conv2 (pre-im2col'd) + BN2d + LReLU + fc1 + BN1d + LReLU + [dc|cl] heads."""

    def kernel(p2_ref, w2_ref, b2_ref, g2_ref, bt2_ref,
               w1_ref, b1_ref, g1_ref, bt1_ref,
               wh_ref, bh_ref, o_ref):
        # ---- conv2 as one matmul over all B*Ho2*Wo2 patch rows (rows: (p, b))
        y = jnp.dot(p2_ref[...], w2_ref[...], preferred_element_type=jnp.float32)
        y = y + b2_ref[...]
        m = y.shape[0]
        mean = jnp.sum(y, axis=0, keepdims=True) * (1.0 / m)
        yc = y - mean
        var = jnp.sum(yc * yc, axis=0, keepdims=True) * (1.0 / m)
        y = yc * jax.lax.rsqrt(var + BN_EPS) * g2_ref[...] + bt2_ref[...]
        y = jnp.maximum(y, NEG_SLOPE * y).astype(jnp.bfloat16)

        # ---- fc1: W1 rows pre-permuted to (spatial, channel) order, so
        #      h[b] = sum_p y[p*B + b, :] @ W1[p*C2:(p+1)*C2, :]
        n1 = w1_ref.shape[1]
        h = jnp.zeros((batch, n1), jnp.float32)
        for p in range(n_spatial):
            h = h + jnp.dot(y[p * batch:(p + 1) * batch, :],
                            w1_ref[p * c2:(p + 1) * c2, :],
                            preferred_element_type=jnp.float32)
        h = h + b1_ref[...]
        mean1 = jnp.sum(h, axis=0, keepdims=True) * (1.0 / batch)
        hc = h - mean1
        var1 = jnp.sum(hc * hc, axis=0, keepdims=True) * (1.0 / batch)
        h = hc * jax.lax.rsqrt(var1 + BN_EPS) * g1_ref[...] + bt1_ref[...]
        h = jnp.maximum(h, NEG_SLOPE * h)

        # ---- packed [dc | cl] head; sigmoid only on first n_sigmoid columns
        z = jnp.dot(h.astype(wh_ref.dtype), wh_ref[...],
                    preferred_element_type=jnp.float32) + bh_ref[...]
        col = jax.lax.broadcasted_iota(jnp.int32, z.shape, 1)
        sig = pl.reciprocal(1.0 + jnp.exp(-z), approx=True)
        o_ref[...] = jnp.where(col < n_sigmoid, sig, z)

    return kernel


# ------------------------------ kernel wrappers ------------------------------

def conv1_lrelu(p1, w, b):
    """LeakyReLU(p1 @ w + b), one grid step, bf16 output."""
    M, K = p1.shape
    N = w.shape[1]
    return pl.pallas_call(
        _conv1_lrelu_kernel,
        out_shape=jax.ShapeDtypeStruct((M, N), jnp.bfloat16),
        grid=(1,),
        in_specs=[pl.BlockSpec((M, K), lambda i: (0, 0)),
                  pl.BlockSpec((K, N), lambda i: (0, 0)),
                  pl.BlockSpec((1, N), lambda i: (0, 0))],
        out_specs=pl.BlockSpec((M, N), lambda i: (0, 0)),
        compiler_params=pltpu.CompilerParams(
            dimension_semantics=("arbitrary",)),
    )(p1, w, b)


def fused_trunk_head(p2, w2, b2, g2, bt2, w1p, b1, g1, bt1, wh, bh, *,
                     n_sigmoid, batch, n_spatial, c2):
    """Single launch: conv2 + BN2d + LReLU + fc1 + BN1d + LReLU + heads."""
    M2, K2 = p2.shape
    N2 = w2.shape[1]
    K1, N1 = w1p.shape
    NH = wh.shape[1]
    kern = _make_trunk_head_kernel(n_sigmoid, n_spatial, batch, c2)
    return pl.pallas_call(
        kern,
        out_shape=jax.ShapeDtypeStruct((batch, NH), jnp.float32),
        grid=(1,),
        in_specs=[pl.BlockSpec((M2, K2), lambda i: (0, 0)),
                  pl.BlockSpec((K2, N2), lambda i: (0, 0)),
                  pl.BlockSpec((1, N2), lambda i: (0, 0)),
                  pl.BlockSpec((1, N2), lambda i: (0, 0)),
                  pl.BlockSpec((1, N2), lambda i: (0, 0)),
                  pl.BlockSpec((K1, N1), lambda i: (0, 0)),
                  pl.BlockSpec((1, N1), lambda i: (0, 0)),
                  pl.BlockSpec((1, N1), lambda i: (0, 0)),
                  pl.BlockSpec((1, N1), lambda i: (0, 0)),
                  pl.BlockSpec((N1, NH), lambda i: (0, 0)),
                  pl.BlockSpec((1, NH), lambda i: (0, 0))],
        out_specs=pl.BlockSpec((batch, NH), lambda i: (0, 0)),
        compiler_params=pltpu.CompilerParams(
            dimension_semantics=("arbitrary",)),
    )(p2, w2, b2, g2, bt2, w1p, b1, g1, bt1, wh, bh)


# --------------------------- im2col / weight glue ----------------------------

def im2col_nhwc(x_nhwc, k, stride, pad, row_order="bhw"):
    """Patches for a regular strided conv. Feature ordering: (ki, kj, cin)."""
    B, H, W, C = x_nhwc.shape
    xp = jnp.pad(x_nhwc, ((0, 0), (pad, pad), (pad, pad), (0, 0)))
    Ho = (H + 2 * pad - k) // stride + 1
    Wo = (W + 2 * pad - k) // stride + 1
    cols = [xp[:, i:i + stride * Ho:stride, j:j + stride * Wo:stride, :]
            for i in range(k) for j in range(k)]
    patches = jnp.concatenate(cols, axis=-1)                 # (B, Ho, Wo, k*k*C)
    if row_order == "hwb":                                    # rows = (spatial, batch)
        patches = jnp.transpose(patches, (1, 2, 0, 3))
        return patches.reshape(Ho * Wo * B, k * k * C), (B, Ho, Wo)
    return patches.reshape(B * Ho * Wo, k * k * C), (B, Ho, Wo)


def conv_w_to_mat(w_oihw):
    """(Cout, Cin, kh, kw) -> (kh*kw*Cin, Cout), matching im2col ordering."""
    Cout, Cin, kh, kw = w_oihw.shape
    return jnp.transpose(w_oihw, (2, 3, 1, 0)).reshape(kh * kw * Cin, Cout)


# ------------------------------- weight prep ---------------------------------

def prepare_params(params, *, input_size, output_dim=1, class_num=10):
    """One-time: bf16 casts, head-slab packing, fc1 row permutation."""
    s4 = input_size // 4
    n_spatial = s4 * s4
    c1 = params["c1_w"].shape[0]
    c2 = params["c2_w"].shape[0]
    n1 = params["fc1_w"].shape[1]

    # fc1_w consumes NCHW-flattened features (row = c*P + p); permute rows to
    # (p, c) order so the fused kernel consumes (spatial, batch)-ordered conv2
    # output rows with plain contiguous slices.
    w1p = (params["fc1_w"].reshape(c2, n_spatial, n1)
           .transpose(1, 0, 2).reshape(c2 * n_spatial, n1))

    wh = jnp.zeros((n1, LANE), jnp.float32)
    wh = wh.at[:, :output_dim].set(params["dc_w"])
    wh = wh.at[:, output_dim:output_dim + class_num].set(params["cl_w"])
    bh = jnp.zeros((LANE,), jnp.float32)
    bh = bh.at[:output_dim].set(params["dc_b"])
    bh = bh.at[output_dim:output_dim + class_num].set(params["cl_b"])

    return {
        "c1_wm": conv_w_to_mat(params["c1_w"]).astype(jnp.bfloat16),
        "c1_b": params["c1_b"].reshape(1, c1).astype(jnp.float32),
        "c2_wm": conv_w_to_mat(params["c2_w"]).astype(jnp.bfloat16),
        "c2_b": params["c2_b"].reshape(1, c2).astype(jnp.float32),
        "bn2_g": params["bn2_g"].reshape(1, c2).astype(jnp.float32),
        "bn2_b": params["bn2_b"].reshape(1, c2).astype(jnp.float32),
        "fc1_wp": w1p.astype(jnp.bfloat16),
        "fc1_b": params["fc1_b"].reshape(1, n1).astype(jnp.float32),
        "bn1_g": params["bn1_g"].reshape(1, n1).astype(jnp.float32),
        "bn1_b": params["bn1_b"].reshape(1, n1).astype(jnp.float32),
        "head_w": wh.astype(jnp.bfloat16),
        "head_b": bh.reshape(1, LANE).astype(jnp.float32),
    }


# ------------------------------- full forward --------------------------------

def discriminator_forward(x_nchw, prep, *, output_dim=1, class_num=10):
    B = x_nchw.shape[0]
    c1 = prep["c1_wm"].shape[1]
    c2 = prep["c2_wm"].shape[1]

    # conv1: tiny im2col on the 8 KB image, one matmul kernel, bf16 out
    x_nhwc = jnp.transpose(x_nchw, (0, 2, 3, 1)).astype(jnp.bfloat16)
    p1, (_, Ho1, Wo1) = im2col_nhwc(x_nhwc, 4, 2, 1)
    y1 = conv1_lrelu(p1, prep["c1_wm"], prep["c1_b"])        # (B*Ho1*Wo1, 64) bf16
    y1 = y1.reshape(B, Ho1, Wo1, c1)                         # NHWC

    # conv2 patches, rows ordered (spatial, batch) to feed the fused fc stage
    p2, (_, Ho2, Wo2) = im2col_nhwc(y1, 4, 2, 1, row_order="hwb")
    n_spatial = Ho2 * Wo2

    # conv2 + BN2d + LReLU + fc1 + BN1d + LReLU + [dc|cl] heads, ONE launch
    out = fused_trunk_head(p2, prep["c2_wm"], prep["c2_b"],
                           prep["bn2_g"], prep["bn2_b"],
                           prep["fc1_wp"], prep["fc1_b"],
                           prep["bn1_g"], prep["bn1_b"],
                           prep["head_w"], prep["head_b"],
                           n_sigmoid=output_dim, batch=B,
                           n_spatial=n_spatial, c2=c2)
    d = out[:, :output_dim]
    c = out[:, output_dim:output_dim + class_num]
    return d, c


# ----------------------------- pure-JAX reference ----------------------------

def reference_forward(x, params, *, output_dim=1, class_num=10):
    def lrelu(v):
        return jnp.where(v > 0, v, NEG_SLOPE * v)

    def conv(v, w, b):
        y = jax.lax.conv_general_dilated(
            v, w, window_strides=(2, 2), padding=((1, 1), (1, 1)),
            dimension_numbers=("NCHW", "OIHW", "NCHW"))
        return y + b.reshape(1, -1, 1, 1)

    B = x.shape[0]
    y = lrelu(conv(x, params["c1_w"], params["c1_b"]))
    y = conv(y, params["c2_w"], params["c2_b"])
    m = jnp.mean(y, axis=(0, 2, 3), keepdims=True)
    v = jnp.mean((y - m) ** 2, axis=(0, 2, 3), keepdims=True)
    y = (y - m) / jnp.sqrt(v + BN_EPS) * params["bn2_g"].reshape(1, -1, 1, 1) \
        + params["bn2_b"].reshape(1, -1, 1, 1)
    y = lrelu(y)
    y = y.reshape(B, -1)
    h = y @ params["fc1_w"] + params["fc1_b"]
    m = jnp.mean(h, axis=0, keepdims=True)
    v = jnp.mean((h - m) ** 2, axis=0, keepdims=True)
    h = (h - m) / jnp.sqrt(v + BN_EPS) * params["bn1_g"] + params["bn1_b"]
    h = lrelu(h)
    d = jax.nn.sigmoid(h @ params["dc_w"] + params["dc_b"])
    c = h @ params["cl_w"] + params["cl_b"]
    return d, c


# ------------------------------------ main -----------------------------------

if __name__ == "__main__":
    # input_dim=1, class_num=10, output_dim=1, input_size shrunk 32 -> 16,
    # batch = 8 (sublane quantum).
    B, INPUT_DIM, OUTPUT_DIM, INPUT_SIZE, CLASS_NUM = 8, 1, 1, 16, 10
    S4 = INPUT_SIZE // 4
    FC_IN = 128 * S4 * S4

    key = jax.random.PRNGKey(0)
    ks = jax.random.split(key, 12)
    normal = jax.random.normal

    # initialize_weights: conv/linear W ~ N(0, 0.02), biases 0,
    #                     BN gamma ~ N(1, 0.02), BN beta 0.
    params = {
        "c1_w": 0.02 * normal(ks[0], (64, INPUT_DIM, 4, 4), jnp.float32),
        "c1_b": jnp.zeros((64,), jnp.float32),
        "c2_w": 0.02 * normal(ks[1], (128, 64, 4, 4), jnp.float32),
        "c2_b": jnp.zeros((128,), jnp.float32),
        "bn2_g": 1.0 + 0.02 * normal(ks[2], (128,), jnp.float32),
        "bn2_b": jnp.zeros((128,), jnp.float32),
        "fc1_w": 0.02 * normal(ks[3], (FC_IN, 1024), jnp.float32),
        "fc1_b": jnp.zeros((1024,), jnp.float32),
        "bn1_g": 1.0 + 0.02 * normal(ks[4], (1024,), jnp.float32),
        "bn1_b": jnp.zeros((1024,), jnp.float32),
        "dc_w": 0.02 * normal(ks[5], (1024, OUTPUT_DIM), jnp.float32),
        "dc_b": jnp.zeros((OUTPUT_DIM,), jnp.float32),
        "cl_w": 0.02 * normal(ks[6], (1024, CLASS_NUM), jnp.float32),
        "cl_b": jnp.zeros((CLASS_NUM,), jnp.float32),
    }

    x = normal(ks[7], (B, INPUT_DIM, INPUT_SIZE, INPUT_SIZE), jnp.float32)

    # one-time weight prep (bf16 casts, head packing, fc1 row permutation)
    prep = prepare_params(params, input_size=INPUT_SIZE,
                          output_dim=OUTPUT_DIM, class_num=CLASS_NUM)
    prep = jax.tree_util.tree_map(jnp.asarray, prep)
    jax.block_until_ready(prep)

    fwd = jax.jit(functools.partial(discriminator_forward,
                                    output_dim=OUTPUT_DIM, class_num=CLASS_NUM))
    d, c = fwd(x, prep)
    jax.block_until_ready((d, c))
    assert d.shape == (B, OUTPUT_DIM), d.shape
    assert c.shape == (B, CLASS_NUM), c.shape

    d_ref, c_ref = reference_forward(x, params,
                                     output_dim=OUTPUT_DIM, class_num=CLASS_NUM)
    err = max(float(jnp.max(jnp.abs(d - d_ref))),
              float(jnp.max(jnp.abs(c - c_ref))))
    assert err < 5e-2, f"max abs err {err}"

    print("KERNEL_OK")
</pallas_src>

<mosaic_0001>
module attributes {stable_mosaic.version = 11 : i64} {
  func.func @_conv1_lrelu_kernel(%arg0: i32, %arg1: memref<512x16xbf16, #tpu.memory_space<vmem>>, %arg2: memref<16x64xbf16, #tpu.memory_space<vmem>>, %arg3: memref<1x64xf32, #tpu.memory_space<vmem>>, %arg4: memref<512x64xbf16, #tpu.memory_space<vmem>>) attributes {dimension_semantics = [#tpu.dimension_semantics<arbitrary>], iteration_bounds = array<i64: 1>, scalar_prefetch = 0 : i64, scratch_operands = 0 : i64, tpu.core_type = #tpu.core_type<tc>, window_params = [{pipeline_mode = #tpu.pipeline_mode<synchronous>, transform_indices = @transform_0, window_bounds = array<i64: 512, 16>}, {pipeline_mode = #tpu.pipeline_mode<synchronous>, transform_indices = @transform_1, window_bounds = array<i64: 16, 64>}, {pipeline_mode = #tpu.pipeline_mode<synchronous>, transform_indices = @transform_2, window_bounds = array<i64: 1, 64>}, {pipeline_mode = #tpu.pipeline_mode<synchronous>, transform_indices = @transform_3, window_bounds = array<i64: 512, 64>}]} {
    %c0 = arith.constant 0 : index
    %c0_0 = arith.constant 0 : index
    %0 = vector.load %arg1[%c0, %c0_0] : memref<512x16xbf16, #tpu.memory_space<vmem>>, vector<512x16xbf16>
    %c0_1 = arith.constant 0 : index
    %c0_2 = arith.constant 0 : index
    %1 = vector.load %arg2[%c0_1, %c0_2] : memref<16x64xbf16, #tpu.memory_space<vmem>>, vector<16x64xbf16>
    %cst = arith.constant dense<0.000000e+00> : vector<512x64xf32>
    %2 = tpu.matmul %0, %1, %cst {dimension_numbers = #tpu.dot_dimension_numbers<[1], [0], [0], [1], [0, 0, 1, 1], [], []>} : vector<512x16xbf16>, vector<16x64xbf16>, vector<512x64xf32> -> vector<512x64xf32>
    %c0_3 = arith.constant 0 : index
    %c0_4 = arith.constant 0 : index
    %3 = vector.load %arg3[%c0_3, %c0_4] : memref<1x64xf32, #tpu.memory_space<vmem>>, vector<1x64xf32>
    %4 = vector.broadcast %3 : vector<1x64xf32> to vector<512x64xf32>
    %5 = arith.addf %2, %4 : vector<512x64xf32>
    %cst_5 = arith.constant 2.000000e-01 : f32
    %6 = vector.broadcast %cst_5 : f32 to vector<512x64xf32>
    %7 = arith.mulf %6, %5 : vector<512x64xf32>
    %8 = arith.maximumf %5, %7 : vector<512x64xf32>
    %9 = arith.truncf %8 : vector<512x64xf32> to vector<512x64xbf16>
    %c0_6 = arith.constant 0 : index
    %c0_7 = arith.constant 0 : index
    %10 = vector.load %arg4[%c0_6, %c0_7] : memref<512x64xbf16, #tpu.memory_space<vmem>>, vector<512x64xbf16>
    tpu.vector_store %arg4[%c0_6, %c0_7], %9 {strides = array<i32>} : memref<512x64xbf16, #tpu.memory_space<vmem>>, vector<512x64xbf16>,
    return
  }
  func.func @transform_0(%arg0: i32) -> (i32, i32) {
    %c0_i32 = arith.constant 0 : i32
    %c0_i32_0 = arith.constant 0 : i32
    %c0_i32_1 = arith.constant 0 : i32
    return %c0_i32, %c0_i32_0 : i32, i32
  }
  func.func @transform_1(%arg0: i32) -> (i32, i32) {
    %c0_i32 = arith.constant 0 : i32
    %c0_i32_0 = arith.constant 0 : i32
    %c0_i32_1 = arith.constant 0 : i32
    return %c0_i32, %c0_i32_0 : i32, i32
  }
  func.func @transform_2(%arg0: i32) -> (i32, i32) {
    %c0_i32 = arith.constant 0 : i32
    %c0_i32_0 = arith.constant 0 : i32
    %c0_i32_1 = arith.constant 0 : i32
    return %c0_i32, %c0_i32_0 : i32, i32
  }
  func.func @transform_3(%arg0: i32) -> (i32, i32) {
    %c0_i32 = arith.constant 0 : i32
    %c0_i32_0 = arith.constant 0 : i32
    %c0_i32_1 = arith.constant 0 : i32
    return %c0_i32, %c0_i32_0 : i32, i32
  }
}

module attributes {stable_mosaic.version = 11 : i64} {
  func.func @kernel(%arg0: i32, %arg1: memref<128x1024xbf16, #tpu.memory_space<vmem>>, %arg2: memref<1024x128xbf16, #tpu.memory_space<vmem>>, %arg3: memref<1x128xf32, #tpu.memory_space<vmem>>, %arg4: memref<1x128xf32, #tpu.memory_space<vmem>>, %arg5: memref<1x128xf32, #tpu.memory_space<vmem>>, %arg6: memref<2048x1024xbf16, #tpu.memory_space<vmem>>, %arg7: memref<1x1024xf32, #tpu.memory_space<vmem>>, %arg8: memref<1x1024xf32, #tpu.memory_space<vmem>>, %arg9: memref<1x1024xf32, #tpu.memory_space<vmem>>, %arg10: memref<1024x128xbf16, #tpu.memory_space<vmem>>, %arg11: memref<1x128xf32, #tpu.memory_space<vmem>>, %arg12: memref<8x128xf32, #tpu.memory_space<vmem>>) attributes {dimension_semantics = [#tpu.dimension_semantics<arbitrary>], iteration_bounds = array<i64: 1>, scalar_prefetch = 0 : i64, scratch_operands = 0 : i64, tpu.core_type = #tpu.core_type<tc>, window_params = [{pipeline_mode = #tpu.pipeline_mode<synchronous>, transform_indices = @transform_0, window_bounds = array<i64: 128, 1024>}, {pipeline_mode = #tpu.pipeline_mode<synchronous>, transform_indices = @transform_1, window_bounds = array<i64: 1024, 128>}, {pipeline_mode = #tpu.pipeline_mode<synchronous>, transform_indices = @transform_2, window_bounds = array<i64: 1, 128>}, {pipeline_mode = #tpu.pipeline_mode<synchronous>, transform_indices = @transform_3, window_bounds = array<i64: 1, 128>}, {pipeline_mode = #tpu.pipeline_mode<synchronous>, transform_indices = @transform_4, window_bounds = array<i64: 1, 128>}, {pipeline_mode = #tpu.pipeline_mode<synchronous>, transform_indices = @transform_5, window_bounds = array<i64: 2048, 1024>}, {pipeline_mode = #tpu.pipeline_mode<synchronous>, transform_indices = @transform_6, window_bounds = array<i64: 1, 1024>}, {pipeline_mode = #tpu.pipeline_mode<synchronous>, transform_indices = @transform_7, window_bounds = array<i64: 1, 1024>}, {pipeline_mode = #tpu.pipeline_mode<synchronous>, transform_indices = @transform_8, window_bounds = array<i64: 1, 1024>}, {pipeline_mode = #tpu.pipeline_mode<synchronous>, transform_indices = @transform_9, window_bounds = array<i64: 1024, 128>}, {pipeline_mode = #tpu.pipeline_mode<synchronous>, transform_indices = @transform_10, window_bounds = array<i64: 1, 128>}, {pipeline_mode = #tpu.pipeline_mode<synchronous>, transform_indices = @transform_11, window_bounds = array<i64: 8, 128>}]} {
    %c0 = arith.constant 0 : index
    %c0_0 = arith.constant 0 : index
    %0 = vector.load %arg1[%c0, %c0_0] : memref<128x1024xbf16, #tpu.memory_space<vmem>>, vector<128x1024xbf16>
    %c0_1 = arith.constant 0 : index
    %c0_2 = arith.constant 0 : index
    %1 = vector.load %arg2[%c0_1, %c0_2] : memref<1024x128xbf16, #tpu.memory_space<vmem>>, vector<1024x128xbf16>
    %cst = arith.constant dense<0.000000e+00> : vector<128x128xf32>
    %2 = tpu.matmul %0, %1, %cst {dimension_numbers = #tpu.dot_dimension_numbers<[1], [0], [0], [1], [0, 0, 1, 1], [], []>} : vector<128x1024xbf16>, vector<1024x128xbf16>, vector<128x128xf32> -> vector<128x128xf32>
    %c0_3 = arith.constant 0 : index
    %c0_4 = arith.constant 0 : index
    %3 = vector.load %arg3[%c0_3, %c0_4] : memref<1x128xf32, #tpu.memory_space<vmem>>, vector<1x128xf32>
    %4 = vector.broadcast %3 : vector<1x128xf32> to vector<128x128xf32>
    %5 = arith.addf %2, %4 : vector<128x128xf32>
    %cst_5 = arith.constant dense<0.000000e+00> : vector<128xf32>
    %6 = vector.multi_reduction <add>, %5, %cst_5 [0] : vector<128x128xf32> to vector<128xf32>
    %7 = vector.shape_cast %6 : vector<128xf32> to vector<1x128xf32>
    %cst_6 = arith.constant 7.812500e-03 : f32
    %8 = vector.broadcast %cst_6 : f32 to vector<1x128xf32>
    %9 = arith.mulf %7, %8 : vector<1x128xf32>
    %10 = vector.broadcast %9 : vector<1x128xf32> to vector<128x128xf32>
    %11 = arith.subf %5, %10 : vector<128x128xf32>
    %12 = arith.mulf %11, %11 : vector<128x128xf32>
    %cst_7 = arith.constant dense<0.000000e+00> : vector<128xf32>
    %13 = vector.multi_reduction <add>, %12, %cst_7 [0] : vector<128x128xf32> to vector<128xf32>
    %14 = vector.shape_cast %13 : vector<128xf32> to vector<1x128xf32>
    %cst_8 = arith.constant 7.812500e-03 : f32
    %15 = vector.broadcast %cst_8 : f32 to vector<1x128xf32>
    %16 = arith.mulf %14, %15 : vector<1x128xf32>
    %cst_9 = arith.constant 9.99999974E-6 : f32
    %17 = vector.broadcast %cst_9 : f32 to vector<1x128xf32>
    %18 = arith.addf %16, %17 : vector<1x128xf32>
    %19 = math.rsqrt %18 : vector<1x128xf32>
    %20 = vector.broadcast %19 : vector<1x128xf32> to vector<128x128xf32>
    %21 = arith.mulf %11, %20 : vector<128x128xf32>
    %c0_10 = arith.constant 0 : index
    %c0_11 = arith.constant 0 : index
    %22 = vector.load %arg4[%c0_10, %c0_11] : memref<1x128xf32, #tpu.memory_space<vmem>>, vector<1x128xf32>
    %23 = vector.broadcast %22 : vector<1x128xf32> to vector<128x128xf32>
    %24 = arith.mulf %21, %23 : vector<128x128xf32>
    %c0_12 = arith.constant 0 : index
    %c0_13 = arith.constant 0 : index
    %25 = vector.load %arg5[%c0_12, %c0_13] : memref<1x128xf32, #tpu.memory_space<vmem>>, vector<1x128xf32>
    %26 = vector.broadcast %25 : vector<1x128xf32> to vector<128x128xf32>
    %27 = arith.addf %24, %26 : vector<128x128xf32>
    %cst_14 = arith.constant 2.000000e-01 : f32
    %28 = vector.broadcast %cst_14 : f32 to vector<128x128xf32>
    %29 = arith.mulf %28, %27 : vector<128x128xf32>
    %30 = arith.maximumf %27, %29 : vector<128x128xf32>
    %31 = arith.truncf %30 : vector<128x128xf32> to vector<128x128xbf16>
    %cst_15 = arith.constant 0.000000e+00 : f32
    %32 = vector.broadcast %cst_15 : f32 to vector<8x1024xf32>
    %33 = vector.extract_strided_slice %31 {offsets = [0, 0], sizes = [8, 128], strides = [1, 1]} : vector<128x128xbf16> to vector<8x128xbf16>
    %c0_16 = arith.constant 0 : index
    %c0_17 = arith.constant 0 : index
    %34 = vector.load %arg6[%c0_16, %c0_17] : memref<2048x1024xbf16, #tpu.memory_space<vmem>>, vector<128x1024xbf16>
    %cst_18 = arith.constant dense<0.000000e+00> : vector<8x1024xf32>
    %35 = tpu.matmul %33, %34, %cst_18 {dimension_numbers = #tpu.dot_dimension_numbers<[1], [0], [0], [1], [0, 0, 1, 1], [], []>} : vector<8x128xbf16>, vector<128x1024xbf16>, vector<8x1024xf32> -> vector<8x1024xf32>
    %36 = arith.addf %32, %35 : vector<8x1024xf32>
    %37 = vector.extract_strided_slice %31 {offsets = [8, 0], sizes = [8, 128], strides = [1, 1]} : vector<128x128xbf16> to vector<8x128xbf16>
    %c128 = arith.constant 128 : index
    %c0_19 = arith.constant 0 : index
    %38 = vector.load %arg6[%c128, %c0_19] : memref<2048x1024xbf16, #tpu.memory_space<vmem>>, vector<128x1024xbf16>
    %cst_20 = arith.constant dense<0.000000e+00> : vector<8x1024xf32>
    %39 = tpu.matmul %37, %38, %cst_20 {dimension_numbers = #tpu.dot_dimension_numbers<[1], [0], [0], [1], [0, 0, 1, 1], [], []>} : vector<8x128xbf16>, vector<128x1024xbf16>, vector<8x1024xf32> -> vector<8x1024xf32>
    %40 = arith.addf %36, %39 : vector<8x1024xf32>
    %41 = vector.extract_strided_slice %31 {offsets = [16, 0], sizes = [8, 128], strides = [1, 1]} : vector<128x128xbf16> to vector<8x128xbf16>
    %c256 = arith.constant 256 : index
    %c0_21 = arith.constant 0 : index
    %42 = vector.load %arg6[%c256, %c0_21] : memref<2048x1024xbf16, #tpu.memory_space<vmem>>, vector<128x1024xbf16>
    %cst_22 = arith.constant dense<0.000000e+00> : vector<8x1024xf32>
    %43 = tpu.matmul %41, %42, %cst_22 {dimension_numbers = #tpu.dot_dimension_numbers<[1], [0], [0], [1], [0, 0, 1, 1], [], []>} : vector<8x128xbf16>, vector<128x1024xbf16>, vector<8x1024xf32> -> vector<8x1024xf32>
    %44 = arith.addf %40, %43 : vector<8x1024xf32>
    %45 = vector.extract_strided_slice %31 {offsets = [24, 0], sizes = [8, 128], strides = [1, 1]} : vector<128x128xbf16> to vector<8x128xbf16>
    %c384 = arith.constant 384 : index
    %c0_23 = arith.constant 0 : index
    %46 = vector.load %arg6[%c384, %c0_23] : memref<2048x1024xbf16, #tpu.memory_space<vmem>>, vector<128x1024xbf16>
    %cst_24 = arith.constant dense<0.000000e+00> : vector<8x1024xf32>
    %47 = tpu.matmul %45, %46, %cst_24 {dimension_numbers = #tpu.dot_dimension_numbers<[1], [0], [0], [1], [0, 0, 1, 1], [], []>} : vector<8x128xbf16>, vector<128x1024xbf16>, vector<8x1024xf32> -> vector<8x1024xf32>
    %48 = arith.addf %44, %47 : vector<8x1024xf32>
    %49 = vector.extract_strided_slice %31 {offsets = [32, 0], sizes = [8, 128], strides = [1, 1]} : vector<128x128xbf16> to vector<8x128xbf16>
    %c512 = arith.constant 512 : index
    %c0_25 = arith.constant 0 : index
    %50 = vector.load %arg6[%c512, %c0_25] : memref<2048x1024xbf16, #tpu.memory_space<vmem>>, vector<128x1024xbf16>
    %cst_26 = arith.constant dense<0.000000e+00> : vector<8x1024xf32>
    %51 = tpu.matmul %49, %50, %cst_26 {dimension_numbers = #tpu.dot_dimension_numbers<[1], [0], [0], [1], [0, 0, 1, 1], [], []>} : vector<8x128xbf16>, vector<128x1024xbf16>, vector<8x1024xf32> -> vector<8x1024xf32>
    %52 = arith.addf %48, %51 : vector<8x1024xf32>
    %53 = vector.extract_strided_slice %31 {offsets = [40, 0], sizes = [8, 128], strides = [1, 1]} : vector<128x128xbf16> to vector<8x128xbf16>
    %c640 = arith.constant 640 : index
    %c0_27 = arith.constant 0 : index
    %54 = vector.load %arg6[%c640, %c0_27] : memref<2048x1024xbf16, #tpu.memory_space<vmem>>, vector<128x1024xbf16>
    %cst_28 = arith.constant dense<0.000000e+00> : vector<8x1024xf32>
    %55 = tpu.matmul %53, %54, %cst_28 {dimension_numbers = #tpu.dot_dimension_numbers<[1], [0], [0], [1], [0, 0, 1, 1], [], []>} : vector<8x128xbf16>, vector<128x1024xbf16>, vector<8x1024xf32> -> vector<8x1024xf32>
    %56 = arith.addf %52, %55 : vector<8x1024xf32>
    %57 = vector.extract_strided_slice %31 {offsets = [48, 0], sizes = [8, 128], strides = [1, 1]} : vector<128x128xbf16> to vector<8x128xbf16>
    %c768 = arith.constant 768 : index
    %c0_29 = arith.constant 0 : index
    %58 = vector.load %arg6[%c768, %c0_29] : memref<2048x1024xbf16, #tpu.memory_space<vmem>>, vector<128x1024xbf16>
    %cst_30 = arith.constant dense<0.000000e+00> : vector<8x1024xf32>
    %59 = tpu.matmul %57, %58, %cst_30 {dimension_numbers = #tpu.dot_dimension_numbers<[1], [0], [0], [1], [0, 0, 1, 1], [], []>} : vector<8x128xbf16>, vector<128x1024xbf16>, vector<8x1024xf32> -> vector<8x1024xf32>
    %60 = arith.addf %56, %59 : vector<8x1024xf32>
    %61 = vector.extract_strided_slice %31 {offsets = [56, 0], sizes = [8, 128], strides = [1, 1]} : vector<128x128xbf16> to vector<8x128xbf16>
    %c896 = arith.constant 896 : index
    %c0_31 = arith.constant 0 : index
    %62 = vector.load %arg6[%c896, %c0_31] : memref<2048x1024xbf16, #tpu.memory_space<vmem>>, vector<128x1024xbf16>
    %cst_32 = arith.constant dense<0.000000e+00> : vector<8x1024xf32>
    %63 = tpu.matmul %61, %62, %cst_32 {dimension_numbers = #tpu.dot_dimension_numbers<[1], [0], [0], [1], [0, 0, 1, 1], [], []>} : vector<8x128xbf16>, vector<128x1024xbf16>, vector<8x1024xf32> -> vector<8x1024xf32>
    %64 = arith.addf %60, %63 : vector<8x1024xf32>
    %65 = vector.extract_strided_slice %31 {offsets = [64, 0], sizes = [8, 128], strides = [1, 1]} : vector<128x128xbf16> to vector<8x128xbf16>
    %c1024 = arith.constant 1024 : index
    %c0_33 = arith.constant 0 : index
    %66 = vector.load %arg6[%c1024, %c0_33] : memref<2048x1024xbf16, #tpu.memory_space<vmem>>, vector<128x1024xbf16>
    %cst_34 = arith.constant dense<0.000000e+00> : vector<8x1024xf32>
    %67 = tpu.matmul %65, %66, %cst_34 {dimension_numbers = #tpu.dot_dimension_numbers<[1], [0], [0], [1], [0, 0, 1, 1], [], []>} : vector<8x128xbf16>, vector<128x1024xbf16>, vector<8x1024xf32> -> vector<8x1024xf32>
    %68 = arith.addf %64, %67 : vector<8x1024xf32>
    %69 = vector.extract_strided_slice %31 {offsets = [72, 0], sizes = [8, 128], strides = [1, 1]} : vector<128x128xbf16> to vector<8x128xbf16>
    %c1152 = arith.constant 1152 : index
    %c0_35 = arith.constant 0 : index
    %70 = vector.load %arg6[%c1152, %c0_35] : memref<2048x1024xbf16, #tpu.memory_space<vmem>>, vector<128x1024xbf16>
    %cst_36 = arith.constant dense<0.000000e+00> : vector<8x1024xf32>
    %71 = tpu.matmul %69, %70, %cst_36 {dimension_numbers = #tpu.dot_dimension_numbers<[1], [0], [0], [1], [0, 0, 1, 1], [], []>} : vector<8x128xbf16>, vector<128x1024xbf16>, vector<8x1024xf32> -> vector<8x1024xf32>
    %72 = arith.addf %68, %71 : vector<8x1024xf32>
    %73 = vector.extract_strided_slice %31 {offsets = [80, 0], sizes = [8, 128], strides = [1, 1]} : vector<128x128xbf16> to vector<8x128xbf16>
    %c1280 = arith.constant 1280 : index
    %c0_37 = arith.constant 0 : index
    %74 = vector.load %arg6[%c1280, %c0_37] : memref<2048x1024xbf16, #tpu.memory_space<vmem>>, vector<128x1024xbf16>
    %cst_38 = arith.constant dense<0.000000e+00> : vector<8x1024xf32>
    %75 = tpu.matmul %73, %74, %cst_38 {dimension_numbers = #tpu.dot_dimension_numbers<[1], [0], [0], [1], [0, 0, 1, 1], [], []>} : vector<8x128xbf16>, vector<128x1024xbf16>, vector<8x1024xf32> -> vector<8x1024xf32>
    %76 = arith.addf %72, %75 : vector<8x1024xf32>
    %77 = vector.extract_strided_slice %31 {offsets = [88, 0], sizes = [8, 128], strides = [1, 1]} : vector<128x128xbf16> to vector<8x128xbf16>
    %c1408 = arith.constant 1408 : index
    %c0_39 = arith.constant 0 : index
    %78 = vector.load %arg6[%c1408, %c0_39] : memref<2048x1024xbf16, #tpu.memory_space<vmem>>, vector<128x1024xbf16>
    %cst_40 = arith.constant dense<0.000000e+00> : vector<8x1024xf32>
    %79 = tpu.matmul %77, %78, %cst_40 {dimension_numbers = #tpu.dot_dimension_numbers<[1], [0], [0], [1], [0, 0, 1, 1], [], []>} : vector<8x128xbf16>, vector<128x1024xbf16>, vector<8x1024xf32> -> vector<8x1024xf32>
    %80 = arith.addf %76, %79 : vector<8x1024xf32>
    %81 = vector.extract_strided_slice %31 {offsets = [96, 0], sizes = [8, 128], strides = [1, 1]} : vector<128x128xbf16> to vector<8x128xbf16>
    %c1536 = arith.constant 1536 : index
    %c0_41 = arith.constant 0 : index
    %82 = vector.load %arg6[%c1536, %c0_41] : memref<2048x1024xbf16, #tpu.memory_space<vmem>>, vector<128x1024xbf16>
    %cst_42 = arith.constant dense<0.000000e+00> : vector<8x1024xf32>
    %83 = tpu.matmul %81, %82, %cst_42 {dimension_numbers = #tpu.dot_dimension_numbers<[1], [0], [0], [1], [0, 0, 1, 1], [], []>} : vector<8x128xbf16>, vector<128x1024xbf16>, vector<8x1024xf32> -> vector<8x1024xf32>
    %84 = arith.addf %80, %83 : vector<8x1024xf32>
    %85 = vector.extract_strided_slice %31 {offsets = [104, 0], sizes = [8, 128], strides = [1, 1]} : vector<128x128xbf16> to vector<8x128xbf16>
    %c1664 = arith.constant 1664 : index
    %c0_43 = arith.constant 0 : index
    %86 = vector.load %arg6[%c1664, %c0_43] : memref<2048x1024xbf16, #tpu.memory_space<vmem>>, vector<128x1024xbf16>
    %cst_44 = arith.constant dense<0.000000e+00> : vector<8x1024xf32>
    %87 = tpu.matmul %85, %86, %cst_44 {dimension_numbers = #tpu.dot_dimension_numbers<[1], [0], [0], [1], [0, 0, 1, 1], [], []>} : vector<8x128xbf16>, vector<128x1024xbf16>, vector<8x1024xf32> -> vector<8x1024xf32>
    %88 = arith.addf %84, %87 : vector<8x1024xf32>
    %89 = vector.extract_strided_slice %31 {offsets = [112, 0], sizes = [8, 128], strides = [1, 1]} : vector<128x128xbf16> to vector<8x128xbf16>
    %c1792 = arith.constant 1792 : index
    %c0_45 = arith.constant 0 : index
    %90 = vector.load %arg6[%c1792, %c0_45] : memref<2048x1024xbf16, #tpu.memory_space<vmem>>, vector<128x1024xbf16>
    %cst_46 = arith.constant dense<0.000000e+00> : vector<8x1024xf32>
    %91 = tpu.matmul %89, %90, %cst_46 {dimension_numbers = #tpu.dot_dimension_numbers<[1], [0], [0], [1], [0, 0, 1, 1], [], []>} : vector<8x128xbf16>, vector<128x1024xbf16>, vector<8x1024xf32> -> vector<8x1024xf32>
    %92 = arith.addf %88, %91 : vector<8x1024xf32>
    %93 = vector.extract_strided_slice %31 {offsets = [120, 0], sizes = [8, 128], strides = [1, 1]} : vector<128x128xbf16> to vector<8x128xbf16>
    %c1920 = arith.constant 1920 : index
    %c0_47 = arith.constant 0 : index
    %94 = vector.load %arg6[%c1920, %c0_47] : memref<2048x1024xbf16, #tpu.memory_space<vmem>>, vector<128x1024xbf16>
    %cst_48 = arith.constant dense<0.000000e+00> : vector<8x1024xf32>
    %95 = tpu.matmul %93, %94, %cst_48 {dimension_numbers = #tpu.dot_dimension_numbers<[1], [0], [0], [1], [0, 0, 1, 1], [], []>} : vector<8x128xbf16>, vector<128x1024xbf16>, vector<8x1024xf32> -> vector<8x1024xf32>
    %96 = arith.addf %92, %95 : vector<8x1024xf32>
    %c0_49 = arith.constant 0 : index
    %c0_50 = arith.constant 0 : index
    %97 = vector.load %arg7[%c0_49, %c0_50] : memref<1x1024xf32, #tpu.memory_space<vmem>>, vector<1x1024xf32>
    %98 = vector.broadcast %97 : vector<1x1024xf32> to vector<8x1024xf32>
    %99 = arith.addf %96, %98 : vector<8x1024xf32>
    %cst_51 = arith.constant dense<0.000000e+00> : vector<1024xf32>
    %100 = vector.multi_reduction <add>, %99, %cst_51 [0] : vector<8x1024xf32> to vector<1024xf32>
    %101 = vector.shape_cast %100 : vector<1024xf32> to vector<1x1024xf32>
    %cst_52 = arith.constant 1.250000e-01 : f32
    %102 = vector.broadcast %cst_52 : f32 to vector<1x1024xf32>
    %103 = arith.mulf %101, %102 : vector<1x1024xf32>
    %104 = vector.broadcast %103 : vector<1x1024xf32> to vector<8x1024xf32>
    %105 = arith.subf %99, %104 : vector<8x1024xf32>
    %106 = arith.mulf %105, %105 : vector<8x1024xf32>
    %cst_53 = arith.constant dense<0.000000e+00> : vector<1024xf32>
    %107 = vector.multi_reduction <add>, %106, %cst_53 [0] : vector<8x1024xf32> to vector<1024xf32>
    %108 = vector.shape_cast %107 : vector<1024xf32> to vector<1x1024xf32>
    %cst_54 = arith.constant 1.250000e-01 : f32
    %109 = vector.broadcast %cst_54 : f32 to vector<1x1024xf32>
    %110 = arith.mulf %108, %109 : vector<1x1024xf32>
    %cst_55 = arith.constant 9.99999974E-6 : f32
    %111 = vector.broadcast %cst_55 : f32 to vector<1x1024xf32>
    %112 = arith.addf %110, %111 : vector<1x1024xf32>
    %113 = math.rsqrt %112 : vector<1x1024xf32>
    %114 = vector.broadcast %113 : vector<1x1024xf32> to vector<8x1024xf32>
    %115 = arith.mulf %105, %114 : vector<8x1024xf32>
    %c0_56 = arith.constant 0 : index
    %c0_57 = arith.constant 0 : index
    %116 = vector.load %arg8[%c0_56, %c0_57] : memref<1x1024xf32, #tpu.memory_space<vmem>>, vector<1x1024xf32>
    %117 = vector.broadcast %116 : vector<1x1024xf32> to vector<8x1024xf32>
    %118 = arith.mulf %115, %117 : vector<8x1024xf32>
    %c0_58 = arith.constant 0 : index
    %c0_59 = arith.constant 0 : index
    %119 = vector.load %arg9[%c0_58, %c0_59] : memref<1x1024xf32, #tpu.memory_space<vmem>>, vector<1x1024xf32>
    %120 = vector.broadcast %119 : vector<1x1024xf32> to vector<8x1024xf32>
    %121 = arith.addf %118, %120 : vector<8x1024xf32>
    %cst_60 = arith.constant 2.000000e-01 : f32
    %122 = vector.broadcast %cst_60 : f32 to vector<8x1024xf32>
    %123 = arith.mulf %122, %121 : vector<8x1024xf32>
    %124 = arith.maximumf %121, %123 : vector<8x1024xf32>
    %125 = arith.truncf %124 : vector<8x1024xf32> to vector<8x1024xbf16>
    %c0_61 = arith.constant 0 : index
    %c0_62 = arith.constant 0 : index
    %126 = vector.load %arg10[%c0_61, %c0_62] : memref<1024x128xbf16, #tpu.memory_space<vmem>>, vector<1024x128xbf16>
    %cst_63 = arith.constant dense<0.000000e+00> : vector<8x128xf32>
    %127 = tpu.matmul %125, %126, %cst_63 {dimension_numbers = #tpu.dot_dimension_numbers<[1], [0], [0], [1], [0, 0, 1, 1], [], []>} : vector<8x1024xbf16>, vector<1024x128xbf16>, vector<8x128xf32> -> vector<8x128xf32>
    %c0_64 = arith.constant 0 : index
    %c0_65 = arith.constant 0 : index
    %128 = vector.load %arg11[%c0_64, %c0_65] : memref<1x128xf32, #tpu.memory_space<vmem>>, vector<1x128xf32>
    %129 = vector.broadcast %128 : vector<1x128xf32> to vector<8x128xf32>
    %130 = arith.addf %127, %129 : vector<8x128xf32>
    %131 = tpu.iota {dimensions = array<i32: 1>} : vector<8x128xi32>
    %cst_66 = arith.constant 0.000000e+00 : f32
    %132 = vector.broadcast %cst_66 : f32 to vector<8x128xf32>
    %133 = arith.subf %132, %130 : vector<8x128xf32>
    %134 = math.exp %133 : vector<8x128xf32>
    %cst_67 = arith.constant 1.000000e+00 : f32
    %135 = vector.broadcast %cst_67 : f32 to vector<8x128xf32>
    %136 = arith.addf %135, %134 : vector<8x128xf32>
    %137 = tpu.reciprocal %136 {approx = true} : vector<8x128xf32> -> vector<8x128xf32>
    %c1_i32 = arith.constant 1 : i32
    %138 = vector.broadcast %c1_i32 : i32 to vector<8x128xi32>
    %139 = arith.cmpi slt, %131, %138 : vector<8x128xi32>
    %140 = arith.select %139, %137, %130 : vector<8x128xi1>, vector<8x128xf32>
    %c0_68 = arith.constant 0 : index
    %c0_69 = arith.constant 0 : index
    %141 = vector.load %arg12[%c0_68, %c0_69] : memref<8x128xf32, #tpu.memory_space<vmem>>, vector<8x128xf32>
    tpu.vector_store %arg12[%c0_68, %c0_69], %140 {strides = array<i32>} : memref<8x128xf32, #tpu.memory_space<vmem>>, vector<8x128xf32>,
    return
  }
  func.func @transform_0(%arg0: i32) -> (i32, i32) {
    %c0_i32 = arith.constant 0 : i32
    %c0_i32_0 = arith.constant 0 : i32
    %c0_i32_1 = arith.constant 0 : i32
    return %c0_i32, %c0_i32_0 : i32, i32
  }
  func.func @transform_1(%arg0: i32) -> (i32, i32) {
    %c0_i32 = arith.constant 0 : i32
    %c0_i32_0 = arith.constant 0 : i32
    %c0_i32_1 = arith.constant 0 : i32
    return %c0_i32, %c0_i32_0 : i32, i32
  }
  func.func @transform_2(%arg0: i32) -> (i32, i32) {
    %c0_i32 = arith.constant 0 : i32
    %c0_i32_0 = arith.constant 0 : i32
    %c0_i32_1 = arith.constant 0 : i32
    return %c0_i32, %c0_i32_0 : i32, i32
  }
  func.func @transform_3(%arg0: i32) -> (i32, i32) {
    %c0_i32 = arith.constant 0 : i32
    %c0_i32_0 = arith.constant 0 : i32
    %c0_i32_1 = arith.constant 0 : i32
    return %c0_i32, %c0_i32_0 : i32, i32
  }
  func.func @transform_4(%arg0: i32) -> (i32, i32) {
    %c0_i32 = arith.constant 0 : i32
    %c0_i32_0 = arith.constant 0 : i32
    %c0_i32_1 = arith.constant 0 : i32
    return %c0_i32, %c0_i32_0 : i32, i32
  }
  func.func @transform_5(%arg0: i32) -> (i32, i32) {
    %c0_i32 = arith.constant 0 : i32
    %c0_i32_0 = arith.constant 0 : i32
    %c0_i32_1 = arith.constant 0 : i32
    return %c0_i32, %c0_i32_0 : i32, i32
  }
  func.func @transform_6(%arg0: i32) -> (i32, i32) {
    %c0_i32 = arith.constant 0 : i32
    %c0_i32_0 = arith.constant 0 : i32
    %c0_i32_1 = arith.constant 0 : i32
    return %c0_i32, %c0_i32_0 : i32, i32
  }
  func.func @transform_7(%arg0: i32) -> (i32, i32) {
    %c0_i32 = arith.constant 0 : i32
    %c0_i32_0 = arith.constant 0 : i32
    %c0_i32_1 = arith.constant 0 : i32
    return %c0_i32, %c0_i32_0 : i32, i32
  }
  func.func @transform_8(%arg0: i32) -> (i32, i32) {
    %c0_i32 = arith.constant 0 : i32
    %c0_i32_0 = arith.constant 0 : i32
    %c0_i32_1 = arith.constant 0 : i32
    return %c0_i32, %c0_i32_0 : i32, i32
  }
  func.func @transform_9(%arg0: i32) -> (i32, i32) {
    %c0_i32 = arith.constant 0 : i32
    %c0_i32_0 = arith.constant 0 : i32
    %c0_i32_1 = arith.constant 0 : i32
    return %c0_i32, %c0_i32_0 : i32, i32
  }
  func.func @transform_10(%arg0: i32) -> (i32, i32) {
    %c0_i32 = arith.constant 0 : i32
    %c0_i32_0 = arith.constant 0 : i32
    %c0_i32_1 = arith.constant 0 : i32
    return %c0_i32, %c0_i32_0 : i32, i32
  }
  func.func @transform_11(%arg0: i32) -> (i32, i32) {
    %c0_i32 = arith.constant 0 : i32
    %c0_i32_0 = arith.constant 0 : i32
    %c0_i32_1 = arith.constant 0 : i32
    return %c0_i32, %c0_i32_0 : i32, i32
  }
}

</mosaic_0001>

<bundles_post_ra>
// kernel: discriminator_forward.2
= control target key start
LH: loop header
LB: loop body
LE: loop exit
PB: predicated region body
PF: predicated region fallthrough
CT: control target
= control target key end

     0   :  { %8 = vsyncpa [#allocation3], 0  ;;  %s1999_s0 = inlined_call_operand.vmem [shape: bf16[512,16], index: 0, kind: input, shape index: {}]   ;;  %s2000_s1 = inlined_call_operand.hbm [shape: bf16[16,64], index: 1, kind: input, shape index: {}]   ;;  %s2001_s2 = inlined_call_operand.hbm [shape: f32[1,64], index: 2, kind: input, shape index: {}]   ;;  %s2002_s3 = inlined_call_operand.vmem [shape: bf16[512,64], index: 3, kind: output, shape index: {}]  }
   0x1   :  { %9 = vsyncpa [#allocation5], 0  ;;  %s1501_s12 = smov [#allocation2]   ;;  %s1453_s16 = scalar_lea.hbm %s2000_s1, 128 }
   0x2   :  { %s17_s13 = sshll.u32 %s1501_s12, 4  ;;  %p1454_p0 = scmp.ne.s32.totalorder %s2000_s1, %s1453_s16  ;;  %s18_s13 = int_to_ptr.vmem [resolvable:$true] %s17_s13 }
   0x3   :  { %p1457_p1 = scmp.lt.u32.totalorder %s1453_s16, %s2000_s1 }
   0x5   :  { %p1459_p2 = pnand %p1457_p1, %p1454_p0 }
   0x7   :  { %1462 = shalt.err (!%p1459_p2)
}
   0x8   :  { %s1463_s21 = scalar_lea.vmem %s18_s13, 128  ;;  %p1468_p4 = scmp.lt.s32.totalorder %s18_s13, %s18_s13 }
   0x9   :  { %p1464_p3 = scmp.ne.s32.totalorder %s18_s13, %s1463_s21  ;;  %p1469_p5 = scmp.lt.s32.totalorder %s1463_s21, %s1463_s21 }
   0xb   :  { %p1470_p6 = por %p1469_p5, %p1468_p4 }
   0xd   :  { %p1471_p7 = pnand %p1470_p6, %p1464_p3 }
   0xf   :  { %1474 = shalt.err (!%p1471_p7)
}
  0x10   :  { %s1502_s22 = smov 64   ;;  %s1503_s23 = smov 4  }
  0x11   :  { %23 = dma.hbm_to_vmem [thread:$0]  %s2000_s1, 128, %s18_s13, [#allocation3], %s1502_s22, %s1502_s22, %s1503_s23  }
  0x12   :  { %s1504_s26 = smov [#allocation4]   ;;  %s1475_s30 = scalar_lea.hbm %s2001_s2, 16 }
  0x13   :  { %s30_s27 = sshll.u32 %s1504_s26, 4  ;;  %p1476_p8 = scmp.ne.s32.totalorder %s2001_s2, %s1475_s30  ;;  %s31_s27 = int_to_ptr.vmem [resolvable:$true] %s30_s27 }
  0x14   :  { %p1479_p9 = scmp.lt.u32.totalorder %s1475_s30, %s2001_s2 }
  0x16   :  { %p1481_p10 = pnand %p1479_p9, %p1476_p8 }
  0x18   :  { %1484 = shalt.err (!%p1481_p10)
}
  0x19   :  { %s1485_s8 = scalar_lea.vmem %s31_s27, 16  ;;  %s1489_s1 = scalar_lea.vmem %s31_s27, 32 }
  0x1a   :  { %p1486_p11 = scmp.ne.s32.totalorder %s31_s27, %s1485_s8  ;;  %p1490_p12 = scmp.lt.s32.totalorder %s31_s27, %s31_s27 }
  0x1b   :  { %p1491_p13 = scmp.lt.s32.totalorder %s1489_s1, %s1485_s8 }
  0x1d   :  { %p1492_p0 = por %p1491_p13, %p1490_p12 }
  0x1f   :  { %p1493_p1 = pnand %p1492_p0, %p1486_p11 }
  0x21   :  { %1496 = shalt.err (!%p1493_p1)
}
  0x22   :  { %33 = dma.hbm_to_vmem [thread:$0]  %s2001_s2, 16, %s31_s27, [#allocation5]  }
  0x23   :  { %1497 = dma.done.wait [#allocation3], 128  }
  0x24   :  { %1498 = vsyncadd [#allocation3], 4294967168 }
  0x25   :  { %1499 = dma.done.wait [#allocation5], 16  }
  0x26   :  { %1500 = vsyncadd [#allocation5], 4294967280  ;;  %v1420_v0 = vld [vmem:[#allocation2] sm:$0xff]   ;;  %vm280_vm0 = vcmask 130048   ;;  %v1423_v3 = vld [vmem:[%s1999_s0 + $0x8] sm:$0xff]   ;;  %vm1050_vm1 = vcmask 519168  }
  0x27   :  { %v1421_v1 = vld [vmem:[%s1999_s0] sm:$0xff]   ;;  %1348 = vmatprep.subr.bf16.mxu0 %v1420_v0  ;;  %1414 = vmatprep.subr.bf16.mxu1 %v1420_v0  ;;  %v1424_v4 = vld [vmem:[%s1999_s0 + $0x88] sm:$0xff]   ;;  %v1425_v5 = vld [vmem:[%s1999_s0 + $0x10] sm:$0xff]  }
  0x28   :  { %v1422_v2 = vld [vmem:[%s1999_s0 + $0x80] sm:$0xff]   ;;  %1349 = vmatpush3.bf16.msra.mxu0 %v1420_v0  ;;  %1415 = vmatpush3.bf16.msra.mxu1 %v1420_v0  ;;  %v1426_v6 = vld [vmem:[%s1999_s0 + $0x90] sm:$0xff]   ;;  %v1427_v7 = vld [vmem:[%s1999_s0 + $0x18] sm:$0xff]  }
  0x29   :  { %1350 = vmatprep.mubr.msk.bf16.mxu0 %vm280_vm0, %v1421_v1  ;;  %1382 = vmatprep.mubr.msk.bf16.mxu1 %vm280_vm0, %v1422_v2  ;;  %v1428_v8 = vld [vmem:[%s1999_s0 + $0x98] sm:$0xff]   ;;  %v1429_v9 = vld [vmem:[%s1999_s0 + $0x20] sm:$0xff]   ;;  %v1431_v11 = vld [vmem:[%s1999_s0 + $0x28] sm:$0xff]  }
  0x2a   :  { %v1430_v10 = vld [vmem:[%s1999_s0 + $0xa0] sm:$0xff]   ;;  %v1432_v12 = vld [vmem:[%s1999_s0 + $0xa8] sm:$0xff]   ;;  %v1433_v13 = vld [vmem:[%s1999_s0 + $0x30] sm:$0xff]  }
  0x2b   :  { %1351 = vmatmul.mubr.msk.bf16.vlgmr.msra.gmra.mrb[0].mxu0 %vm280_vm0, %v1423_v3  ;;  %1383 = vmatmul.mubr.msk.bf16.vlgmr.msra.gmra.mrb[0].mxu1 %vm280_vm0, %v1424_v4  ;;  %v1434_v14 = vld [vmem:[%s1999_s0 + $0xb0] sm:$0xff]   ;;  %v1435_v15 = vld [vmem:[%s1999_s0 + $0x38] sm:$0xff]   ;;  %v1437_v17 = vld [vmem:[%s1999_s0 + $0x40] sm:$0xff]  }
  0x2c   :  { %1354 = vmatprep.mubr.msk.bf16.mxu0 %vm280_vm0, %v1425_v5  ;;  %1386 = vmatprep.mubr.msk.bf16.mxu1 %vm280_vm0, %v1426_v6  ;;  %v1436_v16 = vld [vmem:[%s1999_s0 + $0xb8] sm:$0xff]   ;;  %v1438_v18 = vld [vmem:[%s1999_s0 + $0xc0] sm:$0xff]   ;;  %v1439_v19 = vld [vmem:[%s1999_s0 + $0x48] sm:$0xff]  }
  0x2d   :  { %v1440_v20 = vld [vmem:[%s1999_s0 + $0xc8] sm:$0xff]   ;;  %v1441_v21 = vld [vmem:[%s1999_s0 + $0x50] sm:$0xff]   ;;  %v1443_v23 = vld [vmem:[%s1999_s0 + $0x58] sm:$0xff]  }
  0x2e   :  { %v1442_v22 = vld [vmem:[%s1999_s0 + $0xd0] sm:$0xff]   ;;  %v1444_v24 = vld [vmem:[%s1999_s0 + $0xd8] sm:$0xff]   ;;  %v1445_v25 = vld [vmem:[%s1999_s0 + $0x60] sm:$0xff]  }
  0x2f   :  { %v1446_v26 = vld [vmem:[%s1999_s0 + $0xe0] sm:$0xff]   ;;  %v1447_v27 = vld [vmem:[%s1999_s0 + $0x68] sm:$0xff]   ;;  %v1449_v29 = vld [vmem:[%s1999_s0 + $0x70] sm:$0xff]  }
  0x30   :  { %v1448_v28 = vld [vmem:[%s1999_s0 + $0xe8] sm:$0xff]   ;;  %v1450_v30 = vld [vmem:[%s1999_s0 + $0xf0] sm:$0xff]   ;;  %v1451_v31 = vld [vmem:[%s1999_s0 + $0x78] sm:$0xff]  }
  0x31   :  { %v1452_v32 = vld [vmem:[%s1999_s0 + $0xf8] sm:$0xff]   ;;  %v1677_v33 = vld [vmem:[#allocation4] ss:$0 sm:$0xff] }
  0x33   :  { %1355 = vmatmul.mubr.msk.bf16.gmra.mrb[4].mxu0 %vm280_vm0, %v1427_v7  ;;  %1387 = vmatmul.mubr.msk.bf16.gmra.mrb[4].mxu1 %vm280_vm0, %v1428_v8 }
  0x34   :  { %1358 = vmatprep.mubr.msk.bf16.mxu0 %vm280_vm0, %v1429_v9  ;;  %1390 = vmatprep.mubr.msk.bf16.mxu1 %vm280_vm0, %v1430_v10 }
  0x3b   :  { %1359 = vmatmul.mubr.msk.bf16.gmra.mrb[8].mxu0 %vm280_vm0, %v1431_v11  ;;  %1391 = vmatmul.mubr.msk.bf16.gmra.mrb[8].mxu1 %vm280_vm0, %v1432_v12 }
  0x3c   :  { %1362 = vmatprep.mubr.msk.bf16.mxu0 %vm280_vm0, %v1433_v13  ;;  %1394 = vmatprep.mubr.msk.bf16.mxu1 %vm280_vm0, %v1434_v14 }
  0x43   :  { %1363 = vmatmul.mubr.msk.bf16.gmra.mrb[12].mxu0 %vm280_vm0, %v1435_v15  ;;  %1395 = vmatmul.mubr.msk.bf16.gmra.mrb[12].mxu1 %vm280_vm0, %v1436_v16 }
  0x44   :  { %1366 = vmatprep.mubr.msk.bf16.mxu0 %vm280_vm0, %v1437_v17  ;;  %1398 = vmatprep.mubr.msk.bf16.mxu1 %vm280_vm0, %v1438_v18 }
  0x4b   :  { %1367 = vmatmul.mubr.msk.bf16.gmra.mrb[16].mxu0 %vm280_vm0, %v1439_v19  ;;  %1399 = vmatmul.mubr.msk.bf16.gmra.mrb[16].mxu1 %vm280_vm0, %v1440_v20 }
  0x4c   :  { %1370 = vmatprep.mubr.msk.bf16.mxu0 %vm280_vm0, %v1441_v21  ;;  %1402 = vmatprep.mubr.msk.bf16.mxu1 %vm280_vm0, %v1442_v22 }
  0x53   :  { %1371 = vmatmul.mubr.msk.bf16.gmra.mrb[20].mxu0 %vm280_vm0, %v1443_v23  ;;  %1403 = vmatmul.mubr.msk.bf16.gmra.mrb[20].mxu1 %vm280_vm0, %v1444_v24 }
  0x54   :  { %1374 = vmatprep.mubr.msk.bf16.mxu0 %vm280_vm0, %v1445_v25  ;;  %1406 = vmatprep.mubr.msk.bf16.mxu1 %vm280_vm0, %v1446_v26 }
  0x5b   :  { %1375 = vmatmul.mubr.msk.bf16.gmra.mrb[24].mxu0 %vm280_vm0, %v1447_v27  ;;  %1407 = vmatmul.mubr.msk.bf16.gmra.mrb[24].mxu1 %vm280_vm0, %v1448_v28 }
  0x5c   :  { %1378 = vmatprep.mubr.msk.bf16.mxu0 %vm280_vm0, %v1449_v29  ;;  %1410 = vmatprep.mubr.msk.bf16.mxu1 %vm280_vm0, %v1450_v30 }
  0x63   :  { %1379 = vmatmul.mubr.msk.bf16.gmra.mrb[28].mxu0 %vm280_vm0, %v1451_v31  ;;  %1411 = vmatmul.mubr.msk.bf16.gmra.mrb[28].mxu1 %vm280_vm0, %v1452_v32 }
  0xfe   :  { %v1352_v34 = vpop.f32.mrb[0].mxu0  ;;  %v1384_v35 = vpop.f32.mrb[0].mxu1 }
  0xff   :  { %v420_v36 = vadd.f32 %v1352_v34, %v1677_v33  ;;  %v548_v37 = vadd.f32 %v1384_v35, %v1677_v33  ;;  %v411_v38 = vpop.f32.mrb[1].mxu0  ;;  %v539_v39 = vpop.f32.mrb[1].mxu1 }
 0x100   :  { %v412_v40 = vadd.f32 %v1677_v33, %v411_v38  ;;  %v540_v41 = vadd.f32 %v1677_v33, %v539_v39  ;;  %v1353_v42 = vpop.f32.mrb[2].mxu0  ;;  %v1385_v43 = vpop.f32.mrb[2].mxu1 }
 0x101   :  { %v668_v44 = vmul.f32 0.2, %v420_v36  ;;  %v700_v45 = vmul.f32 0.2, %v548_v37  ;;  %v423_v46 = vadd.f32 %v1353_v42, %v1677_v33  ;;  %v551_v47 = vadd.f32 %v1385_v43, %v1677_v33  ;;  %v414_v48 = vpop.f32.mrb[3].mxu0  ;;  %v542_v49 = vpop.f32.mrb[3].mxu1 }
 0x102   :  { %v666_v50 = vmul.f32 0.2, %v412_v40  ;;  %v698_v51 = vmul.f32 0.2, %v540_v41  ;;  %v415_v52 = vadd.f32 %v1677_v33, %v414_v48  ;;  %v543_v53 = vadd.f32 %v1677_v33, %v542_v49 }
 0x103   :  { %v732_v54 = vmax.f32 %v420_v36, %v668_v44  ;;  %v764_v55 = vmax.f32 %v548_v37, %v700_v45  ;;  %v669_v56 = vmul.f32 0.2, %v423_v46  ;;  %v701_v57 = vmul.f32 0.2, %v551_v47 }
 0x104   :  { %v730_v58 = vmax.f32 %v412_v40, %v666_v50  ;;  %v762_v59 = vmax.f32 %v540_v41, %v698_v51  ;;  %v667_v60 = vmul.f32 0.2, %v415_v52  ;;  %v699_v61 = vmul.f32 0.2, %v543_v53 }
 0x105   :  { %v1253_v62 = vpack.c.bf16 %v732_v54, %v732_v54  ;;  %v1285_v63 = vpack.c.bf16 %v764_v55, %v764_v55  ;;  %v733_v0 = vmax.f32 %v423_v46, %v669_v56  ;;  %v765_v1 = vmax.f32 %v551_v47, %v701_v57 }
 0x106   :  { %v1251_v2 = vpack.c.bf16 %v730_v58, %v730_v58  ;;  %v1283_v3 = vpack.c.bf16 %v762_v59, %v762_v59  ;;  %v731_v4 = vmax.f32 %v415_v52, %v667_v60  ;;  %v763_v5 = vmax.f32 %v543_v53, %v699_v61  ;;  %v1356_v6 = vpop.f32.mrb[4].mxu0  ;;  %v1388_v7 = vpop.f32.mrb[4].mxu1 }
 0x107   :  { %1053 = vst.msk [vmem:[%s2002_s3 + $0x8] sm:$0xf] %vm1050_vm1, %v1253_v62  ;;  %1085 = vst.msk [vmem:[%s2002_s3 + $0x88] sm:$0xf] %vm1050_vm1, %v1285_v63  ;;  %v1254_v8 = vpack.c.bf16 %v733_v0, %v733_v0  ;;  %v1286_v9 = vpack.c.bf16 %v765_v1, %v765_v1  ;;  %v436_v10 = vadd.f32 %v1356_v6, %v1677_v33  ;;  %v427_v12 = vpop.f32.mrb[5].mxu0  ;;  %v555_v13 = vpop.f32.mrb[5].mxu1 }
 0x108   :  { %v564_v11 = vadd.f32 %v1388_v7, %v1677_v33  ;;  %1051 = vst.msk [vmem:[%s2002_s3] sm:$0xf] %vm1050_vm1, %v1251_v2  ;;  %1083 = vst.msk [vmem:[%s2002_s3 + $0x80] sm:$0xf] %vm1050_vm1, %v1283_v3  ;;  %v1252_v14 = vpack.c.bf16 %v731_v4, %v731_v4  ;;  %v1284_v15 = vpack.c.bf16 %v763_v5, %v763_v5  ;;  %v1357_v18 = vpop.f32.mrb[6].mxu0  ;;  %v1389_v19 = vpop.f32.mrb[6].mxu1 }
 0x109   :  { %v428_v16 = vadd.f32 %v1677_v33, %v427_v12  ;;  %v556_v17 = vadd.f32 %v1677_v33, %v555_v13  ;;  %1054 = vst.msk [vmem:[%s2002_s3 + $0xc] sm:$0xf] %vm1050_vm1, %v1254_v8  ;;  %1086 = vst.msk [vmem:[%s2002_s3 + $0x8c] sm:$0xf] %vm1050_vm1, %v1286_v9  ;;  %v672_v20 = vmul.f32 0.2, %v436_v10  ;;  %v439_v22 = vadd.f32 %v1357_v18, %v1677_v33 }
 0x10a   :  { %v704_v21 = vmul.f32 0.2, %v564_v11  ;;  %v567_v23 = vadd.f32 %v1389_v19, %v1677_v33  ;;  %v430_v24 = vpop.f32.mrb[7].mxu0  ;;  %v558_v25 = vpop.f32.mrb[7].mxu1  ;;  %1052 = vst.msk [vmem:[%s2002_s3 + $0x4] sm:$0xf] %vm1050_vm1, %v1252_v14 }
 0x10b   :  { %1084 = vst.msk [vmem:[%s2002_s3 + $0x84] sm:$0xf] %vm1050_vm1, %v1284_v15  ;;  %v670_v26 = vmul.f32 0.2, %v428_v16  ;;  %v702_v27 = vmul.f32 0.2, %v556_v17  ;;  %v431_v28 = vadd.f32 %v1677_v33, %v430_v24  ;;  %v559_v29 = vadd.f32 %v1677_v33, %v558_v25 }
 0x10c   :  { %v736_v30 = vmax.f32 %v436_v10, %v672_v20  ;;  %v768_v31 = vmax.f32 %v564_v11, %v704_v21  ;;  %v673_v32 = vmul.f32 0.2, %v439_v22  ;;  %v705_v34 = vmul.f32 0.2, %v567_v23 }
 0x10d   :  { %v734_v35 = vmax.f32 %v428_v16, %v670_v26  ;;  %v766_v36 = vmax.f32 %v556_v17, %v702_v27  ;;  %v671_v37 = vmul.f32 0.2, %v431_v28  ;;  %v703_v38 = vmul.f32 0.2, %v559_v29 }
 0x10e   :  { %v1257_v39 = vpack.c.bf16 %v736_v30, %v736_v30  ;;  %v1289_v40 = vpack.c.bf16 %v768_v31, %v768_v31  ;;  %v737_v41 = vmax.f32 %v439_v22, %v673_v32  ;;  %v769_v42 = vmax.f32 %v567_v23, %v705_v34  ;;  %v1360_v47 = vpop.f32.mrb[8].mxu0  ;;  %v1392_v48 = vpop.f32.mrb[8].mxu1 }
 0x10f   :  { %v1255_v43 = vpack.c.bf16 %v734_v35, %v734_v35  ;;  %v1287_v44 = vpack.c.bf16 %v766_v36, %v766_v36  ;;  %v735_v45 = vmax.f32 %v431_v28, %v671_v37  ;;  %v767_v46 = vmax.f32 %v559_v29, %v703_v38  ;;  %v443_v53 = vpop.f32.mrb[9].mxu0  ;;  %v571_v54 = vpop.f32.mrb[9].mxu1 }
 0x110   :  { %1057 = vst.msk [vmem:[%s2002_s3 + $0x18] sm:$0xf] %vm1050_vm1, %v1257_v39  ;;  %1089 = vst.msk [vmem:[%s2002_s3 + $0x98] sm:$0xf] %vm1050_vm1, %v1289_v40  ;;  %v1258_v49 = vpack.c.bf16 %v737_v41, %v737_v41  ;;  %v1290_v50 = vpack.c.bf16 %v769_v42, %v769_v42  ;;  %v452_v51 = vadd.f32 %v1360_v47, %v1677_v33  ;;  %v1361_v59 = vpop.f32.mrb[10].mxu0  ;;  %v1393_v60 = vpop.f32.mrb[10].mxu1 }
 0x111   :  { %v580_v52 = vadd.f32 %v1392_v48, %v1677_v33  ;;  %1055 = vst.msk [vmem:[%s2002_s3 + $0x10] sm:$0xf] %vm1050_vm1, %v1255_v43  ;;  %1087 = vst.msk [vmem:[%s2002_s3 + $0x90] sm:$0xf] %vm1050_vm1, %v1287_v44  ;;  %v1256_v55 = vpack.c.bf16 %v735_v45, %v735_v45  ;;  %v1288_v56 = vpack.c.bf16 %v767_v46, %v767_v46  ;;  %v446_v1 = vpop.f32.mrb[11].mxu0  ;;  %v574_v2 = vpop.f32.mrb[11].mxu1 }
 0x112   :  { %v444_v57 = vadd.f32 %v1677_v33, %v443_v53  ;;  %v572_v58 = vadd.f32 %v1677_v33, %v571_v54  ;;  %1058 = vst.msk [vmem:[%s2002_s3 + $0x1c] sm:$0xf] %vm1050_vm1, %v1258_v49  ;;  %1090 = vst.msk [vmem:[%s2002_s3 + $0x9c] sm:$0xf] %vm1050_vm1, %v1290_v50  ;;  %v676_v61 = vmul.f32 0.2, %v452_v51  ;;  %v455_v63 = vadd.f32 %v1361_v59, %v1677_v33 }
 0x113   :  { %v708_v62 = vmul.f32 0.2, %v580_v52  ;;  %v583_v0 = vadd.f32 %v1393_v60, %v1677_v33  ;;  %1056 = vst.msk [vmem:[%s2002_s3 + $0x14] sm:$0xf] %vm1050_vm1, %v1256_v55  ;;  %1088 = vst.msk [vmem:[%s2002_s3 + $0x94] sm:$0xf] %vm1050_vm1, %v1288_v56  ;;  %v447_v5 = vadd.f32 %v1677_v33, %v446_v1  ;;  %v575_v6 = vadd.f32 %v1677_v33, %v574_v2 }
 0x114   :  { %v674_v3 = vmul.f32 0.2, %v444_v57  ;;  %v706_v4 = vmul.f32 0.2, %v572_v58  ;;  %v740_v7 = vmax.f32 %v452_v51, %v676_v61  ;;  %v677_v9 = vmul.f32 0.2, %v455_v63 }
 0x115   :  { %v772_v8 = vmax.f32 %v580_v52, %v708_v62  ;;  %v709_v10 = vmul.f32 0.2, %v583_v0  ;;  %v675_v13 = vmul.f32 0.2, %v447_v5  ;;  %v707_v14 = vmul.f32 0.2, %v575_v6 }
 0x116   :  { %v738_v11 = vmax.f32 %v444_v57, %v674_v3  ;;  %v770_v12 = vmax.f32 %v572_v58, %v706_v4  ;;  %v1261_v15 = vpack.c.bf16 %v740_v7, %v740_v7  ;;  %v741_v17 = vmax.f32 %v455_v63, %v677_v9  ;;  %v1364_v23 = vpop.f32.mrb[12].mxu0  ;;  %v1396_v24 = vpop.f32.mrb[12].mxu1 }
 0x117   :  { %v1293_v16 = vpack.c.bf16 %v772_v8, %v772_v8  ;;  %v773_v18 = vmax.f32 %v583_v0, %v709_v10  ;;  %v739_v21 = vmax.f32 %v447_v5, %v675_v13  ;;  %v771_v22 = vmax.f32 %v575_v6, %v707_v14  ;;  %v459_v29 = vpop.f32.mrb[13].mxu0  ;;  %v587_v30 = vpop.f32.mrb[13].mxu1 }
 0x118   :  { %v1259_v19 = vpack.c.bf16 %v738_v11, %v738_v11  ;;  %v1291_v20 = vpack.c.bf16 %v770_v12, %v770_v12  ;;  %1061 = vst.msk [vmem:[%s2002_s3 + $0x28] sm:$0xf] %vm1050_vm1, %v1261_v15  ;;  %v1262_v25 = vpack.c.bf16 %v741_v17, %v741_v17  ;;  %v468_v27 = vadd.f32 %v1364_v23, %v1677_v33  ;;  %v1365_v36 = vpop.f32.mrb[14].mxu0  ;;  %v1397_v37 = vpop.f32.mrb[14].mxu1 }
 0x119   :  { %1093 = vst.msk [vmem:[%s2002_s3 + $0xa8] sm:$0xf] %vm1050_vm1, %v1293_v16  ;;  %v1294_v26 = vpack.c.bf16 %v773_v18, %v773_v18  ;;  %v596_v28 = vadd.f32 %v1396_v24, %v1677_v33  ;;  %v1260_v31 = vpack.c.bf16 %v739_v21, %v739_v21  ;;  %v1292_v32 = vpack.c.bf16 %v771_v22, %v771_v22  ;;  %v462_v42 = vpop.f32.mrb[15].mxu0  ;;  %v590_v43 = vpop.f32.mrb[15].mxu1 }
 0x11a   :  { %1059 = vst.msk [vmem:[%s2002_s3 + $0x20] sm:$0xf] %vm1050_vm1, %v1259_v19  ;;  %1091 = vst.msk [vmem:[%s2002_s3 + $0xa0] sm:$0xf] %vm1050_vm1, %v1291_v20  ;;  %v460_v34 = vadd.f32 %v1677_v33, %v459_v29  ;;  %v588_v35 = vadd.f32 %v1677_v33, %v587_v30  ;;  %v680_v38 = vmul.f32 0.2, %v468_v27  ;;  %v471_v40 = vadd.f32 %v1365_v36, %v1677_v33 }
 0x11b   :  { %1062 = vst.msk [vmem:[%s2002_s3 + $0x2c] sm:$0xf] %vm1050_vm1, %v1262_v25  ;;  %1094 = vst.msk [vmem:[%s2002_s3 + $0xac] sm:$0xf] %vm1050_vm1, %v1294_v26  ;;  %v712_v39 = vmul.f32 0.2, %v596_v28  ;;  %v599_v41 = vadd.f32 %v1397_v37, %v1677_v33  ;;  %v463_v46 = vadd.f32 %v1677_v33, %v462_v42  ;;  %v591_v47 = vadd.f32 %v1677_v33, %v590_v43 }
 0x11c   :  { %1060 = vst.msk [vmem:[%s2002_s3 + $0x24] sm:$0xf] %vm1050_vm1, %v1260_v31  ;;  %1092 = vst.msk [vmem:[%s2002_s3 + $0xa4] sm:$0xf] %vm1050_vm1, %v1292_v32  ;;  %v678_v44 = vmul.f32 0.2, %v460_v34  ;;  %v744_v48 = vmax.f32 %v468_v27, %v680_v38 }
 0x11d   :  { %v710_v45 = vmul.f32 0.2, %v588_v35  ;;  %v776_v49 = vmax.f32 %v596_v28, %v712_v39  ;;  %v681_v50 = vmul.f32 0.2, %v471_v40  ;;  %v713_v51 = vmul.f32 0.2, %v599_v41 }
 0x11e   :  { %v742_v52 = vmax.f32 %v460_v34, %v678_v44  ;;  %v679_v54 = vmul.f32 0.2, %v463_v46  ;;  %v711_v55 = vmul.f32 0.2, %v591_v47  ;;  %v1265_v56 = vpack.c.bf16 %v744_v48, %v744_v48  ;;  %v1368_v0 = vpop.f32.mrb[16].mxu0  ;;  %v1400_v1 = vpop.f32.mrb[16].mxu1 }
 0x11f   :  { %v774_v53 = vmax.f32 %v588_v35, %v710_v45  ;;  %v1297_v57 = vpack.c.bf16 %v776_v49, %v776_v49  ;;  %v745_v58 = vmax.f32 %v471_v40, %v681_v50  ;;  %v777_v59 = vmax.f32 %v599_v41, %v713_v51  ;;  %v475_v6 = vpop.f32.mrb[17].mxu0  ;;  %v603_v7 = vpop.f32.mrb[17].mxu1 }
 0x120   :  { %v1263_v60 = vpack.c.bf16 %v742_v52, %v742_v52  ;;  %v743_v62 = vmax.f32 %v463_v46, %v679_v54  ;;  %v775_v63 = vmax.f32 %v591_v47, %v711_v55  ;;  %1065 = vst.msk [vmem:[%s2002_s3 + $0x38] sm:$0xf] %vm1050_vm1, %v1265_v56  ;;  %v484_v4 = vadd.f32 %v1368_v0, %v1677_v33  ;;  %v1369_v12 = vpop.f32.mrb[18].mxu0  ;;  %v1401_v13 = vpop.f32.mrb[18].mxu1 }
 0x121   :  { %v1295_v61 = vpack.c.bf16 %v774_v53, %v774_v53  ;;  %1097 = vst.msk [vmem:[%s2002_s3 + $0xb8] sm:$0xf] %vm1050_vm1, %v1297_v57  ;;  %v1266_v2 = vpack.c.bf16 %v745_v58, %v745_v58  ;;  %v1298_v3 = vpack.c.bf16 %v777_v59, %v777_v59  ;;  %v612_v5 = vadd.f32 %v1400_v1, %v1677_v33  ;;  %v478_v18 = vpop.f32.mrb[19].mxu0  ;;  %v606_v19 = vpop.f32.mrb[19].mxu1 }
 0x122   :  { %1063 = vst.msk [vmem:[%s2002_s3 + $0x30] sm:$0xf] %vm1050_vm1, %v1263_v60  ;;  %v1264_v8 = vpack.c.bf16 %v743_v62, %v743_v62  ;;  %v1296_v9 = vpack.c.bf16 %v775_v63, %v775_v63  ;;  %v476_v10 = vadd.f32 %v1677_v33, %v475_v6  ;;  %v604_v11 = vadd.f32 %v1677_v33, %v603_v7 }
 0x123   :  { %1095 = vst.msk [vmem:[%s2002_s3 + $0xb0] sm:$0xf] %vm1050_vm1, %v1295_v61  ;;  %1066 = vst.msk [vmem:[%s2002_s3 + $0x3c] sm:$0xf] %vm1050_vm1, %v1266_v2  ;;  %v684_v14 = vmul.f32 0.2, %v484_v4  ;;  %v487_v16 = vadd.f32 %v1369_v12, %v1677_v33  ;;  %v615_v17 = vadd.f32 %v1401_v13, %v1677_v33  ;;  %v479_v22 = vadd.f32 %v1677_v33, %v478_v18 }
 0x124   :  { %1098 = vst.msk [vmem:[%s2002_s3 + $0xbc] sm:$0xf] %vm1050_vm1, %v1298_v3  ;;  %v716_v15 = vmul.f32 0.2, %v612_v5  ;;  %1064 = vst.msk [vmem:[%s2002_s3 + $0x34] sm:$0xf] %vm1050_vm1, %v1264_v8  ;;  %v607_v23 = vadd.f32 %v1677_v33, %v606_v19 }
 0x125   :  { %1096 = vst.msk [vmem:[%s2002_s3 + $0xb4] sm:$0xf] %vm1050_vm1, %v1296_v9  ;;  %v682_v20 = vmul.f32 0.2, %v476_v10  ;;  %v714_v21 = vmul.f32 0.2, %v604_v11  ;;  %v748_v24 = vmax.f32 %v484_v4, %v684_v14 }
 0x126   :  { %v780_v25 = vmax.f32 %v612_v5, %v716_v15  ;;  %v685_v26 = vmul.f32 0.2, %v487_v16  ;;  %v717_v27 = vmul.f32 0.2, %v615_v17  ;;  %v683_v30 = vmul.f32 0.2, %v479_v22 }
 0x127   :  { %v746_v28 = vmax.f32 %v476_v10, %v682_v20  ;;  %v778_v29 = vmax.f32 %v604_v11, %v714_v21  ;;  %v715_v31 = vmul.f32 0.2, %v607_v23  ;;  %v1269_v32 = vpack.c.bf16 %v748_v24, %v748_v24  ;;  %v1372_v41 = vpop.f32.mrb[20].mxu0  ;;  %v1404_v42 = vpop.f32.mrb[20].mxu1 }
 0x128   :  { %v1301_v34 = vpack.c.bf16 %v780_v25, %v780_v25  ;;  %v749_v35 = vmax.f32 %v487_v16, %v685_v26  ;;  %v781_v36 = vmax.f32 %v615_v17, %v717_v27  ;;  %v747_v39 = vmax.f32 %v479_v22, %v683_v30  ;;  %v491_v47 = vpop.f32.mrb[21].mxu0  ;;  %v619_v48 = vpop.f32.mrb[21].mxu1 }
 0x129   :  { %v1267_v37 = vpack.c.bf16 %v746_v28, %v746_v28  ;;  %v1299_v38 = vpack.c.bf16 %v778_v29, %v778_v29  ;;  %v779_v40 = vmax.f32 %v607_v23, %v715_v31  ;;  %1069 = vst.msk [vmem:[%s2002_s3 + $0x48] sm:$0xf] %vm1050_vm1, %v1269_v32  ;;  %v500_v45 = vadd.f32 %v1372_v41, %v1677_v33  ;;  %v1373_v53 = vpop.f32.mrb[22].mxu0  ;;  %v1405_v54 = vpop.f32.mrb[22].mxu1 }
 0x12a   :  { %1101 = vst.msk [vmem:[%s2002_s3 + $0xc8] sm:$0xf] %vm1050_vm1, %v1301_v34  ;;  %v1270_v43 = vpack.c.bf16 %v749_v35, %v749_v35  ;;  %v1302_v44 = vpack.c.bf16 %v781_v36, %v781_v36  ;;  %v628_v46 = vadd.f32 %v1404_v42, %v1677_v33  ;;  %v1268_v49 = vpack.c.bf16 %v747_v39, %v747_v39  ;;  %v494_v59 = vpop.f32.mrb[23].mxu0  ;;  %v622_v60 = vpop.f32.mrb[23].mxu1 }
 0x12b   :  { %1067 = vst.msk [vmem:[%s2002_s3 + $0x40] sm:$0xf] %vm1050_vm1, %v1267_v37  ;;  %1099 = vst.msk [vmem:[%s2002_s3 + $0xc0] sm:$0xf] %vm1050_vm1, %v1299_v38  ;;  %v1300_v50 = vpack.c.bf16 %v779_v40, %v779_v40  ;;  %v492_v51 = vadd.f32 %v1677_v33, %v491_v47  ;;  %v620_v52 = vadd.f32 %v1677_v33, %v619_v48  ;;  %v688_v55 = vmul.f32 0.2, %v500_v45 }
 0x12c   :  { %1070 = vst.msk [vmem:[%s2002_s3 + $0x4c] sm:$0xf] %vm1050_vm1, %v1270_v43  ;;  %1102 = vst.msk [vmem:[%s2002_s3 + $0xcc] sm:$0xf] %vm1050_vm1, %v1302_v44  ;;  %v720_v56 = vmul.f32 0.2, %v628_v46  ;;  %v503_v57 = vadd.f32 %v1373_v53, %v1677_v33  ;;  %v631_v58 = vadd.f32 %v1405_v54, %v1677_v33  ;;  %v495_v63 = vadd.f32 %v1677_v33, %v494_v59 }
 0x12d   :  { %1068 = vst.msk [vmem:[%s2002_s3 + $0x44] sm:$0xf] %vm1050_vm1, %v1268_v49  ;;  %1100 = vst.msk [vmem:[%s2002_s3 + $0xc4] sm:$0xf] %vm1050_vm1, %v1300_v50  ;;  %v686_v61 = vmul.f32 0.2, %v492_v51  ;;  %v623_v0 = vadd.f32 %v1677_v33, %v622_v60  ;;  %v752_v1 = vmax.f32 %v500_v45, %v688_v55 }
 0x12e   :  { %v718_v62 = vmul.f32 0.2, %v620_v52  ;;  %v784_v2 = vmax.f32 %v628_v46, %v720_v56  ;;  %v689_v3 = vmul.f32 0.2, %v503_v57  ;;  %v721_v4 = vmul.f32 0.2, %v631_v58 }
 0x12f   :  { %v750_v5 = vmax.f32 %v492_v51, %v686_v61  ;;  %v687_v7 = vmul.f32 0.2, %v495_v63  ;;  %v719_v8 = vmul.f32 0.2, %v623_v0  ;;  %v1273_v9 = vpack.c.bf16 %v752_v1, %v752_v1  ;;  %v1376_v17 = vpop.f32.mrb[24].mxu0  ;;  %v1408_v18 = vpop.f32.mrb[24].mxu1 }
 0x130   :  { %v782_v6 = vmax.f32 %v620_v52, %v718_v62  ;;  %v1305_v10 = vpack.c.bf16 %v784_v2, %v784_v2  ;;  %v753_v11 = vmax.f32 %v503_v57, %v689_v3  ;;  %v785_v12 = vmax.f32 %v631_v58, %v721_v4  ;;  %v507_v23 = vpop.f32.mrb[25].mxu0  ;;  %v635_v24 = vpop.f32.mrb[25].mxu1 }
 0x131   :  { %v1271_v13 = vpack.c.bf16 %v750_v5, %v750_v5  ;;  %v751_v15 = vmax.f32 %v495_v63, %v687_v7  ;;  %v783_v16 = vmax.f32 %v623_v0, %v719_v8  ;;  %1073 = vst.msk [vmem:[%s2002_s3 + $0x58] sm:$0xf] %vm1050_vm1, %v1273_v9  ;;  %v516_v21 = vadd.f32 %v1376_v17, %v1677_v33  ;;  %v1377_v29 = vpop.f32.mrb[26].mxu0  ;;  %v1409_v30 = vpop.f32.mrb[26].mxu1 }
 0x132   :  { %v1303_v14 = vpack.c.bf16 %v782_v6, %v782_v6  ;;  %1105 = vst.msk [vmem:[%s2002_s3 + $0xd8] sm:$0xf] %vm1050_vm1, %v1305_v10  ;;  %v1274_v19 = vpack.c.bf16 %v753_v11, %v753_v11  ;;  %v1306_v20 = vpack.c.bf16 %v785_v12, %v785_v12  ;;  %v644_v22 = vadd.f32 %v1408_v18, %v1677_v33  ;;  %v510_v36 = vpop.f32.mrb[27].mxu0  ;;  %v638_v37 = vpop.f32.mrb[27].mxu1 }
 0x133   :  { %1071 = vst.msk [vmem:[%s2002_s3 + $0x50] sm:$0xf] %vm1050_vm1, %v1271_v13  ;;  %v1272_v25 = vpack.c.bf16 %v751_v15, %v751_v15  ;;  %v1304_v26 = vpack.c.bf16 %v783_v16, %v783_v16  ;;  %v508_v27 = vadd.f32 %v1677_v33, %v507_v23  ;;  %v636_v28 = vadd.f32 %v1677_v33, %v635_v24 }
 0x134   :  { %1103 = vst.msk [vmem:[%s2002_s3 + $0xd0] sm:$0xf] %vm1050_vm1, %v1303_v14  ;;  %1074 = vst.msk [vmem:[%s2002_s3 + $0x5c] sm:$0xf] %vm1050_vm1, %v1274_v19  ;;  %v692_v31 = vmul.f32 0.2, %v516_v21  ;;  %v519_v34 = vadd.f32 %v1377_v29, %v1677_v33  ;;  %v647_v35 = vadd.f32 %v1409_v30, %v1677_v33  ;;  %v511_v40 = vadd.f32 %v1677_v33, %v510_v36 }
 0x135   :  { %1106 = vst.msk [vmem:[%s2002_s3 + $0xdc] sm:$0xf] %vm1050_vm1, %v1306_v20  ;;  %v724_v32 = vmul.f32 0.2, %v644_v22  ;;  %1072 = vst.msk [vmem:[%s2002_s3 + $0x54] sm:$0xf] %vm1050_vm1, %v1272_v25  ;;  %v639_v41 = vadd.f32 %v1677_v33, %v638_v37 }
 0x136   :  { %1104 = vst.msk [vmem:[%s2002_s3 + $0xd4] sm:$0xf] %vm1050_vm1, %v1304_v26  ;;  %v690_v38 = vmul.f32 0.2, %v508_v27  ;;  %v722_v39 = vmul.f32 0.2, %v636_v28  ;;  %v756_v42 = vmax.f32 %v516_v21, %v692_v31 }
 0x137   :  { %v788_v43 = vmax.f32 %v644_v22, %v724_v32  ;;  %v693_v44 = vmul.f32 0.2, %v519_v34  ;;  %v725_v45 = vmul.f32 0.2, %v647_v35  ;;  %v691_v48 = vmul.f32 0.2, %v511_v40 }
 0x138   :  { %v754_v46 = vmax.f32 %v508_v27, %v690_v38  ;;  %v786_v47 = vmax.f32 %v636_v28, %v722_v39  ;;  %v723_v49 = vmul.f32 0.2, %v639_v41  ;;  %v1277_v50 = vpack.c.bf16 %v756_v42, %v756_v42  ;;  %v1380_v58 = vpop.f32.mrb[28].mxu0  ;;  %v1412_v59 = vpop.f32.mrb[28].mxu1 }
 0x139   :  { %v1309_v51 = vpack.c.bf16 %v788_v43, %v788_v43  ;;  %v757_v52 = vmax.f32 %v519_v34, %v693_v44  ;;  %v789_v53 = vmax.f32 %v647_v35, %v725_v45  ;;  %v755_v56 = vmax.f32 %v511_v40, %v691_v48  ;;  %v523_v0 = vpop.f32.mrb[29].mxu0  ;;  %v651_v1 = vpop.f32.mrb[29].mxu1 }
 0x13a   :  { %v1275_v54 = vpack.c.bf16 %v754_v46, %v754_v46  ;;  %v1307_v55 = vpack.c.bf16 %v786_v47, %v786_v47  ;;  %v787_v57 = vmax.f32 %v639_v41, %v723_v49  ;;  %1077 = vst.msk [vmem:[%s2002_s3 + $0x68] sm:$0xf] %vm1050_vm1, %v1277_v50  ;;  %v532_v62 = vadd.f32 %v1380_v58, %v1677_v33  ;;  %v1381_v6 = vpop.f32.mrb[30].mxu0  ;;  %v1413_v7 = vpop.f32.mrb[30].mxu1 }
 0x13b   :  { %1109 = vst.msk [vmem:[%s2002_s3 + $0xe8] sm:$0xf] %vm1050_vm1, %v1309_v51  ;;  %v1278_v60 = vpack.c.bf16 %v757_v52, %v757_v52  ;;  %v1310_v61 = vpack.c.bf16 %v789_v53, %v789_v53  ;;  %v660_v63 = vadd.f32 %v1412_v59, %v1677_v33  ;;  %v1276_v2 = vpack.c.bf16 %v755_v56, %v755_v56  ;;  %v526_v12 = vpop.f32.mrb[31].mxu0  ;;  %v654_v13 = vpop.f32.mrb[31].mxu1 }
 0x13c   :  { %1075 = vst.msk [vmem:[%s2002_s3 + $0x60] sm:$0xf] %vm1050_vm1, %v1275_v54  ;;  %1107 = vst.msk [vmem:[%s2002_s3 + $0xe0] sm:$0xf] %vm1050_vm1, %v1307_v55  ;;  %v1308_v3 = vpack.c.bf16 %v787_v57, %v787_v57  ;;  %v524_v4 = vadd.f32 %v1677_v33, %v523_v0  ;;  %v652_v5 = vadd.f32 %v1677_v33, %v651_v1  ;;  %v696_v8 = vmul.f32 0.2, %v532_v62 }
 0x13d   :  { %1078 = vst.msk [vmem:[%s2002_s3 + $0x6c] sm:$0xf] %vm1050_vm1, %v1278_v60  ;;  %1110 = vst.msk [vmem:[%s2002_s3 + $0xec] sm:$0xf] %vm1050_vm1, %v1310_v61  ;;  %v728_v9 = vmul.f32 0.2, %v660_v63  ;;  %v535_v10 = vadd.f32 %v1381_v6, %v1677_v33  ;;  %v663_v11 = vadd.f32 %v1413_v7, %v1677_v33  ;;  %v527_v16 = vadd.f32 %v1677_v33, %v526_v12 }
 0x13e   :  { %1076 = vst.msk [vmem:[%s2002_s3 + $0x64] sm:$0xf] %vm1050_vm1, %v1276_v2  ;;  %1108 = vst.msk [vmem:[%s2002_s3 + $0xe4] sm:$0xf] %vm1050_vm1, %v1308_v3  ;;  %v694_v14 = vmul.f32 0.2, %v524_v4  ;;  %v655_v17 = vadd.f32 %v1677_v33, %v654_v13  ;;  %v760_v18 = vmax.f32 %v532_v62, %v696_v8 }
 0x13f   :  { %v726_v15 = vmul.f32 0.2, %v652_v5  ;;  %v792_v19 = vmax.f32 %v660_v63, %v728_v9  ;;  %v697_v20 = vmul.f32 0.2, %v535_v10  ;;  %v729_v21 = vmul.f32 0.2, %v663_v11 }
 0x140   :  { %v758_v22 = vmax.f32 %v524_v4, %v694_v14  ;;  %v695_v24 = vmul.f32 0.2, %v527_v16  ;;  %v727_v25 = vmul.f32 0.2, %v655_v17  ;;  %v1281_v26 = vpack.c.bf16 %v760_v18, %v760_v18 }
 0x141   :  { %v790_v23 = vmax.f32 %v652_v5, %v726_v15  ;;  %v1313_v27 = vpack.c.bf16 %v792_v19, %v792_v19  ;;  %v761_v28 = vmax.f32 %v535_v10, %v697_v20  ;;  %v793_v29 = vmax.f32 %v663_v11, %v729_v21 }
 0x142   :  { %v1279_v30 = vpack.c.bf16 %v758_v22, %v758_v22  ;;  %v759_v32 = vmax.f32 %v527_v16, %v695_v24  ;;  %v791_v34 = vmax.f32 %v655_v17, %v727_v25  ;;  %1081 = vst.msk [vmem:[%s2002_s3 + $0x78] sm:$0xf] %vm1050_vm1, %v1281_v26 }
 0x143   :  { %v1311_v31 = vpack.c.bf16 %v790_v23, %v790_v23  ;;  %1113 = vst.msk [vmem:[%s2002_s3 + $0xf8] sm:$0xf] %vm1050_vm1, %v1313_v27  ;;  %v1282_v33 = vpack.c.bf16 %v761_v28, %v761_v28  ;;  %v1314_v35 = vpack.c.bf16 %v793_v29, %v793_v29 }
 0x144   :  { %1079 = vst.msk [vmem:[%s2002_s3 + $0x70] sm:$0xf] %vm1050_vm1, %v1279_v30  ;;  %v1280_v36 = vpack.c.bf16 %v759_v32, %v759_v32  ;;  %v1312_v37 = vpack.c.bf16 %v791_v34, %v791_v34 }
 0x145   :  { %1111 = vst.msk [vmem:[%s2002_s3 + $0xf0] sm:$0xf] %vm1050_vm1, %v1311_v31  ;;  %1082 = vst.msk [vmem:[%s2002_s3 + $0x7c] sm:$0xf] %vm1050_vm1, %v1282_v33 }
 0x146   :  { %1114 = vst.msk [vmem:[%s2002_s3 + $0xfc] sm:$0xf] %vm1050_vm1, %v1314_v35  ;;  %1080 = vst.msk [vmem:[%s2002_s3 + $0x74] sm:$0xf] %vm1050_vm1, %v1280_v36 }
 0x147   :  { %1112 = vst.msk [vmem:[%s2002_s3 + $0xf4] sm:$0xf] %vm1050_vm1, %v1312_v37 }
 0x148   :  { %1119 = vsyncpa [#allocation3], 1 }
 0x149   :  { %1120 = vsyncpa [#allocation5], 1 }

// kernel: discriminator_forward.3
= control target key start
LH: loop header
LB: loop body
LE: loop exit
PB: predicated region body
PF: predicated region fallthrough
CT: control target
= control target key end

     0   :  { %16 = vsyncpa [#allocation3], 0  ;;  %s14774_s0 = inlined_call_operand.vmem [shape: bf16[128,1024], index: 0, kind: input, shape index: {}]   ;;  %s14775_s1 = inlined_call_operand.hbm [shape: bf16[1024,128], index: 1, kind: input, shape index: {}]   ;;  %s14776_s2 = inlined_call_operand.hbm [shape: f32[1,128], index: 2, kind: input, shape index: {}]   ;;  %s14777_s3 = inlined_call_operand.hbm [shape: f32[1,128], index: 3, kind: input, shape index: {}]   ;;  %s14778_s4 = inlined_call_operand.hbm [shape: f32[1,128], index: 4, kind: input, shape index: {}]   ;;  %s14779_s5 = inlined_call_operand.hbm [shape: bf16[2048,1024], index: 5, kind: input, shape index: {}]   ;;  %s14780_s6 = inlined_call_operand.hbm [shape: f32[1,1024], index: 6, kind: input, shape index: {}]   ;;  %s14781_s7 = inlined_call_operand.hbm [shape: f32[1,1024], index: 7, kind: input, shape index: {}]   ;;  %s14782_s8 = inlined_call_operand.hbm [shape: f32[1,1024], index: 8, kind: input, shape index: {}]   ;;  %s14783_s9 = inlined_call_operand.hbm [shape: bf16[1024,128], index: 9, kind: input, shape index: {}]   ;;  %s14784_s10 = inlined_call_operand.hbm [shape: f32[1,128], index: 10, kind: input, shape index: {}]   ;;  %s14785_s11 = inlined_call_operand.vmem [shape: f32[8,128], index: 11, kind: output, shape index: {}]  }
   0x1   :  { %17 = vsyncpa [#allocation5], 0 }
   0x2   :  { %18 = vsyncpa [#allocation8], 0 }
   0x3   :  { %19 = vsyncpa [#allocation11], 0 }
   0x4   :  { %20 = vsyncpa [#allocation14], 0 }
   0x5   :  { %21 = vsyncpa [#allocation17], 0  ;;  %s13522_s17 = smov [#allocation4]   ;;  %s13523_s19 = smov [#allocation7]  }
   0x6   :  { %s42_s18 = sshll.u32 %s13522_s17, 4  ;;  %s62_s20 = sshll.u32 %s13523_s19, 4  ;;  %s43_s18 = int_to_ptr.vmem [resolvable:$true] %s42_s18  ;;  %s63_s20 = int_to_ptr.vmem [resolvable:$true] %s62_s20 }
   0x7   :  { %s13290_s23 = scalar_lea.hbm %s14776_s2, 16 }
   0x8   :  { %p13291_p0 = scmp.ne.s32.totalorder %s14776_s2, %s13290_s23  ;;  %p13294_p1 = scmp.lt.u32.totalorder %s13290_s23, %s14776_s2 }
   0xa   :  { %p13296_p2 = pnand %p13294_p1, %p13291_p0 }
   0xc   :  { %13299 = shalt.err (!%p13296_p2)
}
   0xd   :  { %s13300_s28 = scalar_lea.vmem %s43_s18, 16  ;;  %s13304_s29 = scalar_lea.vmem %s43_s18, 32 }
   0xe   :  { %p13301_p3 = scmp.ne.s32.totalorder %s43_s18, %s13300_s28  ;;  %p13305_p4 = scmp.lt.s32.totalorder %s43_s18, %s43_s18 }
   0xf   :  { %p13306_p5 = scmp.lt.s32.totalorder %s13304_s29, %s13300_s28 }
  0x11   :  { %p13307_p6 = por %p13306_p5, %p13305_p4 }
  0x13   :  { %p13308_p7 = pnand %p13307_p6, %p13301_p3 }
  0x15   :  { %13311 = shalt.err (!%p13308_p7)
}
  0x16   :  { %45 = dma.hbm_to_vmem [thread:$0]  %s14776_s2, 16, %s43_s18, [#allocation5]  }
  0x17   :  { %s13312_s15 = scalar_lea.hbm %s14778_s4, 16 }
  0x18   :  { %p13313_p8 = scmp.ne.s32.totalorder %s14778_s4, %s13312_s15  ;;  %p13316_p9 = scmp.lt.u32.totalorder %s13312_s15, %s14778_s4 }
  0x1a   :  { %p13318_p10 = pnand %p13316_p9, %p13313_p8 }
  0x1c   :  { %13321 = shalt.err (!%p13318_p10)
}
  0x1d   :  { %s13322_s22 = scalar_lea.vmem %s63_s20, 16  ;;  %s13326_s23 = scalar_lea.vmem %s63_s20, 32 }
  0x1e   :  { %p13323_p11 = scmp.ne.s32.totalorder %s63_s20, %s13322_s22  ;;  %p13327_p12 = scmp.lt.s32.totalorder %s63_s20, %s63_s20 }
  0x1f   :  { %p13328_p13 = scmp.lt.s32.totalorder %s13326_s23, %s13322_s22 }
  0x21   :  { %p13329_p0 = por %p13328_p13, %p13327_p12 }
  0x23   :  { %p13330_p1 = pnand %p13329_p0, %p13323_p11 }
  0x25   :  { %13333 = shalt.err (!%p13330_p1)
}
  0x26   :  { %65 = dma.hbm_to_vmem [thread:$0]  %s14778_s4, 16, %s63_s20, [#allocation8]  }
  0x27   :  { %s13524_s24 = smov [#allocation10]   ;;  %s13525_s26 = smov [#allocation13]  }
  0x28   :  { %s84_s25 = sshll.u32 %s13524_s24, 4  ;;  %s104_s27 = sshll.u32 %s13525_s26, 4  ;;  %s85_s25 = int_to_ptr.vmem [resolvable:$true] %s84_s25  ;;  %s105_s27 = int_to_ptr.vmem [resolvable:$true] %s104_s27 }
  0x29   :  { %s13334_s30 = scalar_lea.hbm %s14780_s6, 128 }
  0x2a   :  { %p13335_p2 = scmp.ne.s32.totalorder %s14780_s6, %s13334_s30  ;;  %p13338_p3 = scmp.lt.u32.totalorder %s13334_s30, %s14780_s6 }
  0x2c   :  { %p13340_p4 = pnand %p13338_p3, %p13335_p2 }
  0x2e   :  { %13343 = shalt.err (!%p13340_p4)
}
  0x2f   :  { %s13344_s4 = scalar_lea.vmem %s85_s25, 128  ;;  %p13349_p6 = scmp.lt.s32.totalorder %s85_s25, %s85_s25 }
  0x30   :  { %p13345_p5 = scmp.ne.s32.totalorder %s85_s25, %s13344_s4  ;;  %p13350_p7 = scmp.lt.s32.totalorder %s13344_s4, %s13344_s4 }
  0x32   :  { %p13351_p8 = por %p13350_p7, %p13349_p6 }
  0x34   :  { %p13352_p9 = pnand %p13351_p8, %p13345_p5 }
  0x36   :  { %13355 = shalt.err (!%p13352_p9)
}
  0x37   :  { %87 = dma.hbm_to_vmem [thread:$0]  %s14780_s6, 128, %s85_s25, [#allocation11]  }
  0x38   :  { %s13356_s21 = scalar_lea.hbm %s14782_s8, 128 }
  0x39   :  { %p13357_p10 = scmp.ne.s32.totalorder %s14782_s8, %s13356_s21  ;;  %p13360_p11 = scmp.lt.u32.totalorder %s13356_s21, %s14782_s8 }
  0x3b   :  { %p13362_p12 = pnand %p13360_p11, %p13357_p10 }
  0x3d   :  { %13365 = shalt.err (!%p13362_p12)
}
  0x3e   :  { %s13366_s24 = scalar_lea.vmem %s105_s27, 128  ;;  %p13371_p0 = scmp.lt.s32.totalorder %s105_s27, %s105_s27 }
  0x3f   :  { %p13367_p13 = scmp.ne.s32.totalorder %s105_s27, %s13366_s24  ;;  %p13372_p1 = scmp.lt.s32.totalorder %s13366_s24, %s13366_s24 }
  0x41   :  { %p13373_p2 = por %p13372_p1, %p13371_p0 }
  0x43   :  { %p13374_p3 = pnand %p13373_p2, %p13367_p13 }
  0x45   :  { %13377 = shalt.err (!%p13374_p3)
}
  0x46   :  { %107 = dma.hbm_to_vmem [thread:$0]  %s14782_s8, 128, %s105_s27, [#allocation14]  }
  0x47   :  { %s13526_s26 = smov [#allocation2]   ;;  %s13378_s12 = scalar_lea.hbm %s14775_s1, 8192 }
  0x48   :  { %s29_s28 = sshll.u32 %s13526_s26, 4  ;;  %p13379_p4 = scmp.ne.s32.totalorder %s14775_s1, %s13378_s12  ;;  %s30_s28 = int_to_ptr.vmem [resolvable:$true] %s29_s28 }
  0x49   :  { %p13382_p5 = scmp.lt.u32.totalorder %s13378_s12, %s14775_s1 }
  0x4b   :  { %p13384_p6 = pnand %p13382_p5, %p13379_p4 }
  0x4d   :  { %13387 = shalt.err (!%p13384_p6)
}
  0x4e   :  { %s13388_s20 = scalar_lea.vmem %s30_s28, 8192  ;;  %p13393_p8 = scmp.lt.s32.totalorder %s30_s28, %s30_s28 }
  0x4f   :  { %p13389_p7 = scmp.ne.s32.totalorder %s30_s28, %s13388_s20  ;;  %p13394_p9 = scmp.lt.s32.totalorder %s13388_s20, %s13388_s20 }
  0x51   :  { %p13395_p10 = por %p13394_p9, %p13393_p8 }
  0x53   :  { %p13396_p11 = pnand %p13395_p10, %p13389_p7 }
  0x55   :  { %13399 = shalt.err (!%p13396_p11)
}
  0x56   :  { %s13527_s8 = smov 64   ;;  %s13528_s27 = smov 4  }
  0x57   :  { %35 = dma.hbm_to_vmem [thread:$0]  %s14775_s1, 8192, %s30_s28, [#allocation3], %s13527_s8, %s13527_s8, %s13528_s27  }
  0x58   :  { %s13529_s19 = smov [#allocation6]   ;;  %s13530_s22 = smov [#allocation9]  }
  0x59   :  { %s52_s21 = sshll.u32 %s13529_s19, 4  ;;  %s71_s23 = sshll.u32 %s13530_s22, 4  ;;  %s53_s21 = int_to_ptr.vmem [resolvable:$true] %s52_s21  ;;  %s72_s23 = int_to_ptr.vmem [resolvable:$true] %s71_s23 }
  0x5a   :  { %s13400_s24 = scalar_lea.hbm %s14777_s3, 16 }
  0x5b   :  { %p13401_p12 = scmp.ne.s32.totalorder %s14777_s3, %s13400_s24  ;;  %p13404_p13 = scmp.lt.u32.totalorder %s13400_s24, %s14777_s3 }
  0x5d   :  { %p13406_p0 = pnand %p13404_p13, %p13401_p12 }
  0x5f   :  { %13409 = shalt.err (!%p13406_p0)
}
  0x60   :  { %s13410_s1 = scalar_lea.vmem %s53_s21, 16  ;;  %s13414_s28 = scalar_lea.vmem %s53_s21, 32 }
  0x61   :  { %p13411_p1 = scmp.ne.s32.totalorder %s53_s21, %s13410_s1  ;;  %p13415_p2 = scmp.lt.s32.totalorder %s53_s21, %s53_s21 }
  0x62   :  { %p13416_p3 = scmp.lt.s32.totalorder %s13414_s28, %s13410_s1 }
  0x64   :  { %p13417_p4 = por %p13416_p3, %p13415_p2 }
  0x66   :  { %p13418_p5 = pnand %p13417_p4, %p13411_p1 }
  0x68   :  { %13421 = shalt.err (!%p13418_p5)
}
  0x69   :  { %55 = dma.hbm_to_vmem [thread:$0]  %s14777_s3, 16, %s53_s21, [#allocation5]  }
  0x6a   :  { %s13422_s15 = scalar_lea.hbm %s14779_s5, 131072 }
  0x6b   :  { %p13423_p6 = scmp.ne.s32.totalorder %s14779_s5, %s13422_s15  ;;  %p13426_p7 = scmp.lt.u32.totalorder %s13422_s15, %s14779_s5 }
  0x6d   :  { %p13428_p8 = pnand %p13426_p7, %p13423_p6 }
  0x6f   :  { %13431 = shalt.err (!%p13428_p8)
}
  0x70   :  { %s13432_s19 = scalar_lea.vmem %s72_s23, 131072  ;;  %p13437_p10 = scmp.lt.s32.totalorder %s72_s23, %s72_s23 }
  0x71   :  { %p13433_p9 = scmp.ne.s32.totalorder %s72_s23, %s13432_s19  ;;  %p13438_p11 = scmp.lt.s32.totalorder %s13432_s19, %s13432_s19 }
  0x73   :  { %p13439_p12 = por %p13438_p11, %p13437_p10 }
  0x75   :  { %p13440_p13 = pnand %p13439_p12, %p13433_p9 }
  0x77   :  { %13443 = shalt.err (!%p13440_p13)
}
  0x78   :  { %s13531_s3 = smov 512   ;;  %s13532_s21 = smov 32  }
  0x79   :  { %77 = dma.hbm_to_vmem [thread:$0]  %s14779_s5, 131072, %s72_s23, [#allocation8], %s13531_s3, %s13531_s3, %s13532_s21  }
  0x7a   :  { %s13533_s18 = smov [#allocation12]   ;;  %s13534_s6 = smov [#allocation15]  }
  0x7b   :  { %s94_s24 = sshll.u32 %s13533_s18, 4  ;;  %s113_s25 = sshll.u32 %s13534_s6, 4  ;;  %s95_s24 = int_to_ptr.vmem [resolvable:$true] %s94_s24  ;;  %s114_s25 = int_to_ptr.vmem [resolvable:$true] %s113_s25 }
  0x7c   :  { %s13444_s1 = scalar_lea.hbm %s14781_s7, 128 }
  0x7d   :  { %p13445_p0 = scmp.ne.s32.totalorder %s14781_s7, %s13444_s1  ;;  %p13448_p1 = scmp.lt.u32.totalorder %s13444_s1, %s14781_s7 }
  0x7f   :  { %p13450_p2 = pnand %p13448_p1, %p13445_p0 }
  0x81   :  { %13453 = shalt.err (!%p13450_p2)
}
  0x82   :  { %s13454_s5 = scalar_lea.vmem %s95_s24, 128  ;;  %p13459_p4 = scmp.lt.s32.totalorder %s95_s24, %s95_s24 }
  0x83   :  { %p13455_p3 = scmp.ne.s32.totalorder %s95_s24, %s13454_s5  ;;  %p13460_p5 = scmp.lt.s32.totalorder %s13454_s5, %s13454_s5 }
  0x85   :  { %p13461_p6 = por %p13460_p5, %p13459_p4 }
  0x87   :  { %p13462_p7 = pnand %p13461_p6, %p13455_p3 }
  0x89   :  { %13465 = shalt.err (!%p13462_p7)
}
  0x8a   :  { %97 = dma.hbm_to_vmem [thread:$0]  %s14781_s7, 128, %s95_s24, [#allocation11]  }
  0x8b   :  { %s13466_s20 = scalar_lea.hbm %s14783_s9, 8192 }
  0x8c   :  { %p13467_p8 = scmp.ne.s32.totalorder %s14783_s9, %s13466_s20  ;;  %p13470_p9 = scmp.lt.u32.totalorder %s13466_s20, %s14783_s9 }
  0x8e   :  { %p13472_p10 = pnand %p13470_p9, %p13467_p8 }
  0x90   :  { %13475 = shalt.err (!%p13472_p10)
}
  0x91   :  { %s13476_s21 = scalar_lea.vmem %s114_s25, 8192  ;;  %p13481_p12 = scmp.lt.s32.totalorder %s114_s25, %s114_s25 }
  0x92   :  { %p13477_p11 = scmp.ne.s32.totalorder %s114_s25, %s13476_s21  ;;  %p13482_p13 = scmp.lt.s32.totalorder %s13476_s21, %s13476_s21 }
  0x94   :  { %p13483_p0 = por %p13482_p13, %p13481_p12 }
  0x96   :  { %p13484_p1 = pnand %p13483_p0, %p13477_p11 }
  0x98   :  { %13487 = shalt.err (!%p13484_p1)
}
  0x99   :  { %119 = dma.hbm_to_vmem [thread:$0]  %s14783_s9, 8192, %s114_s25, [#allocation14], %s13527_s8, %s13527_s8, %s13528_s27  }
  0x9a   :  { %s13535_s2 = smov [#allocation16]   ;;  %s13488_s26 = scalar_lea.hbm %s14784_s10, 16 }
  0x9b   :  { %s126_s18 = sshll.u32 %s13535_s2, 4  ;;  %p13489_p2 = scmp.ne.s32.totalorder %s14784_s10, %s13488_s26  ;;  %s127_s18 = int_to_ptr.vmem [resolvable:$true] %s126_s18 }
  0x9c   :  { %p13492_p3 = scmp.lt.u32.totalorder %s13488_s26, %s14784_s10 }
  0x9e   :  { %p13494_p4 = pnand %p13492_p3, %p13489_p2 }
  0xa0   :  { %13497 = shalt.err (!%p13494_p4)
}
  0xa1   :  { %s13498_s12 = scalar_lea.vmem %s127_s18, 16  ;;  %s13502_s9 = scalar_lea.vmem %s127_s18, 32 }
  0xa2   :  { %p13499_p5 = scmp.ne.s32.totalorder %s127_s18, %s13498_s12  ;;  %p13503_p6 = scmp.lt.s32.totalorder %s127_s18, %s127_s18 }
  0xa3   :  { %p13504_p7 = scmp.lt.s32.totalorder %s13502_s9, %s13498_s12 }
  0xa5   :  { %p13505_p8 = por %p13504_p7, %p13503_p6 }
  0xa7   :  { %p13506_p9 = pnand %p13505_p8, %p13499_p5 }
  0xa9   :  { %13509 = shalt.err (!%p13506_p9)
}
  0xaa   :  { %129 = dma.hbm_to_vmem [thread:$0]  %s14784_s10, 16, %s127_s18, [#allocation17]  }
  0xab   :  { %13510 = dma.done.wait [#allocation3], 8192  }
  0xac   :  { %13511 = vsyncadd [#allocation3], 4294959104 }
  0xad   :  { %13512 = dma.done.wait [#allocation5], 32  }
  0xae   :  { %13513 = vsyncadd [#allocation5], 4294967264 }
  0xaf   :  { %13514 = dma.done.wait [#allocation8], 131088  }
  0xb0   :  { %13515 = vsyncadd [#allocation8], 4294836208 }
  0xb1   :  { %13516 = dma.done.wait [#allocation11], 256  }
  0xb2   :  { %13517 = vsyncadd [#allocation11], 4294967040 }
  0xb3   :  { %13518 = dma.done.wait [#allocation14], 8320  }
  0xb4   :  { %13519 = vsyncadd [#allocation14], 4294958976 }
  0xb5   :  { %13520 = dma.done.wait [#allocation17], 16  }
  0xb6   :  { %13521 = vsyncadd [#allocation17], 4294967280  ;;  %v13140_v0 = vld [vmem:[#allocation2 + $0x40] sm:$0xff]   ;;  %v13144_v4 = vld [vmem:[#allocation2 + $0x48] sm:$0xff]  }
  0xb7   :  { %v13141_v1 = vld [vmem:[#allocation2 + $0xc0] sm:$0xff]   ;;  %12781 = vmatprep.subr.bf16.mxu0 %v13140_v0  ;;  %v13145_v5 = vld [vmem:[#allocation2 + $0xc8] sm:$0xff]   ;;  %v13148_v8 = vld [vmem:[#allocation2 + $0x50] sm:$0xff]  }
  0xb8   :  { %v13142_v2 = vld [vmem:[#allocation2] sm:$0xff]   ;;  %12845 = vmatprep.subr.bf16.mxu1 %v13141_v1  ;;  %v13146_v6 = vld [vmem:[#allocation2 + $0x8] sm:$0xff]   ;;  %v13149_v9 = vld [vmem:[#allocation2 + $0xd0] sm:$0xff]  }
  0xb9   :  { %v13143_v3 = vld [vmem:[#allocation2 + $0x80] sm:$0xff]   ;;  %12782 = vmatpush3.bf16.msra.mxu0 %v13142_v2  ;;  %v13147_v7 = vld [vmem:[#allocation2 + $0x88] sm:$0xff]   ;;  %v13150_v10 = vld [vmem:[#allocation2 + $0x10] sm:$0xff]  }
  0xba   :  { %12846 = vmatpush3.bf16.msra.mxu1 %v13143_v3  ;;  %12783 = vmatprep.subr.bf16.mxu0 %v13144_v4  ;;  %v13151_v11 = vld [vmem:[#allocation2 + $0x90] sm:$0xff]   ;;  %v13152_v12 = vld [vmem:[#allocation2 + $0x58] sm:$0xff]   ;;  %v13156_v16 = vld [vmem:[#allocation2 + $0x60] sm:$0xff]  }
  0xbb   :  { %12847 = vmatprep.subr.bf16.mxu1 %v13145_v5  ;;  %v13153_v13 = vld [vmem:[#allocation2 + $0xd8] sm:$0xff]   ;;  %v13157_v17 = vld [vmem:[#allocation2 + $0xe0] sm:$0xff]   ;;  %v13160_v20 = vld [vmem:[#allocation2 + $0x68] sm:$0xff]  }
  0xbc   :  { %v13154_v14 = vld [vmem:[#allocation2 + $0x18] sm:$0xff]   ;;  %v13158_v18 = vld [vmem:[#allocation2 + $0x20] sm:$0xff]   ;;  %v13161_v21 = vld [vmem:[#allocation2 + $0xe8] sm:$0xff]  }
  0xbd   :  { %12784 = vmatpush3.bf16.msra.mxu0 %v13146_v6  ;;  %v13155_v15 = vld [vmem:[#allocation2 + $0x98] sm:$0xff]   ;;  %v13159_v19 = vld [vmem:[#allocation2 + $0xa0] sm:$0xff]   ;;  %v13162_v22 = vld [vmem:[#allocation2 + $0x28] sm:$0xff]  }
  0xbe   :  { %12848 = vmatpush3.bf16.msra.mxu1 %v13147_v7  ;;  %12785 = vmatprep.subr.bf16.mxu0 %v13148_v8  ;;  %v13163_v23 = vld [vmem:[#allocation2 + $0xa8] sm:$0xff]   ;;  %v13164_v24 = vld [vmem:[#allocation2 + $0x70] sm:$0xff]   ;;  %v13168_v28 = vld [vmem:[#allocation2 + $0x78] sm:$0xff]  }
  0xbf   :  { %12849 = vmatprep.subr.bf16.mxu1 %v13149_v9  ;;  %v13165_v25 = vld [vmem:[#allocation2 + $0xf0] sm:$0xff]   ;;  %v13169_v29 = vld [vmem:[#allocation2 + $0xf8] sm:$0xff]   ;;  %v161_v32 = vld [vmem:[%s14774_s0] sm:$0xff] }
  0xc0   :  { %v13166_v26 = vld [vmem:[#allocation2 + $0x30] sm:$0xff]   ;;  %v13170_v30 = vld [vmem:[#allocation2 + $0x38] sm:$0xff]   ;;  %v165_v33 = vld [vmem:[%s14774_s0 + $0x20] sm:$0xff] }
  0xc1   :  { %12786 = vmatpush3.bf16.msra.mxu0 %v13150_v10  ;;  %v13167_v27 = vld [vmem:[#allocation2 + $0xb0] sm:$0xff]   ;;  %v13171_v31 = vld [vmem:[#allocation2 + $0xb8] sm:$0xff]   ;;  %v162_v34 = vld [vmem:[%s14774_s0 + $0x8] sm:$0xff]  ;;  %v11562_v35 = vcombine.low %v161_v32, %v165_v33  ;;  %v11563_v36 = vcombine.high %v161_v32, %v165_v33 }
  0xc2   :  { %12850 = vmatpush3.bf16.msra.mxu1 %v13151_v11  ;;  %12787 = vmatprep.subr.bf16.mxu0 %v13152_v12  ;;  %v166_v37 = vld [vmem:[%s14774_s0 + $0x28] sm:$0xff]  ;;  %v13172_v40 = vld [vmem:[#allocation2 + $0x140] sm:$0xff]   ;;  %v13180_v62 = vld [vmem:[#allocation2 + $0x150] sm:$0xff]  }
  0xc3   :  { %12851 = vmatprep.subr.bf16.mxu1 %v13153_v13  ;;  %v11564_v38 = vcombine.low %v162_v34, %v166_v37  ;;  %v11565_v39 = vcombine.high %v162_v34, %v166_v37  ;;  %1096 = vmatprep.mubr.bf16.mxu0 %v11563_v36  ;;  %v13173_v41 = vld [vmem:[#allocation2 + $0x100] sm:$0xff]   ;;  %v170_v47 = vld [vmem:[%s14774_s0 + $0x48] sm:$0xff]  ;;  %v13181_v63 = vld [vmem:[#allocation2 + $0x110] sm:$0xff]  }
  0xc4   :  { %v13174_v42 = vld [vmem:[#allocation2 + $0x1c0] sm:$0xff]   ;;  %v174_v48 = vld [vmem:[%s14774_s0 + $0x68] sm:$0xff]  ;;  %v13182_v0 = vld [vmem:[#allocation2 + $0x1d0] sm:$0xff]  }
  0xc5   :  { %12788 = vmatpush3.bf16.msra.mxu0 %v13154_v14  ;;  %1193 = vmatprep.mubr.bf16.mxu1 %v11565_v39  ;;  %v13175_v43 = vld [vmem:[#allocation2 + $0x180] sm:$0xff]   ;;  %v11573_v49 = vcombine.high %v170_v47, %v174_v48  ;;  %v13176_v50 = vld [vmem:[#allocation2 + $0x148] sm:$0xff]   ;;  %v11572_v53 = vcombine.low %v170_v47, %v174_v48  ;;  %v13183_v1 = vld [vmem:[#allocation2 + $0x190] sm:$0xff]  }
  0xc6   :  { %12852 = vmatpush3.bf16.msra.mxu1 %v13155_v15  ;;  %12789 = vmatprep.subr.bf16.mxu0 %v13156_v16  ;;  %v169_v44 = vld [vmem:[%s14774_s0 + $0x40] sm:$0xff]  ;;  %v13177_v52 = vld [vmem:[#allocation2 + $0x108] sm:$0xff]   ;;  %v13184_v10 = vld [vmem:[#allocation2 + $0x158] sm:$0xff]  }
  0xc7   :  { %12853 = vmatprep.subr.bf16.mxu1 %v13157_v17  ;;  %v173_v45 = vld [vmem:[%s14774_s0 + $0x60] sm:$0xff]  ;;  %v13178_v54 = vld [vmem:[#allocation2 + $0x1c8] sm:$0xff]   ;;  %v13185_v11 = vld [vmem:[#allocation2 + $0x118] sm:$0xff]  }
  0xc8   :  { %v11571_v46 = vcombine.high %v169_v44, %v173_v45  ;;  %v11570_v51 = vcombine.low %v169_v44, %v173_v45  ;;  %v13179_v55 = vld [vmem:[#allocation2 + $0x188] sm:$0xff]   ;;  %v177_v56 = vld [vmem:[%s14774_s0 + $0x80] sm:$0xff]  ;;  %v13186_v12 = vld [vmem:[#allocation2 + $0x1d8] sm:$0xff]  }
  0xc9   :  { %12790 = vmatpush3.bf16.msra.mxu0 %v13158_v18  ;;  %v181_v57 = vld [vmem:[%s14774_s0 + $0xa0] sm:$0xff]  ;;  %v178_v58 = vld [vmem:[%s14774_s0 + $0x88] sm:$0xff]  ;;  %v13187_v13 = vld [vmem:[#allocation2 + $0x198] sm:$0xff]  }
  0xca   :  { %12854 = vmatpush3.bf16.msra.mxu1 %v13159_v19  ;;  %12791 = vmatprep.subr.bf16.mxu0 %v13160_v20  ;;  %v182_v59 = vld [vmem:[%s14774_s0 + $0xa8] sm:$0xff]  ;;  %v11579_v60 = vcombine.high %v177_v56, %v181_v57  ;;  %v11578_v2 = vcombine.low %v177_v56, %v181_v57  ;;  %v185_v3 = vld [vmem:[%s14774_s0 + $0xc0] sm:$0xff]  ;;  %v13197_v39 = vld [vmem:[#allocation2 + $0x130] sm:$0xff]  }
  0xcb   :  { %12855 = vmatprep.subr.bf16.mxu1 %v13161_v21  ;;  %v11581_v61 = vcombine.high %v178_v58, %v182_v59  ;;  %v189_v4 = vld [vmem:[%s14774_s0 + $0xe0] sm:$0xff]  ;;  %v186_v5 = vld [vmem:[%s14774_s0 + $0xc8] sm:$0xff]  ;;  %v11580_v6 = vcombine.low %v178_v58, %v182_v59  ;;  %v13201_v48 = vld [vmem:[#allocation2 + $0x138] sm:$0xff]  }
  0xcc   :  { %v11587_v7 = vcombine.high %v185_v3, %v189_v4  ;;  %v190_v8 = vld [vmem:[%s14774_s0 + $0xe8] sm:$0xff]  ;;  %v193_v14 = vld [vmem:[%s14774_s0 + $0x100] sm:$0xff]  ;;  %v11586_v19 = vcombine.low %v185_v3, %v189_v4 }
  0xcd   :  { %12792 = vmatpush3.bf16.msra.mxu0 %v13162_v22  ;;  %v11589_v9 = vcombine.high %v186_v5, %v190_v8  ;;  %v197_v15 = vld [vmem:[%s14774_s0 + $0x120] sm:$0xff]  ;;  %v194_v16 = vld [vmem:[%s14774_s0 + $0x108] sm:$0xff]  ;;  %v11588_v21 = vcombine.low %v186_v5, %v190_v8  ;;  %v172_v8 = vld [vmem:[%s14774_s0 + $0x58] sm:$0xff] }
  0xce   :  { %12856 = vmatpush3.bf16.msra.mxu1 %v13163_v23  ;;  %12793 = vmatprep.subr.bf16.mxu0 %v13164_v24  ;;  %v198_v17 = vld [vmem:[%s14774_s0 + $0x128] sm:$0xff]  ;;  %v13188_v18 = vld [vmem:[#allocation2 + $0x160] sm:$0xff]   ;;  %v11595_v22 = vcombine.high %v193_v14, %v197_v15  ;;  %v11594_v34 = vcombine.low %v193_v14, %v197_v15  ;;  %v179_v14 = vld [vmem:[%s14774_s0 + $0x90] sm:$0xff] }
  0xcf   :  { %12857 = vmatprep.subr.bf16.mxu1 %v13165_v25  ;;  %v13189_v20 = vld [vmem:[#allocation2 + $0x120] sm:$0xff]   ;;  %v11597_v24 = vcombine.high %v194_v16, %v198_v17  ;;  %v13194_v32 = vld [vmem:[#allocation2 + $0x1e8] sm:$0xff]   ;;  %v183_v15 = vld [vmem:[%s14774_s0 + $0xb0] sm:$0xff] }
  0xd0   :  { %v13190_v23 = vld [vmem:[#allocation2 + $0x1e0] sm:$0xff]   ;;  %v13195_v33 = vld [vmem:[#allocation2 + $0x1a8] sm:$0xff]  }
  0xd1   :  { %12794 = vmatpush3.bf16.msra.mxu0 %v13166_v26  ;;  %v13191_v25 = vld [vmem:[#allocation2 + $0x1a0] sm:$0xff]   ;;  %v210_v44 = vld [vmem:[%s14774_s0 + $0x188] sm:$0xff] }
  0xd2   :  { %12858 = vmatpush3.bf16.msra.mxu1 %v13167_v27  ;;  %12795 = vmatprep.subr.bf16.mxu0 %v13168_v28  ;;  %v201_v26 = vld [vmem:[%s14774_s0 + $0x140] sm:$0xff]  ;;  %v13192_v28 = vld [vmem:[#allocation2 + $0x168] sm:$0xff]  }
  0xd3   :  { %12859 = vmatprep.subr.bf16.mxu1 %v13169_v29  ;;  %v205_v27 = vld [vmem:[%s14774_s0 + $0x160] sm:$0xff]  ;;  %v202_v29 = vld [vmem:[%s14774_s0 + $0x148] sm:$0xff] }
  0xd4   :  { %v11603_v36 = vcombine.high %v201_v26, %v205_v27  ;;  %v214_v45 = vld [vmem:[%s14774_s0 + $0x1a8] sm:$0xff]  ;;  %v11602_v47 = vcombine.low %v201_v26, %v205_v27  ;;  %v11582_v26 = vcombine.low %v179_v14, %v183_v15 }
  0xd5   :  { %12796 = vmatpush3.bf16.msra.mxu0 %v13170_v30  ;;  %v206_v30 = vld [vmem:[%s14774_s0 + $0x168] sm:$0xff]  ;;  %v11612_v59 = vcombine.low %v210_v44, %v214_v45 }
  0xd6   :  { %12860 = vmatpush3.bf16.msra.mxu1 %v13171_v31  ;;  %12909 = vmatprep.subr.bf16.mxu0 %v13172_v40  ;;  %v13193_v31 = vld [vmem:[#allocation2 + $0x128] sm:$0xff]   ;;  %v11605_v37 = vcombine.high %v202_v29, %v206_v30  ;;  %v13198_v40 = vld [vmem:[#allocation2 + $0x1f0] sm:$0xff]  }
  0xd7   :  { %12973 = vmatprep.subr.bf16.mxu1 %v13174_v42  ;;  %v213_v42 = vld [vmem:[%s14774_s0 + $0x1a0] sm:$0xff]  ;;  %v218_v56 = vld [vmem:[%s14774_s0 + $0x1c8] sm:$0xff] }
  0xd8   :  { %1097 = vmatmul.mubr.bf16.vlgmr.msra.gmra.mrb[0].mxu0 %v11562_v35  ;;  %v11596_v35 = vcombine.low %v194_v16, %v198_v17  ;;  %v222_v57 = vld [vmem:[%s14774_s0 + $0x1e8] sm:$0xff]  ;;  %v180_v16 = vld [vmem:[%s14774_s0 + $0x98] sm:$0xff] }
  0xd9   :  { %1194 = vmatmul.mubr.bf16.vlgmr.msra.gmra.mrb[0].mxu1 %v11564_v38  ;;  %12910 = vmatpush3.bf16.msra.mxu0 %v13173_v41  ;;  %v13196_v38 = vld [vmem:[#allocation2 + $0x170] sm:$0xff]   ;;  %v209_v41 = vld [vmem:[%s14774_s0 + $0x180] sm:$0xff]  ;;  %v11620_v3 = vcombine.low %v218_v56, %v222_v57  ;;  %v184_v17 = vld [vmem:[%s14774_s0 + $0xb8] sm:$0xff] }
  0xda   :  { %12974 = vmatpush3.bf16.msra.mxu1 %v13175_v43  ;;  %1104 = vmatprep.mubr.bf16.mxu0 %v11571_v46  ;;  %v13199_v43 = vld [vmem:[#allocation2 + $0x1b0] sm:$0xff]   ;;  %v13200_v46 = vld [vmem:[#allocation2 + $0x178] sm:$0xff]   ;;  %v11610_v58 = vcombine.low %v209_v41, %v213_v42  ;;  %v11584_v27 = vcombine.low %v180_v16, %v184_v17 }
  0xdb   :  { %1201 = vmatprep.mubr.bf16.mxu1 %v11573_v49  ;;  %12911 = vmatprep.subr.bf16.mxu0 %v13176_v50  ;;  %v11604_v49 = vcombine.low %v202_v29, %v206_v30  ;;  %v11611_v50 = vcombine.high %v209_v41, %v213_v42  ;;  %v195_v30 = vld [vmem:[%s14774_s0 + $0x110] sm:$0xff]  ;;  %v208_v41 = vld [vmem:[%s14774_s0 + $0x178] sm:$0xff] }
  0xdc   :  { %12975 = vmatprep.subr.bf16.mxu1 %v13178_v54  ;;  %v217_v54 = vld [vmem:[%s14774_s0 + $0x1c0] sm:$0xff] }
  0xdd   :  { %12912 = vmatpush3.bf16.msra.mxu0 %v13177_v52  ;;  %v11613_v52 = vcombine.high %v210_v44, %v214_v45 }
  0xde   :  { %12976 = vmatpush3.bf16.msra.mxu1 %v13179_v55  ;;  %12913 = vmatprep.subr.bf16.mxu0 %v13180_v62  ;;  %v221_v55 = vld [vmem:[%s14774_s0 + $0x1e0] sm:$0xff]  ;;  %v163_v62 = vld [vmem:[%s14774_s0 + $0x10] sm:$0xff] }
  0xdf   :  { %12977 = vmatprep.subr.bf16.mxu1 %v13182_v0  ;;  %v164_v0 = vld [vmem:[%s14774_s0 + $0x18] sm:$0xff] }
  0xe0   :  { %1105 = vmatmul.mubr.bf16.gmra.mrb[4].mxu0 %v11570_v51  ;;  %v13202_v51 = vld [vmem:[#allocation2 + $0x1f8] sm:$0xff]  }
  0xe1   :  { %1202 = vmatmul.mubr.bf16.gmra.mrb[4].mxu1 %v11572_v53  ;;  %1112 = vmatprep.mubr.bf16.mxu0 %v11579_v60  ;;  %v13203_v53 = vld [vmem:[#allocation2 + $0x1b8] sm:$0xff]   ;;  %v11619_v60 = vcombine.high %v217_v54, %v221_v55 }
  0xe2   :  { %1209 = vmatprep.mubr.bf16.mxu1 %v11581_v61  ;;  %12914 = vmatpush3.bf16.msra.mxu0 %v13181_v63  ;;  %v11621_v61 = vcombine.high %v218_v56, %v222_v57  ;;  %v167_v63 = vld [vmem:[%s14774_s0 + $0x30] sm:$0xff]  ;;  %v220_v56 = vld [vmem:[%s14774_s0 + $0x1d8] sm:$0xff] }
  0xe3   :  { %12978 = vmatpush3.bf16.msra.mxu1 %v13183_v1  ;;  %12915 = vmatprep.subr.bf16.mxu0 %v13184_v10  ;;  %v168_v1 = vld [vmem:[%s14774_s0 + $0x38] sm:$0xff]  ;;  %v11567_v4 = vcombine.high %v163_v62, %v167_v63  ;;  %v11566_v10 = vcombine.low %v163_v62, %v167_v63 }
  0xe4   :  { %12979 = vmatprep.subr.bf16.mxu1 %v13186_v12  ;;  %v11569_v5 = vcombine.high %v164_v0, %v168_v1  ;;  %v224_v57 = vld [vmem:[%s14774_s0 + $0x1f8] sm:$0xff] }
  0xe5   :  { %v11624_v63 = vcombine.low %v220_v56, %v224_v57 }
  0xe6   :  { %12916 = vmatpush3.bf16.msra.mxu0 %v13185_v11  ;;  %v11568_v11 = vcombine.low %v164_v0, %v168_v1 }
  0xe7   :  { %12980 = vmatpush3.bf16.msra.mxu1 %v13187_v13  ;;  %12917 = vmatprep.subr.bf16.mxu0 %v13188_v18 }
  0xe8   :  { %1113 = vmatmul.mubr.bf16.gmra.mrb[8].mxu0 %v11578_v2  ;;  %12981 = vmatprep.subr.bf16.mxu1 %v13190_v23  ;;  %v11618_v2 = vcombine.low %v217_v54, %v221_v55  ;;  %v191_v23 = vld [vmem:[%s14774_s0 + $0xf0] sm:$0xff] }
  0xe9   :  { %1210 = vmatmul.mubr.bf16.gmra.mrb[8].mxu1 %v11580_v6  ;;  %1120 = vmatprep.mubr.bf16.mxu0 %v11587_v7  ;;  %v171_v6 = vld [vmem:[%s14774_s0 + $0x50] sm:$0xff] }
  0xea   :  { %1217 = vmatprep.mubr.bf16.mxu1 %v11589_v9  ;;  %12918 = vmatpush3.bf16.msra.mxu0 %v13189_v20  ;;  %v175_v7 = vld [vmem:[%s14774_s0 + $0x70] sm:$0xff]  ;;  %v176_v9 = vld [vmem:[%s14774_s0 + $0x78] sm:$0xff]  ;;  %v11583_v20 = vcombine.high %v179_v14, %v183_v15 }
  0xeb   :  { %12982 = vmatpush3.bf16.msra.mxu1 %v13191_v25  ;;  %12919 = vmatprep.subr.bf16.mxu0 %v13192_v28  ;;  %v11575_v12 = vcombine.high %v171_v6, %v175_v7  ;;  %v11577_v13 = vcombine.high %v172_v8, %v176_v9  ;;  %v11574_v18 = vcombine.low %v171_v6, %v175_v7  ;;  %v192_v25 = vld [vmem:[%s14774_s0 + $0xf8] sm:$0xff]  ;;  %v219_v54 = vld [vmem:[%s14774_s0 + $0x1d0] sm:$0xff] }
  0xec   :  { %12983 = vmatprep.subr.bf16.mxu1 %v13194_v32  ;;  %v196_v32 = vld [vmem:[%s14774_s0 + $0x118] sm:$0xff]  ;;  %v223_v55 = vld [vmem:[%s14774_s0 + $0x1f0] sm:$0xff] }
  0xed   :  { %v11622_v62 = vcombine.low %v219_v54, %v223_v55 }
  0xee   :  { %12920 = vmatpush3.bf16.msra.mxu0 %v13193_v31  ;;  %v199_v31 = vld [vmem:[%s14774_s0 + $0x130] sm:$0xff] }
  0xef   :  { %12984 = vmatpush3.bf16.msra.mxu1 %v13195_v33  ;;  %12921 = vmatprep.subr.bf16.mxu0 %v13196_v38  ;;  %v200_v33 = vld [vmem:[%s14774_s0 + $0x138] sm:$0xff]  ;;  %v203_v38 = vld [vmem:[%s14774_s0 + $0x150] sm:$0xff]  ;;  %v11598_v42 = vcombine.low %v195_v30, %v199_v31 }
  0xf0   :  { %1121 = vmatmul.mubr.bf16.gmra.mrb[12].mxu0 %v11586_v19  ;;  %12985 = vmatprep.subr.bf16.mxu1 %v13198_v40  ;;  %v11576_v19 = vcombine.low %v172_v8, %v176_v9  ;;  %v204_v40 = vld [vmem:[%s14774_s0 + $0x158] sm:$0xff] }
  0xf1   :  { %1218 = vmatmul.mubr.bf16.gmra.mrb[12].mxu1 %v11588_v21  ;;  %1128 = vmatprep.mubr.bf16.mxu0 %v11595_v22  ;;  %v11585_v21 = vcombine.high %v180_v16, %v184_v17  ;;  %v187_v22 = vld [vmem:[%s14774_s0 + $0xd0] sm:$0xff]  ;;  %v11609_v45 = vcombine.high %v204_v40, %v208_v41 }
  0xf2   :  { %1225 = vmatprep.mubr.bf16.mxu1 %v11597_v24  ;;  %12922 = vmatpush3.bf16.msra.mxu0 %v13197_v39  ;;  %v188_v24 = vld [vmem:[%s14774_s0 + $0xd8] sm:$0xff]  ;;  %v11591_v28 = vcombine.high %v187_v22, %v191_v23  ;;  %v207_v39 = vld [vmem:[%s14774_s0 + $0x170] sm:$0xff] }
  0xf3   :  { %12986 = vmatpush3.bf16.msra.mxu1 %v13199_v43  ;;  %12923 = vmatprep.subr.bf16.mxu0 %v13200_v46  ;;  %v11593_v29 = vcombine.high %v188_v24, %v192_v25  ;;  %v11600_v43 = vcombine.low %v196_v32, %v200_v33  ;;  %v11607_v44 = vcombine.high %v203_v38, %v207_v39  ;;  %v211_v46 = vld [vmem:[%s14774_s0 + $0x190] sm:$0xff] }
  0xf4   :  { %12987 = vmatprep.subr.bf16.mxu1 %v13202_v51  ;;  %v11608_v51 = vcombine.low %v204_v40, %v208_v41 }
  0xf6   :  { %12924 = vmatpush3.bf16.msra.mxu0 %v13201_v48  ;;  %v212_v48 = vld [vmem:[%s14774_s0 + $0x198] sm:$0xff] }
  0xf7   :  { %12988 = vmatpush3.bf16.msra.mxu1 %v13203_v53 }
  0xf8   :  { %1129 = vmatmul.mubr.bf16.gmra.mrb[16].mxu0 %v11594_v34  ;;  %v11590_v34 = vcombine.low %v187_v22, %v191_v23 }
  0xf9   :  { %1226 = vmatmul.mubr.bf16.gmra.mrb[16].mxu1 %v11596_v35  ;;  %1136 = vmatprep.mubr.bf16.mxu0 %v11603_v36  ;;  %v11592_v35 = vcombine.low %v188_v24, %v192_v25  ;;  %v11599_v36 = vcombine.high %v195_v30, %v199_v31 }
  0xfa   :  { %1233 = vmatprep.mubr.bf16.mxu1 %v11605_v37  ;;  %v11601_v37 = vcombine.high %v196_v32, %v200_v33 }
 0x100   :  { %1137 = vmatmul.mubr.bf16.gmra.mrb[20].mxu0 %v11602_v47  ;;  %v215_v47 = vld [vmem:[%s14774_s0 + $0x1b0] sm:$0xff] }
 0x101   :  { %1234 = vmatmul.mubr.bf16.gmra.mrb[20].mxu1 %v11604_v49  ;;  %1144 = vmatprep.mubr.bf16.mxu0 %v11611_v50  ;;  %v216_v49 = vld [vmem:[%s14774_s0 + $0x1b8] sm:$0xff]  ;;  %v11606_v50 = vcombine.low %v203_v38, %v207_v39 }
 0x102   :  { %1241 = vmatprep.mubr.bf16.mxu1 %v11613_v52  ;;  %v11615_v52 = vcombine.high %v211_v46, %v215_v47  ;;  %v11617_v53 = vcombine.high %v212_v48, %v216_v49 }
 0x108   :  { %1145 = vmatmul.mubr.bf16.gmra.mrb[24].mxu0 %v11610_v58  ;;  %v11614_v58 = vcombine.low %v211_v46, %v215_v47 }
 0x109   :  { %1242 = vmatmul.mubr.bf16.gmra.mrb[24].mxu1 %v11612_v59  ;;  %1152 = vmatprep.mubr.bf16.mxu0 %v11619_v60  ;;  %v11616_v59 = vcombine.low %v212_v48, %v216_v49  ;;  %v11623_v60 = vcombine.high %v219_v54, %v223_v55 }
 0x10a   :  { %1249 = vmatprep.mubr.bf16.mxu1 %v11621_v61  ;;  %v11625_v61 = vcombine.high %v220_v56, %v224_v57 }
 0x110   :  { %1153 = vmatmul.mubr.bf16.gmra.mrb[28].mxu0 %v11618_v2  ;;  %v13915_v2 = vld [vmem:[#allocation4] ss:$0 sm:$0xff] }
 0x111   :  { %1250 = vmatmul.mubr.bf16.gmra.mrb[28].mxu1 %v11620_v3  ;;  %1290 = vmatprep.mubr.bf16.mxu0 %v11567_v4 }
 0x112   :  { %1387 = vmatprep.mubr.bf16.mxu1 %v11569_v5 }
 0x118   :  { %1291 = vmatmul.mubr.bf16.vlgmr.msra.gmra.mrb[32].mxu0 %v11566_v10 }
 0x119   :  { %1388 = vmatmul.mubr.bf16.vlgmr.msra.gmra.mrb[32].mxu1 %v11568_v11  ;;  %1298 = vmatprep.mubr.bf16.mxu0 %v11575_v12 }
 0x11a   :  { %1395 = vmatprep.mubr.bf16.mxu1 %v11577_v13 }
 0x120   :  { %1299 = vmatmul.mubr.bf16.gmra.mrb[36].mxu0 %v11574_v18 }
 0x121   :  { %1396 = vmatmul.mubr.bf16.gmra.mrb[36].mxu1 %v11576_v19  ;;  %1306 = vmatprep.mubr.bf16.mxu0 %v11583_v20 }
 0x122   :  { %1403 = vmatprep.mubr.bf16.mxu1 %v11585_v21 }
 0x128   :  { %1307 = vmatmul.mubr.bf16.gmra.mrb[40].mxu0 %v11582_v26 }
 0x129   :  { %1404 = vmatmul.mubr.bf16.gmra.mrb[40].mxu1 %v11584_v27  ;;  %1314 = vmatprep.mubr.bf16.mxu0 %v11591_v28 }
 0x12a   :  { %1411 = vmatprep.mubr.bf16.mxu1 %v11593_v29 }
 0x130   :  { %1315 = vmatmul.mubr.bf16.gmra.mrb[44].mxu0 %v11590_v34 }
 0x131   :  { %1412 = vmatmul.mubr.bf16.gmra.mrb[44].mxu1 %v11592_v35  ;;  %1322 = vmatprep.mubr.bf16.mxu0 %v11599_v36 }
 0x132   :  { %1419 = vmatprep.mubr.bf16.mxu1 %v11601_v37 }
 0x138   :  { %1323 = vmatmul.mubr.bf16.gmra.mrb[48].mxu0 %v11598_v42 }
 0x139   :  { %1420 = vmatmul.mubr.bf16.gmra.mrb[48].mxu1 %v11600_v43  ;;  %1330 = vmatprep.mubr.bf16.mxu0 %v11607_v44 }
 0x13a   :  { %1427 = vmatprep.mubr.bf16.mxu1 %v11609_v45 }
 0x140   :  { %1331 = vmatmul.mubr.bf16.gmra.mrb[52].mxu0 %v11606_v50 }
 0x141   :  { %1428 = vmatmul.mubr.bf16.gmra.mrb[52].mxu1 %v11608_v51  ;;  %1338 = vmatprep.mubr.bf16.mxu0 %v11615_v52 }
 0x142   :  { %1435 = vmatprep.mubr.bf16.mxu1 %v11617_v53 }
 0x148   :  { %1339 = vmatmul.mubr.bf16.gmra.mrb[56].mxu0 %v11614_v58 }
 0x149   :  { %1436 = vmatmul.mubr.bf16.gmra.mrb[56].mxu1 %v11616_v59  ;;  %1346 = vmatprep.mubr.bf16.mxu0 %v11623_v60 }
 0x14a   :  { %1443 = vmatprep.mubr.bf16.mxu1 %v11625_v61 }
 0x150   :  { %1347 = vmatmul.mubr.bf16.gmra.mrb[60].mxu0 %v11622_v62 }
 0x151   :  { %1444 = vmatmul.mubr.bf16.gmra.mrb[60].mxu1 %v11624_v63 }
 0x1ab   :  { %v12797_v0 = vpop.f32.mrb[0].mxu0 }
 0x1ac   :  { %v12861_v1 = vpop.f32.mrb[0].mxu1  ;;  %v12798_v3 = vpop.f32.mrb[1].mxu0 }
 0x1ad   :  { %v12799_v4 = vadd.f32 %v12798_v3, %v12797_v0  ;;  %v12862_v5 = vpop.f32.mrb[1].mxu1  ;;  %v12800_v6 = vpop.f32.mrb[2].mxu0 }
 0x1ae   :  { %v12863_v7 = vadd.f32 %v12862_v5, %v12861_v1  ;;  %v12864_v8 = vpop.f32.mrb[2].mxu1  ;;  %v12801_v9 = vpop.f32.mrb[3].mxu0 }
 0x1af   :  { %v1099_v10 = vadd.f32 %v12799_v4, %v13915_v2  ;;  %v12802_v11 = vadd.f32 %v12801_v9, %v12800_v6  ;;  %v12865_v12 = vpop.f32.mrb[3].mxu1 }
 0x1b0   :  { %v12866_v13 = vadd.f32 %v12865_v12, %v12864_v8 }
 0x1b1   :  { %v13918_v14 = vadd.f32 %v12863_v7, %v1099_v10  ;;  %v1102_v15 = vadd.f32 %v12802_v11, %v13915_v2 }
 0x1b3   :  { %v13921_v16 = vadd.f32 %v12866_v13, %v1102_v15  ;;  %v12803_v17 = vpop.f32.mrb[4].mxu0 }
 0x1b4   :  { %v12867_v18 = vpop.f32.mrb[4].mxu1  ;;  %v12804_v19 = vpop.f32.mrb[5].mxu0 }
 0x1b5   :  { %v12805_v20 = vadd.f32 %v12804_v19, %v12803_v17  ;;  %v12868_v21 = vpop.f32.mrb[5].mxu1  ;;  %v12806_v22 = vpop.f32.mrb[6].mxu0 }
 0x1b6   :  { %v12869_v23 = vadd.f32 %v12868_v21, %v12867_v18  ;;  %v12870_v24 = vpop.f32.mrb[6].mxu1  ;;  %v12807_v25 = vpop.f32.mrb[7].mxu0 }
 0x1b7   :  { %v1107_v26 = vadd.f32 %v12805_v20, %v13915_v2  ;;  %v12808_v27 = vadd.f32 %v12807_v25, %v12806_v22  ;;  %v12871_v28 = vpop.f32.mrb[7].mxu1 }
 0x1b8   :  { %v12872_v29 = vadd.f32 %v12871_v28, %v12870_v24 }
 0x1b9   :  { %v13924_v30 = vadd.f32 %v12869_v23, %v1107_v26  ;;  %v1110_v31 = vadd.f32 %v12808_v27, %v13915_v2 }
 0x1bb   :  { %v13927_v32 = vadd.f32 %v12872_v29, %v1110_v31  ;;  %v12809_v33 = vpop.f32.mrb[8].mxu0 }
 0x1bc   :  { %v12873_v34 = vpop.f32.mrb[8].mxu1  ;;  %v12810_v35 = vpop.f32.mrb[9].mxu0 }
 0x1bd   :  { %v12811_v36 = vadd.f32 %v12810_v35, %v12809_v33  ;;  %v12874_v37 = vpop.f32.mrb[9].mxu1  ;;  %v12812_v38 = vpop.f32.mrb[10].mxu0 }
 0x1be   :  { %v12875_v39 = vadd.f32 %v12874_v37, %v12873_v34  ;;  %v12876_v40 = vpop.f32.mrb[10].mxu1  ;;  %v12813_v41 = vpop.f32.mrb[11].mxu0 }
 0x1bf   :  { %v1115_v42 = vadd.f32 %v12811_v36, %v13915_v2  ;;  %v12814_v43 = vadd.f32 %v12813_v41, %v12812_v38  ;;  %v12877_v44 = vpop.f32.mrb[11].mxu1 }
 0x1c0   :  { %v12878_v45 = vadd.f32 %v12877_v44, %v12876_v40 }
 0x1c1   :  { %v13930_v46 = vadd.f32 %v12875_v39, %v1115_v42  ;;  %v1118_v47 = vadd.f32 %v12814_v43, %v13915_v2 }
 0x1c3   :  { %v13933_v48 = vadd.f32 %v12878_v45, %v1118_v47  ;;  %v12815_v49 = vpop.f32.mrb[12].mxu0 }
 0x1c4   :  { %v12879_v50 = vpop.f32.mrb[12].mxu1  ;;  %v12816_v51 = vpop.f32.mrb[13].mxu0 }
 0x1c5   :  { %v12817_v52 = vadd.f32 %v12816_v51, %v12815_v49  ;;  %v12880_v53 = vpop.f32.mrb[13].mxu1  ;;  %v12818_v54 = vpop.f32.mrb[14].mxu0 }
 0x1c6   :  { %v12881_v55 = vadd.f32 %v12880_v53, %v12879_v50  ;;  %v12882_v56 = vpop.f32.mrb[14].mxu1  ;;  %v12819_v57 = vpop.f32.mrb[15].mxu0 }
 0x1c7   :  { %v1123_v58 = vadd.f32 %v12817_v52, %v13915_v2  ;;  %v12820_v59 = vadd.f32 %v12819_v57, %v12818_v54  ;;  %v12883_v60 = vpop.f32.mrb[15].mxu1 }
 0x1c8   :  { %v12884_v61 = vadd.f32 %v12883_v60, %v12882_v56 }
 0x1c9   :  { %v13936_v62 = vadd.f32 %v12881_v55, %v1123_v58  ;;  %v1126_v63 = vadd.f32 %v12820_v59, %v13915_v2 }
 0x1cb   :  { %v13939_v0 = vadd.f32 %v12884_v61, %v1126_v63  ;;  %v12821_v1 = vpop.f32.mrb[16].mxu0 }
 0x1cc   :  { %v12885_v3 = vpop.f32.mrb[16].mxu1  ;;  %v12822_v4 = vpop.f32.mrb[17].mxu0 }
 0x1cd   :  { %v12823_v5 = vadd.f32 %v12822_v4, %v12821_v1  ;;  %v12886_v6 = vpop.f32.mrb[17].mxu1  ;;  %v12824_v7 = vpop.f32.mrb[18].mxu0 }
 0x1ce   :  { %v12887_v8 = vadd.f32 %v12886_v6, %v12885_v3  ;;  %v12888_v9 = vpop.f32.mrb[18].mxu1  ;;  %v12825_v10 = vpop.f32.mrb[19].mxu0 }
 0x1cf   :  { %v1131_v11 = vadd.f32 %v12823_v5, %v13915_v2  ;;  %v12826_v12 = vadd.f32 %v12825_v10, %v12824_v7  ;;  %v12889_v13 = vpop.f32.mrb[19].mxu1  ;;  %v1696_v10 = vld [vmem:[#allocation9 + $0x200] sm:$0xff] }
 0x1d0   :  { %v12890_v15 = vadd.f32 %v12889_v13, %v12888_v9 }
 0x1d1   :  { %v13942_v17 = vadd.f32 %v12887_v8, %v1131_v11  ;;  %v1134_v18 = vadd.f32 %v12826_v12, %v13915_v2  ;;  %v1700_v11 = vld [vmem:[#allocation9 + $0x220] sm:$0xff]  ;;  %v1697_v12 = vld [vmem:[#allocation9 + $0x208] sm:$0xff] }
 0x1d2   :  { %v11693_v13 = vcombine.high %v1696_v10, %v1700_v11 }
 0x1d3   :  { %v13945_v19 = vadd.f32 %v12890_v15, %v1134_v18  ;;  %v12827_v20 = vpop.f32.mrb[20].mxu0  ;;  %v1701_v15 = vld [vmem:[#allocation9 + $0x228] sm:$0xff] }
 0x1d4   :  { %v12891_v21 = vpop.f32.mrb[20].mxu1  ;;  %v12828_v22 = vpop.f32.mrb[21].mxu0  ;;  %2083 = vmatprep.subr.bf16.mxu0 %v11693_v13 }
 0x1d5   :  { %v12829_v23 = vadd.f32 %v12828_v22, %v12827_v20  ;;  %v12892_v24 = vpop.f32.mrb[21].mxu1  ;;  %v12830_v25 = vpop.f32.mrb[22].mxu0  ;;  %v11694_v22 = vcombine.low %v1697_v12, %v1701_v15 }
 0x1d6   :  { %v12893_v26 = vadd.f32 %v12892_v24, %v12891_v21  ;;  %v12894_v27 = vpop.f32.mrb[22].mxu1  ;;  %v12831_v28 = vpop.f32.mrb[23].mxu0  ;;  %v11692_v21 = vcombine.low %v1696_v10, %v1700_v11 }
 0x1d7   :  { %v1139_v29 = vadd.f32 %v12829_v23, %v13915_v2  ;;  %v12832_v31 = vadd.f32 %v12831_v28, %v12830_v25  ;;  %v12895_v33 = vpop.f32.mrb[23].mxu1  ;;  %v11695_v23 = vcombine.high %v1697_v12, %v1701_v15  ;;  %v1725_v15 = vld [vmem:[#allocation9 + $0x2e8] sm:$0xff] }
 0x1d8   :  { %v12896_v34 = vadd.f32 %v12895_v33, %v12894_v27  ;;  %2084 = vmatpush1.bf16.msra.mxu0 %v11692_v21 }
 0x1d9   :  { %v13948_v35 = vadd.f32 %v12893_v26, %v1139_v29  ;;  %v1142_v36 = vadd.f32 %v12832_v31, %v13915_v2  ;;  %2124 = vmatprep.subr.bf16.mxu1 %v11695_v23  ;;  %v1708_v29 = vld [vmem:[#allocation9 + $0x260] sm:$0xff]  ;;  %v1705_v31 = vld [vmem:[#allocation9 + $0x248] sm:$0xff] }
 0x1da   :  { %2125 = vmatpush1.bf16.msra.mxu1 %v11694_v22 }
 0x1db   :  { %v13951_v37 = vadd.f32 %v12896_v34, %v1142_v36  ;;  %v12833_v38 = vpop.f32.mrb[24].mxu0 }
 0x1dc   :  { %v12897_v39 = vpop.f32.mrb[24].mxu1  ;;  %v12834_v40 = vpop.f32.mrb[25].mxu0 }
 0x1dd   :  { %v12835_v41 = vadd.f32 %v12834_v40, %v12833_v38  ;;  %v12898_v42 = vpop.f32.mrb[25].mxu1  ;;  %v12836_v43 = vpop.f32.mrb[26].mxu0 }
 0x1de   :  { %v12899_v44 = vadd.f32 %v12898_v42, %v12897_v39  ;;  %v12900_v45 = vpop.f32.mrb[26].mxu1  ;;  %v12837_v47 = vpop.f32.mrb[27].mxu0  ;;  %v1709_v39 = vld [vmem:[#allocation9 + $0x268] sm:$0xff] }
 0x1df   :  { %v1147_v49 = vadd.f32 %v12835_v41, %v13915_v2  ;;  %v12838_v50 = vadd.f32 %v12837_v47, %v12836_v43  ;;  %v12901_v51 = vpop.f32.mrb[27].mxu1  ;;  %v11703_v47 = vcombine.high %v1705_v31, %v1709_v39 }
 0x1e0   :  { %v12902_v52 = vadd.f32 %v12901_v51, %v12900_v45  ;;  %v1712_v51 = vld [vmem:[#allocation9 + $0x280] sm:$0xff] }
 0x1e1   :  { %v13954_v53 = vadd.f32 %v12899_v44, %v1147_v49  ;;  %v1150_v54 = vadd.f32 %v12838_v50, %v13915_v2  ;;  %v11702_v44 = vcombine.low %v1705_v31, %v1709_v39  ;;  %2126 = vmatprep.subr.bf16.mxu1 %v11703_v47  ;;  %v1729_v31 = vld [vmem:[#allocation9 + $0x308] sm:$0xff] }
 0x1e3   :  { %v13957_v55 = vadd.f32 %v12902_v52, %v1150_v54  ;;  %v12839_v56 = vpop.f32.mrb[28].mxu0  ;;  %v1716_v52 = vld [vmem:[#allocation9 + $0x2a0] sm:$0xff]  ;;  %v1713_v54 = vld [vmem:[#allocation9 + $0x288] sm:$0xff]  ;;  %2127 = vmatpush1.bf16.msra.mxu1 %v11702_v44 }
 0x1e4   :  { %v12903_v57 = vpop.f32.mrb[28].mxu1  ;;  %v12840_v58 = vpop.f32.mrb[29].mxu0 }
 0x1e5   :  { %v12841_v59 = vadd.f32 %v12840_v58, %v12839_v56  ;;  %v12904_v60 = vpop.f32.mrb[29].mxu1  ;;  %v12842_v61 = vpop.f32.mrb[30].mxu0  ;;  %v11709_v56 = vcombine.high %v1712_v51, %v1716_v52 }
 0x1e6   :  { %v12905_v63 = vadd.f32 %v12904_v60, %v12903_v57  ;;  %v12906_v1 = vpop.f32.mrb[30].mxu1  ;;  %v12843_v3 = vpop.f32.mrb[31].mxu0  ;;  %v1717_v57 = vld [vmem:[#allocation9 + $0x2a8] sm:$0xff] }
 0x1e7   :  { %v1155_v4 = vadd.f32 %v12841_v59, %v13915_v2  ;;  %v12844_v5 = vadd.f32 %v12843_v3, %v12842_v61  ;;  %v12907_v6 = vpop.f32.mrb[31].mxu1  ;;  %v11708_v59 = vcombine.low %v1712_v51, %v1716_v52  ;;  %v11710_v60 = vcombine.low %v1713_v54, %v1717_v57  ;;  %v1740_v51 = vld [vmem:[#allocation9 + $0x360] sm:$0xff]  ;;  %v1737_v52 = vld [vmem:[#allocation9 + $0x348] sm:$0xff] }
 0x1e8   :  { %v12908_v7 = vadd.f32 %v12907_v6, %v12906_v1  ;;  %v11711_v61 = vcombine.high %v1713_v54, %v1717_v57  ;;  %v1720_v6 = vld [vmem:[#allocation9 + $0x2c0] sm:$0xff] }
 0x1e9   :  { %v13960_v8 = vadd.f32 %v12905_v63, %v1155_v4  ;;  %v1158_v9 = vadd.f32 %v12844_v5, %v13915_v2  ;;  %v1704_v2 = vld [vmem:[#allocation9 + $0x240] sm:$0xff] }
 0x1ea   :  { %v11701_v38 = vcombine.high %v1704_v2, %v1708_v29  ;;  %v11700_v43 = vcombine.low %v1704_v2, %v1708_v29  ;;  %2128 = vmatprep.subr.bf16.mxu1 %v11711_v61  ;;  %v1728_v2 = vld [vmem:[#allocation9 + $0x300] sm:$0xff] }
 0x1eb   :  { %v13963_v18 = vadd.f32 %v12908_v7, %v1158_v9  ;;  %v12925_v20 = vpop.f32.mrb[32].mxu0  ;;  %v1724_v7 = vld [vmem:[#allocation9 + $0x2e0] sm:$0xff]  ;;  %v1721_v9 = vld [vmem:[#allocation9 + $0x2c8] sm:$0xff]  ;;  %2129 = vmatpush1.bf16.msra.mxu1 %v11710_v60 }
 0x1ec   :  { %v12989_v24 = vpop.f32.mrb[32].mxu1  ;;  %v12926_v25 = vpop.f32.mrb[33].mxu0  ;;  %2085 = vmatprep.subr.bf16.mxu0 %v11701_v38  ;;  %v11717_v13 = vcombine.high %v1720_v6, %v1724_v7  ;;  %v11716_v23 = vcombine.low %v1720_v6, %v1724_v7  ;;  %v1732_v29 = vld [vmem:[#allocation9 + $0x320] sm:$0xff] }
 0x1ed   :  { %v12927_v26 = vadd.f32 %v12926_v25, %v12925_v20  ;;  %v12990_v27 = vpop.f32.mrb[33].mxu1  ;;  %v12928_v28 = vpop.f32.mrb[34].mxu0  ;;  %2086 = vmatpush1.bf16.msra.mxu0 %v11700_v43  ;;  %v11724_v39 = vcombine.low %v1728_v2, %v1732_v29  ;;  %v1744_v7 = vld [vmem:[#allocation9 + $0x380] sm:$0xff] }
 0x1ee   :  { %v12991_v33 = vadd.f32 %v12990_v27, %v12989_v24  ;;  %v12992_v34 = vpop.f32.mrb[34].mxu1  ;;  %v12929_v36 = vpop.f32.mrb[35].mxu0  ;;  %2087 = vmatprep.subr.bf16.mxu0 %v11709_v56  ;;  %v11718_v24 = vcombine.low %v1721_v9, %v1725_v15 }
 0x1ef   :  { %v1293_v40 = vadd.f32 %v12927_v26, %v13918_v14  ;;  %v12930_v41 = vadd.f32 %v12929_v36, %v12928_v28  ;;  %v12993_v42 = vpop.f32.mrb[35].mxu1  ;;  %v11719_v26 = vcombine.high %v1721_v9, %v1725_v15  ;;  %v1748_v9 = vld [vmem:[#allocation9 + $0x3a0] sm:$0xff] }
 0x1f0   :  { %v12994_v45 = vadd.f32 %v12993_v42, %v12992_v34  ;;  %v1733_v34 = vld [vmem:[#allocation9 + $0x328] sm:$0xff] }
 0x1f1   :  { %v13966_v49 = vadd.f32 %v12991_v33, %v1293_v40  ;;  %v1296_v50 = vadd.f32 %v12930_v41, %v13921_v16  ;;  %2088 = vmatpush1.bf16.msra.mxu0 %v11708_v59  ;;  %2130 = vmatprep.subr.bf16.mxu1 %v11719_v26  ;;  %v11725_v33 = vcombine.high %v1728_v2, %v1732_v29  ;;  %v1741_v59 = vld [vmem:[#allocation9 + $0x368] sm:$0xff]  ;;  %v1752_v2 = vld [vmem:[#allocation9 + $0x3c0] sm:$0xff] }
 0x1f2   :  { %2089 = vmatprep.subr.bf16.mxu0 %v11717_v13  ;;  %2131 = vmatpush1.bf16.msra.mxu1 %v11718_v24  ;;  %v11726_v40 = vcombine.low %v1729_v31, %v1733_v34  ;;  %v11727_v43 = vcombine.high %v1729_v31, %v1733_v34  ;;  %v1756_v29 = vld [vmem:[#allocation9 + $0x3e0] sm:$0xff]  ;;  %v1753_v31 = vld [vmem:[#allocation9 + $0x3c8] sm:$0xff] }
 0x1f3   :  { %v13969_v58 = vadd.f32 %v12994_v45, %v1296_v50  ;;  %v12931_v14 = vpop.f32.mrb[36].mxu0  ;;  %v1736_v50 = vld [vmem:[#allocation9 + $0x340] sm:$0xff] }
 0x1f4   :  { %v12995_v63 = vpop.f32.mrb[36].mxu1  ;;  %v12932_v1 = vpop.f32.mrb[37].mxu0  ;;  %2132 = vmatprep.subr.bf16.mxu1 %v11727_v43 }
 0x1f5   :  { %v1452_v16 = vadd.f32 %v13969_v58, %v13966_v49  ;;  %v12933_v3 = vadd.f32 %v12932_v1, %v12931_v14  ;;  %v12996_v4 = vpop.f32.mrb[37].mxu1  ;;  %v12934_v5 = vpop.f32.mrb[38].mxu0  ;;  %2090 = vmatpush1.bf16.msra.mxu0 %v11716_v23  ;;  %v11733_v14 = vcombine.high %v1736_v50, %v1740_v51  ;;  %v11732_v1 = vcombine.low %v1736_v50, %v1740_v51  ;;  %v13994_v50 = vld [vmem:[#allocation9 + $0x218] sm:$0xff] }
 0x1f6   :  { %v12997_v10 = vadd.f32 %v12996_v4, %v12995_v63  ;;  %v12998_v11 = vpop.f32.mrb[38].mxu1  ;;  %v12935_v12 = vpop.f32.mrb[39].mxu0  ;;  %2091 = vmatprep.subr.bf16.mxu0 %v11725_v33  ;;  %2133 = vmatpush1.bf16.msra.mxu1 %v11726_v40  ;;  %v11735_v4 = vcombine.high %v1737_v52, %v1741_v59  ;;  %v1757_v40 = vld [vmem:[#allocation9 + $0x3e8] sm:$0xff]  ;;  %v13996_v51 = vld [vmem:[#allocation9 + $0x238] sm:$0xff] }
 0x1f7   :  { %v1301_v20 = vadd.f32 %v12933_v3, %v13924_v30  ;;  %v12936_v21 = vadd.f32 %v12935_v12, %v12934_v5  ;;  %v12999_v22 = vpop.f32.mrb[39].mxu1  ;;  %v1749_v12 = vld [vmem:[#allocation9 + $0x3a8] sm:$0xff] }
 0x1f8   :  { %v13000_v25 = vadd.f32 %v12999_v22, %v12998_v11  ;;  %2134 = vmatprep.subr.bf16.mxu1 %v11735_v4  ;;  %v11741_v11 = vcombine.high %v1744_v7, %v1748_v9 }
 0x1f9   :  { %v13974_v27 = vadd.f32 %v12997_v10, %v1301_v20  ;;  %v1304_v28 = vadd.f32 %v12936_v21, %v13927_v32  ;;  %2092 = vmatpush1.bf16.msra.mxu0 %v11724_v39  ;;  %v1745_v10 = vld [vmem:[#allocation9 + $0x388] sm:$0xff]  ;;  %v11740_v20 = vcombine.low %v1744_v7, %v1748_v9  ;;  %v11749_v39 = vcombine.high %v1752_v2, %v1756_v29 }
 0x1fa   :  { %2093 = vmatprep.subr.bf16.mxu0 %v11733_v14  ;;  %v11742_v21 = vcombine.low %v1745_v10, %v1749_v12  ;;  %v11743_v24 = vcombine.high %v1745_v10, %v1749_v12 }
 0x1fb   :  { %v1453_v30 = vadd.f32 %v1452_v16, %v13974_v27  ;;  %v13978_v36 = vadd.f32 %v13000_v25, %v1304_v28  ;;  %v12937_v38 = vpop.f32.mrb[40].mxu0  ;;  %v11734_v16 = vcombine.low %v1737_v52, %v1741_v59  ;;  %v11698_v59 = vcombine.low %v13994_v50, %v13996_v51 }
 0x1fc   :  { %v13001_v41 = vpop.f32.mrb[40].mxu1  ;;  %v12938_v42 = vpop.f32.mrb[41].mxu0 }
 0x1fd   :  { %v1454_v32 = vadd.f32 %v1453_v30, %v13978_v36  ;;  %v12939_v44 = vadd.f32 %v12938_v42, %v12937_v38  ;;  %v13002_v45 = vpop.f32.mrb[41].mxu1  ;;  %v12940_v47 = vpop.f32.mrb[42].mxu0  ;;  %2094 = vmatpush1.bf16.msra.mxu0 %v11732_v1  ;;  %2135 = vmatpush1.bf16.msra.mxu1 %v11734_v16  ;;  %v11748_v38 = vcombine.low %v1752_v2, %v1756_v29  ;;  %v13991_v42 = vld [vmem:[#allocation9 + $0x230] sm:$0xff] }
 0x1fe   :  { %v13003_v54 = vadd.f32 %v13002_v45, %v13001_v41  ;;  %v13004_v56 = vpop.f32.mrb[42].mxu1  ;;  %v12941_v57 = vpop.f32.mrb[43].mxu0  ;;  %2095 = vmatprep.subr.bf16.mxu0 %v11741_v11  ;;  %2136 = vmatprep.subr.bf16.mxu1 %v11743_v24  ;;  %v13989_v41 = vld [vmem:[#allocation9 + $0x210] sm:$0xff]  ;;  %v11750_v45 = vcombine.low %v1753_v31, %v1757_v40 }
 0x1ff   :  { %v1309_v60 = vadd.f32 %v12939_v44, %v13930_v46  ;;  %v12942_v61 = vadd.f32 %v12941_v57, %v12940_v47  ;;  %v13005_v63 = vpop.f32.mrb[43].mxu1  ;;  %v11751_v47 = vcombine.high %v1753_v31, %v1757_v40 }
 0x200   :  { %v13006_v3 = vadd.f32 %v13005_v63, %v13004_v56  ;;  %v11696_v56 = vcombine.low %v13989_v41, %v13991_v42 }
 0x201   :  { %v13982_v5 = vadd.f32 %v13003_v54, %v1309_v60  ;;  %v1312_v6 = vadd.f32 %v12942_v61, %v13933_v48  ;;  %2096 = vmatpush1.bf16.msra.mxu0 %v11740_v20  ;;  %2137 = vmatpush1.bf16.msra.mxu1 %v11742_v21  ;;  %v13536_v54 = vmov 0   ;;  %v11699_v60 = vcombine.high %v13994_v50, %v13996_v51 }
 0x202   :  { %2097 = vmatprep.subr.bf16.mxu0 %v11749_v39  ;;  %2115 = vmatprep.mubr.bf16.mxu0 %v13536_v54 }
 0x203   :  { %v1455_v46 = vadd.f32 %v1454_v32, %v13982_v5  ;;  %v13986_v13 = vadd.f32 %v13006_v3, %v1312_v6  ;;  %v12943_v15 = vpop.f32.mrb[44].mxu0  ;;  %2138 = vmatprep.subr.bf16.mxu1 %v11751_v47  ;;  %2156 = vmatprep.mubr.bf16.mxu1 %v13536_v54 }
 0x204   :  { %v13007_v22 = vpop.f32.mrb[44].mxu1  ;;  %v12944_v23 = vpop.f32.mrb[45].mxu0 }
 0x205   :  { %v1456_v48 = vadd.f32 %v1455_v46, %v13986_v13  ;;  %v12945_v25 = vadd.f32 %v12944_v23, %v12943_v15  ;;  %v13008_v26 = vpop.f32.mrb[45].mxu1  ;;  %v12946_v28 = vpop.f32.mrb[46].mxu0  ;;  %2098 = vmatpush1.bf16.msra.mxu0 %v11748_v38  ;;  %2139 = vmatpush1.bf16.msra.mxu1 %v11750_v45 }
 0x206   :  { %v13009_v33 = vadd.f32 %v13008_v26, %v13007_v22  ;;  %v13010_v34 = vpop.f32.mrb[46].mxu1  ;;  %v12947_v30 = vpop.f32.mrb[47].mxu0  ;;  %2206 = vmatprep.subr.bf16.mxu1 %v11699_v60 }
 0x207   :  { %v1317_v43 = vadd.f32 %v12945_v25, %v13936_v62  ;;  %v12948_v32 = vadd.f32 %v12947_v30, %v12946_v28  ;;  %v13011_v44 = vpop.f32.mrb[47].mxu1  ;;  %v11697_v62 = vcombine.high %v13989_v41, %v13991_v42 }
 0x208   :  { %v13012_v52 = vadd.f32 %v13011_v44, %v13010_v34 }
 0x209   :  { %v14003_v57 = vadd.f32 %v13009_v33, %v1317_v43  ;;  %v1320_v14 = vadd.f32 %v12948_v32, %v13939_v0  ;;  %2165 = vmatprep.subr.bf16.mxu0 %v11697_v62 }
 0x20b   :  { %v1457_v61 = vadd.f32 %v1456_v48, %v14003_v57  ;;  %v14012_v63 = vadd.f32 %v13012_v52, %v1320_v14  ;;  %v12949_v1 = vpop.f32.mrb[48].mxu0 }
 0x20c   :  { %v13013_v16 = vpop.f32.mrb[48].mxu1  ;;  %v12950_v3 = vpop.f32.mrb[49].mxu0 }
 0x20d   :  { %v1458_v0 = vadd.f32 %v1457_v61, %v14012_v63  ;;  %v12951_v4 = vadd.f32 %v12950_v3, %v12949_v1  ;;  %v13014_v6 = vpop.f32.mrb[49].mxu1  ;;  %v12952_v7 = vpop.f32.mrb[50].mxu0 }
 0x20e   :  { %v13015_v9 = vadd.f32 %v13014_v6, %v13013_v16  ;;  %v13016_v10 = vpop.f32.mrb[50].mxu1  ;;  %v12953_v11 = vpop.f32.mrb[51].mxu0 }
 0x20f   :  { %v1325_v12 = vadd.f32 %v12951_v4, %v13942_v17  ;;  %v12954_v46 = vadd.f32 %v12953_v11, %v12952_v7  ;;  %v13017_v15 = vpop.f32.mrb[51].mxu1 }
 0x210   :  { %v13018_v20 = vadd.f32 %v13017_v15, %v13016_v10 }
 0x211   :  { %v14016_v21 = vadd.f32 %v13015_v9, %v1325_v12  ;;  %v1328_v22 = vadd.f32 %v12954_v46, %v13945_v19 }
 0x213   :  { %v1459_v23 = vadd.f32 %v1458_v0, %v14016_v21  ;;  %v14020_v24 = vadd.f32 %v13018_v20, %v1328_v22  ;;  %v12955_v48 = vpop.f32.mrb[52].mxu0 }
 0x214   :  { %v13019_v25 = vpop.f32.mrb[52].mxu1  ;;  %v12956_v26 = vpop.f32.mrb[53].mxu0 }
 0x215   :  { %v1460_v28 = vadd.f32 %v1459_v23, %v14020_v24  ;;  %v12957_v2 = vadd.f32 %v12956_v26, %v12955_v48  ;;  %v13020_v29 = vpop.f32.mrb[53].mxu1  ;;  %v12958_v31 = vpop.f32.mrb[54].mxu0 }
 0x216   :  { %v13021_v17 = vadd.f32 %v13020_v29, %v13019_v25  ;;  %v13022_v33 = vpop.f32.mrb[54].mxu1  ;;  %v12959_v34 = vpop.f32.mrb[55].mxu0 }
 0x217   :  { %v1333_v30 = vadd.f32 %v12957_v2, %v13948_v35  ;;  %v12960_v38 = vadd.f32 %v12959_v34, %v12958_v31  ;;  %v13023_v39 = vpop.f32.mrb[55].mxu1 }
 0x218   :  { %v13024_v19 = vadd.f32 %v13023_v39, %v13022_v33 }
 0x219   :  { %v1430_v40 = vadd.f32 %v13021_v17, %v1333_v30  ;;  %v1336_v43 = vadd.f32 %v12960_v38, %v13951_v37 }
 0x21b   :  { %v1461_v32 = vadd.f32 %v1460_v28, %v1430_v40  ;;  %v1433_v44 = vadd.f32 %v13024_v19, %v1336_v43  ;;  %v12961_v45 = vpop.f32.mrb[56].mxu0 }
 0x21c   :  { %v13025_v47 = vpop.f32.mrb[56].mxu1  ;;  %v12962_v52 = vpop.f32.mrb[57].mxu0 }
 0x21d   :  { %v1462_v62 = vadd.f32 %v1461_v32, %v1433_v44  ;;  %v12963_v14 = vadd.f32 %v12962_v52, %v12961_v45  ;;  %v13026_v60 = vpop.f32.mrb[57].mxu1  ;;  %v12964_v61 = vpop.f32.mrb[58].mxu0 }
 0x21e   :  { %v13027_v1 = vadd.f32 %v13026_v60, %v13025_v47  ;;  %v13028_v16 = vpop.f32.mrb[58].mxu1  ;;  %v12965_v3 = vpop.f32.mrb[59].mxu0 }
 0x21f   :  { %v1341_v35 = vadd.f32 %v12963_v14, %v13954_v53  ;;  %v12966_v0 = vadd.f32 %v12965_v3, %v12964_v61  ;;  %v13029_v4 = vpop.f32.mrb[59].mxu1 }
 0x220   :  { %v13030_v6 = vadd.f32 %v13029_v4, %v13028_v16 }
 0x221   :  { %v1438_v7 = vadd.f32 %v13027_v1, %v1341_v35  ;;  %v1344_v37 = vadd.f32 %v12966_v0, %v13957_v55 }
 0x223   :  { %v1463_v9 = vadd.f32 %v1462_v62, %v1438_v7  ;;  %v1441_v10 = vadd.f32 %v13030_v6, %v1344_v37  ;;  %v12967_v11 = vpop.f32.mrb[60].mxu0 }
 0x224   :  { %v13031_v12 = vpop.f32.mrb[60].mxu1  ;;  %v12968_v46 = vpop.f32.mrb[61].mxu0 }
 0x225   :  { %v1464_v15 = vadd.f32 %v1463_v9, %v1441_v10  ;;  %v12969_v20 = vadd.f32 %v12968_v46, %v12967_v11  ;;  %v13032_v22 = vpop.f32.mrb[61].mxu1  ;;  %v12970_v23 = vpop.f32.mrb[62].mxu0 }
 0x226   :  { %v13033_v48 = vadd.f32 %v13032_v22, %v13031_v12  ;;  %v13034_v25 = vpop.f32.mrb[62].mxu1  ;;  %v12971_v26 = vpop.f32.mrb[63].mxu0 }
 0x227   :  { %v1349_v53 = vadd.f32 %v12969_v20, %v13960_v8  ;;  %v12972_v28 = vadd.f32 %v12971_v26, %v12970_v23  ;;  %v13035_v2 = vpop.f32.mrb[63].mxu1 }
 0x228   :  { %v13036_v29 = vadd.f32 %v13035_v2, %v13034_v25 }
 0x229   :  { %v1446_v31 = vadd.f32 %v13033_v48, %v1349_v53  ;;  %v1352_v55 = vadd.f32 %v12972_v28, %v13963_v18 }
 0x22b   :  { %v1465_v17 = vadd.f32 %v1464_v15, %v1446_v31  ;;  %v1449_v33 = vadd.f32 %v13036_v29, %v1352_v55 }
 0x22d   :  { %v1466_v34 = vadd.f32 %v1465_v17, %v1449_v33 }
 0x22f   :  { %v1467_v30 = vrot.slane %v1466_v34, 4 }
 0x231   :  { %v1468_v38 = vadd.f32 %v1467_v30, %v1466_v34 }
 0x233   :  { %v1469_v39 = vrot.slane %v1468_v38, 2 }
 0x235   :  { %v1470_v19 = vadd.f32 %v1469_v39, %v1468_v38 }
 0x237   :  { %v1471_v43 = vrot.slane %v1470_v19, 1 }
 0x239   :  { %v1472_v32 = vadd.f32 %v1471_v43, %v1470_v19 }
 0x23b   :  { %v1473_v45 = vmul.f32 0.0078125, %v1472_v32 }
 0x23d   :  { %v1474_v47 = vsub.f32 %v13966_v49, %v1473_v45  ;;  %v1475_v8 = vsub.f32 %v13969_v58, %v1473_v45  ;;  %v1476_v52 = vsub.f32 %v13974_v27, %v1473_v45  ;;  %v14033_v62 = vsub.f32 %v13978_v36, %v1473_v45 }
 0x23e   :  { %v14036_v18 = vsub.f32 %v13982_v5, %v1473_v45  ;;  %v14039_v14 = vsub.f32 %v13986_v13, %v1473_v45  ;;  %v14042_v60 = vsub.f32 %v14003_v57, %v1473_v45  ;;  %v14045_v61 = vsub.f32 %v14012_v63, %v1473_v45 }
 0x23f   :  { %v14048_v49 = vsub.f32 %v14016_v21, %v1473_v45  ;;  %v14051_v58 = vsub.f32 %v14020_v24, %v1473_v45  ;;  %v14053_v27 = vsub.f32 %v1430_v40, %v1473_v45  ;;  %v14055_v36 = vsub.f32 %v1433_v44, %v1473_v45 }
 0x240   :  { %v14057_v5 = vsub.f32 %v1438_v7, %v1473_v45  ;;  %v1487_v13 = vsub.f32 %v1441_v10, %v1473_v45  ;;  %v1488_v1 = vsub.f32 %v1446_v31, %v1473_v45  ;;  %v1489_v16 = vsub.f32 %v1449_v33, %v1473_v45  ;;  %v14081_v45 = vld [vmem:[#allocation6] ss:$0 sm:$0xff] }
 0x241   :  { %v1490_v57 = vmul.f32 %v1474_v47, %v1474_v47  ;;  %v1491_v3 = vmul.f32 %v1475_v8, %v1475_v8  ;;  %v1492_v35 = vmul.f32 %v1476_v52, %v1476_v52  ;;  %v1493_v21 = vmul.f32 %v14033_v62, %v14033_v62 }
 0x242   :  { %v1494_v24 = vmul.f32 %v14036_v18, %v14036_v18  ;;  %v1495_v44 = vmul.f32 %v14039_v14, %v14039_v14  ;;  %v1496_v6 = vmul.f32 %v14042_v60, %v14042_v60  ;;  %v1497_v37 = vmul.f32 %v14045_v61, %v14045_v61 }
 0x243   :  { %v1506_v63 = vadd.f32 %v1491_v3, %v1490_v57  ;;  %v1498_v10 = vmul.f32 %v14048_v49, %v14048_v49  ;;  %v1499_v12 = vmul.f32 %v14051_v58, %v14051_v58  ;;  %v1500_v15 = vmul.f32 %v14053_v27, %v14053_v27 }
 0x244   :  { %v1501_v22 = vmul.f32 %v14055_v36, %v14055_v36  ;;  %v1502_v48 = vmul.f32 %v14057_v5, %v14057_v5  ;;  %v1503_v26 = vmul.f32 %v1487_v13, %v1487_v13  ;;  %v1504_v28 = vmul.f32 %v1488_v1, %v1488_v1 }
 0x245   :  { %v1507_v0 = vadd.f32 %v1506_v63, %v1492_v35  ;;  %v1505_v29 = vmul.f32 %v1489_v16, %v1489_v16 }
 0x247   :  { %v1508_v40 = vadd.f32 %v1507_v0, %v1493_v21  ;;  %v14091_v21 = vld [vmem:[#allocation7] ss:$0 sm:$0xff] }
 0x249   :  { %v1509_v4 = vadd.f32 %v1508_v40, %v1494_v24 }
 0x24b   :  { %v1510_v7 = vadd.f32 %v1509_v4, %v1495_v44 }
 0x24d   :  { %v1511_v9 = vadd.f32 %v1510_v7, %v1496_v6 }
 0x24f   :  { %v1512_v11 = vadd.f32 %v1511_v9, %v1497_v37 }
 0x251   :  { %v1513_v46 = vadd.f32 %v1512_v11, %v1498_v10  ;;  %v1706_v10 = vld [vmem:[#allocation9 + $0x250] sm:$0xff] }
 0x252   :  { %v1710_v11 = vld [vmem:[#allocation9 + $0x270] sm:$0xff] }
 0x253   :  { %v1514_v20 = vadd.f32 %v1513_v46, %v1499_v12 }
 0x255   :  { %v1515_v23 = vadd.f32 %v1514_v20, %v1500_v15 }
 0x257   :  { %v1516_v25 = vadd.f32 %v1515_v23, %v1501_v22  ;;  %v11705_v23 = vcombine.high %v1706_v10, %v1710_v11 }
 0x259   :  { %v1517_v53 = vadd.f32 %v1516_v25, %v1502_v48  ;;  %v1707_v48 = vld [vmem:[#allocation9 + $0x258] sm:$0xff] }
 0x25a   :  { %v1711_v25 = vld [vmem:[#allocation9 + $0x278] sm:$0xff] }
 0x25b   :  { %v1518_v2 = vadd.f32 %v1517_v53, %v1503_v26 }
 0x25d   :  { %v1519_v31 = vadd.f32 %v1518_v2, %v1504_v28 }
 0x25f   :  { %v1520_v55 = vadd.f32 %v1519_v31, %v1505_v29 }
 0x261   :  { %v1521_v17 = vrot.slane %v1520_v55, 4 }
 0x263   :  { %v1522_v33 = vadd.f32 %v1521_v17, %v1520_v55 }
 0x265   :  { %v1523_v34 = vrot.slane %v1522_v33, 2 }
 0x267   :  { %v1524_v30 = vadd.f32 %v1523_v34, %v1522_v33 }
 0x269   :  { %v1525_v38 = vrot.slane %v1524_v30, 1 }
 0x26b   :  { %v1526_v39 = vadd.f32 %v1525_v38, %v1524_v30  ;;  %v11707_v30 = vcombine.high %v1707_v48, %v1711_v25  ;;  %v1714_v38 = vld [vmem:[#allocation9 + $0x290] sm:$0xff] }
 0x26d   :  { %v1527_v19 = vmul.f32 0.0078125, %v1526_v39 }
 0x26f   :  { %v1528_v43 = vadd.f32 1e-05, %v1527_v19 }
 0x271   :  { %13268 = vrsqrt.f32 %v1528_v43  ;;  %v1718_v43 = vld [vmem:[#allocation9 + $0x2b0] sm:$0xff] }
 0x27b   :  { %v14079_v32 = vpop.eup %13268 }
 0x27c   :  { %v14084_v57 = vmul.f32 %v14079_v32, %v1487_v13  ;;  %v14087_v3 = vmul.f32 %v14079_v32, %v1488_v1  ;;  %v1545_v35 = vmul.f32 %v14079_v32, %v1489_v16  ;;  %v1530_v63 = vmul.f32 %v14079_v32, %v1474_v47 }
 0x27d   :  { %v1531_v0 = vmul.f32 %v14079_v32, %v1475_v8  ;;  %v1532_v24 = vmul.f32 %v14079_v32, %v1476_v52  ;;  %v1533_v1 = vmul.f32 %v14079_v32, %v14033_v62  ;;  %v1534_v47 = vmul.f32 %v14079_v32, %v14036_v18 }
 0x27e   :  { %v1568_v40 = vmul.f32 %v14081_v45, %v1545_v35  ;;  %v1553_v44 = vmul.f32 %v14081_v45, %v1530_v63  ;;  %v1535_v52 = vmul.f32 %v14079_v32, %v14039_v14  ;;  %v1536_v6 = vmul.f32 %v14079_v32, %v14042_v60  ;;  %v1715_v35 = vld [vmem:[#allocation9 + $0x298] sm:$0xff] }
 0x27f   :  { %v1554_v13 = vmul.f32 %v14081_v45, %v1531_v0  ;;  %v1555_v4 = vmul.f32 %v14081_v45, %v1532_v24  ;;  %v1556_v62 = vmul.f32 %v14081_v45, %v1533_v1  ;;  %v1557_v46 = vmul.f32 %v14081_v45, %v1534_v47  ;;  %v1719_v63 = vld [vmem:[#allocation9 + $0x2b8] sm:$0xff] }
 0x280   :  { %v14104_v16 = vadd.f32 %v14091_v21, %v1568_v40  ;;  %v1576_v8 = vadd.f32 %v14091_v21, %v1553_v44  ;;  %v1558_v14 = vmul.f32 %v14081_v45, %v1535_v52  ;;  %v1537_v60 = vmul.f32 %v14079_v32, %v14045_v61 }
 0x281   :  { %v1577_v7 = vadd.f32 %v14091_v21, %v1554_v13  ;;  %v1578_v18 = vadd.f32 %v14091_v21, %v1555_v4  ;;  %v1579_v12 = vadd.f32 %v14091_v21, %v1556_v62  ;;  %v1580_v53 = vadd.f32 %v14091_v21, %v1557_v46 }
 0x282   :  { %v1592_v37 = vmul.f32 0.2, %v1576_v8  ;;  %v1581_v29 = vadd.f32 %v14091_v21, %v1558_v14  ;;  %v1559_v31 = vmul.f32 %v14081_v45, %v1536_v6  ;;  %v1560_v33 = vmul.f32 %v14081_v45, %v1537_v60 }
 0x283   :  { %v1593_v9 = vmul.f32 0.2, %v1577_v7  ;;  %v1594_v22 = vmul.f32 0.2, %v1578_v18  ;;  %v1595_v26 = vmul.f32 0.2, %v1579_v12  ;;  %v1538_v61 = vmul.f32 %v14079_v32, %v14048_v49 }
 0x284   :  { %v1608_v15 = vmax.f32 %v1576_v8, %v1592_v37  ;;  %v1596_v17 = vmul.f32 0.2, %v1580_v53  ;;  %v1597_v39 = vmul.f32 0.2, %v1581_v29  ;;  %v1582_v19 = vadd.f32 %v14091_v21, %v1559_v31 }
 0x285   :  { %v1609_v20 = vmax.f32 %v1577_v7, %v1593_v9  ;;  %v1610_v2 = vmax.f32 %v1578_v18, %v1594_v22  ;;  %v1611_v55 = vmax.f32 %v1579_v12, %v1595_v26  ;;  %v1583_v40 = vadd.f32 %v14091_v21, %v1560_v33  ;;  %v1722_v7 = vld [vmem:[#allocation9 + $0x2d0] sm:$0xff]  ;;  %v1723_v9 = vld [vmem:[#allocation9 + $0x2d8] sm:$0xff] }
 0x286   :  { %v1612_v24 = vmax.f32 %v1580_v53, %v1596_v17  ;;  %v1561_v44 = vmul.f32 %v14081_v45, %v1538_v61  ;;  %v1613_v49 = vmax.f32 %v1581_v29, %v1597_v39  ;;  %v1598_v13 = vmul.f32 0.2, %v1582_v19  ;;  %v1727_v18 = vld [vmem:[#allocation9 + $0x2f8] sm:$0xff]  ;;  %v1734_v22 = vld [vmem:[#allocation9 + $0x330] sm:$0xff] }
 0x287   :  { %v14120_v28 = vpack.c.bf16 %v1609_v20, %v1608_v15  ;;  %v14131_v0 = vpack.c.bf16 %v1611_v55, %v1610_v2  ;;  %v1539_v1 = vmul.f32 %v14079_v32, %v14051_v58  ;;  %v11704_v4 = vcombine.low %v1706_v10, %v1710_v11  ;;  %v1726_v58 = vld [vmem:[#allocation9 + $0x2f0] sm:$0xff] }
 0x288   :  { %v11706_v47 = vcombine.low %v1707_v48, %v1711_v25  ;;  %v1599_v8 = vmul.f32 0.2, %v1583_v40  ;;  %v11713_v52 = vcombine.high %v1714_v38, %v1718_v43  ;;  %v11715_v6 = vcombine.high %v1715_v35, %v1719_v63  ;;  %v1730_v15 = vld [vmem:[#allocation9 + $0x310] sm:$0xff]  ;;  %v1735_v48 = vld [vmem:[#allocation9 + $0x338] sm:$0xff] }
 0x289   :  { %v14128_v34 = vrot.slane %v14120_v28, 4  ;;  %v14145_v62 = vpack.c.bf16 %v1613_v49, %v1612_v24  ;;  %v11712_v37 = vcombine.low %v1714_v38, %v1718_v43  ;;  %v1614_v41 = vmax.f32 %v1582_v19, %v1598_v13  ;;  %v1738_v33 = vld [vmem:[#allocation9 + $0x350] sm:$0xff]  ;;  %v1739_v19 = vld [vmem:[#allocation9 + $0x358] sm:$0xff] }
 0x28a   :  { %v11714_v42 = vcombine.low %v1715_v35, %v1719_v63  ;;  %v1615_v50 = vmax.f32 %v1583_v40, %v1599_v8  ;;  %v1562_v51 = vmul.f32 %v14081_v45, %v1539_v1  ;;  %v1541_v10 = vmul.f32 %v14079_v32, %v14055_v36  ;;  %v1742_v61 = vld [vmem:[#allocation9 + $0x370] sm:$0xff]  ;;  %v1743_v43 = vld [vmem:[#allocation9 + $0x378] sm:$0xff] }
 0x28b   :  { %2116 = vmatmul.mubr.bf16.vlgmr.msra.gmra.mrb[64].mxu0 %v14128_v34  ;;  %2157 = vmatmul.mubr.bf16.vlgmr.msra.gmra.mrb[64].mxu1 %v14128_v34  ;;  %v1542_v11 = vmul.f32 %v14079_v32, %v14057_v5  ;;  %v11721_v12 = vcombine.high %v1722_v7, %v1726_v58  ;;  %v11723_v46 = vcombine.high %v1723_v9, %v1727_v18  ;;  %v1607_v38 = vmul.f32 0.2, %v14104_v16 }
 0x28c   :  { %2166 = vmatpush1.bf16.msra.mxu0 %v11696_v56  ;;  %2207 = vmatpush1.bf16.msra.mxu1 %v11698_v59  ;;  %v1584_v56 = vadd.f32 %v14091_v21, %v1561_v44  ;;  %v1540_v59 = vmul.f32 %v14079_v32, %v14053_v27  ;;  %v14157_v14 = vpack.c.bf16 %v1615_v50, %v1614_v41 }
 0x28d   :  { %2167 = vmatprep.subr.bf16.mxu0 %v11705_v23  ;;  %2208 = vmatprep.subr.bf16.mxu1 %v11707_v30  ;;  %v11720_v20 = vcombine.low %v1722_v7, %v1726_v58  ;;  %v1731_v23 = vld [vmem:[#allocation9 + $0x318] sm:$0xff]  ;;  %v1585_v27 = vadd.f32 %v14091_v21, %v1562_v51  ;;  %v11722_v36 = vcombine.low %v1723_v9, %v1727_v18 }
 0x28e   :  { %2197 = vmatprep.mubr.bf16.mxu0 %v13536_v54  ;;  %2238 = vmatprep.mubr.bf16.mxu1 %v13536_v54  ;;  %v1600_v60 = vmul.f32 0.2, %v1584_v56  ;;  %v1563_v25 = vmul.f32 %v14081_v45, %v1540_v59  ;;  %v1564_v5 = vmul.f32 %v14081_v45, %v1541_v10  ;;  %v1565_v32 = vmul.f32 %v14081_v45, %v1542_v11  ;;  %v1751_v7 = vld [vmem:[#allocation9 + $0x3b8] sm:$0xff]  ;;  %v1754_v59 = vld [vmem:[#allocation9 + $0x3d0] sm:$0xff] }
 0x28f   :  { %v1601_v53 = vmul.f32 0.2, %v1585_v27  ;;  %v1566_v29 = vmul.f32 %v14081_v45, %v14084_v57  ;;  %v1567_v31 = vmul.f32 %v14081_v45, %v14087_v3  ;;  %v11729_v55 = vcombine.high %v1730_v15, %v1734_v22  ;;  %v1758_v11 = vld [vmem:[#allocation9 + $0x3f0] sm:$0xff] }
 0x290   :  { %2168 = vmatpush1.bf16.msra.mxu0 %v11704_v4  ;;  %2209 = vmatpush1.bf16.msra.mxu1 %v11706_v47  ;;  %v1616_v26 = vmax.f32 %v1584_v56, %v1600_v60  ;;  %v1586_v2 = vadd.f32 %v14091_v21, %v1563_v25  ;;  %v11731_v17 = vcombine.high %v1731_v23, %v1735_v48  ;;  %v1746_v4 = vld [vmem:[#allocation9 + $0x390] sm:$0xff]  ;;  %v1633_v25 = vld [vmem:[#allocation9 + $0x8] sm:$0xff] }
 0x291   :  { %2169 = vmatprep.subr.bf16.mxu0 %v11713_v52  ;;  %2210 = vmatprep.subr.bf16.mxu1 %v11715_v6  ;;  %v1587_v30 = vadd.f32 %v14091_v21, %v1564_v5  ;;  %v11728_v39 = vcombine.low %v1730_v15, %v1734_v22  ;;  %v1617_v35 = vmax.f32 %v1585_v27, %v1601_v53  ;;  %v1750_v52 = vld [vmem:[#allocation9 + $0x3b0] sm:$0xff]  ;;  %v1747_v6 = vld [vmem:[#allocation9 + $0x398] sm:$0xff]  ;;  %v1636_v27 = vld [vmem:[#allocation9 + $0x20] sm:$0xff] }
 0x292   :  { %v1602_v63 = vmul.f32 0.2, %v1586_v2  ;;  %v1588_v57 = vadd.f32 %v14091_v21, %v1565_v32  ;;  %v1589_v45 = vadd.f32 %v14091_v21, %v1566_v29  ;;  %v1590_v3 = vadd.f32 %v14091_v21, %v1567_v31  ;;  %v1644_v29 = vld [vmem:[#allocation9 + $0x60] sm:$0xff]  ;;  %v1641_v31 = vld [vmem:[#allocation9 + $0x48] sm:$0xff] }
 0x293   :  { %v1603_v24 = vmul.f32 0.2, %v1587_v30  ;;  %v11730_v40 = vcombine.low %v1731_v23, %v1735_v48  ;;  %v14173_v44 = vpack.c.bf16 %v1617_v35, %v1616_v26  ;;  %v11737_v13 = vcombine.high %v1738_v33, %v1742_v61  ;;  %v1632_v48 = vld [vmem:[#allocation9] sm:$0xff] }
 0x294   :  { %2170 = vmatpush1.bf16.msra.mxu0 %v11712_v37  ;;  %2211 = vmatpush1.bf16.msra.mxu1 %v11714_v42  ;;  %v1618_v49 = vmax.f32 %v1586_v2, %v1602_v63  ;;  %v11739_v1 = vcombine.high %v1739_v19, %v1743_v43  ;;  %v1604_v8 = vmul.f32 0.2, %v1588_v57  ;;  %v1605_v37 = vmul.f32 0.2, %v1589_v45  ;;  %v1640_v2 = vld [vmem:[#allocation9 + $0x40] sm:$0xff] }
 0x295   :  { %2171 = vmatprep.subr.bf16.mxu0 %v11721_v12  ;;  %2212 = vmatprep.subr.bf16.mxu1 %v11723_v46  ;;  %v1619_v47 = vmax.f32 %v1587_v30, %v1603_v24  ;;  %v1623_v58 = vmax.f32 %v14104_v16, %v1607_v38  ;;  %v1606_v18 = vmul.f32 0.2, %v1590_v3  ;;  %v11736_v41 = vcombine.low %v1738_v33, %v1742_v61  ;;  %v1755_v12 = vld [vmem:[#allocation9 + $0x3d8] sm:$0xff]  ;;  %v1648_v38 = vld [vmem:[#allocation9 + $0x80] sm:$0xff] }
 0x296   :  { %v1620_v9 = vmax.f32 %v1588_v57, %v1604_v8  ;;  %v11738_v42 = vcombine.low %v1739_v19, %v1743_v43  ;;  %v1621_v50 = vmax.f32 %v1589_v45, %v1605_v37  ;;  %v11745_v51 = vcombine.high %v1746_v4, %v1750_v52  ;;  %v1759_v46 = vld [vmem:[#allocation9 + $0x3f8] sm:$0xff]  ;;  %v1649_v19 = vld [vmem:[#allocation9 + $0x88] sm:$0xff]  ;;  %v1656_v45 = vld [vmem:[#allocation9 + $0xc0] sm:$0xff] }
 0x297   :  { %v14176_v21 = vpack.c.bf16 %v1619_v47, %v1618_v49  ;;  %v11747_v56 = vcombine.high %v1747_v6, %v1751_v7  ;;  %v1622_v10 = vmax.f32 %v1590_v3, %v1606_v18  ;;  %v11744_v60 = vcombine.low %v1746_v4, %v1750_v52  ;;  %v1653_v43 = vld [vmem:[#allocation9 + $0xa8] sm:$0xff]  ;;  %v1660_v3 = vld [vmem:[#allocation9 + $0xe0] sm:$0xff] }
 0x298   :  { %2172 = vmatpush1.bf16.msra.mxu0 %v11720_v20  ;;  %2213 = vmatpush1.bf16.msra.mxu1 %v11722_v36  ;;  %v14178_v15 = vpack.c.bf16 %v1621_v50, %v1620_v9  ;;  %v11746_v20 = vcombine.low %v1747_v6, %v1751_v7  ;;  %v11753_v22 = vcombine.high %v1754_v59, %v1758_v11  ;;  %v1637_v36 = vld [vmem:[#allocation9 + $0x28] sm:$0xff]  ;;  %v1664_v47 = vld [vmem:[#allocation9 + $0x100] sm:$0xff] }
 0x299   :  { %2173 = vmatprep.subr.bf16.mxu0 %v11729_v55  ;;  %2214 = vmatprep.subr.bf16.mxu1 %v11731_v17  ;;  %v14180_v16 = vpack.c.bf16 %v1623_v58, %v1622_v10  ;;  %v11755_v23 = vcombine.high %v1755_v12, %v1759_v46  ;;  %v11752_v26 = vcombine.low %v1754_v59, %v1758_v11  ;;  %v1645_v55 = vld [vmem:[#allocation9 + $0x68] sm:$0xff]  ;;  %v1668_v8 = vld [vmem:[#allocation9 + $0x120] sm:$0xff] }
 0x29a   :  { %v11754_v5 = vcombine.low %v1755_v12, %v1759_v46  ;;  %v11757_v32 = vcombine.high %v1632_v48, %v1636_v27  ;;  %v11759_v53 = vcombine.high %v1633_v25, %v1637_v36  ;;  %v11756_v17 = vcombine.low %v1632_v48, %v1636_v27  ;;  %v1661_v49 = vld [vmem:[#allocation9 + $0xe8] sm:$0xff]  ;;  %v1672_v18 = vld [vmem:[#allocation9 + $0x140] sm:$0xff] }
 0x29b   :  { %v11758_v33 = vcombine.low %v1633_v25, %v1637_v36  ;;  %v11765_v61 = vcombine.high %v1640_v2, %v1644_v29  ;;  %v11767_v30 = vcombine.high %v1641_v31, %v1645_v55  ;;  %v11764_v35 = vcombine.low %v1640_v2, %v1644_v29  ;;  %v1665_v52 = vld [vmem:[#allocation9 + $0x108] sm:$0xff]  ;;  %v1680_v11 = vld [vmem:[#allocation9 + $0x180] sm:$0xff]  ;;  %v1634_v29 = vld [vmem:[#allocation9 + $0x10] sm:$0xff] }
 0x29c   :  { %2174 = vmatpush1.bf16.msra.mxu0 %v11728_v39  ;;  %2215 = vmatpush1.bf16.msra.mxu1 %v11730_v40  ;;  %v1652_v39 = vld [vmem:[#allocation9 + $0xa0] sm:$0xff]  ;;  %v11766_v63 = vcombine.low %v1641_v31, %v1645_v55  ;;  %v11775_v57 = vcombine.high %v1649_v19, %v1653_v43  ;;  %v1657_v40 = vld [vmem:[#allocation9 + $0xc8] sm:$0xff]  ;;  %v11780_v7 = vcombine.low %v1656_v45, %v1660_v3  ;;  %v1638_v31 = vld [vmem:[#allocation9 + $0x30] sm:$0xff] }
 0x29d   :  { %2175 = vmatprep.subr.bf16.mxu0 %v11737_v13  ;;  %2216 = vmatprep.subr.bf16.mxu1 %v11739_v1  ;;  %v11773_v24 = vcombine.high %v1648_v38, %v1652_v39  ;;  %v11772_v13 = vcombine.low %v1648_v38, %v1652_v39  ;;  %v11781_v1 = vcombine.high %v1656_v45, %v1660_v3  ;;  %v1669_v6 = vld [vmem:[#allocation9 + $0x128] sm:$0xff]  ;;  %v1684_v12 = vld [vmem:[#allocation9 + $0x1a0] sm:$0xff]  ;;  %v1635_v55 = vld [vmem:[#allocation9 + $0x18] sm:$0xff] }
 0x29e   :  { %v11783_v4 = vcombine.high %v1657_v40, %v1661_v49  ;;  %v11782_v37 = vcombine.low %v1657_v40, %v1661_v49  ;;  %v11789_v58 = vcombine.high %v1664_v47, %v1668_v8  ;;  %v11791_v9 = vcombine.high %v1665_v52, %v1669_v6  ;;  %v1677_v50 = vld [vmem:[#allocation9 + $0x168] sm:$0xff]  ;;  %v1688_v27 = vld [vmem:[#allocation9 + $0x1c0] sm:$0xff]  ;;  %v1642_v39 = vld [vmem:[#allocation9 + $0x50] sm:$0xff] }
 0x29f   :  { %v1681_v46 = vld [vmem:[#allocation9 + $0x188] sm:$0xff]  ;;  %v1692_v25 = vld [vmem:[#allocation9 + $0x1e0] sm:$0xff]  ;;  %v1650_v3 = vld [vmem:[#allocation9 + $0x90] sm:$0xff] }
 0x2a0   :  { %2176 = vmatpush1.bf16.msra.mxu0 %v11736_v41  ;;  %2217 = vmatpush1.bf16.msra.mxu1 %v11738_v42  ;;  %v1676_v41 = vld [vmem:[#allocation9 + $0x160] sm:$0xff]  ;;  %v1673_v42 = vld [vmem:[#allocation9 + $0x148] sm:$0xff]  ;;  %v1654_v40 = vld [vmem:[#allocation9 + $0xb0] sm:$0xff] }
 0x2a1   :  { %2177 = vmatprep.subr.bf16.mxu0 %v11745_v51  ;;  %2218 = vmatprep.subr.bf16.mxu1 %v11747_v56  ;;  %v11788_v51 = vcombine.low %v1664_v47, %v1668_v8  ;;  %v11790_v56 = vcombine.low %v1665_v52, %v1669_v6  ;;  %v11797_v59 = vcombine.high %v1672_v18, %v1676_v41  ;;  %v1689_v36 = vld [vmem:[#allocation9 + $0x1c8] sm:$0xff]  ;;  %v1651_v49 = vld [vmem:[#allocation9 + $0x98] sm:$0xff]  ;;  %v1658_v8 = vld [vmem:[#allocation9 + $0xd0] sm:$0xff] }
 0x2a2   :  { %v11799_v10 = vcombine.high %v1673_v42, %v1677_v50  ;;  %v1662_v52 = vld [vmem:[#allocation9 + $0xf0] sm:$0xff]  ;;  %v1659_v6 = vld [vmem:[#allocation9 + $0xd8] sm:$0xff] }
 0x2a4   :  { %2178 = vmatpush1.bf16.msra.mxu0 %v11744_v60  ;;  %2219 = vmatpush1.bf16.msra.mxu1 %v11746_v20  ;;  %v1685_v60 = vld [vmem:[#allocation9 + $0x1a8] sm:$0xff]  ;;  %v11796_v20 = vcombine.low %v1672_v18, %v1676_v41  ;;  %v1666_v41 = vld [vmem:[#allocation9 + $0x110] sm:$0xff] }
 0x2a5   :  { %2179 = vmatprep.subr.bf16.mxu0 %v11753_v22  ;;  %2220 = vmatprep.subr.bf16.mxu1 %v11755_v23  ;;  %v11798_v22 = vcombine.low %v1673_v42, %v1677_v50  ;;  %v11805_v23 = vcombine.high %v1680_v11, %v1684_v12  ;;  %v11807_v48 = vcombine.high %v1681_v46, %v1685_v60  ;;  %v1670_v42 = vld [vmem:[#allocation9 + $0x130] sm:$0xff]  ;;  %v1667_v50 = vld [vmem:[#allocation9 + $0x118] sm:$0xff] }
 0x2a8   :  { %2180 = vmatpush1.bf16.msra.mxu0 %v11752_v26  ;;  %2221 = vmatpush1.bf16.msra.mxu1 %v11754_v5  ;;  %v1693_v26 = vld [vmem:[#allocation9 + $0x1e8] sm:$0xff]  ;;  %v11804_v5 = vcombine.low %v1680_v11, %v1684_v12  ;;  %v1674_v12 = vld [vmem:[#allocation9 + $0x150] sm:$0xff] }
 0x2a9   :  { %2567 = vmatprep.subr.bf16.mxu0 %v11757_v32  ;;  %2608 = vmatprep.subr.bf16.mxu1 %v11759_v53  ;;  %v11806_v32 = vcombine.low %v1681_v46, %v1685_v60  ;;  %v11813_v53 = vcombine.high %v1688_v27, %v1692_v25  ;;  %v11815_v2 = vcombine.high %v1689_v36, %v1693_v26  ;;  %v1678_v46 = vld [vmem:[#allocation9 + $0x170] sm:$0xff]  ;;  %v1675_v60 = vld [vmem:[#allocation9 + $0x158] sm:$0xff] }
 0x2ab   :  { %2198 = vmatmul.mubr.bf16.vlgmr.msra.gmra.mrb[68].mxu0 %v14128_v34  ;;  %2239 = vmatmul.mubr.bf16.vlgmr.msra.gmra.mrb[68].mxu1 %v14128_v34  ;;  %v11774_v34 = vcombine.low %v1649_v19, %v1653_v43  ;;  %v1646_v19 = vld [vmem:[#allocation9 + $0x70] sm:$0xff]  ;;  %v1643_v43 = vld [vmem:[#allocation9 + $0x58] sm:$0xff] }
 0x2ac   :  { %2568 = vmatpush1.bf16.msra.mxu0 %v11756_v17  ;;  %2609 = vmatpush1.bf16.msra.mxu1 %v11758_v33  ;;  %v1639_v17 = vld [vmem:[#allocation9 + $0x38] sm:$0xff]  ;;  %v11812_v33 = vcombine.low %v1688_v27, %v1692_v25  ;;  %v1682_v25 = vld [vmem:[#allocation9 + $0x190] sm:$0xff] }
 0x2ad   :  { %2569 = vmatprep.subr.bf16.mxu0 %v11765_v61  ;;  %2610 = vmatprep.subr.bf16.mxu1 %v11767_v30  ;;  %v11814_v61 = vcombine.low %v1689_v36, %v1693_v26  ;;  %v11761_v30 = vcombine.high %v1634_v29, %v1638_v31  ;;  %v11763_v38 = vcombine.high %v1635_v55, %v1639_v17  ;;  %v1686_v36 = vld [vmem:[#allocation9 + $0x1b0] sm:$0xff]  ;;  %v1683_v26 = vld [vmem:[#allocation9 + $0x198] sm:$0xff] }
 0x2ae   :  { %2599 = vmatprep.mubr.bf16.mxu0 %v13536_v54  ;;  %2640 = vmatprep.mubr.bf16.mxu1 %v13536_v54 }
 0x2b0   :  { %2570 = vmatpush1.bf16.msra.mxu0 %v11764_v35  ;;  %2611 = vmatpush1.bf16.msra.mxu1 %v11766_v63  ;;  %v1647_v35 = vld [vmem:[#allocation9 + $0x78] sm:$0xff]  ;;  %v11760_v63 = vcombine.low %v1634_v29, %v1638_v31  ;;  %v1690_v31 = vld [vmem:[#allocation9 + $0x1d0] sm:$0xff] }
 0x2b1   :  { %2571 = vmatprep.subr.bf16.mxu0 %v11773_v24  ;;  %2612 = vmatprep.subr.bf16.mxu1 %v11775_v57  ;;  %v11762_v24 = vcombine.low %v1635_v55, %v1639_v17  ;;  %v11769_v57 = vcombine.high %v1642_v39, %v1646_v19  ;;  %v11771_v45 = vcombine.high %v1643_v43, %v1647_v35  ;;  %v1694_v55 = vld [vmem:[#allocation9 + $0x1f0] sm:$0xff]  ;;  %v1691_v17 = vld [vmem:[#allocation9 + $0x1d8] sm:$0xff] }
 0x2b4   :  { %2572 = vmatpush1.bf16.msra.mxu0 %v11772_v13  ;;  %2613 = vmatpush1.bf16.msra.mxu1 %v11774_v34  ;;  %v1655_v13 = vld [vmem:[#allocation9 + $0xb8] sm:$0xff]  ;;  %v11768_v34 = vcombine.low %v1642_v39, %v1646_v19  ;;  %v2731_v19 = vld [vmem:[#allocation9 + $0x400] sm:$0xff] }
 0x2b5   :  { %2573 = vmatprep.subr.bf16.mxu0 %v11781_v1  ;;  %2614 = vmatprep.subr.bf16.mxu1 %v11783_v4  ;;  %v11770_v1 = vcombine.low %v1643_v43, %v1647_v35  ;;  %v11777_v4 = vcombine.high %v1650_v3, %v1654_v40  ;;  %v11779_v47 = vcombine.high %v1651_v49, %v1655_v13  ;;  %v2735_v43 = vld [vmem:[#allocation9 + $0x420] sm:$0xff]  ;;  %v2732_v35 = vld [vmem:[#allocation9 + $0x408] sm:$0xff] }
 0x2b8   :  { %2574 = vmatpush1.bf16.msra.mxu0 %v11780_v7  ;;  %2615 = vmatpush1.bf16.msra.mxu1 %v11782_v37  ;;  %v1663_v7 = vld [vmem:[#allocation9 + $0xf8] sm:$0xff]  ;;  %v11776_v37 = vcombine.low %v1650_v3, %v1654_v40  ;;  %v2739_v40 = vld [vmem:[#allocation9 + $0x440] sm:$0xff] }
 0x2b9   :  { %2575 = vmatprep.subr.bf16.mxu0 %v11789_v58  ;;  %2616 = vmatprep.subr.bf16.mxu1 %v11791_v9  ;;  %v11778_v58 = vcombine.low %v1651_v49, %v1655_v13  ;;  %v11785_v9 = vcombine.high %v1658_v8, %v1662_v52  ;;  %v11787_v18 = vcombine.high %v1659_v6, %v1663_v7  ;;  %v2743_v49 = vld [vmem:[#allocation9 + $0x460] sm:$0xff]  ;;  %v2740_v13 = vld [vmem:[#allocation9 + $0x448] sm:$0xff] }
 0x2bc   :  { %2576 = vmatpush1.bf16.msra.mxu0 %v11788_v51  ;;  %2617 = vmatpush1.bf16.msra.mxu1 %v11790_v56  ;;  %v1671_v51 = vld [vmem:[#allocation9 + $0x138] sm:$0xff]  ;;  %v11784_v56 = vcombine.low %v1658_v8, %v1662_v52  ;;  %v2747_v52 = vld [vmem:[#allocation9 + $0x480] sm:$0xff] }
 0x2bd   :  { %2577 = vmatprep.subr.bf16.mxu0 %v11797_v59  ;;  %2618 = vmatprep.subr.bf16.mxu1 %v11799_v10  ;;  %v11786_v59 = vcombine.low %v1659_v6, %v1663_v7  ;;  %v11793_v10 = vcombine.high %v1666_v41, %v1670_v42  ;;  %v11795_v11 = vcombine.high %v1667_v50, %v1671_v51  ;;  %v2751_v6 = vld [vmem:[#allocation9 + $0x4a0] sm:$0xff]  ;;  %v2748_v7 = vld [vmem:[#allocation9 + $0x488] sm:$0xff] }
 0x2c0   :  { %2578 = vmatpush1.bf16.msra.mxu0 %v11796_v20  ;;  %2619 = vmatpush1.bf16.msra.mxu1 %v11798_v22  ;;  %v1679_v20 = vld [vmem:[#allocation9 + $0x178] sm:$0xff]  ;;  %v11792_v22 = vcombine.low %v1666_v41, %v1670_v42  ;;  %v2755_v42 = vld [vmem:[#allocation9 + $0x4c0] sm:$0xff] }
 0x2c1   :  { %2579 = vmatprep.subr.bf16.mxu0 %v11805_v23  ;;  %2620 = vmatprep.subr.bf16.mxu1 %v11807_v48  ;;  %v11794_v23 = vcombine.low %v1667_v50, %v1671_v51  ;;  %v11801_v48 = vcombine.high %v1674_v12, %v1678_v46  ;;  %v11803_v27 = vcombine.high %v1675_v60, %v1679_v20  ;;  %v2759_v50 = vld [vmem:[#allocation9 + $0x4e0] sm:$0xff]  ;;  %v2756_v51 = vld [vmem:[#allocation9 + $0x4c8] sm:$0xff] }
 0x2c4   :  { %2580 = vmatpush1.bf16.msra.mxu0 %v11804_v5  ;;  %2621 = vmatpush1.bf16.msra.mxu1 %v11806_v32  ;;  %v1687_v5 = vld [vmem:[#allocation9 + $0x1b8] sm:$0xff]  ;;  %v11800_v32 = vcombine.low %v1674_v12, %v1678_v46  ;;  %v2763_v12 = vld [vmem:[#allocation9 + $0x500] sm:$0xff] }
 0x2c5   :  { %2581 = vmatprep.subr.bf16.mxu0 %v11813_v53  ;;  %2622 = vmatprep.subr.bf16.mxu1 %v11815_v2  ;;  %v11802_v53 = vcombine.low %v1675_v60, %v1679_v20  ;;  %v11809_v2 = vcombine.high %v1682_v25, %v1686_v36  ;;  %v11811_v29 = vcombine.high %v1683_v26, %v1687_v5  ;;  %v2767_v46 = vld [vmem:[#allocation9 + $0x520] sm:$0xff]  ;;  %v2764_v60 = vld [vmem:[#allocation9 + $0x508] sm:$0xff] }
 0x2c6   :  { %v2768_v20 = vld [vmem:[#allocation9 + $0x528] sm:$0xff] }
 0x2c8   :  { %2582 = vmatpush1.bf16.msra.mxu0 %v11812_v33  ;;  %2623 = vmatpush1.bf16.msra.mxu1 %v11814_v61  ;;  %v1695_v33 = vld [vmem:[#allocation9 + $0x1f8] sm:$0xff]  ;;  %v11808_v61 = vcombine.low %v1682_v25, %v1686_v36  ;;  %v2771_v25 = vld [vmem:[#allocation9 + $0x540] sm:$0xff] }
 0x2c9   :  { %2649 = vmatprep.subr.bf16.mxu0 %v11761_v30  ;;  %2690 = vmatprep.subr.bf16.mxu1 %v11763_v38  ;;  %v11810_v30 = vcombine.low %v1683_v26, %v1687_v5  ;;  %v11817_v38 = vcombine.high %v1690_v31, %v1694_v55  ;;  %v11819_v39 = vcombine.high %v1691_v17, %v1695_v33  ;;  %v2775_v36 = vld [vmem:[#allocation9 + $0x560] sm:$0xff]  ;;  %v2772_v26 = vld [vmem:[#allocation9 + $0x548] sm:$0xff] }
 0x2ca   :  { %v2776_v5 = vld [vmem:[#allocation9 + $0x568] sm:$0xff] }
 0x2cb   :  { %2600 = vmatmul.mubr.bf16.vlgmr.msra.gmra.mrb[72].mxu0 %v14120_v28  ;;  %2641 = vmatmul.mubr.bf16.vlgmr.msra.gmra.mrb[72].mxu1 %v14120_v28 }
 0x2cc   :  { %2650 = vmatpush1.bf16.msra.mxu0 %v11760_v63  ;;  %2691 = vmatpush1.bf16.msra.mxu1 %v11762_v24  ;;  %v2736_v63 = vld [vmem:[#allocation9 + $0x428] sm:$0xff]  ;;  %v11816_v24 = vcombine.low %v1690_v31, %v1694_v55  ;;  %v2779_v31 = vld [vmem:[#allocation9 + $0x580] sm:$0xff] }
 0x2cd   :  { %2651 = vmatprep.subr.bf16.mxu0 %v11769_v57  ;;  %2692 = vmatprep.subr.bf16.mxu1 %v11771_v45  ;;  %v11818_v57 = vcombine.low %v1691_v17, %v1695_v33  ;;  %v11821_v45 = vcombine.high %v2731_v19, %v2735_v43  ;;  %v11823_v3 = vcombine.high %v2732_v35, %v2736_v63  ;;  %v2783_v55 = vld [vmem:[#allocation9 + $0x5a0] sm:$0xff]  ;;  %v2780_v17 = vld [vmem:[#allocation9 + $0x588] sm:$0xff] }
 0x2ce   :  { %2681 = vmatprep.mubr.bf16.mxu0 %v13536_v54  ;;  %2722 = vmatprep.mubr.bf16.mxu1 %v13536_v54  ;;  %v2784_v33 = vld [vmem:[#allocation9 + $0x5a8] sm:$0xff] }
 0x2d0   :  { %2652 = vmatpush1.bf16.msra.mxu0 %v11768_v34  ;;  %2693 = vmatpush1.bf16.msra.mxu1 %v11770_v1  ;;  %v2744_v34 = vld [vmem:[#allocation9 + $0x468] sm:$0xff]  ;;  %v11820_v1 = vcombine.low %v2731_v19, %v2735_v43  ;;  %v2787_v19 = vld [vmem:[#allocation9 + $0x5c0] sm:$0xff] }
 0x2d1   :  { %2653 = vmatprep.subr.bf16.mxu0 %v11777_v4  ;;  %2694 = vmatprep.subr.bf16.mxu1 %v11779_v47  ;;  %v11822_v4 = vcombine.low %v2732_v35, %v2736_v63  ;;  %v11829_v47 = vcombine.high %v2739_v40, %v2743_v49  ;;  %v11831_v8 = vcombine.high %v2740_v13, %v2744_v34  ;;  %v2791_v43 = vld [vmem:[#allocation9 + $0x5e0] sm:$0xff]  ;;  %v2788_v35 = vld [vmem:[#allocation9 + $0x5c8] sm:$0xff] }
 0x2d2   :  { %v2792_v63 = vld [vmem:[#allocation9 + $0x5e8] sm:$0xff] }
 0x2d4   :  { %2654 = vmatpush1.bf16.msra.mxu0 %v11776_v37  ;;  %2695 = vmatpush1.bf16.msra.mxu1 %v11778_v58  ;;  %v2752_v37 = vld [vmem:[#allocation9 + $0x4a8] sm:$0xff]  ;;  %v11828_v58 = vcombine.low %v2739_v40, %v2743_v49  ;;  %v2733_v40 = vld [vmem:[#allocation9 + $0x410] sm:$0xff] }
 0x2d5   :  { %2655 = vmatprep.subr.bf16.mxu0 %v11785_v9  ;;  %2696 = vmatprep.subr.bf16.mxu1 %v11787_v18  ;;  %v11830_v9 = vcombine.low %v2740_v13, %v2744_v34  ;;  %v11837_v18 = vcombine.high %v2747_v52, %v2751_v6  ;;  %v11839_v41 = vcombine.high %v2748_v7, %v2752_v37  ;;  %v2737_v49 = vld [vmem:[#allocation9 + $0x430] sm:$0xff]  ;;  %v2734_v13 = vld [vmem:[#allocation9 + $0x418] sm:$0xff] }
 0x2d6   :  { %v2738_v34 = vld [vmem:[#allocation9 + $0x438] sm:$0xff] }
 0x2d8   :  { %2656 = vmatpush1.bf16.msra.mxu0 %v11784_v56  ;;  %2697 = vmatpush1.bf16.msra.mxu1 %v11786_v59  ;;  %v2760_v56 = vld [vmem:[#allocation9 + $0x4e8] sm:$0xff]  ;;  %v11836_v59 = vcombine.low %v2747_v52, %v2751_v6  ;;  %v2741_v52 = vld [vmem:[#allocation9 + $0x450] sm:$0xff] }
 0x2d9   :  { %2657 = vmatprep.subr.bf16.mxu0 %v11793_v10  ;;  %2698 = vmatprep.subr.bf16.mxu1 %v11795_v11  ;;  %v11845_v10 = vcombine.high %v2755_v42, %v2759_v50  ;;  %v11847_v11 = vcombine.high %v2756_v51, %v2760_v56  ;;  %v2745_v6 = vld [vmem:[#allocation9 + $0x470] sm:$0xff] }
 0x2dc   :  { %2658 = vmatpush1.bf16.msra.mxu0 %v11792_v22  ;;  %2699 = vmatpush1.bf16.msra.mxu1 %v11794_v23  ;;  %v11844_v22 = vcombine.low %v2755_v42, %v2759_v50  ;;  %v11846_v23 = vcombine.low %v2756_v51, %v2760_v56  ;;  %v2749_v42 = vld [vmem:[#allocation9 + $0x490] sm:$0xff]  ;;  %v2750_v51 = vld [vmem:[#allocation9 + $0x498] sm:$0xff] }
 0x2dd   :  { %2659 = vmatprep.subr.bf16.mxu0 %v11801_v48  ;;  %2700 = vmatprep.subr.bf16.mxu1 %v11803_v27  ;;  %v11853_v48 = vcombine.high %v2763_v12, %v2767_v46  ;;  %v11855_v27 = vcombine.high %v2764_v60, %v2768_v20  ;;  %v2753_v50 = vld [vmem:[#allocation9 + $0x4b0] sm:$0xff]  ;;  %v2754_v56 = vld [vmem:[#allocation9 + $0x4b8] sm:$0xff] }
 0x2e0   :  { %2660 = vmatpush1.bf16.msra.mxu0 %v11800_v32  ;;  %2701 = vmatpush1.bf16.msra.mxu1 %v11802_v53  ;;  %v11852_v32 = vcombine.low %v2763_v12, %v2767_v46  ;;  %v11854_v53 = vcombine.low %v2764_v60, %v2768_v20  ;;  %v2757_v12 = vld [vmem:[#allocation9 + $0x4d0] sm:$0xff]  ;;  %v2758_v60 = vld [vmem:[#allocation9 + $0x4d8] sm:$0xff] }
 0x2e1   :  { %2661 = vmatprep.subr.bf16.mxu0 %v11809_v2  ;;  %2702 = vmatprep.subr.bf16.mxu1 %v11811_v29  ;;  %v11861_v2 = vcombine.high %v2771_v25, %v2775_v36  ;;  %v11863_v29 = vcombine.high %v2772_v26, %v2776_v5  ;;  %v2761_v46 = vld [vmem:[#allocation9 + $0x4f0] sm:$0xff]  ;;  %v2762_v20 = vld [vmem:[#allocation9 + $0x4f8] sm:$0xff] }
 0x2e4   :  { %2662 = vmatpush1.bf16.msra.mxu0 %v11808_v61  ;;  %2703 = vmatpush1.bf16.msra.mxu1 %v11810_v30  ;;  %v11860_v61 = vcombine.low %v2771_v25, %v2775_v36  ;;  %v11862_v30 = vcombine.low %v2772_v26, %v2776_v5  ;;  %v2765_v25 = vld [vmem:[#allocation9 + $0x510] sm:$0xff]  ;;  %v2766_v26 = vld [vmem:[#allocation9 + $0x518] sm:$0xff] }
 0x2e5   :  { %2663 = vmatprep.subr.bf16.mxu0 %v11817_v38  ;;  %2704 = vmatprep.subr.bf16.mxu1 %v11819_v39  ;;  %v11869_v38 = vcombine.high %v2779_v31, %v2783_v55  ;;  %v11871_v39 = vcombine.high %v2780_v17, %v2784_v33  ;;  %v2769_v36 = vld [vmem:[#allocation9 + $0x530] sm:$0xff]  ;;  %v2770_v5 = vld [vmem:[#allocation9 + $0x538] sm:$0xff] }
 0x2e8   :  { %2664 = vmatpush1.bf16.msra.mxu0 %v11816_v24  ;;  %2705 = vmatpush1.bf16.msra.mxu1 %v11818_v57  ;;  %v11868_v24 = vcombine.low %v2779_v31, %v2783_v55  ;;  %v11870_v57 = vcombine.low %v2780_v17, %v2784_v33  ;;  %v2773_v31 = vld [vmem:[#allocation9 + $0x550] sm:$0xff]  ;;  %v2774_v17 = vld [vmem:[#allocation9 + $0x558] sm:$0xff] }
 0x2e9   :  { %3115 = vmatprep.subr.bf16.mxu0 %v11821_v45  ;;  %3156 = vmatprep.subr.bf16.mxu1 %v11823_v3  ;;  %v11877_v45 = vcombine.high %v2787_v19, %v2791_v43  ;;  %v11879_v3 = vcombine.high %v2788_v35, %v2792_v63  ;;  %v2777_v55 = vld [vmem:[#allocation9 + $0x570] sm:$0xff]  ;;  %v2778_v33 = vld [vmem:[#allocation9 + $0x578] sm:$0xff] }
 0x2eb   :  { %2682 = vmatmul.mubr.bf16.vlgmr.msra.gmra.mrb[76].mxu0 %v14120_v28  ;;  %2723 = vmatmul.mubr.bf16.vlgmr.msra.gmra.mrb[76].mxu1 %v14120_v28  ;;  %v11838_v28 = vcombine.low %v2748_v7, %v2752_v37  ;;  %v2742_v7 = vld [vmem:[#allocation9 + $0x458] sm:$0xff] }
 0x2ec   :  { %3116 = vmatpush1.bf16.msra.mxu0 %v11820_v1  ;;  %3157 = vmatpush1.bf16.msra.mxu1 %v11822_v4  ;;  %v11876_v1 = vcombine.low %v2787_v19, %v2791_v43  ;;  %v11878_v4 = vcombine.low %v2788_v35, %v2792_v63  ;;  %v2746_v37 = vld [vmem:[#allocation9 + $0x478] sm:$0xff]  ;;  %v2781_v19 = vld [vmem:[#allocation9 + $0x590] sm:$0xff] }
 0x2ed   :  { %3117 = vmatprep.subr.bf16.mxu0 %v11829_v47  ;;  %3158 = vmatprep.subr.bf16.mxu1 %v11831_v8  ;;  %v11825_v47 = vcombine.high %v2733_v40, %v2737_v49  ;;  %v11827_v8 = vcombine.high %v2734_v13, %v2738_v34  ;;  %v2785_v43 = vld [vmem:[#allocation9 + $0x5b0] sm:$0xff]  ;;  %v2782_v35 = vld [vmem:[#allocation9 + $0x598] sm:$0xff] }
 0x2ee   :  { %3147 = vmatprep.mubr.bf16.mxu0 %v13536_v54  ;;  %3188 = vmatprep.mubr.bf16.mxu1 %v13536_v54  ;;  %v2786_v63 = vld [vmem:[#allocation9 + $0x5b8] sm:$0xff] }
 0x2f0   :  { %3118 = vmatpush1.bf16.msra.mxu0 %v11828_v58  ;;  %3159 = vmatpush1.bf16.msra.mxu1 %v11830_v9  ;;  %v11824_v58 = vcombine.low %v2733_v40, %v2737_v49  ;;  %v11826_v9 = vcombine.low %v2734_v13, %v2738_v34  ;;  %v2789_v40 = vld [vmem:[#allocation9 + $0x5d0] sm:$0xff]  ;;  %v2790_v13 = vld [vmem:[#allocation9 + $0x5d8] sm:$0xff] }
 0x2f1   :  { %3119 = vmatprep.subr.bf16.mxu0 %v11837_v18  ;;  %3160 = vmatprep.subr.bf16.mxu1 %v11839_v41  ;;  %v11833_v18 = vcombine.high %v2741_v52, %v2745_v6  ;;  %v11835_v41 = vcombine.high %v2742_v7, %v2746_v37  ;;  %v2793_v49 = vld [vmem:[#allocation9 + $0x5f0] sm:$0xff]  ;;  %v2794_v34 = vld [vmem:[#allocation9 + $0x5f8] sm:$0xff] }
 0x2f4   :  { %3120 = vmatpush1.bf16.msra.mxu0 %v11836_v59  ;;  %3161 = vmatpush1.bf16.msra.mxu1 %v11838_v28  ;;  %v11832_v59 = vcombine.low %v2741_v52, %v2745_v6  ;;  %v11834_v28 = vcombine.low %v2742_v7, %v2746_v37  ;;  %v3287_v52 = vld [vmem:[#allocation9 + $0x600] sm:$0xff]  ;;  %v3288_v7 = vld [vmem:[#allocation9 + $0x608] sm:$0xff] }
 0x2f5   :  { %3121 = vmatprep.subr.bf16.mxu0 %v11845_v10  ;;  %3162 = vmatprep.subr.bf16.mxu1 %v11847_v11  ;;  %v11841_v10 = vcombine.high %v2749_v42, %v2753_v50  ;;  %v11843_v11 = vcombine.high %v2750_v51, %v2754_v56  ;;  %v3291_v6 = vld [vmem:[#allocation9 + $0x620] sm:$0xff]  ;;  %v3292_v37 = vld [vmem:[#allocation9 + $0x628] sm:$0xff] }
 0x2f8   :  { %3122 = vmatpush1.bf16.msra.mxu0 %v11844_v22  ;;  %3163 = vmatpush1.bf16.msra.mxu1 %v11846_v23  ;;  %v11840_v22 = vcombine.low %v2749_v42, %v2753_v50  ;;  %v11842_v23 = vcombine.low %v2750_v51, %v2754_v56  ;;  %v3295_v42 = vld [vmem:[#allocation9 + $0x640] sm:$0xff]  ;;  %v3296_v51 = vld [vmem:[#allocation9 + $0x648] sm:$0xff] }
 0x2f9   :  { %3123 = vmatprep.subr.bf16.mxu0 %v11853_v48  ;;  %3164 = vmatprep.subr.bf16.mxu1 %v11855_v27  ;;  %v11849_v48 = vcombine.high %v2757_v12, %v2761_v46  ;;  %v11851_v27 = vcombine.high %v2758_v60, %v2762_v20  ;;  %v3299_v50 = vld [vmem:[#allocation9 + $0x660] sm:$0xff]  ;;  %v3300_v56 = vld [vmem:[#allocation9 + $0x668] sm:$0xff] }
 0x2fc   :  { %3124 = vmatpush1.bf16.msra.mxu0 %v11852_v32  ;;  %3165 = vmatpush1.bf16.msra.mxu1 %v11854_v53  ;;  %v11848_v32 = vcombine.low %v2757_v12, %v2761_v46  ;;  %v11850_v53 = vcombine.low %v2758_v60, %v2762_v20  ;;  %v3303_v12 = vld [vmem:[#allocation9 + $0x680] sm:$0xff]  ;;  %v3304_v60 = vld [vmem:[#allocation9 + $0x688] sm:$0xff] }
 0x2fd   :  { %3125 = vmatprep.subr.bf16.mxu0 %v11861_v2  ;;  %3166 = vmatprep.subr.bf16.mxu1 %v11863_v29  ;;  %v11857_v2 = vcombine.high %v2765_v25, %v2769_v36  ;;  %v11859_v29 = vcombine.high %v2766_v26, %v2770_v5  ;;  %v3307_v46 = vld [vmem:[#allocation9 + $0x6a0] sm:$0xff]  ;;  %v3308_v20 = vld [vmem:[#allocation9 + $0x6a8] sm:$0xff] }
 0x300   :  { %3126 = vmatpush1.bf16.msra.mxu0 %v11860_v61  ;;  %3167 = vmatpush1.bf16.msra.mxu1 %v11862_v30  ;;  %v11856_v61 = vcombine.low %v2765_v25, %v2769_v36  ;;  %v11858_v30 = vcombine.low %v2766_v26, %v2770_v5  ;;  %v3311_v25 = vld [vmem:[#allocation9 + $0x6c0] sm:$0xff]  ;;  %v3312_v26 = vld [vmem:[#allocation9 + $0x6c8] sm:$0xff] }
 0x301   :  { %3127 = vmatprep.subr.bf16.mxu0 %v11869_v38  ;;  %3168 = vmatprep.subr.bf16.mxu1 %v11871_v39  ;;  %v11865_v38 = vcombine.high %v2773_v31, %v2777_v55  ;;  %v11867_v39 = vcombine.high %v2774_v17, %v2778_v33  ;;  %v3315_v36 = vld [vmem:[#allocation9 + $0x6e0] sm:$0xff]  ;;  %v3316_v5 = vld [vmem:[#allocation9 + $0x6e8] sm:$0xff] }
 0x304   :  { %3128 = vmatpush1.bf16.msra.mxu0 %v11868_v24  ;;  %3169 = vmatpush1.bf16.msra.mxu1 %v11870_v57  ;;  %v11864_v24 = vcombine.low %v2773_v31, %v2777_v55  ;;  %v11866_v57 = vcombine.low %v2774_v17, %v2778_v33  ;;  %v3319_v31 = vld [vmem:[#allocation9 + $0x700] sm:$0xff]  ;;  %v3320_v17 = vld [vmem:[#allocation9 + $0x708] sm:$0xff] }
 0x305   :  { %3129 = vmatprep.subr.bf16.mxu0 %v11877_v45  ;;  %3170 = vmatprep.subr.bf16.mxu1 %v11879_v3  ;;  %v11873_v45 = vcombine.high %v2781_v19, %v2785_v43  ;;  %v11875_v3 = vcombine.high %v2782_v35, %v2786_v63  ;;  %v3323_v55 = vld [vmem:[#allocation9 + $0x720] sm:$0xff]  ;;  %v3324_v33 = vld [vmem:[#allocation9 + $0x728] sm:$0xff] }
 0x308   :  { %3130 = vmatpush1.bf16.msra.mxu0 %v11876_v1  ;;  %3171 = vmatpush1.bf16.msra.mxu1 %v11878_v4  ;;  %v11872_v1 = vcombine.low %v2781_v19, %v2785_v43  ;;  %v11874_v4 = vcombine.low %v2782_v35, %v2786_v63  ;;  %v3327_v19 = vld [vmem:[#allocation9 + $0x740] sm:$0xff]  ;;  %v3328_v35 = vld [vmem:[#allocation9 + $0x748] sm:$0xff] }
 0x309   :  { %3197 = vmatprep.subr.bf16.mxu0 %v11825_v47  ;;  %3238 = vmatprep.subr.bf16.mxu1 %v11827_v8  ;;  %v11881_v47 = vcombine.high %v2789_v40, %v2793_v49  ;;  %v11883_v8 = vcombine.high %v2790_v13, %v2794_v34  ;;  %v3331_v43 = vld [vmem:[#allocation9 + $0x760] sm:$0xff]  ;;  %v3332_v63 = vld [vmem:[#allocation9 + $0x768] sm:$0xff] }
 0x30b   :  { %3148 = vmatmul.mubr.bf16.vlgmr.msra.gmra.mrb[80].mxu0 %v14131_v0  ;;  %3189 = vmatmul.mubr.bf16.vlgmr.msra.gmra.mrb[80].mxu1 %v14131_v0 }
 0x30c   :  { %3198 = vmatpush1.bf16.msra.mxu0 %v11824_v58  ;;  %3239 = vmatpush1.bf16.msra.mxu1 %v11826_v9  ;;  %v11880_v58 = vcombine.low %v2789_v40, %v2793_v49  ;;  %v11882_v9 = vcombine.low %v2790_v13, %v2794_v34  ;;  %v3335_v40 = vld [vmem:[#allocation9 + $0x780] sm:$0xff]  ;;  %v3336_v13 = vld [vmem:[#allocation9 + $0x788] sm:$0xff] }
 0x30d   :  { %3199 = vmatprep.subr.bf16.mxu0 %v11833_v18  ;;  %3240 = vmatprep.subr.bf16.mxu1 %v11835_v41  ;;  %v11885_v18 = vcombine.high %v3287_v52, %v3291_v6  ;;  %v11887_v41 = vcombine.high %v3288_v7, %v3292_v37  ;;  %v3339_v49 = vld [vmem:[#allocation9 + $0x7a0] sm:$0xff]  ;;  %v3340_v34 = vld [vmem:[#allocation9 + $0x7a8] sm:$0xff] }
 0x30e   :  { %3229 = vmatprep.mubr.bf16.mxu0 %v13536_v54  ;;  %3270 = vmatprep.mubr.bf16.mxu1 %v13536_v54 }
 0x310   :  { %3200 = vmatpush1.bf16.msra.mxu0 %v11832_v59  ;;  %3241 = vmatpush1.bf16.msra.mxu1 %v11834_v28  ;;  %v11884_v59 = vcombine.low %v3287_v52, %v3291_v6  ;;  %v11886_v28 = vcombine.low %v3288_v7, %v3292_v37  ;;  %v3343_v52 = vld [vmem:[#allocation9 + $0x7c0] sm:$0xff]  ;;  %v3344_v7 = vld [vmem:[#allocation9 + $0x7c8] sm:$0xff] }
 0x311   :  { %3201 = vmatprep.subr.bf16.mxu0 %v11841_v10  ;;  %3242 = vmatprep.subr.bf16.mxu1 %v11843_v11  ;;  %v11893_v10 = vcombine.high %v3295_v42, %v3299_v50  ;;  %v11895_v11 = vcombine.high %v3296_v51, %v3300_v56  ;;  %v3347_v6 = vld [vmem:[#allocation9 + $0x7e0] sm:$0xff]  ;;  %v3348_v37 = vld [vmem:[#allocation9 + $0x7e8] sm:$0xff] }
 0x314   :  { %3202 = vmatpush1.bf16.msra.mxu0 %v11840_v22  ;;  %3243 = vmatpush1.bf16.msra.mxu1 %v11842_v23  ;;  %v11892_v22 = vcombine.low %v3295_v42, %v3299_v50  ;;  %v11894_v23 = vcombine.low %v3296_v51, %v3300_v56  ;;  %v3289_v42 = vld [vmem:[#allocation9 + $0x610] sm:$0xff]  ;;  %v3290_v51 = vld [vmem:[#allocation9 + $0x618] sm:$0xff] }
 0x315   :  { %3203 = vmatprep.subr.bf16.mxu0 %v11849_v48  ;;  %3244 = vmatprep.subr.bf16.mxu1 %v11851_v27  ;;  %v11901_v48 = vcombine.high %v3303_v12, %v3307_v46  ;;  %v11903_v27 = vcombine.high %v3304_v60, %v3308_v20  ;;  %v3293_v50 = vld [vmem:[#allocation9 + $0x630] sm:$0xff]  ;;  %v3294_v56 = vld [vmem:[#allocation9 + $0x638] sm:$0xff] }
 0x318   :  { %3204 = vmatpush1.bf16.msra.mxu0 %v11848_v32  ;;  %3245 = vmatpush1.bf16.msra.mxu1 %v11850_v53  ;;  %v11900_v32 = vcombine.low %v3303_v12, %v3307_v46  ;;  %v11902_v53 = vcombine.low %v3304_v60, %v3308_v20  ;;  %v3297_v12 = vld [vmem:[#allocation9 + $0x650] sm:$0xff]  ;;  %v3298_v60 = vld [vmem:[#allocation9 + $0x658] sm:$0xff] }
 0x319   :  { %3205 = vmatprep.subr.bf16.mxu0 %v11857_v2  ;;  %3246 = vmatprep.subr.bf16.mxu1 %v11859_v29  ;;  %v11909_v2 = vcombine.high %v3311_v25, %v3315_v36  ;;  %v11911_v29 = vcombine.high %v3312_v26, %v3316_v5  ;;  %v3301_v46 = vld [vmem:[#allocation9 + $0x670] sm:$0xff]  ;;  %v3302_v20 = vld [vmem:[#allocation9 + $0x678] sm:$0xff] }
 0x31c   :  { %3206 = vmatpush1.bf16.msra.mxu0 %v11856_v61  ;;  %3247 = vmatpush1.bf16.msra.mxu1 %v11858_v30  ;;  %v11908_v61 = vcombine.low %v3311_v25, %v3315_v36  ;;  %v11910_v30 = vcombine.low %v3312_v26, %v3316_v5  ;;  %v11899_v25 = vcombine.high %v3298_v60, %v3302_v20  ;;  %v3305_v36 = vld [vmem:[#allocation9 + $0x690] sm:$0xff]  ;;  %v3306_v5 = vld [vmem:[#allocation9 + $0x698] sm:$0xff] }
 0x31d   :  { %3207 = vmatprep.subr.bf16.mxu0 %v11865_v38  ;;  %3248 = vmatprep.subr.bf16.mxu1 %v11867_v39  ;;  %v11917_v38 = vcombine.high %v3319_v31, %v3323_v55  ;;  %v11919_v39 = vcombine.high %v3320_v17, %v3324_v33  ;;  %v3309_v26 = vld [vmem:[#allocation9 + $0x6b0] sm:$0xff] }
 0x320   :  { %3208 = vmatpush1.bf16.msra.mxu0 %v11864_v24  ;;  %3249 = vmatpush1.bf16.msra.mxu1 %v11866_v57  ;;  %v11916_v24 = vcombine.low %v3319_v31, %v3323_v55  ;;  %v11918_v57 = vcombine.low %v3320_v17, %v3324_v33  ;;  %v3313_v31 = vld [vmem:[#allocation9 + $0x6d0] sm:$0xff]  ;;  %v3314_v17 = vld [vmem:[#allocation9 + $0x6d8] sm:$0xff] }
 0x321   :  { %3209 = vmatprep.subr.bf16.mxu0 %v11873_v45  ;;  %3250 = vmatprep.subr.bf16.mxu1 %v11875_v3  ;;  %v11925_v45 = vcombine.high %v3327_v19, %v3331_v43  ;;  %v11927_v3 = vcombine.high %v3328_v35, %v3332_v63  ;;  %v3317_v55 = vld [vmem:[#allocation9 + $0x6f0] sm:$0xff]  ;;  %v3318_v33 = vld [vmem:[#allocation9 + $0x6f8] sm:$0xff] }
 0x324   :  { %3210 = vmatpush1.bf16.msra.mxu0 %v11872_v1  ;;  %3251 = vmatpush1.bf16.msra.mxu1 %v11874_v4  ;;  %v11924_v1 = vcombine.low %v3327_v19, %v3331_v43  ;;  %v11926_v4 = vcombine.low %v3328_v35, %v3332_v63  ;;  %v3321_v19 = vld [vmem:[#allocation9 + $0x710] sm:$0xff]  ;;  %v3322_v35 = vld [vmem:[#allocation9 + $0x718] sm:$0xff] }
 0x325   :  { %3211 = vmatprep.subr.bf16.mxu0 %v11881_v47  ;;  %3252 = vmatprep.subr.bf16.mxu1 %v11883_v8  ;;  %v11933_v47 = vcombine.high %v3335_v40, %v3339_v49  ;;  %v11935_v8 = vcombine.high %v3336_v13, %v3340_v34  ;;  %v3325_v43 = vld [vmem:[#allocation9 + $0x730] sm:$0xff]  ;;  %v3326_v63 = vld [vmem:[#allocation9 + $0x738] sm:$0xff] }
 0x328   :  { %3212 = vmatpush1.bf16.msra.mxu0 %v11880_v58  ;;  %3253 = vmatpush1.bf16.msra.mxu1 %v11882_v9  ;;  %v11932_v58 = vcombine.low %v3335_v40, %v3339_v49  ;;  %v11934_v9 = vcombine.low %v3336_v13, %v3340_v34  ;;  %v3329_v40 = vld [vmem:[#allocation9 + $0x750] sm:$0xff]  ;;  %v3330_v13 = vld [vmem:[#allocation9 + $0x758] sm:$0xff] }
 0x329   :  { %3674 = vmatprep.subr.bf16.mxu0 %v11885_v18  ;;  %3715 = vmatprep.subr.bf16.mxu1 %v11887_v41  ;;  %v11941_v18 = vcombine.high %v3343_v52, %v3347_v6  ;;  %v11943_v41 = vcombine.high %v3344_v7, %v3348_v37  ;;  %v3333_v49 = vld [vmem:[#allocation9 + $0x770] sm:$0xff]  ;;  %v3334_v34 = vld [vmem:[#allocation9 + $0x778] sm:$0xff] }
 0x32b   :  { %3230 = vmatmul.mubr.bf16.vlgmr.msra.gmra.mrb[84].mxu0 %v14131_v0  ;;  %3271 = vmatmul.mubr.bf16.vlgmr.msra.gmra.mrb[84].mxu1 %v14131_v0 }
 0x32c   :  { %3675 = vmatpush1.bf16.msra.mxu0 %v11884_v59  ;;  %3716 = vmatpush1.bf16.msra.mxu1 %v11886_v28  ;;  %v11940_v59 = vcombine.low %v3343_v52, %v3347_v6  ;;  %v11942_v28 = vcombine.low %v3344_v7, %v3348_v37  ;;  %v3337_v52 = vld [vmem:[#allocation9 + $0x790] sm:$0xff]  ;;  %v3338_v7 = vld [vmem:[#allocation9 + $0x798] sm:$0xff] }
 0x32d   :  { %3676 = vmatprep.subr.bf16.mxu0 %v11893_v10  ;;  %3717 = vmatprep.subr.bf16.mxu1 %v11895_v11  ;;  %v11889_v10 = vcombine.high %v3289_v42, %v3293_v50  ;;  %v11891_v11 = vcombine.high %v3290_v51, %v3294_v56  ;;  %v3341_v6 = vld [vmem:[#allocation9 + $0x7b0] sm:$0xff]  ;;  %v3342_v37 = vld [vmem:[#allocation9 + $0x7b8] sm:$0xff] }
 0x32e   :  { %3706 = vmatprep.mubr.bf16.mxu0 %v13536_v54  ;;  %3747 = vmatprep.mubr.bf16.mxu1 %v13536_v54 }
 0x330   :  { %3677 = vmatpush1.bf16.msra.mxu0 %v11892_v22  ;;  %3718 = vmatpush1.bf16.msra.mxu1 %v11894_v23  ;;  %v11888_v22 = vcombine.low %v3289_v42, %v3293_v50  ;;  %v11890_v23 = vcombine.low %v3290_v51, %v3294_v56  ;;  %v3345_v42 = vld [vmem:[#allocation9 + $0x7d0] sm:$0xff] }
 0x331   :  { %3678 = vmatprep.subr.bf16.mxu0 %v11901_v48  ;;  %3719 = vmatprep.subr.bf16.mxu1 %v11903_v27  ;;  %v14203_v48 = vrot.slane %v14131_v0, 4  ;;  %v11897_v27 = vcombine.high %v3297_v12, %v3301_v46  ;;  %v11905_v0 = vcombine.high %v3305_v36, %v3309_v26  ;;  %v3349_v56 = vld [vmem:[#allocation9 + $0x7f0] sm:$0xff] }
 0x334   :  { %3679 = vmatpush1.bf16.msra.mxu0 %v11900_v32  ;;  %3720 = vmatpush1.bf16.msra.mxu1 %v11902_v53  ;;  %v3310_v32 = vld [vmem:[#allocation9 + $0x6b8] sm:$0xff]  ;;  %v11896_v53 = vcombine.low %v3297_v12, %v3301_v46 }
 0x335   :  { %3680 = vmatprep.subr.bf16.mxu0 %v11909_v2  ;;  %3721 = vmatprep.subr.bf16.mxu1 %v11911_v29  ;;  %v11898_v2 = vcombine.low %v3298_v60, %v3302_v20  ;;  %v11907_v29 = vcombine.high %v3306_v5, %v3310_v32  ;;  %v11936_v60 = vcombine.low %v3337_v52, %v3341_v6 }
 0x336   :  { %v11938_v20 = vcombine.low %v3338_v7, %v3342_v37 }
 0x338   :  { %3681 = vmatpush1.bf16.msra.mxu0 %v11908_v61  ;;  %3722 = vmatpush1.bf16.msra.mxu1 %v11910_v30  ;;  %v11904_v61 = vcombine.low %v3305_v36, %v3309_v26  ;;  %v11906_v30 = vcombine.low %v3306_v5, %v3310_v32  ;;  %v3846_v36 = vld [vmem:[#allocation9 + $0x800] sm:$0xff]  ;;  %v3847_v5 = vld [vmem:[#allocation9 + $0x808] sm:$0xff] }
 0x339   :  { %3682 = vmatprep.subr.bf16.mxu0 %v11917_v38  ;;  %3723 = vmatprep.subr.bf16.mxu1 %v11919_v39  ;;  %v11913_v38 = vcombine.high %v3313_v31, %v3317_v55  ;;  %v11915_v39 = vcombine.high %v3314_v17, %v3318_v33  ;;  %v3850_v26 = vld [vmem:[#allocation9 + $0x820] sm:$0xff]  ;;  %v3851_v32 = vld [vmem:[#allocation9 + $0x828] sm:$0xff] }
 0x33c   :  { %3683 = vmatpush1.bf16.msra.mxu0 %v11916_v24  ;;  %3724 = vmatpush1.bf16.msra.mxu1 %v11918_v57  ;;  %v11912_v24 = vcombine.low %v3313_v31, %v3317_v55  ;;  %v11914_v57 = vcombine.low %v3314_v17, %v3318_v33  ;;  %v3854_v31 = vld [vmem:[#allocation9 + $0x840] sm:$0xff]  ;;  %v3855_v17 = vld [vmem:[#allocation9 + $0x848] sm:$0xff] }
 0x33d   :  { %3684 = vmatprep.subr.bf16.mxu0 %v11925_v45  ;;  %3725 = vmatprep.subr.bf16.mxu1 %v11927_v3  ;;  %v11921_v45 = vcombine.high %v3321_v19, %v3325_v43  ;;  %v11923_v3 = vcombine.high %v3322_v35, %v3326_v63  ;;  %v3858_v55 = vld [vmem:[#allocation9 + $0x860] sm:$0xff]  ;;  %v3859_v33 = vld [vmem:[#allocation9 + $0x868] sm:$0xff] }
 0x340   :  { %3685 = vmatpush1.bf16.msra.mxu0 %v11924_v1  ;;  %3726 = vmatpush1.bf16.msra.mxu1 %v11926_v4  ;;  %v11920_v1 = vcombine.low %v3321_v19, %v3325_v43  ;;  %v11922_v4 = vcombine.low %v3322_v35, %v3326_v63  ;;  %v3862_v19 = vld [vmem:[#allocation9 + $0x880] sm:$0xff]  ;;  %v3863_v35 = vld [vmem:[#allocation9 + $0x888] sm:$0xff] }
 0x341   :  { %3686 = vmatprep.subr.bf16.mxu0 %v11933_v47  ;;  %3727 = vmatprep.subr.bf16.mxu1 %v11935_v8  ;;  %v11929_v47 = vcombine.high %v3329_v40, %v3333_v49  ;;  %v11931_v8 = vcombine.high %v3330_v13, %v3334_v34  ;;  %v3866_v43 = vld [vmem:[#allocation9 + $0x8a0] sm:$0xff]  ;;  %v3867_v63 = vld [vmem:[#allocation9 + $0x8a8] sm:$0xff] }
 0x344   :  { %3687 = vmatpush1.bf16.msra.mxu0 %v11932_v58  ;;  %3728 = vmatpush1.bf16.msra.mxu1 %v11934_v9  ;;  %v11928_v58 = vcombine.low %v3329_v40, %v3333_v49  ;;  %v11930_v9 = vcombine.low %v3330_v13, %v3334_v34  ;;  %v3870_v40 = vld [vmem:[#allocation9 + $0x8c0] sm:$0xff]  ;;  %v3871_v13 = vld [vmem:[#allocation9 + $0x8c8] sm:$0xff] }
 0x345   :  { %3688 = vmatprep.subr.bf16.mxu0 %v11941_v18  ;;  %3729 = vmatprep.subr.bf16.mxu1 %v11943_v41  ;;  %v11937_v18 = vcombine.high %v3337_v52, %v3341_v6  ;;  %v11939_v41 = vcombine.high %v3338_v7, %v3342_v37  ;;  %v3874_v49 = vld [vmem:[#allocation9 + $0x8e0] sm:$0xff]  ;;  %v3875_v34 = vld [vmem:[#allocation9 + $0x8e8] sm:$0xff] }
 0x346   :  { %v3882_v52 = vld [vmem:[#allocation9 + $0x920] sm:$0xff]  ;;  %v3879_v6 = vld [vmem:[#allocation9 + $0x908] sm:$0xff]  ;;  %v11972_v37 = vcombine.low %v3870_v40, %v3874_v49 }
 0x347   :  { %v3883_v7 = vld [vmem:[#allocation9 + $0x928] sm:$0xff] }
 0x348   :  { %3689 = vmatpush1.bf16.msra.mxu0 %v11940_v59  ;;  %3730 = vmatpush1.bf16.msra.mxu1 %v11942_v28  ;;  %v3346_v59 = vld [vmem:[#allocation9 + $0x7d8] sm:$0xff] }
 0x349   :  { %3756 = vmatprep.subr.bf16.mxu0 %v11889_v10  ;;  %3797 = vmatprep.subr.bf16.mxu1 %v11891_v11  ;;  %v3350_v28 = vld [vmem:[#allocation9 + $0x7f8] sm:$0xff] }
 0x34b   :  { %3707 = vmatmul.mubr.bf16.vlgmr.msra.gmra.mrb[88].mxu0 %v14203_v48  ;;  %3748 = vmatmul.mubr.bf16.vlgmr.msra.gmra.mrb[88].mxu1 %v14203_v48 }
 0x34c   :  { %3757 = vmatpush1.bf16.msra.mxu0 %v11888_v22  ;;  %3798 = vmatpush1.bf16.msra.mxu1 %v11890_v23 }
 0x34d   :  { %3758 = vmatprep.subr.bf16.mxu0 %v11897_v27  ;;  %3799 = vmatprep.subr.bf16.mxu1 %v11899_v25  ;;  %v11945_v27 = vcombine.high %v3345_v42, %v3349_v56  ;;  %v11947_v25 = vcombine.high %v3346_v59, %v3350_v28 }
 0x34e   :  { %3788 = vmatprep.mubr.bf16.mxu0 %v13536_v54  ;;  %3829 = vmatprep.mubr.bf16.mxu1 %v13536_v54 }
 0x350   :  { %3759 = vmatpush1.bf16.msra.mxu0 %v11896_v53  ;;  %3800 = vmatpush1.bf16.msra.mxu1 %v11898_v2  ;;  %v11944_v53 = vcombine.low %v3345_v42, %v3349_v56  ;;  %v11946_v2 = vcombine.low %v3346_v59, %v3350_v28  ;;  %v3890_v42 = vld [vmem:[#allocation9 + $0x960] sm:$0xff]  ;;  %v3887_v56 = vld [vmem:[#allocation9 + $0x948] sm:$0xff] }
 0x351   :  { %3760 = vmatprep.subr.bf16.mxu0 %v11905_v0  ;;  %3801 = vmatprep.subr.bf16.mxu1 %v11907_v29  ;;  %v11949_v0 = vcombine.high %v3846_v36, %v3850_v26  ;;  %v11951_v29 = vcombine.high %v3847_v5, %v3851_v32  ;;  %v3891_v59 = vld [vmem:[#allocation9 + $0x968] sm:$0xff] }
 0x354   :  { %3761 = vmatpush1.bf16.msra.mxu0 %v11904_v61  ;;  %3802 = vmatpush1.bf16.msra.mxu1 %v11906_v30  ;;  %v11948_v61 = vcombine.low %v3846_v36, %v3850_v26  ;;  %v11950_v30 = vcombine.low %v3847_v5, %v3851_v32  ;;  %v11990_v36 = vcombine.low %v3887_v56, %v3891_v59  ;;  %v3902_v32 = vld [vmem:[#allocation9 + $0x9c0] sm:$0xff] }
 0x355   :  { %3762 = vmatprep.subr.bf16.mxu0 %v11913_v38  ;;  %3803 = vmatprep.subr.bf16.mxu1 %v11915_v39  ;;  %v11957_v38 = vcombine.high %v3854_v31, %v3858_v55  ;;  %v11959_v39 = vcombine.high %v3855_v17, %v3859_v33 }
 0x358   :  { %3763 = vmatpush1.bf16.msra.mxu0 %v11912_v24  ;;  %3804 = vmatpush1.bf16.msra.mxu1 %v11914_v57  ;;  %v11956_v24 = vcombine.low %v3854_v31, %v3858_v55  ;;  %v11958_v57 = vcombine.low %v3855_v17, %v3859_v33  ;;  %v3907_v31 = vld [vmem:[#allocation9 + $0x9e8] sm:$0xff] }
 0x359   :  { %3764 = vmatprep.subr.bf16.mxu0 %v11921_v45  ;;  %3805 = vmatprep.subr.bf16.mxu1 %v11923_v3  ;;  %v11965_v45 = vcombine.high %v3862_v19, %v3866_v43  ;;  %v11967_v3 = vcombine.high %v3863_v35, %v3867_v63 }
 0x35c   :  { %3765 = vmatpush1.bf16.msra.mxu0 %v11920_v1  ;;  %3806 = vmatpush1.bf16.msra.mxu1 %v11922_v4  ;;  %v11964_v1 = vcombine.low %v3862_v19, %v3866_v43  ;;  %v11973_v4 = vcombine.high %v3870_v40, %v3874_v49 }
 0x35d   :  { %3766 = vmatprep.subr.bf16.mxu0 %v11929_v47  ;;  %3807 = vmatprep.subr.bf16.mxu1 %v11931_v8  ;;  %v11975_v47 = vcombine.high %v3871_v13, %v3875_v34  ;;  %v3878_v8 = vld [vmem:[#allocation9 + $0x900] sm:$0xff] }
 0x35e   :  { %v14209_v50 = vpop.f32.mrb[64].mxu0  ;;  %v14211_v51 = vpop.f32.mrb[64].mxu1  ;;  %v11980_v28 = vcombine.low %v3878_v8, %v3882_v52 }
 0x35f   :  { %v14213_v10 = vpop.f32.mrb[65].mxu0  ;;  %v14215_v11 = vpop.f32.mrb[65].mxu1 }
 0x360   :  { %3767 = vmatpush1.bf16.msra.mxu0 %v11928_v58  ;;  %3808 = vmatpush1.bf16.msra.mxu1 %v11930_v9  ;;  %v2121_v12 = vpop.f32.mrb[66].mxu0  ;;  %v2162_v46 = vpop.f32.mrb[66].mxu1  ;;  %v11974_v58 = vcombine.low %v3871_v13, %v3875_v34  ;;  %v11981_v9 = vcombine.high %v3878_v8, %v3882_v52  ;;  %v3856_v34 = vld [vmem:[#allocation9 + $0x850] sm:$0xff] }
 0x361   :  { %v2122_v22 = vpop.f32.mrb[67].mxu0  ;;  %v2163_v23 = vpop.f32.mrb[67].mxu1  ;;  %3768 = vmatprep.subr.bf16.mxu0 %v11937_v18  ;;  %3809 = vmatprep.subr.bf16.mxu1 %v11939_v41  ;;  %v11983_v18 = vcombine.high %v3879_v6, %v3883_v7  ;;  %v3886_v41 = vld [vmem:[#allocation9 + $0x940] sm:$0xff]  ;;  %v11982_v12 = vcombine.low %v3879_v6, %v3883_v7  ;;  %v3864_v7 = vld [vmem:[#allocation9 + $0x890] sm:$0xff] }
 0x362   :  { %v11989_v46 = vcombine.high %v3886_v41, %v3890_v42  ;;  %v3898_v22 = vld [vmem:[#allocation9 + $0x9a0] sm:$0xff]  ;;  %v3895_v23 = vld [vmem:[#allocation9 + $0x988] sm:$0xff] }
 0x364   :  { %3769 = vmatpush1.bf16.msra.mxu0 %v11936_v60  ;;  %3810 = vmatpush1.bf16.msra.mxu1 %v11938_v20  ;;  %v11991_v60 = vcombine.high %v3887_v56, %v3891_v59  ;;  %v3894_v20 = vld [vmem:[#allocation9 + $0x980] sm:$0xff]  ;;  %v3872_v59 = vld [vmem:[#allocation9 + $0x8d0] sm:$0xff] }
 0x365   :  { %3770 = vmatprep.subr.bf16.mxu0 %v11945_v27  ;;  %3811 = vmatprep.subr.bf16.mxu1 %v11947_v25  ;;  %v3899_v27 = vld [vmem:[#allocation9 + $0x9a8] sm:$0xff]  ;;  %v11988_v25 = vcombine.low %v3886_v41, %v3890_v42  ;;  %v11997_v26 = vcombine.high %v3894_v20, %v3898_v22 }
 0x366   :  { %v11999_v5 = vcombine.high %v3895_v23, %v3899_v27 }
 0x368   :  { %3771 = vmatpush1.bf16.msra.mxu0 %v11944_v53  ;;  %3812 = vmatpush1.bf16.msra.mxu1 %v11946_v2 }
 0x369   :  { %4230 = vmatprep.subr.bf16.mxu0 %v11949_v0  ;;  %4271 = vmatprep.subr.bf16.mxu1 %v11951_v29  ;;  %v3906_v0 = vld [vmem:[#allocation9 + $0x9e0] sm:$0xff]  ;;  %v3903_v29 = vld [vmem:[#allocation9 + $0x9c8] sm:$0xff] }
 0x36a   :  { %v12005_v43 = vcombine.high %v3902_v32, %v3906_v0  ;;  %v12006_v40 = vcombine.low %v3903_v29, %v3907_v31 }
 0x36b   :  { %3789 = vmatmul.mubr.bf16.vlgmr.msra.gmra.mrb[92].mxu0 %v14203_v48  ;;  %3830 = vmatmul.mubr.bf16.vlgmr.msra.gmra.mrb[92].mxu1 %v14203_v48  ;;  %v11966_v48 = vcombine.low %v3863_v35, %v3867_v63  ;;  %v12007_v35 = vcombine.high %v3903_v29, %v3907_v31  ;;  %v3848_v63 = vld [vmem:[#allocation9 + $0x810] sm:$0xff] }
 0x36c   :  { %4231 = vmatpush1.bf16.msra.mxu0 %v11948_v61  ;;  %4272 = vmatpush1.bf16.msra.mxu1 %v11950_v30  ;;  %v11996_v30 = vcombine.low %v3894_v20, %v3898_v22  ;;  %v3888_v31 = vld [vmem:[#allocation9 + $0x950] sm:$0xff] }
 0x36d   :  { %4232 = vmatprep.subr.bf16.mxu0 %v11957_v38  ;;  %4273 = vmatprep.subr.bf16.mxu1 %v11959_v39  ;;  %v11998_v38 = vcombine.low %v3895_v23, %v3899_v27  ;;  %v3880_v27 = vld [vmem:[#allocation9 + $0x910] sm:$0xff] }
 0x36e   :  { %4262 = vmatprep.mubr.bf16.mxu0 %v13536_v54  ;;  %4303 = vmatprep.mubr.bf16.mxu1 %v13536_v54 }
 0x370   :  { %4233 = vmatpush1.bf16.msra.mxu0 %v11956_v24  ;;  %4274 = vmatpush1.bf16.msra.mxu1 %v11958_v57  ;;  %v3852_v24 = vld [vmem:[#allocation9 + $0x830] sm:$0xff]  ;;  %v3849_v57 = vld [vmem:[#allocation9 + $0x818] sm:$0xff] }
 0x371   :  { %4234 = vmatprep.subr.bf16.mxu0 %v11965_v45  ;;  %4275 = vmatprep.subr.bf16.mxu1 %v11967_v3  ;;  %v3853_v45 = vld [vmem:[#allocation9 + $0x838] sm:$0xff]  ;;  %v12004_v3 = vcombine.low %v3902_v32, %v3906_v0  ;;  %v11953_v49 = vcombine.high %v3848_v63, %v3852_v24 }
 0x372   :  { %v11955_v13 = vcombine.high %v3849_v57, %v3853_v45  ;;  %v11954_v8 = vcombine.low %v3849_v57, %v3853_v45  ;;  %v3901_v57 = vld [vmem:[#allocation9 + $0x9b8] sm:$0xff] }
 0x374   :  { %4235 = vmatpush1.bf16.msra.mxu0 %v11964_v1  ;;  %4276 = vmatpush1.bf16.msra.mxu1 %v11966_v48  ;;  %v3860_v1 = vld [vmem:[#allocation9 + $0x870] sm:$0xff]  ;;  %v3857_v48 = vld [vmem:[#allocation9 + $0x858] sm:$0xff] }
 0x375   :  { %4236 = vmatprep.subr.bf16.mxu0 %v11973_v4  ;;  %4277 = vmatprep.subr.bf16.mxu1 %v11975_v47  ;;  %v3861_v4 = vld [vmem:[#allocation9 + $0x878] sm:$0xff]  ;;  %v11952_v47 = vcombine.low %v3848_v63, %v3852_v24  ;;  %v11961_v52 = vcombine.high %v3856_v34, %v3860_v1  ;;  %v3900_v63 = vld [vmem:[#allocation9 + $0x9b0] sm:$0xff] }
 0x376   :  { %v11963_v6 = vcombine.high %v3857_v48, %v3861_v4  ;;  %v11962_v41 = vcombine.low %v3857_v48, %v3861_v4  ;;  %v3897_v24 = vld [vmem:[#allocation9 + $0x998] sm:$0xff]  ;;  %v3908_v48 = vld [vmem:[#allocation9 + $0x9f0] sm:$0xff] }
 0x377   :  { %v3905_v4 = vld [vmem:[#allocation9 + $0x9d8] sm:$0xff] }
 0x378   :  { %4237 = vmatpush1.bf16.msra.mxu0 %v11972_v37  ;;  %4278 = vmatpush1.bf16.msra.mxu1 %v11974_v58  ;;  %v3868_v37 = vld [vmem:[#allocation9 + $0x8b0] sm:$0xff]  ;;  %v3865_v58 = vld [vmem:[#allocation9 + $0x898] sm:$0xff] }
 0x379   :  { %4238 = vmatprep.subr.bf16.mxu0 %v11981_v9  ;;  %4279 = vmatprep.subr.bf16.mxu1 %v11983_v18  ;;  %v3869_v9 = vld [vmem:[#allocation9 + $0x8b8] sm:$0xff]  ;;  %v11960_v18 = vcombine.low %v3856_v34, %v3860_v1  ;;  %v11969_v42 = vcombine.high %v3864_v7, %v3868_v37 }
 0x37a   :  { %v11971_v56 = vcombine.high %v3865_v58, %v3869_v9  ;;  %v11970_v20 = vcombine.low %v3865_v58, %v3869_v9 }
 0x37c   :  { %4239 = vmatpush1.bf16.msra.mxu0 %v11980_v28  ;;  %4280 = vmatpush1.bf16.msra.mxu1 %v11982_v12  ;;  %v3876_v28 = vld [vmem:[#allocation9 + $0x8f0] sm:$0xff]  ;;  %v3873_v12 = vld [vmem:[#allocation9 + $0x8d8] sm:$0xff] }
 0x37d   :  { %4240 = vmatprep.subr.bf16.mxu0 %v11989_v46  ;;  %4281 = vmatprep.subr.bf16.mxu1 %v11991_v60  ;;  %v3877_v46 = vld [vmem:[#allocation9 + $0x8f8] sm:$0xff]  ;;  %v11968_v60 = vcombine.low %v3864_v7, %v3868_v37  ;;  %v11977_v22 = vcombine.high %v3872_v59, %v3876_v28 }
 0x37e   :  { %v14221_v53 = vpop.f32.mrb[68].mxu0  ;;  %v14223_v2 = vpop.f32.mrb[68].mxu1  ;;  %v11979_v23 = vcombine.high %v3873_v12, %v3877_v46  ;;  %v11978_v32 = vcombine.low %v3873_v12, %v3877_v46  ;;  %v4406_v12 = vld [vmem:[#allocation9 + $0xa20] sm:$0xff]  ;;  %v4403_v46 = vld [vmem:[#allocation9 + $0xa08] sm:$0xff] }
 0x37f   :  { %v14225_v55 = vpop.f32.mrb[69].mxu0  ;;  %v14227_v17 = vpop.f32.mrb[69].mxu1 }
 0x380   :  { %v2203_v33 = vpop.f32.mrb[70].mxu0  ;;  %v2244_v61 = vpop.f32.mrb[70].mxu1  ;;  %4241 = vmatpush1.bf16.msra.mxu0 %v11988_v25  ;;  %4282 = vmatpush1.bf16.msra.mxu1 %v11990_v36  ;;  %v3884_v25 = vld [vmem:[#allocation9 + $0x930] sm:$0xff]  ;;  %v3881_v36 = vld [vmem:[#allocation9 + $0x918] sm:$0xff] }
 0x381   :  { %v2204_v39 = vpop.f32.mrb[71].mxu0  ;;  %v2245_v19 = vpop.f32.mrb[71].mxu1  ;;  %4242 = vmatprep.subr.bf16.mxu0 %v11997_v26  ;;  %4283 = vmatprep.subr.bf16.mxu1 %v11999_v5  ;;  %v3885_v26 = vld [vmem:[#allocation9 + $0x938] sm:$0xff]  ;;  %v11976_v5 = vcombine.low %v3872_v59, %v3876_v28  ;;  %v11985_v0 = vcombine.high %v3880_v27, %v3884_v25  ;;  %v3892_v33 = vld [vmem:[#allocation9 + $0x970] sm:$0xff]  ;;  %v4402_v28 = vld [vmem:[#allocation9 + $0xa00] sm:$0xff] }
 0x382   :  { %v11987_v29 = vcombine.high %v3881_v36, %v3885_v26  ;;  %v3889_v61 = vld [vmem:[#allocation9 + $0x958] sm:$0xff]  ;;  %v11986_v39 = vcombine.low %v3881_v36, %v3885_v26  ;;  %v11993_v19 = vcombine.high %v3888_v31, %v3892_v33  ;;  %v11992_v45 = vcombine.low %v3888_v31, %v3892_v33  ;;  %v4415_v36 = vld [vmem:[#allocation9 + $0xa68] sm:$0xff]  ;;  %v4422_v31 = vld [vmem:[#allocation9 + $0xaa0] sm:$0xff] }
 0x383   :  { %v12012_v26 = vcombine.low %v4402_v28, %v4406_v12  ;;  %v4419_v33 = vld [vmem:[#allocation9 + $0xa88] sm:$0xff] }
 0x384   :  { %4243 = vmatpush1.bf16.msra.mxu0 %v11996_v30  ;;  %4284 = vmatpush1.bf16.msra.mxu1 %v11998_v38  ;;  %v3893_v30 = vld [vmem:[#allocation9 + $0x978] sm:$0xff]  ;;  %v11984_v38 = vcombine.low %v3880_v27, %v3884_v25  ;;  %v4414_v27 = vld [vmem:[#allocation9 + $0xa60] sm:$0xff]  ;;  %v4411_v25 = vld [vmem:[#allocation9 + $0xa48] sm:$0xff] }
 0x385   :  { %4244 = vmatprep.subr.bf16.mxu0 %v12005_v43  ;;  %4285 = vmatprep.subr.bf16.mxu1 %v12007_v35  ;;  %v11995_v43 = vcombine.high %v3889_v61, %v3893_v30  ;;  %v3896_v35 = vld [vmem:[#allocation9 + $0x990] sm:$0xff] }
 0x386   :  { %v12000_v37 = vcombine.low %v3896_v35, %v3900_v63 }
 0x388   :  { %4245 = vmatpush1.bf16.msra.mxu0 %v12004_v3  ;;  %4286 = vmatpush1.bf16.msra.mxu1 %v12006_v40  ;;  %v11994_v3 = vcombine.low %v3889_v61, %v3893_v30  ;;  %v12001_v40 = vcombine.high %v3896_v35, %v3900_v63  ;;  %v4423_v61 = vld [vmem:[#allocation9 + $0xaa8] sm:$0xff]  ;;  %v4430_v35 = vld [vmem:[#allocation9 + $0xae0] sm:$0xff] }
 0x389   :  { %4312 = vmatprep.subr.bf16.mxu0 %v11953_v49  ;;  %4353 = vmatprep.subr.bf16.mxu1 %v11955_v13  ;;  %v12003_v49 = vcombine.high %v3897_v24, %v3901_v57  ;;  %v3904_v13 = vld [vmem:[#allocation9 + $0x9d0] sm:$0xff]  ;;  %v4427_v63 = vld [vmem:[#allocation9 + $0xac8] sm:$0xff] }
 0x38b   :  { %4263 = vmatmul.mubr.bf16.vlgmr.msra.gmra.mrb[96].mxu0 %v14145_v62  ;;  %4304 = vmatmul.mubr.bf16.vlgmr.msra.gmra.mrb[96].mxu1 %v14145_v62 }
 0x38c   :  { %4313 = vmatpush1.bf16.msra.mxu0 %v11952_v47  ;;  %4354 = vmatpush1.bf16.msra.mxu1 %v11954_v8  ;;  %v3909_v47 = vld [vmem:[#allocation9 + $0x9f8] sm:$0xff] }
 0x38d   :  { %4314 = vmatprep.subr.bf16.mxu0 %v11961_v52  ;;  %4355 = vmatprep.subr.bf16.mxu1 %v11963_v6  ;;  %v12011_v59 = vcombine.high %v3905_v4, %v3909_v47 }
 0x38e   :  { %4344 = vmatprep.mubr.bf16.mxu0 %v13536_v54  ;;  %4385 = vmatprep.mubr.bf16.mxu1 %v13536_v54 }
 0x390   :  { %4315 = vmatpush1.bf16.msra.mxu0 %v11960_v18  ;;  %4356 = vmatpush1.bf16.msra.mxu1 %v11962_v41 }
 0x391   :  { %4316 = vmatprep.subr.bf16.mxu0 %v11969_v42  ;;  %4357 = vmatprep.subr.bf16.mxu1 %v11971_v56  ;;  %v12002_v42 = vcombine.low %v3897_v24, %v3901_v57  ;;  %v4431_v24 = vld [vmem:[#allocation9 + $0xae8] sm:$0xff] }
 0x394   :  { %4317 = vmatpush1.bf16.msra.mxu0 %v11968_v60  ;;  %4358 = vmatpush1.bf16.msra.mxu1 %v11970_v20  ;;  %v4407_v60 = vld [vmem:[#allocation9 + $0xa28] sm:$0xff]  ;;  %v12013_v20 = vcombine.high %v4402_v28, %v4406_v12  ;;  %v4454_v28 = vld [vmem:[#allocation9 + $0xba0] sm:$0xff] }
 0x395   :  { %4318 = vmatprep.subr.bf16.mxu0 %v11977_v22  ;;  %4359 = vmatprep.subr.bf16.mxu1 %v11979_v23  ;;  %v12015_v22 = vcombine.high %v4403_v46, %v4407_v60  ;;  %v4410_v23 = vld [vmem:[#allocation9 + $0xa40] sm:$0xff]  ;;  %v4451_v12 = vld [vmem:[#allocation9 + $0xb88] sm:$0xff] }
 0x396   :  { %v12020_v30 = vcombine.low %v4410_v23, %v4414_v27 }
 0x398   :  { %4319 = vmatpush1.bf16.msra.mxu0 %v11976_v5  ;;  %4360 = vmatpush1.bf16.msra.mxu1 %v11978_v32  ;;  %v12014_v5 = vcombine.low %v4403_v46, %v4407_v60  ;;  %v12021_v32 = vcombine.high %v4410_v23, %v4414_v27  ;;  %v4455_v46 = vld [vmem:[#allocation9 + $0xba8] sm:$0xff] }
 0x399   :  { %4320 = vmatprep.subr.bf16.mxu0 %v11985_v0  ;;  %4361 = vmatprep.subr.bf16.mxu1 %v11987_v29  ;;  %v12023_v0 = vcombine.high %v4411_v25, %v4415_v36  ;;  %v4418_v29 = vld [vmem:[#allocation9 + $0xa80] sm:$0xff] }
 0x39a   :  { %v12028_v57 = vcombine.low %v4418_v29, %v4422_v31 }
 0x39c   :  { %4321 = vmatpush1.bf16.msra.mxu0 %v11984_v38  ;;  %4362 = vmatpush1.bf16.msra.mxu1 %v11986_v39  ;;  %v12022_v38 = vcombine.low %v4411_v25, %v4415_v36  ;;  %v12029_v39 = vcombine.high %v4418_v29, %v4422_v31  ;;  %v4462_v25 = vld [vmem:[#allocation9 + $0xbe0] sm:$0xff]  ;;  %v4459_v36 = vld [vmem:[#allocation9 + $0xbc8] sm:$0xff] }
 0x39d   :  { %4322 = vmatprep.subr.bf16.mxu0 %v11993_v19  ;;  %4363 = vmatprep.subr.bf16.mxu1 %v11995_v43  ;;  %v12031_v19 = vcombine.high %v4419_v33, %v4423_v61  ;;  %v4426_v43 = vld [vmem:[#allocation9 + $0xac0] sm:$0xff] }
 0x39e   :  { %v2601_v34 = vpop.f32.mrb[72].mxu0  ;;  %v2642_v1 = vpop.f32.mrb[72].mxu1 }
 0x39f   :  { %v14234_v8 = vadd.f32 %v2601_v34, %v14209_v50  ;;  %v14237_v52 = vadd.f32 %v2642_v1, %v14211_v51  ;;  %v2603_v6 = vpop.f32.mrb[73].mxu0  ;;  %v2644_v7 = vpop.f32.mrb[73].mxu1  ;;  %v12009_v51 = vcombine.high %v3904_v13, %v3908_v48  ;;  %v4435_v34 = vld [vmem:[#allocation9 + $0xb08] sm:$0xff] }
 0x3a0   :  { %v14240_v58 = vadd.f32 %v2603_v6, %v14213_v10  ;;  %v14243_v9 = vadd.f32 %v2644_v7, %v14215_v11  ;;  %v2605_v18 = vpop.f32.mrb[74].mxu0  ;;  %v2646_v41 = vpop.f32.mrb[74].mxu1  ;;  %4323 = vmatpush1.bf16.msra.mxu0 %v11992_v45  ;;  %4364 = vmatpush1.bf16.msra.mxu1 %v11994_v3  ;;  %v12008_v10 = vcombine.low %v3904_v13, %v3908_v48  ;;  %v4438_v13 = vld [vmem:[#allocation9 + $0xb20] sm:$0xff]  ;;  %v4439_v1 = vld [vmem:[#allocation9 + $0xb28] sm:$0xff] }
 0x3a1   :  { %v2606_v56 = vpop.f32.mrb[75].mxu0  ;;  %v2647_v50 = vpop.f32.mrb[75].mxu1  ;;  %4324 = vmatprep.subr.bf16.mxu0 %v12001_v40  ;;  %4365 = vmatprep.subr.bf16.mxu1 %v12003_v49  ;;  %v12010_v11 = vcombine.low %v3905_v4, %v3909_v47  ;;  %v12030_v45 = vcombine.low %v4419_v33, %v4423_v61  ;;  %v12037_v3 = vcombine.high %v4426_v43, %v4430_v35  ;;  %v4434_v49 = vld [vmem:[#allocation9 + $0xb00] sm:$0xff]  ;;  %v4443_v18 = vld [vmem:[#allocation9 + $0xb48] sm:$0xff] }
 0x3a2   :  { %v12039_v40 = vcombine.high %v4427_v63, %v4431_v24  ;;  %v12036_v48 = vcombine.low %v4426_v43, %v4430_v35  ;;  %v12038_v4 = vcombine.low %v4427_v63, %v4431_v24  ;;  %v12045_v47 = vcombine.high %v4434_v49, %v4438_v13  ;;  %v4442_v7 = vld [vmem:[#allocation9 + $0xb40] sm:$0xff]  ;;  %v4447_v41 = vld [vmem:[#allocation9 + $0xb68] sm:$0xff]  ;;  %v4404_v35 = vld [vmem:[#allocation9 + $0xa10] sm:$0xff] }
 0x3a3   :  { %v12047_v6 = vcombine.high %v4435_v34, %v4439_v1  ;;  %v12046_v56 = vcombine.low %v4435_v34, %v4439_v1  ;;  %v4408_v63 = vld [vmem:[#allocation9 + $0xa30] sm:$0xff]  ;;  %v4405_v24 = vld [vmem:[#allocation9 + $0xa18] sm:$0xff] }
 0x3a4   :  { %4325 = vmatpush1.bf16.msra.mxu0 %v12000_v37  ;;  %4366 = vmatpush1.bf16.msra.mxu1 %v12002_v42  ;;  %v4446_v37 = vld [vmem:[#allocation9 + $0xb60] sm:$0xff]  ;;  %v12044_v42 = vcombine.low %v4434_v49, %v4438_v13  ;;  %v4416_v49 = vld [vmem:[#allocation9 + $0xa70] sm:$0xff]  ;;  %v4413_v13 = vld [vmem:[#allocation9 + $0xa58] sm:$0xff]  ;;  %v12016_v1 = vcombine.low %v4404_v35, %v4408_v63 }
 0x3a5   :  { %4326 = vmatprep.subr.bf16.mxu0 %v12009_v51  ;;  %4367 = vmatprep.subr.bf16.mxu1 %v12011_v59  ;;  %v12053_v50 = vcombine.high %v4442_v7, %v4446_v37  ;;  %v12055_v51 = vcombine.high %v4443_v18, %v4447_v41  ;;  %v4450_v59 = vld [vmem:[#allocation9 + $0xb80] sm:$0xff]  ;;  %v12052_v60 = vcombine.low %v4442_v7, %v4446_v37  ;;  %v4417_v34 = vld [vmem:[#allocation9 + $0xa78] sm:$0xff]  ;;  %v4420_v7 = vld [vmem:[#allocation9 + $0xa90] sm:$0xff] }
 0x3a6   :  { %v12060_v31 = vcombine.low %v4450_v59, %v4454_v28  ;;  %v4424_v37 = vld [vmem:[#allocation9 + $0xab0] sm:$0xff] }
 0x3a8   :  { %4327 = vmatpush1.bf16.msra.mxu0 %v12008_v10  ;;  %4368 = vmatpush1.bf16.msra.mxu1 %v12010_v11  ;;  %v12054_v10 = vcombine.low %v4443_v18, %v4447_v41  ;;  %v12061_v11 = vcombine.high %v4450_v59, %v4454_v28  ;;  %v4421_v18 = vld [vmem:[#allocation9 + $0xa98] sm:$0xff]  ;;  %v4432_v59 = vld [vmem:[#allocation9 + $0xaf0] sm:$0xff] }
 0x3a9   :  { %4789 = vmatprep.subr.bf16.mxu0 %v12013_v20  ;;  %4830 = vmatprep.subr.bf16.mxu1 %v12015_v22  ;;  %v12063_v20 = vcombine.high %v4451_v12, %v4455_v46  ;;  %v4458_v22 = vld [vmem:[#allocation9 + $0xbc0] sm:$0xff]  ;;  %v4425_v41 = vld [vmem:[#allocation9 + $0xab8] sm:$0xff] }
 0x3aa   :  { %v4429_v28 = vld [vmem:[#allocation9 + $0xad8] sm:$0xff] }
 0x3ab   :  { %4345 = vmatmul.mubr.bf16.vlgmr.msra.gmra.mrb[100].mxu0 %v14145_v62  ;;  %4386 = vmatmul.mubr.bf16.vlgmr.msra.gmra.mrb[100].mxu1 %v14145_v62 }
 0x3ac   :  { %4790 = vmatpush1.bf16.msra.mxu0 %v12012_v26  ;;  %4831 = vmatpush1.bf16.msra.mxu1 %v12014_v5  ;;  %v4463_v26 = vld [vmem:[#allocation9 + $0xbe8] sm:$0xff] }
 0x3ad   :  { %4791 = vmatprep.subr.bf16.mxu0 %v12021_v32  ;;  %4832 = vmatprep.subr.bf16.mxu1 %v12023_v0  ;;  %v12071_v43 = vcombine.high %v4459_v36, %v4463_v26 }
 0x3ae   :  { %4821 = vmatprep.mubr.bf16.mxu0 %v13536_v54  ;;  %4862 = vmatprep.mubr.bf16.mxu1 %v13536_v54 }
 0x3b0   :  { %4792 = vmatpush1.bf16.msra.mxu0 %v12020_v30  ;;  %4833 = vmatpush1.bf16.msra.mxu1 %v12022_v38 }
 0x3b1   :  { %4793 = vmatprep.subr.bf16.mxu0 %v12029_v39  ;;  %4834 = vmatprep.subr.bf16.mxu1 %v12031_v19  ;;  %v12062_v39 = vcombine.low %v4451_v12, %v4455_v46  ;;  %v4433_v12 = vld [vmem:[#allocation9 + $0xaf8] sm:$0xff]  ;;  %v12032_v46 = vcombine.low %v4420_v7, %v4424_v37 }
 0x3b4   :  { %4794 = vmatpush1.bf16.msra.mxu0 %v12028_v57  ;;  %4835 = vmatpush1.bf16.msra.mxu1 %v12030_v45  ;;  %v4409_v57 = vld [vmem:[#allocation9 + $0xa38] sm:$0xff]  ;;  %v12017_v45 = vcombine.high %v4404_v35, %v4408_v63  ;;  %v4456_v35 = vld [vmem:[#allocation9 + $0xbb0] sm:$0xff] }
 0x3b5   :  { %4795 = vmatprep.subr.bf16.mxu0 %v12037_v3  ;;  %4836 = vmatprep.subr.bf16.mxu1 %v12039_v40  ;;  %v12019_v3 = vcombine.high %v4405_v24, %v4409_v57  ;;  %v4412_v40 = vld [vmem:[#allocation9 + $0xa50] sm:$0xff]  ;;  %v4453_v63 = vld [vmem:[#allocation9 + $0xb98] sm:$0xff] }
 0x3b8   :  { %4796 = vmatpush1.bf16.msra.mxu0 %v12036_v48  ;;  %4837 = vmatpush1.bf16.msra.mxu1 %v12038_v4  ;;  %v12018_v48 = vcombine.low %v4405_v24, %v4409_v57  ;;  %v14262_v4 = vrot.slane %v14145_v62, 4  ;;  %v12033_v62 = vcombine.high %v4420_v7, %v4424_v37  ;;  %v4457_v24 = vld [vmem:[#allocation9 + $0xbb8] sm:$0xff] }
 0x3b9   :  { %4797 = vmatprep.subr.bf16.mxu0 %v12045_v47  ;;  %4838 = vmatprep.subr.bf16.mxu1 %v12047_v6  ;;  %v12025_v47 = vcombine.high %v4412_v40, %v4416_v49  ;;  %v12027_v6 = vcombine.high %v4413_v13, %v4417_v34 }
 0x3bc   :  { %4798 = vmatpush1.bf16.msra.mxu0 %v12044_v42  ;;  %4839 = vmatpush1.bf16.msra.mxu1 %v12046_v56  ;;  %v12024_v42 = vcombine.low %v4412_v40, %v4416_v49  ;;  %v12026_v56 = vcombine.low %v4413_v13, %v4417_v34  ;;  %v4464_v13 = vld [vmem:[#allocation9 + $0xbf0] sm:$0xff]  ;;  %v4461_v34 = vld [vmem:[#allocation9 + $0xbd8] sm:$0xff] }
 0x3bd   :  { %4799 = vmatprep.subr.bf16.mxu0 %v12053_v50  ;;  %4840 = vmatprep.subr.bf16.mxu1 %v12055_v51  ;;  %v12035_v50 = vcombine.high %v4421_v18, %v4425_v41  ;;  %v4428_v51 = vld [vmem:[#allocation9 + $0xad0] sm:$0xff] }
 0x3be   :  { %v2683_v23 = vpop.f32.mrb[76].mxu0  ;;  %v2724_v27 = vpop.f32.mrb[76].mxu1 }
 0x3bf   :  { %v14250_v5 = vadd.f32 %v2683_v23, %v14221_v53  ;;  %v14253_v32 = vadd.f32 %v2724_v27, %v14223_v2  ;;  %v2685_v0 = vpop.f32.mrb[77].mxu0  ;;  %v2726_v29 = vpop.f32.mrb[77].mxu1  ;;  %v12069_v2 = vcombine.high %v4458_v22, %v4462_v25  ;;  %v4437_v23 = vld [vmem:[#allocation9 + $0xb18] sm:$0xff] }
 0x3c0   :  { %v14256_v33 = vadd.f32 %v2685_v0, %v14225_v55  ;;  %v14259_v61 = vadd.f32 %v2726_v29, %v14227_v17  ;;  %v2687_v30 = vpop.f32.mrb[78].mxu0  ;;  %v2728_v38 = vpop.f32.mrb[78].mxu1  ;;  %4800 = vmatpush1.bf16.msra.mxu0 %v12052_v60  ;;  %4841 = vmatpush1.bf16.msra.mxu1 %v12054_v10  ;;  %v12068_v55 = vcombine.low %v4458_v22, %v4462_v25  ;;  %v4440_v22 = vld [vmem:[#allocation9 + $0xb30] sm:$0xff]  ;;  %v4441_v27 = vld [vmem:[#allocation9 + $0xb38] sm:$0xff] }
 0x3c1   :  { %v2688_v19 = vpop.f32.mrb[79].mxu0  ;;  %v2729_v53 = vpop.f32.mrb[79].mxu1  ;;  %4801 = vmatprep.subr.bf16.mxu0 %v12061_v11  ;;  %4842 = vmatprep.subr.bf16.mxu1 %v12063_v20  ;;  %v12070_v17 = vcombine.low %v4459_v36, %v4463_v26  ;;  %v12034_v60 = vcombine.low %v4421_v18, %v4425_v41  ;;  %v12041_v10 = vcombine.high %v4428_v51, %v4432_v59  ;;  %v4436_v20 = vld [vmem:[#allocation9 + $0xb10] sm:$0xff]  ;;  %v4445_v30 = vld [vmem:[#allocation9 + $0xb58] sm:$0xff] }
 0x3c2   :  { %v12043_v11 = vcombine.high %v4429_v28, %v4433_v12  ;;  %v12040_v25 = vcombine.low %v4428_v51, %v4432_v59  ;;  %v12042_v36 = vcombine.low %v4429_v28, %v4433_v12  ;;  %v12049_v26 = vcombine.high %v4436_v20, %v4440_v22  ;;  %v4444_v29 = vld [vmem:[#allocation9 + $0xb50] sm:$0xff]  ;;  %v4449_v38 = vld [vmem:[#allocation9 + $0xb78] sm:$0xff]  ;;  %v4961_v59 = vld [vmem:[#allocation9 + $0xc00] sm:$0xff] }
 0x3c3   :  { %v12051_v0 = vcombine.high %v4437_v23, %v4441_v27  ;;  %v12050_v19 = vcombine.low %v4437_v23, %v4441_v27  ;;  %v4965_v28 = vld [vmem:[#allocation9 + $0xc20] sm:$0xff]  ;;  %v4962_v12 = vld [vmem:[#allocation9 + $0xc08] sm:$0xff] }
 0x3c4   :  { %4802 = vmatpush1.bf16.msra.mxu0 %v12060_v31  ;;  %4843 = vmatpush1.bf16.msra.mxu1 %v12062_v39  ;;  %v4448_v31 = vld [vmem:[#allocation9 + $0xb70] sm:$0xff]  ;;  %v12048_v39 = vcombine.low %v4436_v20, %v4440_v22  ;;  %v4973_v20 = vld [vmem:[#allocation9 + $0xc60] sm:$0xff]  ;;  %v4970_v22 = vld [vmem:[#allocation9 + $0xc48] sm:$0xff]  ;;  %v12076_v27 = vcombine.low %v4961_v59, %v4965_v28 }
 0x3c5   :  { %4803 = vmatprep.subr.bf16.mxu0 %v12069_v2  ;;  %4844 = vmatprep.subr.bf16.mxu1 %v12071_v43  ;;  %v12057_v53 = vcombine.high %v4444_v29, %v4448_v31  ;;  %v12059_v2 = vcombine.high %v4445_v30, %v4449_v38  ;;  %v4452_v43 = vld [vmem:[#allocation9 + $0xb90] sm:$0xff]  ;;  %v12056_v57 = vcombine.low %v4444_v29, %v4448_v31  ;;  %v4974_v23 = vld [vmem:[#allocation9 + $0xc68] sm:$0xff]  ;;  %v4981_v29 = vld [vmem:[#allocation9 + $0xca0] sm:$0xff] }
 0x3c6   :  { %v12064_v37 = vcombine.low %v4452_v43, %v4456_v35  ;;  %v4978_v31 = vld [vmem:[#allocation9 + $0xc88] sm:$0xff] }
 0x3c8   :  { %4804 = vmatpush1.bf16.msra.mxu0 %v12068_v55  ;;  %4845 = vmatpush1.bf16.msra.mxu1 %v12070_v17  ;;  %v12058_v55 = vcombine.low %v4445_v30, %v4449_v38  ;;  %v12065_v17 = vcombine.high %v4452_v43, %v4456_v35  ;;  %v4982_v30 = vld [vmem:[#allocation9 + $0xca8] sm:$0xff]  ;;  %v4989_v43 = vld [vmem:[#allocation9 + $0xce0] sm:$0xff] }
 0x3c9   :  { %4871 = vmatprep.subr.bf16.mxu0 %v12017_v45  ;;  %4912 = vmatprep.subr.bf16.mxu1 %v12019_v3  ;;  %v12067_v45 = vcombine.high %v4453_v63, %v4457_v24  ;;  %v4460_v3 = vld [vmem:[#allocation9 + $0xbd0] sm:$0xff]  ;;  %v4986_v35 = vld [vmem:[#allocation9 + $0xcc8] sm:$0xff] }
 0x3cb   :  { %4822 = vmatmul.mubr.bf16.vlgmr.msra.gmra.mrb[104].mxu0 %v14262_v4  ;;  %4863 = vmatmul.mubr.bf16.vlgmr.msra.gmra.mrb[104].mxu1 %v14262_v4 }
 0x3cc   :  { %4872 = vmatpush1.bf16.msra.mxu0 %v12016_v1  ;;  %4913 = vmatpush1.bf16.msra.mxu1 %v12018_v48  ;;  %v4465_v1 = vld [vmem:[#allocation9 + $0xbf8] sm:$0xff] }
 0x3cd   :  { %4873 = vmatprep.subr.bf16.mxu0 %v12025_v47  ;;  %4914 = vmatprep.subr.bf16.mxu1 %v12027_v6  ;;  %v12075_v51 = vcombine.high %v4461_v34, %v4465_v1 }
 0x3ce   :  { %4903 = vmatprep.mubr.bf16.mxu0 %v13536_v54  ;;  %4944 = vmatprep.mubr.bf16.mxu1 %v13536_v54 }
 0x3d0   :  { %4874 = vmatpush1.bf16.msra.mxu0 %v12024_v42  ;;  %4915 = vmatpush1.bf16.msra.mxu1 %v12026_v56 }
 0x3d1   :  { %4875 = vmatprep.subr.bf16.mxu0 %v12033_v62  ;;  %4916 = vmatprep.subr.bf16.mxu1 %v12035_v50  ;;  %v12066_v62 = vcombine.low %v4453_v63, %v4457_v24  ;;  %v4990_v63 = vld [vmem:[#allocation9 + $0xce8] sm:$0xff] }
 0x3d4   :  { %4876 = vmatpush1.bf16.msra.mxu0 %v12032_v46  ;;  %4917 = vmatpush1.bf16.msra.mxu1 %v12034_v60  ;;  %v4966_v46 = vld [vmem:[#allocation9 + $0xc28] sm:$0xff]  ;;  %v12077_v60 = vcombine.high %v4961_v59, %v4965_v28 }
 0x3d5   :  { %4877 = vmatprep.subr.bf16.mxu0 %v12041_v10  ;;  %4918 = vmatprep.subr.bf16.mxu1 %v12043_v11  ;;  %v12079_v10 = vcombine.high %v4962_v12, %v4966_v46  ;;  %v4969_v11 = vld [vmem:[#allocation9 + $0xc40] sm:$0xff]  ;;  %v5010_v59 = vld [vmem:[#allocation9 + $0xd88] sm:$0xff] }
 0x3d6   :  { %v12084_v38 = vcombine.low %v4969_v11, %v4973_v20  ;;  %v5014_v28 = vld [vmem:[#allocation9 + $0xda8] sm:$0xff] }
 0x3d8   :  { %4878 = vmatpush1.bf16.msra.mxu0 %v12040_v25  ;;  %4919 = vmatpush1.bf16.msra.mxu1 %v12042_v36  ;;  %v12078_v25 = vcombine.low %v4962_v12, %v4966_v46  ;;  %v12085_v36 = vcombine.high %v4969_v11, %v4973_v20  ;;  %v5021_v20 = vld [vmem:[#allocation9 + $0xde0] sm:$0xff] }
 0x3d9   :  { %4879 = vmatprep.subr.bf16.mxu0 %v12049_v26  ;;  %4920 = vmatprep.subr.bf16.mxu1 %v12051_v0  ;;  %v12087_v26 = vcombine.high %v4970_v22, %v4974_v23  ;;  %v4977_v0 = vld [vmem:[#allocation9 + $0xc80] sm:$0xff] }
 0x3da   :  { %v12092_v24 = vcombine.low %v4977_v0, %v4981_v29 }
 0x3dc   :  { %4880 = vmatpush1.bf16.msra.mxu0 %v12048_v39  ;;  %4921 = vmatpush1.bf16.msra.mxu1 %v12050_v19  ;;  %v12086_v39 = vcombine.low %v4970_v22, %v4974_v23  ;;  %v12093_v19 = vcombine.high %v4977_v0, %v4981_v29  ;;  %v5018_v22 = vld [vmem:[#allocation9 + $0xdc8] sm:$0xff] }
 0x3dd   :  { %4881 = vmatprep.subr.bf16.mxu0 %v12057_v53  ;;  %4922 = vmatprep.subr.bf16.mxu1 %v12059_v2  ;;  %v12095_v53 = vcombine.high %v4978_v31, %v4982_v30  ;;  %v4985_v2 = vld [vmem:[#allocation9 + $0xcc0] sm:$0xff]  ;;  %v5022_v23 = vld [vmem:[#allocation9 + $0xde8] sm:$0xff] }
 0x3de   :  { %v3149_v40 = vpop.f32.mrb[80].mxu0  ;;  %v3190_v49 = vpop.f32.mrb[80].mxu1 }
 0x3df   :  { %v14269_v48 = vadd.f32 %v3149_v40, %v14234_v8  ;;  %v14272_v47 = vadd.f32 %v3190_v49, %v14237_v52  ;;  %v3151_v6 = vpop.f32.mrb[81].mxu0  ;;  %v3192_v7 = vpop.f32.mrb[81].mxu1  ;;  %v12073_v52 = vcombine.high %v4460_v3, %v4464_v13  ;;  %v4998_v40 = vld [vmem:[#allocation9 + $0xd28] sm:$0xff]  ;;  %v12100_v49 = vcombine.low %v4985_v2, %v4989_v43 }
 0x3e0   :  { %v14275_v18 = vadd.f32 %v3151_v6, %v14240_v58  ;;  %v14278_v41 = vadd.f32 %v3192_v7, %v14243_v9  ;;  %v3153_v42 = vpop.f32.mrb[82].mxu0  ;;  %v3194_v56 = vpop.f32.mrb[82].mxu1  ;;  %4882 = vmatpush1.bf16.msra.mxu0 %v12056_v57  ;;  %4923 = vmatpush1.bf16.msra.mxu1 %v12058_v55  ;;  %v12072_v58 = vcombine.low %v4460_v3, %v4464_v13  ;;  %v4994_v3 = vld [vmem:[#allocation9 + $0xd08] sm:$0xff]  ;;  %v5001_v6 = vld [vmem:[#allocation9 + $0xd40] sm:$0xff] }
 0x3e1   :  { %v3154_v50 = vpop.f32.mrb[83].mxu0  ;;  %v3195_v8 = vpop.f32.mrb[83].mxu1  ;;  %4883 = vmatprep.subr.bf16.mxu0 %v12065_v17  ;;  %4924 = vmatprep.subr.bf16.mxu1 %v12067_v45  ;;  %v12074_v9 = vcombine.low %v4461_v34, %v4465_v1  ;;  %v12101_v57 = vcombine.high %v4985_v2, %v4989_v43  ;;  %v12103_v55 = vcombine.high %v4986_v35, %v4990_v63  ;;  %v4993_v17 = vld [vmem:[#allocation9 + $0xd00] sm:$0xff]  ;;  %v5006_v42 = vld [vmem:[#allocation9 + $0xd68] sm:$0xff]  ;;  %v4963_v2 = vld [vmem:[#allocation9 + $0xc10] sm:$0xff] }
 0x3e2   :  { %v4997_v45 = vld [vmem:[#allocation9 + $0xd20] sm:$0xff]  ;;  %v12102_v13 = vcombine.low %v4986_v35, %v4990_v63  ;;  %v12111_v1 = vcombine.high %v4994_v3, %v4998_v40  ;;  %v4967_v43 = vld [vmem:[#allocation9 + $0xc30] sm:$0xff]  ;;  %v4964_v35 = vld [vmem:[#allocation9 + $0xc18] sm:$0xff] }
 0x3e3   :  { %v12109_v34 = vcombine.high %v4993_v17, %v4997_v45  ;;  %v5005_v7 = vld [vmem:[#allocation9 + $0xd60] sm:$0xff]  ;;  %v12108_v56 = vcombine.low %v4993_v17, %v4997_v45  ;;  %v4968_v63 = vld [vmem:[#allocation9 + $0xc38] sm:$0xff] }
 0x3e4   :  { %4884 = vmatpush1.bf16.msra.mxu0 %v12064_v37  ;;  %4925 = vmatpush1.bf16.msra.mxu1 %v12066_v62  ;;  %v5002_v37 = vld [vmem:[#allocation9 + $0xd48] sm:$0xff]  ;;  %v12110_v62 = vcombine.low %v4994_v3, %v4998_v40  ;;  %v12117_v50 = vcombine.high %v5001_v6, %v5005_v7  ;;  %v12116_v12 = vcombine.low %v5001_v6, %v5005_v7  ;;  %v4972_v17 = vld [vmem:[#allocation9 + $0xc58] sm:$0xff] }
 0x3e5   :  { %4885 = vmatprep.subr.bf16.mxu0 %v12073_v52  ;;  %4926 = vmatprep.subr.bf16.mxu1 %v12075_v51  ;;  %v12119_v8 = vcombine.high %v5002_v37, %v5006_v42  ;;  %v5009_v52 = vld [vmem:[#allocation9 + $0xd80] sm:$0xff]  ;;  %v12118_v46 = vcombine.low %v5002_v37, %v5006_v42  ;;  %v4976_v45 = vld [vmem:[#allocation9 + $0xc78] sm:$0xff]  ;;  %v12080_v3 = vcombine.low %v4963_v2, %v4967_v43 }
 0x3e6   :  { %v5013_v51 = vld [vmem:[#allocation9 + $0xda0] sm:$0xff]  ;;  %v12082_v40 = vcombine.low %v4964_v35, %v4968_v63  ;;  %v4980_v6 = vld [vmem:[#allocation9 + $0xc98] sm:$0xff]  ;;  %v12090_v42 = vcombine.low %v4972_v17, %v4976_v45 }
 0x3e7   :  { %v12124_v0 = vcombine.low %v5009_v52, %v5013_v51  ;;  %v4984_v7 = vld [vmem:[#allocation9 + $0xcb8] sm:$0xff] }
 0x3e8   :  { %4886 = vmatpush1.bf16.msra.mxu0 %v12072_v58  ;;  %4927 = vmatpush1.bf16.msra.mxu1 %v12074_v9  ;;  %v12125_v58 = vcombine.high %v5009_v52, %v5013_v51  ;;  %v12127_v9 = vcombine.high %v5010_v59, %v5014_v28  ;;  %v4988_v52 = vld [vmem:[#allocation9 + $0xcd8] sm:$0xff] }
 0x3e9   :  { %5345 = vmatprep.subr.bf16.mxu0 %v12077_v60  ;;  %5386 = vmatprep.subr.bf16.mxu1 %v12079_v10  ;;  %v5017_v60 = vld [vmem:[#allocation9 + $0xdc0] sm:$0xff]  ;;  %v4992_v51 = vld [vmem:[#allocation9 + $0xcf8] sm:$0xff] }
 0x3eb   :  { %4904 = vmatmul.mubr.bf16.vlgmr.msra.gmra.mrb[108].mxu0 %v14262_v4  ;;  %4945 = vmatmul.mubr.bf16.vlgmr.msra.gmra.mrb[108].mxu1 %v14262_v4  ;;  %v12094_v4 = vcombine.low %v4978_v31, %v4982_v30 }
 0x3ec   :  { %5346 = vmatpush1.bf16.msra.mxu0 %v12076_v27  ;;  %5387 = vmatpush1.bf16.msra.mxu1 %v12078_v25 }
 0x3ed   :  { %5347 = vmatprep.subr.bf16.mxu0 %v12085_v36  ;;  %5388 = vmatprep.subr.bf16.mxu1 %v12087_v26 }
 0x3ee   :  { %5377 = vmatprep.mubr.bf16.mxu0 %v13536_v54  ;;  %5418 = vmatprep.mubr.bf16.mxu1 %v13536_v54 }
 0x3f0   :  { %5348 = vmatpush1.bf16.msra.mxu0 %v12084_v38  ;;  %5389 = vmatpush1.bf16.msra.mxu1 %v12086_v39  ;;  %v12126_v39 = vcombine.low %v5010_v59, %v5014_v28  ;;  %v12098_v28 = vcombine.low %v4980_v6, %v4984_v7 }
 0x3f1   :  { %5349 = vmatprep.subr.bf16.mxu0 %v12093_v19  ;;  %5390 = vmatprep.subr.bf16.mxu1 %v12095_v53  ;;  %v12135_v53 = vcombine.high %v5018_v22, %v5022_v23 }
 0x3f4   :  { %5350 = vmatpush1.bf16.msra.mxu0 %v12092_v24  ;;  %5391 = vmatpush1.bf16.msra.mxu1 %v12094_v4  ;;  %v12081_v24 = vcombine.high %v4963_v2, %v4967_v43  ;;  %v12083_v4 = vcombine.high %v4964_v35, %v4968_v63  ;;  %v5012_v2 = vld [vmem:[#allocation9 + $0xd98] sm:$0xff] }
 0x3f5   :  { %5351 = vmatprep.subr.bf16.mxu0 %v12101_v57  ;;  %5392 = vmatprep.subr.bf16.mxu1 %v12103_v55  ;;  %v4971_v57 = vld [vmem:[#allocation9 + $0xc50] sm:$0xff]  ;;  %v5016_v43 = vld [vmem:[#allocation9 + $0xdb8] sm:$0xff] }
 0x3f6   :  { %v4975_v55 = vld [vmem:[#allocation9 + $0xc70] sm:$0xff] }
 0x3f7   :  { %v12088_v37 = vcombine.low %v4971_v57, %v4975_v55 }
 0x3f8   :  { %5352 = vmatpush1.bf16.msra.mxu0 %v12100_v49  ;;  %5393 = vmatpush1.bf16.msra.mxu1 %v12102_v13  ;;  %v12089_v49 = vcombine.high %v4971_v57, %v4975_v55  ;;  %v12091_v13 = vcombine.high %v4972_v17, %v4976_v45  ;;  %v5023_v55 = vld [vmem:[#allocation9 + $0xdf0] sm:$0xff]  ;;  %v5020_v17 = vld [vmem:[#allocation9 + $0xdd8] sm:$0xff] }
 0x3f9   :  { %5353 = vmatprep.subr.bf16.mxu0 %v12109_v34  ;;  %5394 = vmatprep.subr.bf16.mxu1 %v12111_v1  ;;  %v4979_v34 = vld [vmem:[#allocation9 + $0xc90] sm:$0xff]  ;;  %v5024_v45 = vld [vmem:[#allocation9 + $0xdf8] sm:$0xff] }
 0x3fa   :  { %v4983_v1 = vld [vmem:[#allocation9 + $0xcb0] sm:$0xff] }
 0x3fb   :  { %v12096_v59 = vcombine.low %v4979_v34, %v4983_v1 }
 0x3fc   :  { %5354 = vmatpush1.bf16.msra.mxu0 %v12108_v56  ;;  %5395 = vmatpush1.bf16.msra.mxu1 %v12110_v62  ;;  %v12097_v56 = vcombine.high %v4979_v34, %v4983_v1  ;;  %v12099_v62 = vcombine.high %v4980_v6, %v4984_v7 }
 0x3fd   :  { %5355 = vmatprep.subr.bf16.mxu0 %v12117_v50  ;;  %5396 = vmatprep.subr.bf16.mxu1 %v12119_v8  ;;  %v4987_v50 = vld [vmem:[#allocation9 + $0xcd0] sm:$0xff] }
 0x3fe   :  { %v3231_v10 = vpop.f32.mrb[84].mxu0  ;;  %v3272_v11 = vpop.f32.mrb[84].mxu1  ;;  %v4991_v8 = vld [vmem:[#allocation9 + $0xcf0] sm:$0xff] }
 0x3ff   :  { %v14285_v27 = vadd.f32 %v3231_v10, %v14250_v5  ;;  %v14288_v25 = vadd.f32 %v3272_v11, %v14253_v32  ;;  %v3233_v36 = vpop.f32.mrb[85].mxu0  ;;  %v3274_v26 = vpop.f32.mrb[85].mxu1  ;;  %v12133_v32 = vcombine.high %v5017_v60, %v5021_v20  ;;  %v5000_v10 = vld [vmem:[#allocation9 + $0xd38] sm:$0xff]  ;;  %v12104_v11 = vcombine.low %v4987_v50, %v4991_v8 }
 0x400   :  { %v14291_v29 = vadd.f32 %v3233_v36, %v14256_v33  ;;  %v14294_v31 = vadd.f32 %v3274_v26, %v14259_v61  ;;  %v3235_v30 = vpop.f32.mrb[86].mxu0  ;;  %v3276_v38 = vpop.f32.mrb[86].mxu1  ;;  %5356 = vmatpush1.bf16.msra.mxu0 %v12116_v12  ;;  %5397 = vmatpush1.bf16.msra.mxu1 %v12118_v46  ;;  %v12132_v33 = vcombine.low %v5017_v60, %v5021_v20  ;;  %v4996_v60 = vld [vmem:[#allocation9 + $0xd18] sm:$0xff]  ;;  %v5003_v36 = vld [vmem:[#allocation9 + $0xd50] sm:$0xff] }
 0x401   :  { %v3236_v19 = vpop.f32.mrb[87].mxu0  ;;  %v3277_v5 = vpop.f32.mrb[87].mxu1  ;;  %5357 = vmatprep.subr.bf16.mxu0 %v12125_v58  ;;  %5398 = vmatprep.subr.bf16.mxu1 %v12127_v9  ;;  %v12134_v61 = vcombine.low %v5018_v22, %v5022_v23  ;;  %v12105_v12 = vcombine.high %v4987_v50, %v4991_v8  ;;  %v12107_v46 = vcombine.high %v4988_v52, %v4992_v51  ;;  %v4995_v58 = vld [vmem:[#allocation9 + $0xd10] sm:$0xff]  ;;  %v5008_v30 = vld [vmem:[#allocation9 + $0xd78] sm:$0xff]  ;;  %v5517_v50 = vld [vmem:[#allocation9 + $0xe00] sm:$0xff] }
 0x402   :  { %v4999_v9 = vld [vmem:[#allocation9 + $0xd30] sm:$0xff]  ;;  %v12106_v20 = vcombine.low %v4988_v52, %v4992_v51  ;;  %v12115_v23 = vcombine.high %v4996_v60, %v5000_v10  ;;  %v5521_v8 = vld [vmem:[#allocation9 + $0xe20] sm:$0xff]  ;;  %v5518_v52 = vld [vmem:[#allocation9 + $0xe08] sm:$0xff] }
 0x403   :  { %v12113_v22 = vcombine.high %v4995_v58, %v4999_v9  ;;  %v5007_v26 = vld [vmem:[#allocation9 + $0xd70] sm:$0xff]  ;;  %v12112_v38 = vcombine.low %v4995_v58, %v4999_v9  ;;  %v5522_v51 = vld [vmem:[#allocation9 + $0xe28] sm:$0xff] }
 0x404   :  { %5358 = vmatpush1.bf16.msra.mxu0 %v12124_v0  ;;  %5399 = vmatpush1.bf16.msra.mxu1 %v12126_v39  ;;  %v5004_v0 = vld [vmem:[#allocation9 + $0xd58] sm:$0xff]  ;;  %v12114_v39 = vcombine.low %v4996_v60, %v5000_v10  ;;  %v12121_v19 = vcombine.high %v5003_v36, %v5007_v26  ;;  %v12120_v35 = vcombine.low %v5003_v36, %v5007_v26  ;;  %v5526_v58 = vld [vmem:[#allocation9 + $0xe48] sm:$0xff] }
 0x405   :  { %5359 = vmatprep.subr.bf16.mxu0 %v12133_v32  ;;  %5400 = vmatprep.subr.bf16.mxu1 %v12135_v53  ;;  %v12123_v5 = vcombine.high %v5004_v0, %v5008_v30  ;;  %v5011_v32 = vld [vmem:[#allocation9 + $0xd90] sm:$0xff]  ;;  %v12122_v63 = vcombine.low %v5004_v0, %v5008_v30  ;;  %v5530_v9 = vld [vmem:[#allocation9 + $0xe68] sm:$0xff]  ;;  %v12140_v60 = vcombine.low %v5517_v50, %v5521_v8 }
 0x406   :  { %v5015_v53 = vld [vmem:[#allocation9 + $0xdb0] sm:$0xff]  ;;  %v12142_v10 = vcombine.low %v5518_v52, %v5522_v51  ;;  %v5534_v36 = vld [vmem:[#allocation9 + $0xe88] sm:$0xff]  ;;  %v12150_v30 = vcombine.low %v5526_v58, %v5530_v9 }
 0x407   :  { %v12128_v34 = vcombine.low %v5011_v32, %v5015_v53  ;;  %v5538_v26 = vld [vmem:[#allocation9 + $0xea8] sm:$0xff] }
 0x408   :  { %5360 = vmatpush1.bf16.msra.mxu0 %v12132_v33  ;;  %5401 = vmatpush1.bf16.msra.mxu1 %v12134_v61  ;;  %v12129_v33 = vcombine.high %v5011_v32, %v5015_v53  ;;  %v12131_v61 = vcombine.high %v5012_v2, %v5016_v43  ;;  %v5542_v32 = vld [vmem:[#allocation9 + $0xec8] sm:$0xff] }
 0x409   :  { %5427 = vmatprep.subr.bf16.mxu0 %v12081_v24  ;;  %5468 = vmatprep.subr.bf16.mxu1 %v12083_v4  ;;  %v5019_v24 = vld [vmem:[#allocation9 + $0xdd0] sm:$0xff]  ;;  %v5546_v53 = vld [vmem:[#allocation9 + $0xee8] sm:$0xff] }
 0x40b   :  { %5378 = vmatmul.mubr.bf16.vlgmr.msra.gmra.mrb[112].mxu0 %v14157_v14  ;;  %5419 = vmatmul.mubr.bf16.vlgmr.msra.gmra.mrb[112].mxu1 %v14157_v14 }
 0x40c   :  { %5428 = vmatpush1.bf16.msra.mxu0 %v12080_v3  ;;  %5469 = vmatpush1.bf16.msra.mxu1 %v12082_v40 }
 0x40d   :  { %5429 = vmatprep.subr.bf16.mxu0 %v12089_v49  ;;  %5470 = vmatprep.subr.bf16.mxu1 %v12091_v13 }
 0x40e   :  { %5459 = vmatprep.mubr.bf16.mxu0 %v13536_v54  ;;  %5500 = vmatprep.mubr.bf16.mxu1 %v13536_v54 }
 0x410   :  { %5430 = vmatpush1.bf16.msra.mxu0 %v12088_v37  ;;  %5471 = vmatpush1.bf16.msra.mxu1 %v12090_v42  ;;  %v12130_v42 = vcombine.low %v5012_v2, %v5016_v43  ;;  %v12158_v43 = vcombine.low %v5534_v36, %v5538_v26 }
 0x411   :  { %5431 = vmatprep.subr.bf16.mxu0 %v12097_v56  ;;  %5472 = vmatprep.subr.bf16.mxu1 %v12099_v62  ;;  %v12139_v62 = vcombine.high %v5020_v17, %v5024_v45 }
 0x414   :  { %5432 = vmatpush1.bf16.msra.mxu0 %v12096_v59  ;;  %5473 = vmatpush1.bf16.msra.mxu1 %v12098_v28  ;;  %v12141_v59 = vcombine.high %v5517_v50, %v5521_v8  ;;  %v12143_v28 = vcombine.high %v5518_v52, %v5522_v51  ;;  %v5566_v50 = vld [vmem:[#allocation9 + $0xf88] sm:$0xff] }
 0x415   :  { %5433 = vmatprep.subr.bf16.mxu0 %v12105_v12  ;;  %5474 = vmatprep.subr.bf16.mxu1 %v12107_v46  ;;  %v5525_v12 = vld [vmem:[#allocation9 + $0xe40] sm:$0xff]  ;;  %v5570_v8 = vld [vmem:[#allocation9 + $0xfa8] sm:$0xff] }
 0x416   :  { %v5529_v46 = vld [vmem:[#allocation9 + $0xe60] sm:$0xff] }
 0x417   :  { %v12148_v0 = vcombine.low %v5525_v12, %v5529_v46 }
 0x418   :  { %5434 = vmatpush1.bf16.msra.mxu0 %v12104_v11  ;;  %5475 = vmatpush1.bf16.msra.mxu1 %v12106_v20  ;;  %v12149_v11 = vcombine.high %v5525_v12, %v5529_v46  ;;  %v12151_v20 = vcombine.high %v5526_v58, %v5530_v9  ;;  %v5577_v46 = vld [vmem:[#allocation9 + $0xfe0] sm:$0xff]  ;;  %v5574_v58 = vld [vmem:[#allocation9 + $0xfc8] sm:$0xff] }
 0x419   :  { %5435 = vmatprep.subr.bf16.mxu0 %v12113_v22  ;;  %5476 = vmatprep.subr.bf16.mxu1 %v12115_v23  ;;  %v5533_v22 = vld [vmem:[#allocation9 + $0xe80] sm:$0xff]  ;;  %v5578_v9 = vld [vmem:[#allocation9 + $0xfe8] sm:$0xff] }
 0x41a   :  { %v5537_v23 = vld [vmem:[#allocation9 + $0xea0] sm:$0xff] }
 0x41b   :  { %v12156_v2 = vcombine.low %v5533_v22, %v5537_v23 }
 0x41c   :  { %5436 = vmatpush1.bf16.msra.mxu0 %v12112_v38  ;;  %5477 = vmatpush1.bf16.msra.mxu1 %v12114_v39  ;;  %v12157_v38 = vcombine.high %v5533_v22, %v5537_v23  ;;  %v12159_v39 = vcombine.high %v5534_v36, %v5538_v26 }
 0x41d   :  { %5437 = vmatprep.subr.bf16.mxu0 %v12121_v19  ;;  %5478 = vmatprep.subr.bf16.mxu1 %v12123_v5  ;;  %v5541_v19 = vld [vmem:[#allocation9 + $0xec0] sm:$0xff] }
 0x41e   :  { %v3708_v4 = vpop.f32.mrb[88].mxu0  ;;  %v3749_v57 = vpop.f32.mrb[88].mxu1  ;;  %v5545_v5 = vld [vmem:[#allocation9 + $0xee0] sm:$0xff] }
 0x41f   :  { %v14301_v3 = vadd.f32 %v3708_v4, %v14269_v48  ;;  %v14304_v40 = vadd.f32 %v3749_v57, %v14272_v47  ;;  %v3710_v49 = vpop.f32.mrb[89].mxu0  ;;  %v3751_v13 = vpop.f32.mrb[89].mxu1  ;;  %v12137_v47 = vcombine.high %v5019_v24, %v5023_v55  ;;  %v5554_v4 = vld [vmem:[#allocation9 + $0xf28] sm:$0xff]  ;;  %v12164_v57 = vcombine.low %v5541_v19, %v5545_v5 }
 0x420   :  { %v14307_v1 = vadd.f32 %v3710_v49, %v14275_v18  ;;  %v14310_v6 = vadd.f32 %v3751_v13, %v14278_v41  ;;  %v3712_v7 = vpop.f32.mrb[90].mxu0  ;;  %v3753_v37 = vpop.f32.mrb[90].mxu1  ;;  %5438 = vmatpush1.bf16.msra.mxu0 %v12120_v35  ;;  %5479 = vmatpush1.bf16.msra.mxu1 %v12122_v63  ;;  %v12136_v18 = vcombine.low %v5019_v24, %v5023_v55  ;;  %v5550_v24 = vld [vmem:[#allocation9 + $0xf08] sm:$0xff]  ;;  %v5557_v49 = vld [vmem:[#allocation9 + $0xf40] sm:$0xff] }
 0x421   :  { %v3713_v56 = vpop.f32.mrb[91].mxu0  ;;  %v3754_v48 = vpop.f32.mrb[91].mxu1  ;;  %5439 = vmatprep.subr.bf16.mxu0 %v12129_v33  ;;  %5480 = vmatprep.subr.bf16.mxu1 %v12131_v61  ;;  %v12138_v41 = vcombine.low %v5020_v17, %v5024_v45  ;;  %v12165_v35 = vcombine.high %v5541_v19, %v5545_v5  ;;  %v12167_v63 = vcombine.high %v5542_v32, %v5546_v53  ;;  %v5549_v33 = vld [vmem:[#allocation9 + $0xf00] sm:$0xff]  ;;  %v5562_v7 = vld [vmem:[#allocation9 + $0xf68] sm:$0xff]  ;;  %v5519_v19 = vld [vmem:[#allocation9 + $0xe10] sm:$0xff] }
 0x422   :  { %v5553_v61 = vld [vmem:[#allocation9 + $0xf20] sm:$0xff]  ;;  %v12166_v55 = vcombine.low %v5542_v32, %v5546_v53  ;;  %v12175_v45 = vcombine.high %v5550_v24, %v5554_v4  ;;  %v5523_v5 = vld [vmem:[#allocation9 + $0xe30] sm:$0xff]  ;;  %v5520_v32 = vld [vmem:[#allocation9 + $0xe18] sm:$0xff] }
 0x423   :  { %v12173_v17 = vcombine.high %v5549_v33, %v5553_v61  ;;  %v5561_v13 = vld [vmem:[#allocation9 + $0xf60] sm:$0xff]  ;;  %v12172_v37 = vcombine.low %v5549_v33, %v5553_v61  ;;  %v5524_v53 = vld [vmem:[#allocation9 + $0xe38] sm:$0xff] }
 0x424   :  { %5440 = vmatpush1.bf16.msra.mxu0 %v12128_v34  ;;  %5481 = vmatpush1.bf16.msra.mxu1 %v12130_v42  ;;  %v5558_v34 = vld [vmem:[#allocation9 + $0xf48] sm:$0xff]  ;;  %v12174_v42 = vcombine.low %v5550_v24, %v5554_v4  ;;  %v12181_v56 = vcombine.high %v5557_v49, %v5561_v13  ;;  %v12180_v52 = vcombine.low %v5557_v49, %v5561_v13  ;;  %v5528_v33 = vld [vmem:[#allocation9 + $0xe58] sm:$0xff]  ;;  %v5539_v49 = vld [vmem:[#allocation9 + $0xeb0] sm:$0xff] }
 0x425   :  { %5441 = vmatprep.subr.bf16.mxu0 %v12137_v47  ;;  %5482 = vmatprep.subr.bf16.mxu1 %v12139_v62  ;;  %v12183_v48 = vcombine.high %v5558_v34, %v5562_v7  ;;  %v5565_v47 = vld [vmem:[#allocation9 + $0xf80] sm:$0xff]  ;;  %v12182_v51 = vcombine.low %v5558_v34, %v5562_v7  ;;  %v5532_v61 = vld [vmem:[#allocation9 + $0xe78] sm:$0xff]  ;;  %v12144_v24 = vcombine.low %v5519_v19, %v5523_v5 }
 0x426   :  { %v5569_v62 = vld [vmem:[#allocation9 + $0xfa0] sm:$0xff]  ;;  %v12146_v4 = vcombine.low %v5520_v32, %v5524_v53  ;;  %v5536_v13 = vld [vmem:[#allocation9 + $0xe98] sm:$0xff] }
 0x427   :  { %v12188_v22 = vcombine.low %v5565_v47, %v5569_v62  ;;  %v5540_v34 = vld [vmem:[#allocation9 + $0xeb8] sm:$0xff] }
 0x428   :  { %5442 = vmatpush1.bf16.msra.mxu0 %v12136_v18  ;;  %5483 = vmatpush1.bf16.msra.mxu1 %v12138_v41  ;;  %v12189_v18 = vcombine.high %v5565_v47, %v5569_v62  ;;  %v12191_v41 = vcombine.high %v5566_v50, %v5570_v8  ;;  %v5544_v47 = vld [vmem:[#allocation9 + $0xed8] sm:$0xff] }
 0x429   :  { %5904 = vmatprep.subr.bf16.mxu0 %v12141_v59  ;;  %5945 = vmatprep.subr.bf16.mxu1 %v12143_v28  ;;  %v5573_v59 = vld [vmem:[#allocation9 + $0xfc0] sm:$0xff]  ;;  %v5548_v62 = vld [vmem:[#allocation9 + $0xef8] sm:$0xff] }
 0x42b   :  { %5460 = vmatmul.mubr.bf16.vlgmr.msra.gmra.mrb[116].mxu0 %v14157_v14  ;;  %5501 = vmatmul.mubr.bf16.vlgmr.msra.gmra.mrb[116].mxu1 %v14157_v14 }
 0x42c   :  { %5905 = vmatpush1.bf16.msra.mxu0 %v12140_v60  ;;  %5946 = vmatpush1.bf16.msra.mxu1 %v12142_v10 }
 0x42d   :  { %5906 = vmatprep.subr.bf16.mxu0 %v12149_v11  ;;  %5947 = vmatprep.subr.bf16.mxu1 %v12151_v20 }
 0x42e   :  { %5936 = vmatprep.mubr.bf16.mxu0 %v13536_v54  ;;  %5977 = vmatprep.mubr.bf16.mxu1 %v13536_v54 }
 0x430   :  { %5907 = vmatpush1.bf16.msra.mxu0 %v12148_v0  ;;  %5948 = vmatpush1.bf16.msra.mxu1 %v12150_v30  ;;  %v12190_v30 = vcombine.low %v5566_v50, %v5570_v8  ;;  %v12162_v8 = vcombine.low %v5536_v13, %v5540_v34 }
 0x431   :  { %5908 = vmatprep.subr.bf16.mxu0 %v12157_v38  ;;  %5949 = vmatprep.subr.bf16.mxu1 %v12159_v39  ;;  %v12199_v39 = vcombine.high %v5574_v58, %v5578_v9 }
 0x434   :  { %5909 = vmatpush1.bf16.msra.mxu0 %v12156_v2  ;;  %5950 = vmatpush1.bf16.msra.mxu1 %v12158_v43  ;;  %v12145_v2 = vcombine.high %v5519_v19, %v5523_v5  ;;  %v12147_v43 = vcombine.high %v5520_v32, %v5524_v53  ;;  %v5568_v19 = vld [vmem:[#allocation9 + $0xf98] sm:$0xff] }
 0x435   :  { %5910 = vmatprep.subr.bf16.mxu0 %v12165_v35  ;;  %5951 = vmatprep.subr.bf16.mxu1 %v12167_v63  ;;  %v5527_v35 = vld [vmem:[#allocation9 + $0xe50] sm:$0xff]  ;;  %v5572_v5 = vld [vmem:[#allocation9 + $0xfb8] sm:$0xff] }
 0x436   :  { %v5531_v63 = vld [vmem:[#allocation9 + $0xe70] sm:$0xff] }
 0x437   :  { %v12152_v7 = vcombine.low %v5527_v35, %v5531_v63 }
 0x438   :  { %5911 = vmatpush1.bf16.msra.mxu0 %v12164_v57  ;;  %5952 = vmatpush1.bf16.msra.mxu1 %v12166_v55  ;;  %v14329_v57 = vrot.slane %v14157_v14, 4  ;;  %v12153_v55 = vcombine.high %v5527_v35, %v5531_v63  ;;  %v5579_v63 = vld [vmem:[#allocation9 + $0xff0] sm:$0xff] }
 0x439   :  { %5912 = vmatprep.subr.bf16.mxu0 %v12173_v17  ;;  %5953 = vmatprep.subr.bf16.mxu1 %v12175_v45  ;;  %v12155_v17 = vcombine.high %v5528_v33, %v5532_v61  ;;  %v5535_v45 = vld [vmem:[#allocation9 + $0xe90] sm:$0xff] }
 0x43a   :  { %v12161_v14 = vcombine.high %v5535_v45, %v5539_v49  ;;  %v12160_v50 = vcombine.low %v5535_v45, %v5539_v49 }
 0x43c   :  { %5913 = vmatpush1.bf16.msra.mxu0 %v12172_v37  ;;  %5954 = vmatpush1.bf16.msra.mxu1 %v12174_v42  ;;  %v12154_v37 = vcombine.low %v5528_v33, %v5532_v61  ;;  %v12163_v42 = vcombine.high %v5536_v13, %v5540_v34  ;;  %v5576_v33 = vld [vmem:[#allocation9 + $0xfd8] sm:$0xff] }
 0x43d   :  { %5914 = vmatprep.subr.bf16.mxu0 %v12181_v56  ;;  %5955 = vmatprep.subr.bf16.mxu1 %v12183_v48  ;;  %v5543_v56 = vld [vmem:[#allocation9 + $0xed0] sm:$0xff]  ;;  %v5580_v61 = vld [vmem:[#allocation9 + $0xff8] sm:$0xff] }
 0x43e   :  { %v3790_v28 = vpop.f32.mrb[92].mxu0  ;;  %v3831_v12 = vpop.f32.mrb[92].mxu1  ;;  %v5547_v48 = vld [vmem:[#allocation9 + $0xef0] sm:$0xff] }
 0x43f   :  { %v14317_v60 = vadd.f32 %v3790_v28, %v14285_v27  ;;  %v14320_v10 = vadd.f32 %v3831_v12, %v14288_v25  ;;  %v3792_v11 = vpop.f32.mrb[93].mxu0  ;;  %v3833_v20 = vpop.f32.mrb[93].mxu1  ;;  %v12197_v25 = vcombine.high %v5573_v59, %v5577_v46  ;;  %v5556_v28 = vld [vmem:[#allocation9 + $0xf38] sm:$0xff]  ;;  %v12168_v12 = vcombine.low %v5543_v56, %v5547_v48 }
 0x440   :  { %v14323_v23 = vadd.f32 %v3792_v11, %v14291_v29  ;;  %v14326_v36 = vadd.f32 %v3833_v20, %v14294_v31  ;;  %v3794_v26 = vpop.f32.mrb[94].mxu0  ;;  %v3835_v0 = vpop.f32.mrb[94].mxu1  ;;  %5915 = vmatpush1.bf16.msra.mxu0 %v12180_v52  ;;  %5956 = vmatpush1.bf16.msra.mxu1 %v12182_v51  ;;  %v12196_v29 = vcombine.low %v5573_v59, %v5577_v46  ;;  %v5552_v59 = vld [vmem:[#allocation9 + $0xf18] sm:$0xff]  ;;  %v5559_v11 = vld [vmem:[#allocation9 + $0xf50] sm:$0xff] }
 0x441   :  { %v3795_v38 = vpop.f32.mrb[95].mxu0  ;;  %v3836_v27 = vpop.f32.mrb[95].mxu1  ;;  %5916 = vmatprep.subr.bf16.mxu0 %v12189_v18  ;;  %5957 = vmatprep.subr.bf16.mxu1 %v12191_v41  ;;  %v12198_v31 = vcombine.low %v5574_v58, %v5578_v9  ;;  %v12169_v52 = vcombine.high %v5543_v56, %v5547_v48  ;;  %v12171_v51 = vcombine.high %v5544_v47, %v5548_v62  ;;  %v5551_v18 = vld [vmem:[#allocation9 + $0xf10] sm:$0xff]  ;;  %v5564_v26 = vld [vmem:[#allocation9 + $0xf78] sm:$0xff]  ;;  %v6076_v56 = vld [vmem:[#allocation9 + $0x1000] sm:$0xff] }
 0x442   :  { %v5555_v41 = vld [vmem:[#allocation9 + $0xf30] sm:$0xff]  ;;  %v12170_v46 = vcombine.low %v5544_v47, %v5548_v62  ;;  %v12179_v9 = vcombine.high %v5552_v59, %v5556_v28  ;;  %v6080_v48 = vld [vmem:[#allocation9 + $0x1020] sm:$0xff]  ;;  %v6077_v47 = vld [vmem:[#allocation9 + $0x1008] sm:$0xff] }
 0x443   :  { %v12177_v58 = vcombine.high %v5551_v18, %v5555_v41  ;;  %v5563_v20 = vld [vmem:[#allocation9 + $0xf70] sm:$0xff]  ;;  %v12176_v0 = vcombine.low %v5551_v18, %v5555_v41  ;;  %v6081_v62 = vld [vmem:[#allocation9 + $0x1028] sm:$0xff] }
 0x444   :  { %5917 = vmatpush1.bf16.msra.mxu0 %v12188_v22  ;;  %5958 = vmatpush1.bf16.msra.mxu1 %v12190_v30  ;;  %v5560_v22 = vld [vmem:[#allocation9 + $0xf58] sm:$0xff]  ;;  %v12178_v30 = vcombine.low %v5552_v59, %v5556_v28  ;;  %v12185_v38 = vcombine.high %v5559_v11, %v5563_v20  ;;  %v12184_v32 = vcombine.low %v5559_v11, %v5563_v20  ;;  %v6085_v18 = vld [vmem:[#allocation9 + $0x1048] sm:$0xff] }
 0x445   :  { %5918 = vmatprep.subr.bf16.mxu0 %v12197_v25  ;;  %5959 = vmatprep.subr.bf16.mxu1 %v12199_v39  ;;  %v12187_v27 = vcombine.high %v5560_v22, %v5564_v26  ;;  %v5567_v25 = vld [vmem:[#allocation9 + $0xf90] sm:$0xff]  ;;  %v12186_v53 = vcombine.low %v5560_v22, %v5564_v26  ;;  %v6089_v41 = vld [vmem:[#allocation9 + $0x1068] sm:$0xff]  ;;  %v12204_v59 = vcombine.low %v6076_v56, %v6080_v48 }
 0x446   :  { %v5571_v39 = vld [vmem:[#allocation9 + $0xfb0] sm:$0xff]  ;;  %v12206_v28 = vcombine.low %v6077_v47, %v6081_v62  ;;  %v6093_v11 = vld [vmem:[#allocation9 + $0x1088] sm:$0xff]  ;;  %v12214_v26 = vcombine.low %v6085_v18, %v6089_v41 }
 0x447   :  { %v12192_v45 = vcombine.low %v5567_v25, %v5571_v39  ;;  %v6097_v20 = vld [vmem:[#allocation9 + $0x10a8] sm:$0xff] }
 0x448   :  { %5919 = vmatpush1.bf16.msra.mxu0 %v12196_v29  ;;  %5960 = vmatpush1.bf16.msra.mxu1 %v12198_v31  ;;  %v12193_v29 = vcombine.high %v5567_v25, %v5571_v39  ;;  %v12195_v31 = vcombine.high %v5568_v19, %v5572_v5  ;;  %v6101_v25 = vld [vmem:[#allocation9 + $0x10c8] sm:$0xff] }
 0x449   :  { %5986 = vmatprep.subr.bf16.mxu0 %v12145_v2  ;;  %6027 = vmatprep.subr.bf16.mxu1 %v12147_v43  ;;  %v5575_v2 = vld [vmem:[#allocation9 + $0xfd0] sm:$0xff]  ;;  %v6105_v39 = vld [vmem:[#allocation9 + $0x10e8] sm:$0xff] }
 0x44b   :  { %5937 = vmatmul.mubr.bf16.vlgmr.msra.gmra.mrb[120].mxu0 %v14329_v57  ;;  %5978 = vmatmul.mubr.bf16.vlgmr.msra.gmra.mrb[120].mxu1 %v14329_v57 }
 0x44c   :  { %5987 = vmatpush1.bf16.msra.mxu0 %v12144_v24  ;;  %6028 = vmatpush1.bf16.msra.mxu1 %v12146_v4 }
 0x44d   :  { %5988 = vmatprep.subr.bf16.mxu0 %v12153_v55  ;;  %6029 = vmatprep.subr.bf16.mxu1 %v12155_v17 }
 0x44e   :  { %6018 = vmatprep.mubr.bf16.mxu0 %v13536_v54  ;;  %6059 = vmatprep.mubr.bf16.mxu1 %v13536_v54 }
 0x450   :  { %5989 = vmatpush1.bf16.msra.mxu0 %v12152_v7  ;;  %6030 = vmatpush1.bf16.msra.mxu1 %v12154_v37  ;;  %v12194_v37 = vcombine.low %v5568_v19, %v5572_v5 }
 0x451   :  { %5990 = vmatprep.subr.bf16.mxu0 %v12161_v14  ;;  %6031 = vmatprep.subr.bf16.mxu1 %v12163_v42  ;;  %v12203_v42 = vcombine.high %v5576_v33, %v5580_v61 }
 0x454   :  { %5991 = vmatpush1.bf16.msra.mxu0 %v12160_v50  ;;  %6032 = vmatpush1.bf16.msra.mxu1 %v12162_v8  ;;  %v12205_v50 = vcombine.high %v6076_v56, %v6080_v48  ;;  %v12207_v8 = vcombine.high %v6077_v47, %v6081_v62  ;;  %v6129_v56 = vld [vmem:[#allocation9 + $0x11a8] sm:$0xff] }
 0x455   :  { %5992 = vmatprep.subr.bf16.mxu0 %v12169_v52  ;;  %6033 = vmatprep.subr.bf16.mxu1 %v12171_v51  ;;  %v6084_v52 = vld [vmem:[#allocation9 + $0x1040] sm:$0xff] }
 0x456   :  { %v6088_v51 = vld [vmem:[#allocation9 + $0x1060] sm:$0xff] }
 0x457   :  { %v12212_v22 = vcombine.low %v6084_v52, %v6088_v51 }
 0x458   :  { %5993 = vmatpush1.bf16.msra.mxu0 %v12168_v12  ;;  %6034 = vmatpush1.bf16.msra.mxu1 %v12170_v46  ;;  %v12213_v12 = vcombine.high %v6084_v52, %v6088_v51  ;;  %v12215_v46 = vcombine.high %v6085_v18, %v6089_v41  ;;  %v6136_v52 = vld [vmem:[#allocation9 + $0x11e0] sm:$0xff]  ;;  %v6133_v51 = vld [vmem:[#allocation9 + $0x11c8] sm:$0xff] }
 0x459   :  { %5994 = vmatprep.subr.bf16.mxu0 %v12177_v58  ;;  %6035 = vmatprep.subr.bf16.mxu1 %v12179_v9  ;;  %v6092_v58 = vld [vmem:[#allocation9 + $0x1080] sm:$0xff]  ;;  %v6137_v18 = vld [vmem:[#allocation9 + $0x11e8] sm:$0xff] }
 0x45a   :  { %v6096_v9 = vld [vmem:[#allocation9 + $0x10a0] sm:$0xff] }
 0x45b   :  { %v12220_v19 = vcombine.low %v6092_v58, %v6096_v9 }
 0x45c   :  { %5995 = vmatpush1.bf16.msra.mxu0 %v12176_v0  ;;  %6036 = vmatpush1.bf16.msra.mxu1 %v12178_v30  ;;  %v12221_v0 = vcombine.high %v6092_v58, %v6096_v9  ;;  %v12223_v30 = vcombine.high %v6093_v11, %v6097_v20 }
 0x45d   :  { %5996 = vmatprep.subr.bf16.mxu0 %v12185_v38  ;;  %6037 = vmatprep.subr.bf16.mxu1 %v12187_v27  ;;  %v6100_v38 = vld [vmem:[#allocation9 + $0x10c0] sm:$0xff] }
 0x45e   :  { %v4264_v43 = vpop.f32.mrb[96].mxu0  ;;  %v4305_v35 = vpop.f32.mrb[96].mxu1  ;;  %v6104_v27 = vld [vmem:[#allocation9 + $0x10e0] sm:$0xff] }
 0x45f   :  { %v14336_v24 = vadd.f32 %v4264_v43, %v14301_v3  ;;  %v14339_v4 = vadd.f32 %v4305_v35, %v14304_v40  ;;  %v4266_v55 = vpop.f32.mrb[97].mxu0  ;;  %v4307_v17 = vpop.f32.mrb[97].mxu1  ;;  %v12201_v40 = vcombine.high %v5575_v2, %v5579_v63  ;;  %v12229_v5 = vcombine.high %v6100_v38, %v6104_v27 }
 0x460   :  { %v14342_v49 = vadd.f32 %v4266_v55, %v14307_v1  ;;  %v14345_v13 = vadd.f32 %v4307_v17, %v14310_v6  ;;  %v4268_v34 = vpop.f32.mrb[98].mxu0  ;;  %v4309_v7 = vpop.f32.mrb[98].mxu1  ;;  %5997 = vmatpush1.bf16.msra.mxu0 %v12184_v32  ;;  %6038 = vmatpush1.bf16.msra.mxu1 %v12186_v53  ;;  %v12200_v1 = vcombine.low %v5575_v2, %v5579_v63  ;;  %v6108_v53 = vld [vmem:[#allocation9 + $0x1100] sm:$0xff]  ;;  %v6113_v2 = vld [vmem:[#allocation9 + $0x1128] sm:$0xff] }
 0x461   :  { %v4269_v14 = vpop.f32.mrb[99].mxu0  ;;  %v4310_v3 = vpop.f32.mrb[99].mxu1  ;;  %5998 = vmatprep.subr.bf16.mxu0 %v12193_v29  ;;  %6039 = vmatprep.subr.bf16.mxu1 %v12195_v31  ;;  %v12202_v6 = vcombine.low %v5576_v33, %v5580_v61  ;;  %v12231_v32 = vcombine.high %v6101_v25, %v6105_v39  ;;  %v6112_v29 = vld [vmem:[#allocation9 + $0x1120] sm:$0xff]  ;;  %v6109_v31 = vld [vmem:[#allocation9 + $0x1108] sm:$0xff]  ;;  %v12228_v43 = vcombine.low %v6100_v38, %v6104_v27  ;;  %v6082_v38 = vld [vmem:[#allocation9 + $0x1030] sm:$0xff] }
 0x462   :  { %v12230_v35 = vcombine.low %v6101_v25, %v6105_v39  ;;  %v12237_v63 = vcombine.high %v6108_v53, %v6112_v29  ;;  %v12239_v33 = vcombine.high %v6109_v31, %v6113_v2  ;;  %v6116_v61 = vld [vmem:[#allocation9 + $0x1140] sm:$0xff]  ;;  %v6117_v17 = vld [vmem:[#allocation9 + $0x1148] sm:$0xff]  ;;  %v12236_v34 = vcombine.low %v6108_v53, %v6112_v29  ;;  %v6079_v27 = vld [vmem:[#allocation9 + $0x1018] sm:$0xff] }
 0x463   :  { %v6120_v55 = vld [vmem:[#allocation9 + $0x1160] sm:$0xff]  ;;  %v12238_v7 = vcombine.low %v6109_v31, %v6113_v2  ;;  %v6083_v25 = vld [vmem:[#allocation9 + $0x1038] sm:$0xff] }
 0x464   :  { %5999 = vmatpush1.bf16.msra.mxu0 %v12192_v45  ;;  %6040 = vmatpush1.bf16.msra.mxu1 %v12194_v37  ;;  %v6121_v45 = vld [vmem:[#allocation9 + $0x1168] sm:$0xff]  ;;  %v12245_v37 = vcombine.high %v6116_v61, %v6120_v55  ;;  %v6124_v3 = vld [vmem:[#allocation9 + $0x1180] sm:$0xff]  ;;  %v12244_v48 = vcombine.low %v6116_v61, %v6120_v55  ;;  %v6091_v53 = vld [vmem:[#allocation9 + $0x1078] sm:$0xff]  ;;  %v12210_v31 = vcombine.low %v6079_v27, %v6083_v25 }
 0x465   :  { %6000 = vmatprep.subr.bf16.mxu0 %v12201_v40  ;;  %6041 = vmatprep.subr.bf16.mxu1 %v12203_v42  ;;  %v12247_v14 = vcombine.high %v6117_v17, %v6121_v45  ;;  %v6128_v40 = vld [vmem:[#allocation9 + $0x11a0] sm:$0xff]  ;;  %v6125_v42 = vld [vmem:[#allocation9 + $0x1188] sm:$0xff]  ;;  %v12246_v47 = vcombine.low %v6117_v17, %v6121_v45  ;;  %v6099_v61 = vld [vmem:[#allocation9 + $0x10b8] sm:$0xff] }
 0x466   :  { %v12253_v62 = vcombine.high %v6124_v3, %v6128_v40 }
 0x468   :  { %6001 = vmatpush1.bf16.msra.mxu0 %v12200_v1  ;;  %6042 = vmatpush1.bf16.msra.mxu1 %v12202_v6  ;;  %v12255_v1 = vcombine.high %v6125_v42, %v6129_v56  ;;  %v6132_v6 = vld [vmem:[#allocation9 + $0x11c0] sm:$0xff] }
 0x469   :  { %6460 = vmatprep.subr.bf16.mxu0 %v12205_v50  ;;  %6501 = vmatprep.subr.bf16.mxu1 %v12207_v8 }
 0x46b   :  { %6019 = vmatmul.mubr.bf16.vlgmr.msra.gmra.mrb[124].mxu0 %v14329_v57  ;;  %6060 = vmatmul.mubr.bf16.vlgmr.msra.gmra.mrb[124].mxu1 %v14329_v57  ;;  %v12222_v57 = vcombine.low %v6093_v11, %v6097_v20 }
 0x46c   :  { %6461 = vmatpush1.bf16.msra.mxu0 %v12204_v59  ;;  %6502 = vmatpush1.bf16.msra.mxu1 %v12206_v28 }
 0x46d   :  { %6462 = vmatprep.subr.bf16.mxu0 %v12213_v12  ;;  %6503 = vmatprep.subr.bf16.mxu1 %v12215_v46  ;;  %v12252_v46 = vcombine.low %v6124_v3, %v6128_v40  ;;  %v6107_v3 = vld [vmem:[#allocation9 + $0x10f8] sm:$0xff] }
 0x46e   :  { %6492 = vmatprep.mubr.bf16.mxu0 %v13536_v54  ;;  %6533 = vmatprep.mubr.bf16.mxu1 %v13536_v54 }
 0x470   :  { %6463 = vmatpush1.bf16.msra.mxu0 %v12212_v22  ;;  %6504 = vmatpush1.bf16.msra.mxu1 %v12214_v26  ;;  %v12254_v22 = vcombine.low %v6125_v42, %v6129_v56 }
 0x471   :  { %6464 = vmatprep.subr.bf16.mxu0 %v12221_v0  ;;  %6505 = vmatprep.subr.bf16.mxu1 %v12223_v30  ;;  %v12263_v0 = vcombine.high %v6133_v51, %v6137_v18  ;;  %v6078_v30 = vld [vmem:[#allocation9 + $0x1010] sm:$0xff] }
 0x472   :  { %v12209_v39 = vcombine.high %v6078_v30, %v6082_v38  ;;  %v12208_v29 = vcombine.low %v6078_v30, %v6082_v38  ;;  %v6131_v30 = vld [vmem:[#allocation9 + $0x11b8] sm:$0xff] }
 0x474   :  { %6465 = vmatpush1.bf16.msra.mxu0 %v12220_v19  ;;  %6506 = vmatpush1.bf16.msra.mxu1 %v12222_v57  ;;  %v12211_v19 = vcombine.high %v6079_v27, %v6083_v25  ;;  %v6086_v57 = vld [vmem:[#allocation9 + $0x1050] sm:$0xff] }
 0x475   :  { %6466 = vmatprep.subr.bf16.mxu0 %v12229_v5  ;;  %6507 = vmatprep.subr.bf16.mxu1 %v12231_v32  ;;  %v6090_v5 = vld [vmem:[#allocation9 + $0x1070] sm:$0xff]  ;;  %v6087_v32 = vld [vmem:[#allocation9 + $0x1058] sm:$0xff] }
 0x476   :  { %v12217_v2 = vcombine.high %v6086_v57, %v6090_v5  ;;  %v12216_v55 = vcombine.low %v6086_v57, %v6090_v5  ;;  %v12218_v17 = vcombine.low %v6087_v32, %v6091_v53  ;;  %v6138_v57 = vld [vmem:[#allocation9 + $0x11f0] sm:$0xff]  ;;  %v6135_v5 = vld [vmem:[#allocation9 + $0x11d8] sm:$0xff] }
 0x478   :  { %6467 = vmatpush1.bf16.msra.mxu0 %v12228_v43  ;;  %6508 = vmatpush1.bf16.msra.mxu1 %v12230_v35  ;;  %v12219_v43 = vcombine.high %v6087_v32, %v6091_v53  ;;  %v6094_v35 = vld [vmem:[#allocation9 + $0x1090] sm:$0xff]  ;;  %v6139_v32 = vld [vmem:[#allocation9 + $0x11f8] sm:$0xff] }
 0x479   :  { %6468 = vmatprep.subr.bf16.mxu0 %v12237_v63  ;;  %6509 = vmatprep.subr.bf16.mxu1 %v12239_v33  ;;  %v6098_v63 = vld [vmem:[#allocation9 + $0x10b0] sm:$0xff]  ;;  %v6095_v33 = vld [vmem:[#allocation9 + $0x1098] sm:$0xff] }
 0x47a   :  { %v12225_v45 = vcombine.high %v6094_v35, %v6098_v63  ;;  %v12224_v40 = vcombine.low %v6094_v35, %v6098_v63  ;;  %v12226_v42 = vcombine.low %v6095_v33, %v6099_v61 }
 0x47c   :  { %6469 = vmatpush1.bf16.msra.mxu0 %v12236_v34  ;;  %6510 = vmatpush1.bf16.msra.mxu1 %v12238_v7  ;;  %v12227_v34 = vcombine.high %v6095_v33, %v6099_v61  ;;  %v6102_v7 = vld [vmem:[#allocation9 + $0x10d0] sm:$0xff] }
 0x47d   :  { %6470 = vmatprep.subr.bf16.mxu0 %v12245_v37  ;;  %6511 = vmatprep.subr.bf16.mxu1 %v12247_v14  ;;  %v6106_v37 = vld [vmem:[#allocation9 + $0x10f0] sm:$0xff]  ;;  %v6103_v14 = vld [vmem:[#allocation9 + $0x10d8] sm:$0xff] }
 0x47e   :  { %v4346_v50 = vpop.f32.mrb[100].mxu0  ;;  %v4387_v8 = vpop.f32.mrb[100].mxu1  ;;  %v12233_v56 = vcombine.high %v6102_v7, %v6106_v37 }
 0x47f   :  { %v14352_v41 = vadd.f32 %v4346_v50, %v14317_v60  ;;  %v14355_v59 = vadd.f32 %v4387_v8, %v14320_v10  ;;  %v4348_v28 = vpop.f32.mrb[101].mxu0  ;;  %v4389_v12 = vpop.f32.mrb[101].mxu1  ;;  %v12261_v10 = vcombine.high %v6132_v6, %v6136_v52  ;;  %v12232_v50 = vcombine.low %v6102_v7, %v6106_v37  ;;  %v6636_v7 = vld [vmem:[#allocation9 + $0x1220] sm:$0xff]  ;;  %v6633_v37 = vld [vmem:[#allocation9 + $0x1208] sm:$0xff] }
 0x480   :  { %v14358_v58 = vadd.f32 %v4348_v28, %v14323_v23  ;;  %v14361_v9 = vadd.f32 %v4389_v12, %v14326_v36  ;;  %v4350_v11 = vpop.f32.mrb[102].mxu0  ;;  %v4391_v20 = vpop.f32.mrb[102].mxu1  ;;  %6471 = vmatpush1.bf16.msra.mxu0 %v12244_v48  ;;  %6512 = vmatpush1.bf16.msra.mxu1 %v12246_v47  ;;  %v12260_v23 = vcombine.low %v6132_v6, %v6136_v52  ;;  %v6110_v47 = vld [vmem:[#allocation9 + $0x1110] sm:$0xff]  ;;  %v6115_v6 = vld [vmem:[#allocation9 + $0x1138] sm:$0xff] }
 0x481   :  { %v4351_v26 = vpop.f32.mrb[103].mxu0  ;;  %v4392_v60 = vpop.f32.mrb[103].mxu1  ;;  %6472 = vmatprep.subr.bf16.mxu0 %v12253_v62  ;;  %6513 = vmatprep.subr.bf16.mxu1 %v12255_v1  ;;  %v12262_v36 = vcombine.low %v6133_v51, %v6137_v18  ;;  %v12235_v48 = vcombine.high %v6103_v14, %v6107_v3  ;;  %v6114_v62 = vld [vmem:[#allocation9 + $0x1130] sm:$0xff]  ;;  %v6111_v1 = vld [vmem:[#allocation9 + $0x1118] sm:$0xff]  ;;  %v12234_v8 = vcombine.low %v6103_v14, %v6107_v3  ;;  %v6637_v14 = vld [vmem:[#allocation9 + $0x1228] sm:$0xff] }
 0x482   :  { %v12241_v52 = vcombine.high %v6110_v47, %v6114_v62  ;;  %v12243_v51 = vcombine.high %v6111_v1, %v6115_v6  ;;  %v6118_v18 = vld [vmem:[#allocation9 + $0x1150] sm:$0xff]  ;;  %v6119_v12 = vld [vmem:[#allocation9 + $0x1158] sm:$0xff]  ;;  %v12240_v11 = vcombine.low %v6110_v47, %v6114_v62  ;;  %v12242_v20 = vcombine.low %v6111_v1, %v6115_v6  ;;  %v6645_v47 = vld [vmem:[#allocation9 + $0x1268] sm:$0xff] }
 0x483   :  { %v6122_v28 = vld [vmem:[#allocation9 + $0x1170] sm:$0xff]  ;;  %v12270_v1 = vcombine.low %v6633_v37, %v6637_v14 }
 0x484   :  { %6473 = vmatpush1.bf16.msra.mxu0 %v12252_v46  ;;  %6514 = vmatpush1.bf16.msra.mxu1 %v12254_v22  ;;  %v6123_v46 = vld [vmem:[#allocation9 + $0x1178] sm:$0xff]  ;;  %v12249_v22 = vcombine.high %v6118_v18, %v6122_v28  ;;  %v6126_v60 = vld [vmem:[#allocation9 + $0x1190] sm:$0xff]  ;;  %v12248_v38 = vcombine.low %v6118_v18, %v6122_v28  ;;  %v6653_v18 = vld [vmem:[#allocation9 + $0x12a8] sm:$0xff] }
 0x485   :  { %6474 = vmatprep.subr.bf16.mxu0 %v12261_v10  ;;  %6515 = vmatprep.subr.bf16.mxu1 %v12263_v0  ;;  %v12251_v26 = vcombine.high %v6119_v12, %v6123_v46  ;;  %v6130_v10 = vld [vmem:[#allocation9 + $0x11b0] sm:$0xff]  ;;  %v6127_v0 = vld [vmem:[#allocation9 + $0x1198] sm:$0xff]  ;;  %v12250_v27 = vcombine.low %v6119_v12, %v6123_v46 }
 0x486   :  { %v12257_v25 = vcombine.high %v6126_v60, %v6130_v10 }
 0x488   :  { %6475 = vmatpush1.bf16.msra.mxu0 %v12260_v23  ;;  %6516 = vmatpush1.bf16.msra.mxu1 %v12262_v36  ;;  %v12259_v23 = vcombine.high %v6127_v0, %v6131_v30  ;;  %v6134_v36 = vld [vmem:[#allocation9 + $0x11d0] sm:$0xff] }
 0x489   :  { %6542 = vmatprep.subr.bf16.mxu0 %v12209_v39  ;;  %6583 = vmatprep.subr.bf16.mxu1 %v12211_v19 }
 0x48b   :  { %6493 = vmatmul.mubr.bf16.vlgmr.msra.gmra.mrb[128].mxu0 %v14173_v44  ;;  %6534 = vmatmul.mubr.bf16.vlgmr.msra.gmra.mrb[128].mxu1 %v14173_v44 }
 0x48c   :  { %6543 = vmatpush1.bf16.msra.mxu0 %v12208_v29  ;;  %6584 = vmatpush1.bf16.msra.mxu1 %v12210_v31 }
 0x48d   :  { %6544 = vmatprep.subr.bf16.mxu0 %v12217_v2  ;;  %6585 = vmatprep.subr.bf16.mxu1 %v12219_v43  ;;  %v12256_v43 = vcombine.low %v6126_v60, %v6130_v10  ;;  %v6661_v60 = vld [vmem:[#allocation9 + $0x12e8] sm:$0xff] }
 0x48e   :  { %6574 = vmatprep.mubr.bf16.mxu0 %v13536_v54  ;;  %6615 = vmatprep.mubr.bf16.mxu1 %v13536_v54 }
 0x490   :  { %6545 = vmatpush1.bf16.msra.mxu0 %v12216_v55  ;;  %6586 = vmatpush1.bf16.msra.mxu1 %v12218_v17  ;;  %v12258_v55 = vcombine.low %v6127_v0, %v6131_v30 }
 0x491   :  { %6546 = vmatprep.subr.bf16.mxu0 %v12225_v45  ;;  %6587 = vmatprep.subr.bf16.mxu1 %v12227_v34  ;;  %v12267_v45 = vcombine.high %v6135_v5, %v6139_v32  ;;  %v6632_v34 = vld [vmem:[#allocation9 + $0x1200] sm:$0xff] }
 0x492   :  { %v12269_v3 = vcombine.high %v6632_v34, %v6636_v7  ;;  %v12268_v62 = vcombine.low %v6632_v34, %v6636_v7  ;;  %v6685_v34 = vld [vmem:[#allocation9 + $0x13a8] sm:$0xff] }
 0x494   :  { %6547 = vmatpush1.bf16.msra.mxu0 %v12224_v40  ;;  %6588 = vmatpush1.bf16.msra.mxu1 %v12226_v42  ;;  %v12271_v40 = vcombine.high %v6633_v37, %v6637_v14  ;;  %v6640_v42 = vld [vmem:[#allocation9 + $0x1240] sm:$0xff] }
 0x495   :  { %6548 = vmatprep.subr.bf16.mxu0 %v12233_v56  ;;  %6589 = vmatprep.subr.bf16.mxu1 %v12235_v48  ;;  %v6644_v56 = vld [vmem:[#allocation9 + $0x1260] sm:$0xff]  ;;  %v6641_v48 = vld [vmem:[#allocation9 + $0x1248] sm:$0xff] }
 0x496   :  { %v12277_v6 = vcombine.high %v6640_v42, %v6644_v56  ;;  %v12276_v28 = vcombine.low %v6640_v42, %v6644_v56  ;;  %v12278_v12 = vcombine.low %v6641_v48, %v6645_v47  ;;  %v6692_v42 = vld [vmem:[#allocation9 + $0x13e0] sm:$0xff]  ;;  %v6689_v56 = vld [vmem:[#allocation9 + $0x13c8] sm:$0xff] }
 0x498   :  { %6549 = vmatpush1.bf16.msra.mxu0 %v12232_v50  ;;  %6590 = vmatpush1.bf16.msra.mxu1 %v12234_v8  ;;  %v12279_v50 = vcombine.high %v6641_v48, %v6645_v47  ;;  %v6648_v8 = vld [vmem:[#allocation9 + $0x1280] sm:$0xff]  ;;  %v6693_v48 = vld [vmem:[#allocation9 + $0x13e8] sm:$0xff] }
 0x499   :  { %6550 = vmatprep.subr.bf16.mxu0 %v12241_v52  ;;  %6591 = vmatprep.subr.bf16.mxu1 %v12243_v51  ;;  %v6652_v52 = vld [vmem:[#allocation9 + $0x12a0] sm:$0xff]  ;;  %v6649_v51 = vld [vmem:[#allocation9 + $0x1288] sm:$0xff] }
 0x49a   :  { %v12285_v46 = vcombine.high %v6648_v8, %v6652_v52  ;;  %v12284_v10 = vcombine.low %v6648_v8, %v6652_v52  ;;  %v12286_v0 = vcombine.low %v6649_v51, %v6653_v18 }
 0x49c   :  { %6551 = vmatpush1.bf16.msra.mxu0 %v12240_v11  ;;  %6592 = vmatpush1.bf16.msra.mxu1 %v12242_v20  ;;  %v12287_v11 = vcombine.high %v6649_v51, %v6653_v18  ;;  %v6656_v20 = vld [vmem:[#allocation9 + $0x12c0] sm:$0xff] }
 0x49d   :  { %6552 = vmatprep.subr.bf16.mxu0 %v12249_v22  ;;  %6593 = vmatprep.subr.bf16.mxu1 %v12251_v26  ;;  %v6660_v22 = vld [vmem:[#allocation9 + $0x12e0] sm:$0xff]  ;;  %v6657_v26 = vld [vmem:[#allocation9 + $0x12c8] sm:$0xff] }
 0x49e   :  { %v4823_v39 = vpop.f32.mrb[104].mxu0  ;;  %v4864_v19 = vpop.f32.mrb[104].mxu1  ;;  %v12293_v30 = vcombine.high %v6656_v20, %v6660_v22 }
 0x49f   :  { %v14368_v53 = vadd.f32 %v4823_v39, %v14336_v24  ;;  %v14371_v29 = vadd.f32 %v4864_v19, %v14339_v4  ;;  %v4825_v31 = vpop.f32.mrb[105].mxu0  ;;  %v4866_v2 = vpop.f32.mrb[105].mxu1  ;;  %v12265_v4 = vcombine.high %v6134_v36, %v6138_v57  ;;  %v12292_v39 = vcombine.low %v6656_v20, %v6660_v22  ;;  %v6638_v20 = vld [vmem:[#allocation9 + $0x1230] sm:$0xff]  ;;  %v6635_v22 = vld [vmem:[#allocation9 + $0x1218] sm:$0xff] }
 0x4a0   :  { %v14374_v35 = vadd.f32 %v4825_v31, %v14342_v49  ;;  %v14377_v63 = vadd.f32 %v4866_v2, %v14345_v13  ;;  %v4827_v33 = vpop.f32.mrb[106].mxu0  ;;  %v4868_v61 = vpop.f32.mrb[106].mxu1  ;;  %6553 = vmatpush1.bf16.msra.mxu0 %v12248_v38  ;;  %6594 = vmatpush1.bf16.msra.mxu1 %v12250_v27  ;;  %v12264_v49 = vcombine.low %v6134_v36, %v6138_v57  ;;  %v6664_v27 = vld [vmem:[#allocation9 + $0x1300] sm:$0xff]  ;;  %v6669_v36 = vld [vmem:[#allocation9 + $0x1328] sm:$0xff] }
 0x4a1   :  { %v4828_v17 = vpop.f32.mrb[107].mxu0  ;;  %v4869_v24 = vpop.f32.mrb[107].mxu1  ;;  %6554 = vmatprep.subr.bf16.mxu0 %v12257_v25  ;;  %6595 = vmatprep.subr.bf16.mxu1 %v12259_v23  ;;  %v12266_v13 = vcombine.low %v6135_v5, %v6139_v32  ;;  %v12295_v38 = vcombine.high %v6657_v26, %v6661_v60  ;;  %v6668_v25 = vld [vmem:[#allocation9 + $0x1320] sm:$0xff]  ;;  %v6665_v23 = vld [vmem:[#allocation9 + $0x1308] sm:$0xff]  ;;  %v12294_v19 = vcombine.low %v6657_v26, %v6661_v60  ;;  %v6639_v26 = vld [vmem:[#allocation9 + $0x1238] sm:$0xff] }
 0x4a2   :  { %v12301_v57 = vcombine.high %v6664_v27, %v6668_v25  ;;  %v12303_v5 = vcombine.high %v6665_v23, %v6669_v36  ;;  %v6672_v32 = vld [vmem:[#allocation9 + $0x1340] sm:$0xff]  ;;  %v6673_v2 = vld [vmem:[#allocation9 + $0x1348] sm:$0xff]  ;;  %v12300_v33 = vcombine.low %v6664_v27, %v6668_v25  ;;  %v12302_v61 = vcombine.low %v6665_v23, %v6669_v36  ;;  %v6647_v27 = vld [vmem:[#allocation9 + $0x1278] sm:$0xff] }
 0x4a3   :  { %v6676_v31 = vld [vmem:[#allocation9 + $0x1360] sm:$0xff]  ;;  %v12274_v23 = vcombine.low %v6635_v22, %v6639_v26  ;;  %v14396_v36 = vrot.slane %v14173_v44, 4 }
 0x4a4   :  { %6555 = vmatpush1.bf16.msra.mxu0 %v12256_v43  ;;  %6596 = vmatpush1.bf16.msra.mxu1 %v12258_v55  ;;  %v6677_v43 = vld [vmem:[#allocation9 + $0x1368] sm:$0xff]  ;;  %v12309_v55 = vcombine.high %v6672_v32, %v6676_v31  ;;  %v6680_v24 = vld [vmem:[#allocation9 + $0x1380] sm:$0xff]  ;;  %v12308_v7 = vcombine.low %v6672_v32, %v6676_v31  ;;  %v6651_v32 = vld [vmem:[#allocation9 + $0x1298] sm:$0xff] }
 0x4a5   :  { %6556 = vmatprep.subr.bf16.mxu0 %v12265_v4  ;;  %6597 = vmatprep.subr.bf16.mxu1 %v12267_v45  ;;  %v12311_v17 = vcombine.high %v6673_v2, %v6677_v43  ;;  %v6684_v4 = vld [vmem:[#allocation9 + $0x13a0] sm:$0xff]  ;;  %v6681_v45 = vld [vmem:[#allocation9 + $0x1388] sm:$0xff]  ;;  %v12310_v37 = vcombine.low %v6673_v2, %v6677_v43  ;;  %v6655_v31 = vld [vmem:[#allocation9 + $0x12b8] sm:$0xff] }
 0x4a6   :  { %v12317_v14 = vcombine.high %v6680_v24, %v6684_v4 }
 0x4a8   :  { %6557 = vmatpush1.bf16.msra.mxu0 %v12264_v49  ;;  %6598 = vmatpush1.bf16.msra.mxu1 %v12266_v13  ;;  %v12319_v49 = vcombine.high %v6681_v45, %v6685_v34  ;;  %v6688_v13 = vld [vmem:[#allocation9 + $0x13c0] sm:$0xff] }
 0x4a9   :  { %7019 = vmatprep.subr.bf16.mxu0 %v12269_v3  ;;  %7060 = vmatprep.subr.bf16.mxu1 %v12271_v40 }
 0x4ab   :  { %6575 = vmatmul.mubr.bf16.vlgmr.msra.gmra.mrb[132].mxu0 %v14173_v44  ;;  %6616 = vmatmul.mubr.bf16.vlgmr.msra.gmra.mrb[132].mxu1 %v14173_v44 }
 0x4ac   :  { %7020 = vmatpush1.bf16.msra.mxu0 %v12268_v62  ;;  %7061 = vmatpush1.bf16.msra.mxu1 %v12270_v1 }
 0x4ad   :  { %7021 = vmatprep.subr.bf16.mxu0 %v12277_v6  ;;  %7062 = vmatprep.subr.bf16.mxu1 %v12279_v50  ;;  %v12316_v50 = vcombine.low %v6680_v24, %v6684_v4  ;;  %v6663_v24 = vld [vmem:[#allocation9 + $0x12f8] sm:$0xff] }
 0x4ae   :  { %7051 = vmatprep.mubr.bf16.mxu0 %v13536_v54  ;;  %7092 = vmatprep.mubr.bf16.mxu1 %v13536_v54 }
 0x4b0   :  { %7022 = vmatpush1.bf16.msra.mxu0 %v12276_v28  ;;  %7063 = vmatpush1.bf16.msra.mxu1 %v12278_v12  ;;  %v12318_v28 = vcombine.low %v6681_v45, %v6685_v34  ;;  %v12290_v45 = vcombine.low %v6651_v32, %v6655_v31 }
 0x4b1   :  { %7023 = vmatprep.subr.bf16.mxu0 %v12285_v46  ;;  %7064 = vmatprep.subr.bf16.mxu1 %v12287_v11  ;;  %v12327_v46 = vcombine.high %v6689_v56, %v6693_v48  ;;  %v6634_v11 = vld [vmem:[#allocation9 + $0x1210] sm:$0xff] }
 0x4b2   :  { %v12273_v60 = vcombine.high %v6634_v11, %v6638_v20  ;;  %v12272_v25 = vcombine.low %v6634_v11, %v6638_v20  ;;  %v6687_v11 = vld [vmem:[#allocation9 + $0x13b8] sm:$0xff] }
 0x4b4   :  { %7024 = vmatpush1.bf16.msra.mxu0 %v12284_v10  ;;  %7065 = vmatpush1.bf16.msra.mxu1 %v12286_v0  ;;  %v12275_v10 = vcombine.high %v6635_v22, %v6639_v26  ;;  %v6642_v0 = vld [vmem:[#allocation9 + $0x1250] sm:$0xff] }
 0x4b5   :  { %7025 = vmatprep.subr.bf16.mxu0 %v12293_v30  ;;  %7066 = vmatprep.subr.bf16.mxu1 %v12295_v38  ;;  %v6646_v30 = vld [vmem:[#allocation9 + $0x1270] sm:$0xff]  ;;  %v6643_v38 = vld [vmem:[#allocation9 + $0x1258] sm:$0xff] }
 0x4b6   :  { %v12280_v2 = vcombine.low %v6642_v0, %v6646_v30  ;;  %v12282_v43 = vcombine.low %v6643_v38, %v6647_v27 }
 0x4b8   :  { %7026 = vmatpush1.bf16.msra.mxu0 %v12292_v39  ;;  %7067 = vmatpush1.bf16.msra.mxu1 %v12294_v19  ;;  %v12281_v39 = vcombine.high %v6642_v0, %v6646_v30  ;;  %v12283_v19 = vcombine.high %v6643_v38, %v6647_v27  ;;  %v6694_v0 = vld [vmem:[#allocation9 + $0x13f0] sm:$0xff]  ;;  %v6691_v30 = vld [vmem:[#allocation9 + $0x13d8] sm:$0xff] }
 0x4b9   :  { %7027 = vmatprep.subr.bf16.mxu0 %v12301_v57  ;;  %7068 = vmatprep.subr.bf16.mxu1 %v12303_v5  ;;  %v6650_v57 = vld [vmem:[#allocation9 + $0x1290] sm:$0xff]  ;;  %v6695_v38 = vld [vmem:[#allocation9 + $0x13f8] sm:$0xff] }
 0x4ba   :  { %v6654_v5 = vld [vmem:[#allocation9 + $0x12b0] sm:$0xff] }
 0x4bb   :  { %v12289_v44 = vcombine.high %v6650_v57, %v6654_v5  ;;  %v12288_v4 = vcombine.low %v6650_v57, %v6654_v5 }
 0x4bc   :  { %7028 = vmatpush1.bf16.msra.mxu0 %v12300_v33  ;;  %7069 = vmatpush1.bf16.msra.mxu1 %v12302_v61  ;;  %v12291_v33 = vcombine.high %v6651_v32, %v6655_v31  ;;  %v6658_v61 = vld [vmem:[#allocation9 + $0x12d0] sm:$0xff] }
 0x4bd   :  { %7029 = vmatprep.subr.bf16.mxu0 %v12309_v55  ;;  %7070 = vmatprep.subr.bf16.mxu1 %v12311_v17  ;;  %v6662_v55 = vld [vmem:[#allocation9 + $0x12f0] sm:$0xff]  ;;  %v6659_v17 = vld [vmem:[#allocation9 + $0x12d8] sm:$0xff] }
 0x4be   :  { %v4905_v3 = vpop.f32.mrb[108].mxu0  ;;  %v4946_v40 = vpop.f32.mrb[108].mxu1  ;;  %v12297_v34 = vcombine.high %v6658_v61, %v6662_v55 }
 0x4bf   :  { %v14384_v47 = vadd.f32 %v4905_v3, %v14352_v41  ;;  %v14387_v62 = vadd.f32 %v4946_v40, %v14355_v59  ;;  %v4907_v1 = vpop.f32.mrb[109].mxu0  ;;  %v4948_v6 = vpop.f32.mrb[109].mxu1  ;;  %v12325_v59 = vcombine.high %v6688_v13, %v6692_v42  ;;  %v12296_v3 = vcombine.low %v6658_v61, %v6662_v55  ;;  %v7195_v61 = vld [vmem:[#allocation9 + $0x1420] sm:$0xff]  ;;  %v7192_v55 = vld [vmem:[#allocation9 + $0x1408] sm:$0xff] }
 0x4c0   :  { %v14390_v8 = vadd.f32 %v4907_v1, %v14358_v58  ;;  %v14393_v52 = vadd.f32 %v4948_v6, %v14361_v9  ;;  %v4909_v51 = vpop.f32.mrb[110].mxu0  ;;  %v4950_v18 = vpop.f32.mrb[110].mxu1  ;;  %7030 = vmatpush1.bf16.msra.mxu0 %v12308_v7  ;;  %7071 = vmatpush1.bf16.msra.mxu1 %v12310_v37  ;;  %v12324_v58 = vcombine.low %v6688_v13, %v6692_v42  ;;  %v6666_v37 = vld [vmem:[#allocation9 + $0x1310] sm:$0xff]  ;;  %v6671_v13 = vld [vmem:[#allocation9 + $0x1338] sm:$0xff] }
 0x4c1   :  { %v4910_v12 = vpop.f32.mrb[111].mxu0  ;;  %v4951_v41 = vpop.f32.mrb[111].mxu1  ;;  %7031 = vmatprep.subr.bf16.mxu0 %v12317_v14  ;;  %7072 = vmatprep.subr.bf16.mxu1 %v12319_v49  ;;  %v12326_v9 = vcombine.low %v6689_v56, %v6693_v48  ;;  %v12299_v7 = vcombine.high %v6659_v17, %v6663_v24  ;;  %v6670_v14 = vld [vmem:[#allocation9 + $0x1330] sm:$0xff]  ;;  %v6667_v49 = vld [vmem:[#allocation9 + $0x1318] sm:$0xff]  ;;  %v12298_v40 = vcombine.low %v6659_v17, %v6663_v24  ;;  %v7196_v17 = vld [vmem:[#allocation9 + $0x1428] sm:$0xff] }
 0x4c2   :  { %v12305_v42 = vcombine.high %v6666_v37, %v6670_v14  ;;  %v12307_v56 = vcombine.high %v6667_v49, %v6671_v13  ;;  %v6674_v48 = vld [vmem:[#allocation9 + $0x1350] sm:$0xff]  ;;  %v6675_v6 = vld [vmem:[#allocation9 + $0x1358] sm:$0xff]  ;;  %v12304_v51 = vcombine.low %v6666_v37, %v6670_v14  ;;  %v12306_v18 = vcombine.low %v6667_v49, %v6671_v13  ;;  %v7204_v37 = vld [vmem:[#allocation9 + $0x1468] sm:$0xff] }
 0x4c3   :  { %v6678_v1 = vld [vmem:[#allocation9 + $0x1370] sm:$0xff]  ;;  %v12334_v49 = vcombine.low %v7192_v55, %v7196_v17 }
 0x4c4   :  { %7032 = vmatpush1.bf16.msra.mxu0 %v12316_v50  ;;  %7073 = vmatpush1.bf16.msra.mxu1 %v12318_v28  ;;  %v6679_v50 = vld [vmem:[#allocation9 + $0x1378] sm:$0xff]  ;;  %v12313_v28 = vcombine.high %v6674_v48, %v6678_v1  ;;  %v6682_v41 = vld [vmem:[#allocation9 + $0x1390] sm:$0xff]  ;;  %v12312_v20 = vcombine.low %v6674_v48, %v6678_v1  ;;  %v7212_v48 = vld [vmem:[#allocation9 + $0x14a8] sm:$0xff] }
 0x4c5   :  { %7033 = vmatprep.subr.bf16.mxu0 %v12325_v59  ;;  %7074 = vmatprep.subr.bf16.mxu1 %v12327_v46  ;;  %v12315_v12 = vcombine.high %v6675_v6, %v6679_v50  ;;  %v6686_v59 = vld [vmem:[#allocation9 + $0x13b0] sm:$0xff]  ;;  %v6683_v46 = vld [vmem:[#allocation9 + $0x1398] sm:$0xff]  ;;  %v12314_v22 = vcombine.low %v6675_v6, %v6679_v50 }
 0x4c6   :  { %v12321_v26 = vcombine.high %v6682_v41, %v6686_v59 }
 0x4c8   :  { %7034 = vmatpush1.bf16.msra.mxu0 %v12324_v58  ;;  %7075 = vmatpush1.bf16.msra.mxu1 %v12326_v9  ;;  %v12323_v58 = vcombine.high %v6683_v46, %v6687_v11  ;;  %v6690_v9 = vld [vmem:[#allocation9 + $0x13d0] sm:$0xff] }
 0x4c9   :  { %7101 = vmatprep.subr.bf16.mxu0 %v12273_v60  ;;  %7142 = vmatprep.subr.bf16.mxu1 %v12275_v10 }
 0x4cb   :  { %7052 = vmatmul.mubr.bf16.vlgmr.msra.gmra.mrb[136].mxu0 %v14396_v36  ;;  %7093 = vmatmul.mubr.bf16.vlgmr.msra.gmra.mrb[136].mxu1 %v14396_v36 }
 0x4cc   :  { %7102 = vmatpush1.bf16.msra.mxu0 %v12272_v25  ;;  %7143 = vmatpush1.bf16.msra.mxu1 %v12274_v23 }
 0x4cd   :  { %7103 = vmatprep.subr.bf16.mxu0 %v12281_v39  ;;  %7144 = vmatprep.subr.bf16.mxu1 %v12283_v19  ;;  %v12320_v19 = vcombine.low %v6682_v41, %v6686_v59  ;;  %v7220_v41 = vld [vmem:[#allocation9 + $0x14e8] sm:$0xff] }
 0x4ce   :  { %7133 = vmatprep.mubr.bf16.mxu0 %v13536_v54  ;;  %7174 = vmatprep.mubr.bf16.mxu1 %v13536_v54 }
 0x4d0   :  { %7104 = vmatpush1.bf16.msra.mxu0 %v12280_v2  ;;  %7145 = vmatpush1.bf16.msra.mxu1 %v12282_v43  ;;  %v12322_v2 = vcombine.low %v6683_v46, %v6687_v11 }
 0x4d1   :  { %7105 = vmatprep.subr.bf16.mxu0 %v12289_v44  ;;  %7146 = vmatprep.subr.bf16.mxu1 %v12291_v33  ;;  %v12331_v44 = vcombine.high %v6691_v30, %v6695_v38  ;;  %v7191_v33 = vld [vmem:[#allocation9 + $0x1400] sm:$0xff] }
 0x4d2   :  { %v12333_v24 = vcombine.high %v7191_v33, %v7195_v61  ;;  %v12332_v14 = vcombine.low %v7191_v33, %v7195_v61 }
 0x4d4   :  { %7106 = vmatpush1.bf16.msra.mxu0 %v12288_v4  ;;  %7147 = vmatpush1.bf16.msra.mxu1 %v12290_v45  ;;  %v12335_v4 = vcombine.high %v7192_v55, %v7196_v17  ;;  %v7199_v45 = vld [vmem:[#allocation9 + $0x1440] sm:$0xff] }
 0x4d5   :  { %7107 = vmatprep.subr.bf16.mxu0 %v12297_v34  ;;  %7148 = vmatprep.subr.bf16.mxu1 %v12299_v7  ;;  %v7203_v34 = vld [vmem:[#allocation9 + $0x1460] sm:$0xff]  ;;  %v7200_v7 = vld [vmem:[#allocation9 + $0x1448] sm:$0xff] }
 0x4d6   :  { %v12341_v13 = vcombine.high %v7199_v45, %v7203_v34  ;;  %v12340_v1 = vcombine.low %v7199_v45, %v7203_v34  ;;  %v12342_v6 = vcombine.low %v7200_v7, %v7204_v37  ;;  %v7248_v45 = vld [vmem:[#allocation9 + $0x15c8] sm:$0xff] }
 0x4d7   :  { %v7252_v34 = vld [vmem:[#allocation9 + $0x15e8] sm:$0xff] }
 0x4d8   :  { %7108 = vmatpush1.bf16.msra.mxu0 %v12296_v3  ;;  %7149 = vmatpush1.bf16.msra.mxu1 %v12298_v40  ;;  %v12343_v3 = vcombine.high %v7200_v7, %v7204_v37  ;;  %v7207_v40 = vld [vmem:[#allocation9 + $0x1480] sm:$0xff] }
 0x4d9   :  { %7109 = vmatprep.subr.bf16.mxu0 %v12305_v42  ;;  %7150 = vmatprep.subr.bf16.mxu1 %v12307_v56  ;;  %v7211_v42 = vld [vmem:[#allocation9 + $0x14a0] sm:$0xff]  ;;  %v7208_v56 = vld [vmem:[#allocation9 + $0x1488] sm:$0xff] }
 0x4da   :  { %v12349_v50 = vcombine.high %v7207_v40, %v7211_v42  ;;  %v12348_v59 = vcombine.low %v7207_v40, %v7211_v42 }
 0x4dc   :  { %7110 = vmatpush1.bf16.msra.mxu0 %v12304_v51  ;;  %7151 = vmatpush1.bf16.msra.mxu1 %v12306_v18  ;;  %v12351_v51 = vcombine.high %v7208_v56, %v7212_v48  ;;  %v7215_v18 = vld [vmem:[#allocation9 + $0x14c0] sm:$0xff] }
 0x4dd   :  { %7111 = vmatprep.subr.bf16.mxu0 %v12313_v28  ;;  %7152 = vmatprep.subr.bf16.mxu1 %v12315_v12  ;;  %v7219_v28 = vld [vmem:[#allocation9 + $0x14e0] sm:$0xff]  ;;  %v7216_v12 = vld [vmem:[#allocation9 + $0x14c8] sm:$0xff] }
 0x4de   :  { %v5379_v60 = vpop.f32.mrb[112].mxu0  ;;  %v5420_v10 = vpop.f32.mrb[112].mxu1  ;;  %v12357_v46 = vcombine.high %v7215_v18, %v7219_v28  ;;  %v12359_v11 = vcombine.high %v7216_v12, %v7220_v41 }
 0x4df   :  { %v14403_v27 = vadd.f32 %v5379_v60, %v14368_v53  ;;  %v14406_v25 = vadd.f32 %v5420_v10, %v14371_v29  ;;  %v5381_v23 = vpop.f32.mrb[113].mxu0  ;;  %v5422_v39 = vpop.f32.mrb[113].mxu1  ;;  %v12329_v29 = vcombine.high %v6690_v9, %v6694_v0  ;;  %v12358_v60 = vcombine.low %v7216_v12, %v7220_v41 }
 0x4e0   :  { %v14409_v57 = vadd.f32 %v5381_v23, %v14374_v35  ;;  %v14412_v5 = vadd.f32 %v5422_v39, %v14377_v63  ;;  %v5383_v32 = vpop.f32.mrb[114].mxu0  ;;  %v5424_v31 = vpop.f32.mrb[114].mxu1  ;;  %7112 = vmatpush1.bf16.msra.mxu0 %v12312_v20  ;;  %7153 = vmatpush1.bf16.msra.mxu1 %v12314_v22  ;;  %v12328_v35 = vcombine.low %v6690_v9, %v6694_v0  ;;  %v7223_v20 = vld [vmem:[#allocation9 + $0x1500] sm:$0xff]  ;;  %v7232_v23 = vld [vmem:[#allocation9 + $0x1548] sm:$0xff] }
 0x4e1   :  { %v5384_v43 = vpop.f32.mrb[115].mxu0  ;;  %v5425_v53 = vpop.f32.mrb[115].mxu1  ;;  %7113 = vmatprep.subr.bf16.mxu0 %v12321_v26  ;;  %7154 = vmatprep.subr.bf16.mxu1 %v12323_v58  ;;  %v12330_v63 = vcombine.low %v6691_v30, %v6695_v38  ;;  %v7227_v22 = vld [vmem:[#allocation9 + $0x1520] sm:$0xff]  ;;  %v7224_v26 = vld [vmem:[#allocation9 + $0x1508] sm:$0xff]  ;;  %v12356_v9 = vcombine.low %v7215_v18, %v7219_v28  ;;  %v7194_v18 = vld [vmem:[#allocation9 + $0x1418] sm:$0xff] }
 0x4e2   :  { %v7228_v58 = vld [vmem:[#allocation9 + $0x1528] sm:$0xff]  ;;  %v12365_v10 = vcombine.high %v7223_v20, %v7227_v22  ;;  %v7231_v30 = vld [vmem:[#allocation9 + $0x1540] sm:$0xff]  ;;  %v7198_v28 = vld [vmem:[#allocation9 + $0x1438] sm:$0xff] }
 0x4e3   :  { %v12367_v0 = vcombine.high %v7224_v26, %v7228_v58  ;;  %v7235_v38 = vld [vmem:[#allocation9 + $0x1560] sm:$0xff]  ;;  %v7236_v39 = vld [vmem:[#allocation9 + $0x1568] sm:$0xff]  ;;  %v12366_v32 = vcombine.low %v7224_v26, %v7228_v58  ;;  %v12339_v41 = vcombine.high %v7194_v18, %v7198_v28 }
 0x4e4   :  { %7114 = vmatpush1.bf16.msra.mxu0 %v12320_v19  ;;  %7155 = vmatpush1.bf16.msra.mxu1 %v12322_v2  ;;  %v12364_v19 = vcombine.low %v7223_v20, %v7227_v22  ;;  %v12373_v31 = vcombine.high %v7231_v30, %v7235_v38  ;;  %v12375_v2 = vcombine.high %v7232_v23, %v7236_v39  ;;  %v7239_v43 = vld [vmem:[#allocation9 + $0x1580] sm:$0xff] }
 0x4e5   :  { %7115 = vmatprep.subr.bf16.mxu0 %v12329_v29  ;;  %7156 = vmatprep.subr.bf16.mxu1 %v12331_v44  ;;  %v7243_v53 = vld [vmem:[#allocation9 + $0x15a0] sm:$0xff]  ;;  %v7240_v29 = vld [vmem:[#allocation9 + $0x1588] sm:$0xff]  ;;  %v12372_v33 = vcombine.low %v7231_v30, %v7235_v38  ;;  %v12374_v61 = vcombine.low %v7232_v23, %v7236_v39  ;;  %v12338_v22 = vcombine.low %v7194_v18, %v7198_v28 }
 0x4e6   :  { %v7244_v44 = vld [vmem:[#allocation9 + $0x15a8] sm:$0xff]  ;;  %v12381_v55 = vcombine.high %v7239_v43, %v7243_v53 }
 0x4e7   :  { %v12383_v17 = vcombine.high %v7240_v29, %v7244_v44 }
 0x4e8   :  { %7116 = vmatpush1.bf16.msra.mxu0 %v12328_v35  ;;  %7157 = vmatpush1.bf16.msra.mxu1 %v12330_v63  ;;  %v7247_v35 = vld [vmem:[#allocation9 + $0x15c0] sm:$0xff] }
 0x4e9   :  { %7575 = vmatprep.subr.bf16.mxu0 %v12333_v24  ;;  %7616 = vmatprep.subr.bf16.mxu1 %v12335_v4  ;;  %v7251_v4 = vld [vmem:[#allocation9 + $0x15e0] sm:$0xff] }
 0x4eb   :  { %7134 = vmatmul.mubr.bf16.vlgmr.msra.gmra.mrb[140].mxu0 %v14396_v36  ;;  %7175 = vmatmul.mubr.bf16.vlgmr.msra.gmra.mrb[140].mxu1 %v14396_v36  ;;  %v12350_v36 = vcombine.low %v7208_v56, %v7212_v48  ;;  %v12382_v48 = vcombine.low %v7240_v29, %v7244_v44 }
 0x4ec   :  { %7576 = vmatpush1.bf16.msra.mxu0 %v12332_v14  ;;  %7617 = vmatpush1.bf16.msra.mxu1 %v12334_v49 }
 0x4ed   :  { %7577 = vmatprep.subr.bf16.mxu0 %v12341_v13  ;;  %7618 = vmatprep.subr.bf16.mxu1 %v12343_v3  ;;  %v12380_v13 = vcombine.low %v7239_v43, %v7243_v53 }
 0x4ee   :  { %7607 = vmatprep.mubr.bf16.mxu0 %v13536_v54  ;;  %7648 = vmatprep.mubr.bf16.mxu1 %v13536_v54 }
 0x4f0   :  { %7578 = vmatpush1.bf16.msra.mxu0 %v12340_v1  ;;  %7619 = vmatpush1.bf16.msra.mxu1 %v12342_v6  ;;  %v12391_v6 = vcombine.high %v7248_v45, %v7252_v34 }
 0x4f1   :  { %7579 = vmatprep.subr.bf16.mxu0 %v12349_v50  ;;  %7620 = vmatprep.subr.bf16.mxu1 %v12351_v51  ;;  %v7193_v50 = vld [vmem:[#allocation9 + $0x1410] sm:$0xff] }
 0x4f2   :  { %v7197_v51 = vld [vmem:[#allocation9 + $0x1430] sm:$0xff] }
 0x4f3   :  { %v12337_v12 = vcombine.high %v7193_v50, %v7197_v51  ;;  %v12336_v20 = vcombine.low %v7193_v50, %v7197_v51 }
 0x4f4   :  { %7580 = vmatpush1.bf16.msra.mxu0 %v12348_v59  ;;  %7621 = vmatpush1.bf16.msra.mxu1 %v12350_v36  ;;  %v7201_v59 = vld [vmem:[#allocation9 + $0x1450] sm:$0xff] }
 0x4f5   :  { %7581 = vmatprep.subr.bf16.mxu0 %v12357_v46  ;;  %7622 = vmatprep.subr.bf16.mxu1 %v12359_v11  ;;  %v7205_v36 = vld [vmem:[#allocation9 + $0x1470] sm:$0xff]  ;;  %v7202_v46 = vld [vmem:[#allocation9 + $0x1458] sm:$0xff] }
 0x4f6   :  { %v7206_v11 = vld [vmem:[#allocation9 + $0x1478] sm:$0xff]  ;;  %v12345_v26 = vcombine.high %v7201_v59, %v7205_v36  ;;  %v12344_v30 = vcombine.low %v7201_v59, %v7205_v36 }
 0x4f7   :  { %v12347_v58 = vcombine.high %v7202_v46, %v7206_v11  ;;  %v12346_v38 = vcombine.low %v7202_v46, %v7206_v11  ;;  %v7250_v59 = vld [vmem:[#allocation9 + $0x15d8] sm:$0xff] }
 0x4f8   :  { %7582 = vmatpush1.bf16.msra.mxu0 %v12356_v9  ;;  %7623 = vmatpush1.bf16.msra.mxu1 %v12358_v60  ;;  %v7209_v9 = vld [vmem:[#allocation9 + $0x1490] sm:$0xff]  ;;  %v7254_v36 = vld [vmem:[#allocation9 + $0x15f8] sm:$0xff] }
 0x4f9   :  { %7583 = vmatprep.subr.bf16.mxu0 %v12365_v10  ;;  %7624 = vmatprep.subr.bf16.mxu1 %v12367_v0  ;;  %v7213_v60 = vld [vmem:[#allocation9 + $0x14b0] sm:$0xff]  ;;  %v7210_v10 = vld [vmem:[#allocation9 + $0x1498] sm:$0xff] }
 0x4fa   :  { %v7214_v0 = vld [vmem:[#allocation9 + $0x14b8] sm:$0xff]  ;;  %v12353_v23 = vcombine.high %v7209_v9, %v7213_v60  ;;  %v12352_v43 = vcombine.low %v7209_v9, %v7213_v60 }
 0x4fb   :  { %v12355_v39 = vcombine.high %v7210_v10, %v7214_v0  ;;  %v12354_v53 = vcombine.low %v7210_v10, %v7214_v0 }
 0x4fc   :  { %7584 = vmatpush1.bf16.msra.mxu0 %v12364_v19  ;;  %7625 = vmatpush1.bf16.msra.mxu1 %v12366_v32  ;;  %v7217_v19 = vld [vmem:[#allocation9 + $0x14d0] sm:$0xff] }
 0x4fd   :  { %7585 = vmatprep.subr.bf16.mxu0 %v12373_v31  ;;  %7626 = vmatprep.subr.bf16.mxu1 %v12375_v2  ;;  %v7221_v32 = vld [vmem:[#allocation9 + $0x14f0] sm:$0xff]  ;;  %v7218_v31 = vld [vmem:[#allocation9 + $0x14d8] sm:$0xff] }
 0x4fe   :  { %v5461_v63 = vpop.f32.mrb[116].mxu0  ;;  %v5502_v24 = vpop.f32.mrb[116].mxu1  ;;  %v7222_v2 = vld [vmem:[#allocation9 + $0x14f8] sm:$0xff]  ;;  %v12361_v29 = vcombine.high %v7217_v19, %v7221_v32 }
 0x4ff   :  { %v14419_v7 = vadd.f32 %v5461_v63, %v14384_v47  ;;  %v14422_v37 = vadd.f32 %v5502_v24, %v14387_v62  ;;  %v5463_v14 = vpop.f32.mrb[117].mxu0  ;;  %v5504_v49 = vpop.f32.mrb[117].mxu1  ;;  %v12389_v62 = vcombine.high %v7247_v35, %v7251_v4  ;;  %v12363_v44 = vcombine.high %v7218_v31, %v7222_v2 }
 0x500   :  { %v14425_v3 = vadd.f32 %v5463_v14, %v14390_v8  ;;  %v14428_v40 = vadd.f32 %v5504_v49, %v14393_v52  ;;  %v5465_v42 = vpop.f32.mrb[118].mxu0  ;;  %v5506_v56 = vpop.f32.mrb[118].mxu1  ;;  %7586 = vmatpush1.bf16.msra.mxu0 %v12372_v33  ;;  %7627 = vmatpush1.bf16.msra.mxu1 %v12374_v61  ;;  %v12388_v8 = vcombine.low %v7247_v35, %v7251_v4  ;;  %v7225_v33 = vld [vmem:[#allocation9 + $0x1510] sm:$0xff]  ;;  %v7234_v14 = vld [vmem:[#allocation9 + $0x1558] sm:$0xff] }
 0x501   :  { %v5466_v1 = vpop.f32.mrb[119].mxu0  ;;  %v5507_v47 = vpop.f32.mrb[119].mxu1  ;;  %7587 = vmatprep.subr.bf16.mxu0 %v12381_v55  ;;  %7628 = vmatprep.subr.bf16.mxu1 %v12383_v17  ;;  %v12390_v52 = vcombine.low %v7248_v45, %v7252_v34  ;;  %v7229_v61 = vld [vmem:[#allocation9 + $0x1530] sm:$0xff]  ;;  %v7226_v55 = vld [vmem:[#allocation9 + $0x1518] sm:$0xff]  ;;  %v12360_v35 = vcombine.low %v7217_v19, %v7221_v32  ;;  %v12362_v63 = vcombine.low %v7218_v31, %v7222_v2  ;;  %v7748_v19 = vld [vmem:[#allocation9 + $0x1608] sm:$0xff] }
 0x502   :  { %v7230_v17 = vld [vmem:[#allocation9 + $0x1538] sm:$0xff]  ;;  %v12369_v24 = vcombine.high %v7225_v33, %v7229_v61  ;;  %v7233_v45 = vld [vmem:[#allocation9 + $0x1550] sm:$0xff]  ;;  %v7752_v32 = vld [vmem:[#allocation9 + $0x1628] sm:$0xff] }
 0x503   :  { %v12371_v4 = vcombine.high %v7226_v55, %v7230_v17  ;;  %v7237_v34 = vld [vmem:[#allocation9 + $0x1570] sm:$0xff]  ;;  %v7238_v49 = vld [vmem:[#allocation9 + $0x1578] sm:$0xff]  ;;  %v12370_v42 = vcombine.low %v7226_v55, %v7230_v17  ;;  %v12399_v2 = vcombine.high %v7748_v19, %v7752_v32 }
 0x504   :  { %7588 = vmatpush1.bf16.msra.mxu0 %v12380_v13  ;;  %7629 = vmatpush1.bf16.msra.mxu1 %v12382_v48  ;;  %v12368_v13 = vcombine.low %v7225_v33, %v7229_v61  ;;  %v12377_v56 = vcombine.high %v7233_v45, %v7237_v34  ;;  %v12379_v48 = vcombine.high %v7234_v14, %v7238_v49  ;;  %v7241_v1 = vld [vmem:[#allocation9 + $0x1590] sm:$0xff] }
 0x505   :  { %7589 = vmatprep.subr.bf16.mxu0 %v12389_v62  ;;  %7630 = vmatprep.subr.bf16.mxu1 %v12391_v6  ;;  %v7245_v47 = vld [vmem:[#allocation9 + $0x15b0] sm:$0xff]  ;;  %v7242_v62 = vld [vmem:[#allocation9 + $0x1598] sm:$0xff]  ;;  %v12376_v50 = vcombine.low %v7233_v45, %v7237_v34  ;;  %v12378_v51 = vcombine.low %v7234_v14, %v7238_v49  ;;  %v12398_v61 = vcombine.low %v7748_v19, %v7752_v32 }
 0x506   :  { %v7246_v6 = vld [vmem:[#allocation9 + $0x15b8] sm:$0xff]  ;;  %v12385_v18 = vcombine.high %v7241_v1, %v7245_v47 }
 0x507   :  { %v12387_v28 = vcombine.high %v7242_v62, %v7246_v6  ;;  %v12386_v0 = vcombine.low %v7242_v62, %v7246_v6 }
 0x508   :  { %7590 = vmatpush1.bf16.msra.mxu0 %v12388_v8  ;;  %7631 = vmatpush1.bf16.msra.mxu1 %v12390_v52  ;;  %v7249_v8 = vld [vmem:[#allocation9 + $0x15d0] sm:$0xff] }
 0x509   :  { %7657 = vmatprep.subr.bf16.mxu0 %v12337_v12  ;;  %7698 = vmatprep.subr.bf16.mxu1 %v12339_v41  ;;  %v7253_v41 = vld [vmem:[#allocation9 + $0x15f0] sm:$0xff] }
 0x50b   :  { %7608 = vmatmul.mubr.bf16.vlgmr.msra.gmra.mrb[144].mxu0 %v14176_v21  ;;  %7649 = vmatmul.mubr.bf16.vlgmr.msra.gmra.mrb[144].mxu1 %v14176_v21 }
 0x50c   :  { %7658 = vmatpush1.bf16.msra.mxu0 %v12336_v20  ;;  %7699 = vmatpush1.bf16.msra.mxu1 %v12338_v22 }
 0x50d   :  { %7659 = vmatprep.subr.bf16.mxu0 %v12345_v26  ;;  %7700 = vmatprep.subr.bf16.mxu1 %v12347_v58  ;;  %v12384_v26 = vcombine.low %v7241_v1, %v7245_v47 }
 0x50e   :  { %7689 = vmatprep.mubr.bf16.mxu0 %v13536_v54  ;;  %7730 = vmatprep.mubr.bf16.mxu1 %v13536_v54 }
 0x510   :  { %7660 = vmatpush1.bf16.msra.mxu0 %v12344_v30  ;;  %7701 = vmatpush1.bf16.msra.mxu1 %v12346_v38  ;;  %v12395_v38 = vcombine.high %v7250_v59, %v7254_v36 }
 0x511   :  { %7661 = vmatprep.subr.bf16.mxu0 %v12353_v23  ;;  %7702 = vmatprep.subr.bf16.mxu1 %v12355_v39  ;;  %v7747_v23 = vld [vmem:[#allocation9 + $0x1600] sm:$0xff] }
 0x512   :  { %v7751_v39 = vld [vmem:[#allocation9 + $0x1620] sm:$0xff] }
 0x513   :  { %v12397_v31 = vcombine.high %v7747_v23, %v7751_v39  ;;  %v12396_v33 = vcombine.low %v7747_v23, %v7751_v39 }
 0x514   :  { %7662 = vmatpush1.bf16.msra.mxu0 %v12352_v43  ;;  %7703 = vmatpush1.bf16.msra.mxu1 %v12354_v53  ;;  %v7755_v43 = vld [vmem:[#allocation9 + $0x1640] sm:$0xff] }
 0x515   :  { %7663 = vmatprep.subr.bf16.mxu0 %v12361_v29  ;;  %7704 = vmatprep.subr.bf16.mxu1 %v12363_v44  ;;  %v7759_v53 = vld [vmem:[#allocation9 + $0x1660] sm:$0xff]  ;;  %v7756_v29 = vld [vmem:[#allocation9 + $0x1648] sm:$0xff] }
 0x516   :  { %v7760_v44 = vld [vmem:[#allocation9 + $0x1668] sm:$0xff]  ;;  %v12405_v55 = vcombine.high %v7755_v43, %v7759_v53  ;;  %v12404_v45 = vcombine.low %v7755_v43, %v7759_v53 }
 0x517   :  { %v12407_v17 = vcombine.high %v7756_v29, %v7760_v44  ;;  %v12406_v34 = vcombine.low %v7756_v29, %v7760_v44  ;;  %v7804_v43 = vld [vmem:[#allocation9 + $0x17c8] sm:$0xff] }
 0x518   :  { %7664 = vmatpush1.bf16.msra.mxu0 %v12360_v35  ;;  %7705 = vmatpush1.bf16.msra.mxu1 %v12362_v63  ;;  %v7763_v35 = vld [vmem:[#allocation9 + $0x1680] sm:$0xff]  ;;  %v7808_v53 = vld [vmem:[#allocation9 + $0x17e8] sm:$0xff] }
 0x519   :  { %7665 = vmatprep.subr.bf16.mxu0 %v12369_v24  ;;  %7706 = vmatprep.subr.bf16.mxu1 %v12371_v4  ;;  %v7767_v63 = vld [vmem:[#allocation9 + $0x16a0] sm:$0xff]  ;;  %v7764_v24 = vld [vmem:[#allocation9 + $0x1688] sm:$0xff] }
 0x51a   :  { %v7768_v4 = vld [vmem:[#allocation9 + $0x16a8] sm:$0xff]  ;;  %v12413_v14 = vcombine.high %v7763_v35, %v7767_v63  ;;  %v12412_v1 = vcombine.low %v7763_v35, %v7767_v63 }
 0x51b   :  { %v12415_v49 = vcombine.high %v7764_v24, %v7768_v4  ;;  %v12414_v47 = vcombine.low %v7764_v24, %v7768_v4 }
 0x51c   :  { %7666 = vmatpush1.bf16.msra.mxu0 %v12368_v13  ;;  %7707 = vmatpush1.bf16.msra.mxu1 %v12370_v42  ;;  %v7771_v13 = vld [vmem:[#allocation9 + $0x16c0] sm:$0xff] }
 0x51d   :  { %7667 = vmatprep.subr.bf16.mxu0 %v12377_v56  ;;  %7708 = vmatprep.subr.bf16.mxu1 %v12379_v48  ;;  %v7775_v42 = vld [vmem:[#allocation9 + $0x16e0] sm:$0xff]  ;;  %v7772_v56 = vld [vmem:[#allocation9 + $0x16c8] sm:$0xff] }
 0x51e   :  { %v5938_v52 = vpop.f32.mrb[120].mxu0  ;;  %v5979_v12 = vpop.f32.mrb[120].mxu1  ;;  %v7776_v48 = vld [vmem:[#allocation9 + $0x16e8] sm:$0xff]  ;;  %v12421_v62 = vcombine.high %v7771_v13, %v7775_v42 }
 0x51f   :  { %v14435_v46 = vadd.f32 %v5938_v52, %v14403_v27  ;;  %v14438_v11 = vadd.f32 %v5979_v12, %v14406_v25  ;;  %v5940_v20 = vpop.f32.mrb[121].mxu0  ;;  %v5981_v22 = vpop.f32.mrb[121].mxu1  ;;  %v12393_v25 = vcombine.high %v7249_v8, %v7253_v41  ;;  %v12423_v6 = vcombine.high %v7772_v56, %v7776_v48 }
 0x520   :  { %v14441_v58 = vadd.f32 %v5940_v20, %v14409_v57  ;;  %v14444_v9 = vadd.f32 %v5981_v22, %v14412_v5  ;;  %v5942_v60 = vpop.f32.mrb[122].mxu0  ;;  %v5983_v10 = vpop.f32.mrb[122].mxu1  ;;  %7668 = vmatpush1.bf16.msra.mxu0 %v12376_v50  ;;  %7709 = vmatpush1.bf16.msra.mxu1 %v12378_v51  ;;  %v12392_v57 = vcombine.low %v7249_v8, %v7253_v41  ;;  %v7779_v50 = vld [vmem:[#allocation9 + $0x1700] sm:$0xff]  ;;  %v7788_v20 = vld [vmem:[#allocation9 + $0x1748] sm:$0xff] }
 0x521   :  { %v5943_v30 = vpop.f32.mrb[123].mxu0  ;;  %v5984_v27 = vpop.f32.mrb[123].mxu1  ;;  %7669 = vmatprep.subr.bf16.mxu0 %v12385_v18  ;;  %7710 = vmatprep.subr.bf16.mxu1 %v12387_v28  ;;  %v12394_v5 = vcombine.low %v7250_v59, %v7254_v36  ;;  %v7783_v51 = vld [vmem:[#allocation9 + $0x1720] sm:$0xff]  ;;  %v7780_v18 = vld [vmem:[#allocation9 + $0x1708] sm:$0xff]  ;;  %v12420_v8 = vcombine.low %v7771_v13, %v7775_v42  ;;  %v12422_v52 = vcombine.low %v7772_v56, %v7776_v48  ;;  %v7750_v13 = vld [vmem:[#allocation9 + $0x1618] sm:$0xff] }
 0x522   :  { %v7784_v28 = vld [vmem:[#allocation9 + $0x1728] sm:$0xff]  ;;  %v12429_v12 = vcombine.high %v7779_v50, %v7783_v51  ;;  %v7787_v59 = vld [vmem:[#allocation9 + $0x1740] sm:$0xff]  ;;  %v7754_v42 = vld [vmem:[#allocation9 + $0x1638] sm:$0xff] }
 0x523   :  { %v12431_v41 = vcombine.high %v7780_v18, %v7784_v28  ;;  %v7791_v36 = vld [vmem:[#allocation9 + $0x1760] sm:$0xff]  ;;  %v7792_v22 = vld [vmem:[#allocation9 + $0x1768] sm:$0xff]  ;;  %v12430_v60 = vcombine.low %v7780_v18, %v7784_v28  ;;  %v12403_v48 = vcombine.high %v7750_v13, %v7754_v42  ;;  %v14463_v18 = vrot.slane %v14176_v21, 4 }
 0x524   :  { %7670 = vmatpush1.bf16.msra.mxu0 %v12384_v26  ;;  %7711 = vmatpush1.bf16.msra.mxu1 %v12386_v0  ;;  %v12428_v26 = vcombine.low %v7779_v50, %v7783_v51  ;;  %v12437_v10 = vcombine.high %v7787_v59, %v7791_v36  ;;  %v12439_v0 = vcombine.high %v7788_v20, %v7792_v22  ;;  %v7795_v30 = vld [vmem:[#allocation9 + $0x1780] sm:$0xff] }
 0x525   :  { %7671 = vmatprep.subr.bf16.mxu0 %v12393_v25  ;;  %7712 = vmatprep.subr.bf16.mxu1 %v12395_v38  ;;  %v7799_v27 = vld [vmem:[#allocation9 + $0x17a0] sm:$0xff]  ;;  %v7796_v25 = vld [vmem:[#allocation9 + $0x1788] sm:$0xff]  ;;  %v12436_v23 = vcombine.low %v7787_v59, %v7791_v36  ;;  %v12438_v39 = vcombine.low %v7788_v20, %v7792_v22  ;;  %v12402_v51 = vcombine.low %v7750_v13, %v7754_v42  ;;  %v7770_v59 = vld [vmem:[#allocation9 + $0x16b8] sm:$0xff] }
 0x526   :  { %v7800_v38 = vld [vmem:[#allocation9 + $0x17a8] sm:$0xff]  ;;  %v12445_v19 = vcombine.high %v7795_v30, %v7799_v27 }
 0x527   :  { %v12447_v32 = vcombine.high %v7796_v25, %v7800_v38  ;;  %v12446_v4 = vcombine.low %v7796_v25, %v7800_v38 }
 0x528   :  { %7672 = vmatpush1.bf16.msra.mxu0 %v12392_v57  ;;  %7713 = vmatpush1.bf16.msra.mxu1 %v12394_v5  ;;  %v7803_v57 = vld [vmem:[#allocation9 + $0x17c0] sm:$0xff] }
 0x529   :  { %8134 = vmatprep.subr.bf16.mxu0 %v12397_v31  ;;  %8175 = vmatprep.subr.bf16.mxu1 %v12399_v2  ;;  %v7807_v2 = vld [vmem:[#allocation9 + $0x17e0] sm:$0xff] }
 0x52b   :  { %7690 = vmatmul.mubr.bf16.vlgmr.msra.gmra.mrb[148].mxu0 %v14176_v21  ;;  %7731 = vmatmul.mubr.bf16.vlgmr.msra.gmra.mrb[148].mxu1 %v14176_v21 }
 0x52c   :  { %8135 = vmatpush1.bf16.msra.mxu0 %v12396_v33  ;;  %8176 = vmatpush1.bf16.msra.mxu1 %v12398_v61 }
 0x52d   :  { %8136 = vmatprep.subr.bf16.mxu0 %v12405_v55  ;;  %8177 = vmatprep.subr.bf16.mxu1 %v12407_v17  ;;  %v12444_v55 = vcombine.low %v7795_v30, %v7799_v27 }
 0x52e   :  { %8166 = vmatprep.mubr.bf16.mxu0 %v13536_v54  ;;  %8207 = vmatprep.mubr.bf16.mxu1 %v13536_v54 }
 0x530   :  { %8137 = vmatpush1.bf16.msra.mxu0 %v12404_v45  ;;  %8178 = vmatpush1.bf16.msra.mxu1 %v12406_v34  ;;  %v12455_v34 = vcombine.high %v7804_v43, %v7808_v53 }
 0x531   :  { %8138 = vmatprep.subr.bf16.mxu0 %v12413_v14  ;;  %8179 = vmatprep.subr.bf16.mxu1 %v12415_v49  ;;  %v7749_v14 = vld [vmem:[#allocation9 + $0x1610] sm:$0xff] }
 0x532   :  { %v7753_v49 = vld [vmem:[#allocation9 + $0x1630] sm:$0xff] }
 0x533   :  { %v12401_v56 = vcombine.high %v7749_v14, %v7753_v49  ;;  %v12400_v50 = vcombine.low %v7749_v14, %v7753_v49 }
 0x534   :  { %8139 = vmatpush1.bf16.msra.mxu0 %v12412_v1  ;;  %8180 = vmatpush1.bf16.msra.mxu1 %v12414_v47  ;;  %v7757_v1 = vld [vmem:[#allocation9 + $0x1650] sm:$0xff] }
 0x535   :  { %8140 = vmatprep.subr.bf16.mxu0 %v12421_v62  ;;  %8181 = vmatprep.subr.bf16.mxu1 %v12423_v6  ;;  %v7761_v47 = vld [vmem:[#allocation9 + $0x1670] sm:$0xff]  ;;  %v7758_v62 = vld [vmem:[#allocation9 + $0x1658] sm:$0xff] }
 0x536   :  { %v7762_v6 = vld [vmem:[#allocation9 + $0x1678] sm:$0xff]  ;;  %v12409_v28 = vcombine.high %v7757_v1, %v7761_v47  ;;  %v12408_v36 = vcombine.low %v7757_v1, %v7761_v47 }
 0x537   :  { %v12410_v20 = vcombine.low %v7758_v62, %v7762_v6  ;;  %v7806_v1 = vld [vmem:[#allocation9 + $0x17d8] sm:$0xff] }
 0x538   :  { %8141 = vmatpush1.bf16.msra.mxu0 %v12420_v8  ;;  %8182 = vmatpush1.bf16.msra.mxu1 %v12422_v52  ;;  %v12411_v8 = vcombine.high %v7758_v62, %v7762_v6  ;;  %v7765_v52 = vld [vmem:[#allocation9 + $0x1690] sm:$0xff]  ;;  %v7810_v47 = vld [vmem:[#allocation9 + $0x17f8] sm:$0xff] }
 0x539   :  { %8142 = vmatprep.subr.bf16.mxu0 %v12429_v12  ;;  %8183 = vmatprep.subr.bf16.mxu1 %v12431_v41  ;;  %v7769_v12 = vld [vmem:[#allocation9 + $0x16b0] sm:$0xff]  ;;  %v7766_v41 = vld [vmem:[#allocation9 + $0x1698] sm:$0xff] }
 0x53a   :  { %v12417_v21 = vcombine.high %v7765_v52, %v7769_v12  ;;  %v12419_v22 = vcombine.high %v7766_v41, %v7770_v59  ;;  %v12416_v30 = vcombine.low %v7765_v52, %v7769_v12  ;;  %v12418_v27 = vcombine.low %v7766_v41, %v7770_v59 }
 0x53c   :  { %8143 = vmatpush1.bf16.msra.mxu0 %v12428_v26  ;;  %8184 = vmatpush1.bf16.msra.mxu1 %v12430_v60  ;;  %v7773_v26 = vld [vmem:[#allocation9 + $0x16d0] sm:$0xff] }
 0x53d   :  { %8144 = vmatprep.subr.bf16.mxu0 %v12437_v10  ;;  %8185 = vmatprep.subr.bf16.mxu1 %v12439_v0  ;;  %v7777_v60 = vld [vmem:[#allocation9 + $0x16f0] sm:$0xff]  ;;  %v7774_v10 = vld [vmem:[#allocation9 + $0x16d8] sm:$0xff] }
 0x53e   :  { %v6020_v5 = vpop.f32.mrb[124].mxu0  ;;  %v6061_v31 = vpop.f32.mrb[124].mxu1  ;;  %v7778_v0 = vld [vmem:[#allocation9 + $0x16f8] sm:$0xff]  ;;  %v12425_v25 = vcombine.high %v7773_v26, %v7777_v60 }
 0x53f   :  { %v14451_v29 = vadd.f32 %v6020_v5, %v14419_v7  ;;  %v14454_v44 = vadd.f32 %v6061_v31, %v14422_v37  ;;  %v6022_v33 = vpop.f32.mrb[125].mxu0  ;;  %v6063_v61 = vpop.f32.mrb[125].mxu1  ;;  %v12453_v37 = vcombine.high %v7803_v57, %v7807_v2  ;;  %v12427_v38 = vcombine.high %v7774_v10, %v7778_v0 }
 0x540   :  { %v14457_v17 = vadd.f32 %v6022_v33, %v14425_v3  ;;  %v14460_v35 = vadd.f32 %v6063_v61, %v14428_v40  ;;  %v6024_v63 = vpop.f32.mrb[126].mxu0  ;;  %v6065_v24 = vpop.f32.mrb[126].mxu1  ;;  %8145 = vmatpush1.bf16.msra.mxu0 %v12436_v23  ;;  %8186 = vmatpush1.bf16.msra.mxu1 %v12438_v39  ;;  %v12452_v3 = vcombine.low %v7803_v57, %v7807_v2  ;;  %v7781_v23 = vld [vmem:[#allocation9 + $0x1710] sm:$0xff]  ;;  %v7790_v33 = vld [vmem:[#allocation9 + $0x1758] sm:$0xff] }
 0x541   :  { %v6025_v45 = vpop.f32.mrb[127].mxu0  ;;  %v6066_v7 = vpop.f32.mrb[127].mxu1  ;;  %8146 = vmatprep.subr.bf16.mxu0 %v12445_v19  ;;  %8187 = vmatprep.subr.bf16.mxu1 %v12447_v32  ;;  %v12454_v40 = vcombine.low %v7804_v43, %v7808_v53  ;;  %v7785_v39 = vld [vmem:[#allocation9 + $0x1730] sm:$0xff]  ;;  %v7782_v19 = vld [vmem:[#allocation9 + $0x1718] sm:$0xff]  ;;  %v12424_v57 = vcombine.low %v7773_v26, %v7777_v60  ;;  %v12426_v5 = vcombine.low %v7774_v10, %v7778_v0  ;;  %v8307_v26 = vld [vmem:[#allocation9 + $0x1808] sm:$0xff] }
 0x542   :  { %v7786_v32 = vld [vmem:[#allocation9 + $0x1738] sm:$0xff]  ;;  %v12433_v31 = vcombine.high %v7781_v23, %v7785_v39  ;;  %v7789_v43 = vld [vmem:[#allocation9 + $0x1750] sm:$0xff]  ;;  %v8311_v60 = vld [vmem:[#allocation9 + $0x1828] sm:$0xff] }
 0x543   :  { %v12435_v2 = vcombine.high %v7782_v19, %v7786_v32  ;;  %v7793_v53 = vld [vmem:[#allocation9 + $0x1770] sm:$0xff]  ;;  %v7794_v61 = vld [vmem:[#allocation9 + $0x1778] sm:$0xff]  ;;  %v12434_v63 = vcombine.low %v7782_v19, %v7786_v32  ;;  %v12463_v0 = vcombine.high %v8307_v26, %v8311_v60 }
 0x544   :  { %8147 = vmatpush1.bf16.msra.mxu0 %v12444_v55  ;;  %8188 = vmatpush1.bf16.msra.mxu1 %v12446_v4  ;;  %v12432_v55 = vcombine.low %v7781_v23, %v7785_v39  ;;  %v12441_v24 = vcombine.high %v7789_v43, %v7793_v53  ;;  %v12443_v4 = vcombine.high %v7790_v33, %v7794_v61  ;;  %v7797_v45 = vld [vmem:[#allocation9 + $0x1790] sm:$0xff] }
 0x545   :  { %8148 = vmatprep.subr.bf16.mxu0 %v12453_v37  ;;  %8189 = vmatprep.subr.bf16.mxu1 %v12455_v34  ;;  %v7801_v7 = vld [vmem:[#allocation9 + $0x17b0] sm:$0xff]  ;;  %v7798_v37 = vld [vmem:[#allocation9 + $0x1798] sm:$0xff]  ;;  %v12440_v14 = vcombine.low %v7789_v43, %v7793_v53  ;;  %v12442_v49 = vcombine.low %v7790_v33, %v7794_v61  ;;  %v12462_v39 = vcombine.low %v8307_v26, %v8311_v60  ;;  %v8362_v60 = vld [vmem:[#allocation9 + $0x19c0] sm:$0xff] }
 0x546   :  { %v7802_v34 = vld [vmem:[#allocation9 + $0x17b8] sm:$0xff]  ;;  %v12449_v13 = vcombine.high %v7797_v45, %v7801_v7 }
 0x547   :  { %v12451_v42 = vcombine.high %v7798_v37, %v7802_v34  ;;  %v12450_v59 = vcombine.low %v7798_v37, %v7802_v34  ;;  %v8338_v34 = vld [vmem:[#allocation9 + $0x1900] sm:$0xff] }
 0x548   :  { %8149 = vmatpush1.bf16.msra.mxu0 %v12452_v3  ;;  %8190 = vmatpush1.bf16.msra.mxu1 %v12454_v40  ;;  %v7805_v3 = vld [vmem:[#allocation9 + $0x17d0] sm:$0xff] }
 0x549   :  { %8216 = vmatprep.subr.bf16.mxu0 %v12401_v56  ;;  %8257 = vmatprep.subr.bf16.mxu1 %v12403_v48  ;;  %v7809_v48 = vld [vmem:[#allocation9 + $0x17f0] sm:$0xff] }
 0x54b   :  { %8167 = vmatmul.mubr.bf16.vlgmr.msra.gmra.mrb[152].mxu0 %v14463_v18  ;;  %8208 = vmatmul.mubr.bf16.vlgmr.msra.gmra.mrb[152].mxu1 %v14463_v18 }
 0x54c   :  { %8217 = vmatpush1.bf16.msra.mxu0 %v12400_v50  ;;  %8258 = vmatpush1.bf16.msra.mxu1 %v12402_v51 }
 0x54d   :  { %8218 = vmatprep.subr.bf16.mxu0 %v12409_v28  ;;  %8259 = vmatprep.subr.bf16.mxu1 %v12411_v8  ;;  %v12448_v28 = vcombine.low %v7797_v45, %v7801_v7 }
 0x54e   :  { %8248 = vmatprep.mubr.bf16.mxu0 %v13536_v54  ;;  %8289 = vmatprep.mubr.bf16.mxu1 %v13536_v54 }
 0x550   :  { %8219 = vmatpush1.bf16.msra.mxu0 %v12408_v36  ;;  %8260 = vmatpush1.bf16.msra.mxu1 %v12410_v20  ;;  %v12459_v20 = vcombine.high %v7806_v1, %v7810_v47 }
 0x551   :  { %8220 = vmatprep.subr.bf16.mxu0 %v12417_v21  ;;  %8261 = vmatprep.subr.bf16.mxu1 %v12419_v22  ;;  %v8306_v21 = vld [vmem:[#allocation9 + $0x1800] sm:$0xff] }
 0x552   :  { %v8310_v22 = vld [vmem:[#allocation9 + $0x1820] sm:$0xff] }
 0x553   :  { %v12461_v10 = vcombine.high %v8306_v21, %v8310_v22  ;;  %v12460_v23 = vcombine.low %v8306_v21, %v8310_v22 }
 0x554   :  { %8221 = vmatpush1.bf16.msra.mxu0 %v12416_v30  ;;  %8262 = vmatpush1.bf16.msra.mxu1 %v12418_v27  ;;  %v8314_v30 = vld [vmem:[#allocation9 + $0x1840] sm:$0xff] }
 0x555   :  { %8222 = vmatprep.subr.bf16.mxu0 %v12425_v25  ;;  %8263 = vmatprep.subr.bf16.mxu1 %v12427_v38  ;;  %v8318_v27 = vld [vmem:[#allocation9 + $0x1860] sm:$0xff]  ;;  %v8315_v25 = vld [vmem:[#allocation9 + $0x1848] sm:$0xff] }
 0x556   :  { %v8319_v38 = vld [vmem:[#allocation9 + $0x1868] sm:$0xff]  ;;  %v12469_v19 = vcombine.high %v8314_v30, %v8318_v27  ;;  %v12468_v43 = vcombine.low %v8314_v30, %v8318_v27 }
 0x557   :  { %v12471_v32 = vcombine.high %v8315_v25, %v8319_v38  ;;  %v12470_v53 = vcombine.low %v8315_v25, %v8319_v38  ;;  %v8367_v30 = vld [vmem:[#allocation9 + $0x19e8] sm:$0xff] }
 0x558   :  { %8223 = vmatpush1.bf16.msra.mxu0 %v12424_v57  ;;  %8264 = vmatpush1.bf16.msra.mxu1 %v12426_v5  ;;  %v8322_v57 = vld [vmem:[#allocation9 + $0x1880] sm:$0xff] }
 0x559   :  { %8224 = vmatprep.subr.bf16.mxu0 %v12433_v31  ;;  %8265 = vmatprep.subr.bf16.mxu1 %v12435_v2  ;;  %v8326_v5 = vld [vmem:[#allocation9 + $0x18a0] sm:$0xff]  ;;  %v8323_v31 = vld [vmem:[#allocation9 + $0x1888] sm:$0xff] }
 0x55a   :  { %v8327_v2 = vld [vmem:[#allocation9 + $0x18a8] sm:$0xff]  ;;  %v12477_v33 = vcombine.high %v8322_v57, %v8326_v5  ;;  %v12476_v45 = vcombine.low %v8322_v57, %v8326_v5 }
 0x55b   :  { %v12479_v61 = vcombine.high %v8323_v31, %v8327_v2 }
 0x55c   :  { %8225 = vmatpush1.bf16.msra.mxu0 %v12432_v55  ;;  %8266 = vmatpush1.bf16.msra.mxu1 %v12434_v63  ;;  %v8330_v55 = vld [vmem:[#allocation9 + $0x18c0] sm:$0xff] }
 0x55d   :  { %8226 = vmatprep.subr.bf16.mxu0 %v12441_v24  ;;  %8267 = vmatprep.subr.bf16.mxu1 %v12443_v4  ;;  %v8334_v63 = vld [vmem:[#allocation9 + $0x18e0] sm:$0xff]  ;;  %v8331_v24 = vld [vmem:[#allocation9 + $0x18c8] sm:$0xff] }
 0x55e   :  { %v6494_v40 = vpop.f32.mrb[128].mxu0  ;;  %v6535_v56 = vpop.f32.mrb[128].mxu1  ;;  %v8335_v4 = vld [vmem:[#allocation9 + $0x18e8] sm:$0xff]  ;;  %v12485_v7 = vcombine.high %v8330_v55, %v8334_v63 }
 0x55f   :  { %v14470_v62 = vadd.f32 %v6494_v40, %v14435_v46  ;;  %v14473_v6 = vadd.f32 %v6535_v56, %v14438_v11  ;;  %v6496_v50 = vpop.f32.mrb[129].mxu0  ;;  %v6537_v51 = vpop.f32.mrb[129].mxu1  ;;  %v12457_v11 = vcombine.high %v7805_v3, %v7809_v48  ;;  %v12487_v37 = vcombine.high %v8331_v24, %v8335_v4 }
 0x560   :  { %v14476_v8 = vadd.f32 %v6496_v50, %v14441_v58  ;;  %v14479_v52 = vadd.f32 %v6537_v51, %v14444_v9  ;;  %v6498_v12 = vpop.f32.mrb[130].mxu0  ;;  %v6539_v41 = vpop.f32.mrb[130].mxu1  ;;  %8227 = vmatpush1.bf16.msra.mxu0 %v12440_v14  ;;  %8268 = vmatpush1.bf16.msra.mxu1 %v12442_v49  ;;  %v12456_v58 = vcombine.low %v7805_v3, %v7809_v48  ;;  %v8342_v14 = vld [vmem:[#allocation9 + $0x1920] sm:$0xff]  ;;  %v8339_v49 = vld [vmem:[#allocation9 + $0x1908] sm:$0xff] }
 0x561   :  { %v6499_v36 = vpop.f32.mrb[131].mxu0  ;;  %v6540_v46 = vpop.f32.mrb[131].mxu1  ;;  %8228 = vmatprep.subr.bf16.mxu0 %v12449_v13  ;;  %8269 = vmatprep.subr.bf16.mxu1 %v12451_v42  ;;  %v12458_v9 = vcombine.low %v7806_v1, %v7810_v47  ;;  %v8343_v13 = vld [vmem:[#allocation9 + $0x1928] sm:$0xff]  ;;  %v12484_v42 = vcombine.low %v8330_v55, %v8334_v63  ;;  %v12486_v3 = vcombine.low %v8331_v24, %v8335_v4  ;;  %v8346_v48 = vld [vmem:[#allocation9 + $0x1940] sm:$0xff]  ;;  %v8313_v55 = vld [vmem:[#allocation9 + $0x1838] sm:$0xff] }
 0x562   :  { %v12493_v40 = vcombine.high %v8338_v34, %v8342_v14  ;;  %v12495_v56 = vcombine.high %v8339_v49, %v8343_v13  ;;  %v8350_v1 = vld [vmem:[#allocation9 + $0x1960] sm:$0xff]  ;;  %v8347_v47 = vld [vmem:[#allocation9 + $0x1948] sm:$0xff]  ;;  %v12492_v51 = vcombine.low %v8338_v34, %v8342_v14  ;;  %v8316_v4 = vld [vmem:[#allocation9 + $0x1850] sm:$0xff] }
 0x563   :  { %v8351_v50 = vld [vmem:[#allocation9 + $0x1968] sm:$0xff]  ;;  %v12501_v12 = vcombine.high %v8346_v48, %v8350_v1  ;;  %v8358_v36 = vld [vmem:[#allocation9 + $0x19a0] sm:$0xff] }
 0x564   :  { %8229 = vmatpush1.bf16.msra.mxu0 %v12448_v28  ;;  %8270 = vmatpush1.bf16.msra.mxu1 %v12450_v59  ;;  %v12494_v28 = vcombine.low %v8339_v49, %v8343_v13  ;;  %v12503_v41 = vcombine.high %v8347_v47, %v8351_v50  ;;  %v8354_v59 = vld [vmem:[#allocation9 + $0x1980] sm:$0xff]  ;;  %v8355_v46 = vld [vmem:[#allocation9 + $0x1988] sm:$0xff]  ;;  %v12502_v21 = vcombine.low %v8347_v47, %v8351_v50  ;;  %v8324_v13 = vld [vmem:[#allocation9 + $0x1890] sm:$0xff] }
 0x565   :  { %8230 = vmatprep.subr.bf16.mxu0 %v12457_v11  ;;  %8271 = vmatprep.subr.bf16.mxu1 %v12459_v20  ;;  %v8359_v11 = vld [vmem:[#allocation9 + $0x19a8] sm:$0xff]  ;;  %v12500_v20 = vcombine.low %v8346_v48, %v8350_v1  ;;  %v12509_v22 = vcombine.high %v8354_v59, %v8358_v36  ;;  %v8332_v50 = vld [vmem:[#allocation9 + $0x18d0] sm:$0xff] }
 0x566   :  { %v12511_v26 = vcombine.high %v8355_v46, %v8359_v11 }
 0x568   :  { %8231 = vmatpush1.bf16.msra.mxu0 %v12456_v58  ;;  %8272 = vmatpush1.bf16.msra.mxu1 %v12458_v9 }
 0x569   :  { %8690 = vmatprep.subr.bf16.mxu0 %v12461_v10  ;;  %8731 = vmatprep.subr.bf16.mxu1 %v12463_v0  ;;  %v8366_v10 = vld [vmem:[#allocation9 + $0x19e0] sm:$0xff]  ;;  %v8363_v0 = vld [vmem:[#allocation9 + $0x19c8] sm:$0xff] }
 0x56b   :  { %8249 = vmatmul.mubr.bf16.vlgmr.msra.gmra.mrb[156].mxu0 %v14463_v18  ;;  %8290 = vmatmul.mubr.bf16.vlgmr.msra.gmra.mrb[156].mxu1 %v14463_v18  ;;  %v12478_v18 = vcombine.low %v8323_v31, %v8327_v2  ;;  %v12510_v31 = vcombine.low %v8355_v46, %v8359_v11  ;;  %v8340_v11 = vld [vmem:[#allocation9 + $0x1910] sm:$0xff] }
 0x56c   :  { %8691 = vmatpush1.bf16.msra.mxu0 %v12460_v23  ;;  %8732 = vmatpush1.bf16.msra.mxu1 %v12462_v39  ;;  %v12508_v39 = vcombine.low %v8354_v59, %v8358_v36 }
 0x56d   :  { %8692 = vmatprep.subr.bf16.mxu0 %v12469_v19  ;;  %8733 = vmatprep.subr.bf16.mxu1 %v12471_v32 }
 0x56e   :  { %8722 = vmatprep.mubr.bf16.mxu0 %v13536_v54  ;;  %8763 = vmatprep.mubr.bf16.mxu1 %v13536_v54 }
 0x570   :  { %8693 = vmatpush1.bf16.msra.mxu0 %v12468_v43  ;;  %8734 = vmatpush1.bf16.msra.mxu1 %v12470_v53  ;;  %v12519_v43 = vcombine.high %v8363_v0, %v8367_v30  ;;  %v8308_v53 = vld [vmem:[#allocation9 + $0x1810] sm:$0xff] }
 0x571   :  { %8694 = vmatprep.subr.bf16.mxu0 %v12477_v33  ;;  %8735 = vmatprep.subr.bf16.mxu1 %v12479_v61  ;;  %v8312_v33 = vld [vmem:[#allocation9 + $0x1830] sm:$0xff]  ;;  %v8309_v61 = vld [vmem:[#allocation9 + $0x1818] sm:$0xff] }
 0x572   :  { %v12465_v63 = vcombine.high %v8308_v53, %v8312_v33  ;;  %v12467_v24 = vcombine.high %v8309_v61, %v8313_v55  ;;  %v12466_v34 = vcombine.low %v8309_v61, %v8313_v55  ;;  %v8364_v55 = vld [vmem:[#allocation9 + $0x19d0] sm:$0xff] }
 0x574   :  { %8695 = vmatpush1.bf16.msra.mxu0 %v12476_v45  ;;  %8736 = vmatpush1.bf16.msra.mxu1 %v12478_v18  ;;  %v8320_v45 = vld [vmem:[#allocation9 + $0x1870] sm:$0xff]  ;;  %v8317_v18 = vld [vmem:[#allocation9 + $0x1858] sm:$0xff] }
 0x575   :  { %8696 = vmatprep.subr.bf16.mxu0 %v12485_v7  ;;  %8737 = vmatprep.subr.bf16.mxu1 %v12487_v37  ;;  %v8321_v7 = vld [vmem:[#allocation9 + $0x1878] sm:$0xff]  ;;  %v12464_v37 = vcombine.low %v8308_v53, %v8312_v33  ;;  %v12473_v14 = vcombine.high %v8316_v4, %v8320_v45 }
 0x576   :  { %v12475_v49 = vcombine.high %v8317_v18, %v8321_v7  ;;  %v12474_v48 = vcombine.low %v8317_v18, %v8321_v7 }
 0x578   :  { %8697 = vmatpush1.bf16.msra.mxu0 %v12484_v42  ;;  %8738 = vmatpush1.bf16.msra.mxu1 %v12486_v3  ;;  %v8328_v42 = vld [vmem:[#allocation9 + $0x18b0] sm:$0xff]  ;;  %v8325_v3 = vld [vmem:[#allocation9 + $0x1898] sm:$0xff] }
 0x579   :  { %8698 = vmatprep.subr.bf16.mxu0 %v12493_v40  ;;  %8739 = vmatprep.subr.bf16.mxu1 %v12495_v56  ;;  %v8329_v40 = vld [vmem:[#allocation9 + $0x18b8] sm:$0xff]  ;;  %v12472_v56 = vcombine.low %v8316_v4, %v8320_v45  ;;  %v12481_v1 = vcombine.high %v8324_v13, %v8328_v42 }
 0x57a   :  { %v12483_v47 = vcombine.high %v8325_v3, %v8329_v40  ;;  %v12482_v59 = vcombine.low %v8325_v3, %v8329_v40  ;;  %v8369_v4 = vld [vmem:[#allocation9 + $0x19f8] sm:$0xff] }
 0x57c   :  { %8699 = vmatpush1.bf16.msra.mxu0 %v12492_v51  ;;  %8740 = vmatpush1.bf16.msra.mxu1 %v12494_v28  ;;  %v8336_v51 = vld [vmem:[#allocation9 + $0x18f0] sm:$0xff]  ;;  %v8333_v28 = vld [vmem:[#allocation9 + $0x18d8] sm:$0xff] }
 0x57d   :  { %8700 = vmatprep.subr.bf16.mxu0 %v12501_v12  ;;  %8741 = vmatprep.subr.bf16.mxu1 %v12503_v41  ;;  %v8337_v12 = vld [vmem:[#allocation9 + $0x18f8] sm:$0xff]  ;;  %v12480_v41 = vcombine.low %v8324_v13, %v8328_v42  ;;  %v12489_v36 = vcombine.high %v8332_v50, %v8336_v51 }
 0x57e   :  { %v6576_v58 = vpop.f32.mrb[132].mxu0  ;;  %v6617_v9 = vpop.f32.mrb[132].mxu1  ;;  %v12491_v46 = vcombine.high %v8333_v28, %v8337_v12 }
 0x57f   :  { %v14486_v27 = vadd.f32 %v6576_v58, %v14451_v29  ;;  %v14489_v25 = vadd.f32 %v6617_v9, %v14454_v44  ;;  %v6578_v38 = vpop.f32.mrb[133].mxu0  ;;  %v6619_v23 = vpop.f32.mrb[133].mxu1  ;;  %v12517_v44 = vcombine.high %v8362_v60, %v8366_v10 }
 0x580   :  { %v14492_v19 = vadd.f32 %v6578_v38, %v14457_v17  ;;  %v14495_v32 = vadd.f32 %v6619_v23, %v14460_v35  ;;  %v6580_v57 = vpop.f32.mrb[134].mxu0  ;;  %v6621_v5 = vpop.f32.mrb[134].mxu1  ;;  %8701 = vmatpush1.bf16.msra.mxu0 %v12500_v20  ;;  %8742 = vmatpush1.bf16.msra.mxu1 %v12502_v21  ;;  %v12516_v17 = vcombine.low %v8362_v60, %v8366_v10  ;;  %v8344_v20 = vld [vmem:[#allocation9 + $0x1930] sm:$0xff]  ;;  %v8341_v21 = vld [vmem:[#allocation9 + $0x1918] sm:$0xff] }
 0x581   :  { %v6581_v2 = vpop.f32.mrb[135].mxu0  ;;  %v6622_v29 = vpop.f32.mrb[135].mxu1  ;;  %8702 = vmatprep.subr.bf16.mxu0 %v12509_v22  ;;  %8743 = vmatprep.subr.bf16.mxu1 %v12511_v26  ;;  %v12518_v35 = vcombine.low %v8363_v0, %v8367_v30  ;;  %v8345_v22 = vld [vmem:[#allocation9 + $0x1938] sm:$0xff]  ;;  %v12488_v26 = vcombine.low %v8332_v50, %v8336_v51  ;;  %v12490_v60 = vcombine.low %v8333_v28, %v8337_v12  ;;  %v8348_v10 = vld [vmem:[#allocation9 + $0x1950] sm:$0xff]  ;;  %v8867_v50 = vld [vmem:[#allocation9 + $0x1a28] sm:$0xff] }
 0x582   :  { %v12497_v58 = vcombine.high %v8340_v11, %v8344_v20  ;;  %v12499_v9 = vcombine.high %v8341_v21, %v8345_v22  ;;  %v8352_v0 = vld [vmem:[#allocation9 + $0x1970] sm:$0xff]  ;;  %v8349_v30 = vld [vmem:[#allocation9 + $0x1958] sm:$0xff]  ;;  %v12496_v23 = vcombine.low %v8340_v11, %v8344_v20  ;;  %v8870_v12 = vld [vmem:[#allocation9 + $0x1a40] sm:$0xff] }
 0x583   :  { %v8353_v38 = vld [vmem:[#allocation9 + $0x1978] sm:$0xff]  ;;  %v12505_v57 = vcombine.high %v8348_v10, %v8352_v0  ;;  %v8360_v2 = vld [vmem:[#allocation9 + $0x19b0] sm:$0xff] }
 0x584   :  { %8703 = vmatpush1.bf16.msra.mxu0 %v12508_v39  ;;  %8744 = vmatpush1.bf16.msra.mxu1 %v12510_v31  ;;  %v12498_v39 = vcombine.low %v8341_v21, %v8345_v22  ;;  %v12507_v5 = vcombine.high %v8349_v30, %v8353_v38  ;;  %v8356_v31 = vld [vmem:[#allocation9 + $0x1990] sm:$0xff]  ;;  %v8357_v29 = vld [vmem:[#allocation9 + $0x1998] sm:$0xff]  ;;  %v12506_v53 = vcombine.low %v8349_v30, %v8353_v38  ;;  %v8878_v22 = vld [vmem:[#allocation9 + $0x1a80] sm:$0xff] }
 0x585   :  { %8704 = vmatprep.subr.bf16.mxu0 %v12517_v44  ;;  %8745 = vmatprep.subr.bf16.mxu1 %v12519_v43  ;;  %v8361_v44 = vld [vmem:[#allocation9 + $0x19b8] sm:$0xff]  ;;  %v12504_v43 = vcombine.low %v8348_v10, %v8352_v0  ;;  %v12513_v33 = vcombine.high %v8356_v31, %v8360_v2  ;;  %v8886_v38 = vld [vmem:[#allocation9 + $0x1ac0] sm:$0xff] }
 0x586   :  { %v12515_v61 = vcombine.high %v8357_v29, %v8361_v44  ;;  %v12514_v3 = vcombine.low %v8357_v29, %v8361_v44  ;;  %v8894_v44 = vld [vmem:[#allocation9 + $0x1b00] sm:$0xff] }
 0x588   :  { %8705 = vmatpush1.bf16.msra.mxu0 %v12516_v17  ;;  %8746 = vmatpush1.bf16.msra.mxu1 %v12518_v35 }
 0x589   :  { %8772 = vmatprep.subr.bf16.mxu0 %v12465_v63  ;;  %8813 = vmatprep.subr.bf16.mxu1 %v12467_v24  ;;  %v8368_v63 = vld [vmem:[#allocation9 + $0x19f0] sm:$0xff]  ;;  %v8365_v24 = vld [vmem:[#allocation9 + $0x19d8] sm:$0xff] }
 0x58b   :  { %8723 = vmatmul.mubr.bf16.vlgmr.msra.gmra.mrb[160].mxu0 %v14178_v15  ;;  %8764 = vmatmul.mubr.bf16.vlgmr.msra.gmra.mrb[160].mxu1 %v14178_v15 }
 0x58c   :  { %8773 = vmatpush1.bf16.msra.mxu0 %v12464_v37  ;;  %8814 = vmatpush1.bf16.msra.mxu1 %v12466_v34  ;;  %v12512_v34 = vcombine.low %v8356_v31, %v8360_v2 }
 0x58d   :  { %8774 = vmatprep.subr.bf16.mxu0 %v12473_v14  ;;  %8815 = vmatprep.subr.bf16.mxu1 %v12475_v49 }
 0x58e   :  { %8804 = vmatprep.mubr.bf16.mxu0 %v13536_v54  ;;  %8845 = vmatprep.mubr.bf16.mxu1 %v13536_v54 }
 0x590   :  { %8775 = vmatpush1.bf16.msra.mxu0 %v12472_v56  ;;  %8816 = vmatpush1.bf16.msra.mxu1 %v12474_v48  ;;  %v12523_v56 = vcombine.high %v8365_v24, %v8369_v4  ;;  %v8862_v48 = vld [vmem:[#allocation9 + $0x1a00] sm:$0xff] }
 0x591   :  { %8776 = vmatprep.subr.bf16.mxu0 %v12481_v1  ;;  %8817 = vmatprep.subr.bf16.mxu1 %v12483_v47  ;;  %v8866_v1 = vld [vmem:[#allocation9 + $0x1a20] sm:$0xff]  ;;  %v8863_v47 = vld [vmem:[#allocation9 + $0x1a08] sm:$0xff] }
 0x592   :  { %v12525_v51 = vcombine.high %v8862_v48, %v8866_v1  ;;  %v12527_v28 = vcombine.high %v8863_v47, %v8867_v50  ;;  %v12526_v11 = vcombine.low %v8863_v47, %v8867_v50  ;;  %v8918_v50 = vld [vmem:[#allocation9 + $0x1bc0] sm:$0xff] }
 0x594   :  { %8777 = vmatpush1.bf16.msra.mxu0 %v12480_v41  ;;  %8818 = vmatpush1.bf16.msra.mxu1 %v12482_v59  ;;  %v8874_v41 = vld [vmem:[#allocation9 + $0x1a60] sm:$0xff]  ;;  %v8871_v59 = vld [vmem:[#allocation9 + $0x1a48] sm:$0xff] }
 0x595   :  { %8778 = vmatprep.subr.bf16.mxu0 %v12489_v36  ;;  %8819 = vmatprep.subr.bf16.mxu1 %v12491_v46  ;;  %v8875_v36 = vld [vmem:[#allocation9 + $0x1a68] sm:$0xff]  ;;  %v12524_v46 = vcombine.low %v8862_v48, %v8866_v1  ;;  %v12533_v20 = vcombine.high %v8870_v12, %v8874_v41 }
 0x596   :  { %v12535_v21 = vcombine.high %v8871_v59, %v8875_v36  ;;  %v12534_v10 = vcombine.low %v8871_v59, %v8875_v36 }
 0x598   :  { %8779 = vmatpush1.bf16.msra.mxu0 %v12488_v26  ;;  %8820 = vmatpush1.bf16.msra.mxu1 %v12490_v60  ;;  %v8882_v26 = vld [vmem:[#allocation9 + $0x1aa0] sm:$0xff]  ;;  %v8879_v60 = vld [vmem:[#allocation9 + $0x1a88] sm:$0xff] }
 0x599   :  { %8780 = vmatprep.subr.bf16.mxu0 %v12497_v58  ;;  %8821 = vmatprep.subr.bf16.mxu1 %v12499_v9  ;;  %v8883_v58 = vld [vmem:[#allocation9 + $0x1aa8] sm:$0xff]  ;;  %v12532_v9 = vcombine.low %v8870_v12, %v8874_v41  ;;  %v12541_v0 = vcombine.high %v8878_v22, %v8882_v26 }
 0x59a   :  { %v12543_v30 = vcombine.high %v8879_v60, %v8883_v58  ;;  %v12542_v31 = vcombine.low %v8879_v60, %v8883_v58  ;;  %v8923_v12 = vld [vmem:[#allocation9 + $0x1be8] sm:$0xff] }
 0x59c   :  { %8781 = vmatpush1.bf16.msra.mxu0 %v12496_v23  ;;  %8822 = vmatpush1.bf16.msra.mxu1 %v12498_v39  ;;  %v8890_v23 = vld [vmem:[#allocation9 + $0x1ae0] sm:$0xff]  ;;  %v8887_v39 = vld [vmem:[#allocation9 + $0x1ac8] sm:$0xff] }
 0x59d   :  { %8782 = vmatprep.subr.bf16.mxu0 %v12505_v57  ;;  %8823 = vmatprep.subr.bf16.mxu1 %v12507_v5  ;;  %v8891_v57 = vld [vmem:[#allocation9 + $0x1ae8] sm:$0xff]  ;;  %v12540_v5 = vcombine.low %v8878_v22, %v8882_v26  ;;  %v12549_v2 = vcombine.high %v8886_v38, %v8890_v23 }
 0x59e   :  { %v7053_v17 = vpop.f32.mrb[136].mxu0  ;;  %v7094_v35 = vpop.f32.mrb[136].mxu1  ;;  %v12551_v29 = vcombine.high %v8887_v39, %v8891_v57 }
 0x59f   :  { %v14502_v45 = vadd.f32 %v7053_v17, %v14470_v62  ;;  %v14505_v18 = vadd.f32 %v7094_v35, %v14473_v6  ;;  %v7055_v7 = vpop.f32.mrb[137].mxu0  ;;  %v7096_v37 = vpop.f32.mrb[137].mxu1  ;;  %v12521_v6 = vcombine.high %v8364_v55, %v8368_v63 }
 0x5a0   :  { %v14508_v14 = vadd.f32 %v7055_v7, %v14476_v8  ;;  %v14511_v49 = vadd.f32 %v7096_v37, %v14479_v52  ;;  %v7057_v13 = vpop.f32.mrb[138].mxu0  ;;  %v7098_v42 = vpop.f32.mrb[138].mxu1  ;;  %8783 = vmatpush1.bf16.msra.mxu0 %v12504_v43  ;;  %8824 = vmatpush1.bf16.msra.mxu1 %v12506_v53  ;;  %v12520_v8 = vcombine.low %v8364_v55, %v8368_v63  ;;  %v8898_v43 = vld [vmem:[#allocation9 + $0x1b20] sm:$0xff]  ;;  %v8895_v53 = vld [vmem:[#allocation9 + $0x1b08] sm:$0xff] }
 0x5a1   :  { %v7058_v40 = vpop.f32.mrb[139].mxu0  ;;  %v7099_v62 = vpop.f32.mrb[139].mxu1  ;;  %8784 = vmatprep.subr.bf16.mxu0 %v12513_v33  ;;  %8825 = vmatprep.subr.bf16.mxu1 %v12515_v61  ;;  %v12522_v52 = vcombine.low %v8365_v24, %v8369_v4  ;;  %v8899_v33 = vld [vmem:[#allocation9 + $0x1b28] sm:$0xff]  ;;  %v12548_v61 = vcombine.low %v8886_v38, %v8890_v23  ;;  %v12550_v55 = vcombine.low %v8887_v39, %v8891_v57  ;;  %v8902_v63 = vld [vmem:[#allocation9 + $0x1b40] sm:$0xff]  ;;  %v8869_v38 = vld [vmem:[#allocation9 + $0x1a38] sm:$0xff] }
 0x5a2   :  { %v12557_v17 = vcombine.high %v8894_v44, %v8898_v43  ;;  %v12559_v35 = vcombine.high %v8895_v53, %v8899_v33  ;;  %v8906_v24 = vld [vmem:[#allocation9 + $0x1b60] sm:$0xff]  ;;  %v8903_v4 = vld [vmem:[#allocation9 + $0x1b48] sm:$0xff]  ;;  %v12556_v37 = vcombine.low %v8894_v44, %v8898_v43  ;;  %v8872_v57 = vld [vmem:[#allocation9 + $0x1a50] sm:$0xff]  ;;  %v14530_v43 = vrot.slane %v14178_v15, 4 }
 0x5a3   :  { %v8907_v7 = vld [vmem:[#allocation9 + $0x1b68] sm:$0xff]  ;;  %v12565_v13 = vcombine.high %v8902_v63, %v8906_v24  ;;  %v8914_v40 = vld [vmem:[#allocation9 + $0x1ba0] sm:$0xff] }
 0x5a4   :  { %8785 = vmatpush1.bf16.msra.mxu0 %v12512_v34  ;;  %8826 = vmatpush1.bf16.msra.mxu1 %v12514_v3  ;;  %v12558_v34 = vcombine.low %v8895_v53, %v8899_v33  ;;  %v12567_v42 = vcombine.high %v8903_v4, %v8907_v7  ;;  %v8910_v3 = vld [vmem:[#allocation9 + $0x1b80] sm:$0xff]  ;;  %v8911_v62 = vld [vmem:[#allocation9 + $0x1b88] sm:$0xff]  ;;  %v12566_v48 = vcombine.low %v8903_v4, %v8907_v7  ;;  %v8888_v7 = vld [vmem:[#allocation9 + $0x1ad0] sm:$0xff] }
 0x5a5   :  { %8786 = vmatprep.subr.bf16.mxu0 %v12521_v6  ;;  %8827 = vmatprep.subr.bf16.mxu1 %v12523_v56  ;;  %v8915_v6 = vld [vmem:[#allocation9 + $0x1ba8] sm:$0xff]  ;;  %v12564_v56 = vcombine.low %v8902_v63, %v8906_v24  ;;  %v12573_v1 = vcombine.high %v8910_v3, %v8914_v40 }
 0x5a6   :  { %v12575_v47 = vcombine.high %v8911_v62, %v8915_v6  ;;  %v12574_v60 = vcombine.low %v8911_v62, %v8915_v6  ;;  %v8896_v6 = vld [vmem:[#allocation9 + $0x1b10] sm:$0xff] }
 0x5a8   :  { %8787 = vmatpush1.bf16.msra.mxu0 %v12520_v8  ;;  %8828 = vmatpush1.bf16.msra.mxu1 %v12522_v52 }
 0x5a9   :  { %9249 = vmatprep.subr.bf16.mxu0 %v12525_v51  ;;  %9290 = vmatprep.subr.bf16.mxu1 %v12527_v28  ;;  %v8922_v51 = vld [vmem:[#allocation9 + $0x1be0] sm:$0xff]  ;;  %v8919_v28 = vld [vmem:[#allocation9 + $0x1bc8] sm:$0xff] }
 0x5ab   :  { %8805 = vmatmul.mubr.bf16.vlgmr.msra.gmra.mrb[164].mxu0 %v14178_v15  ;;  %8846 = vmatmul.mubr.bf16.vlgmr.msra.gmra.mrb[164].mxu1 %v14178_v15 }
 0x5ac   :  { %9250 = vmatpush1.bf16.msra.mxu0 %v12524_v46  ;;  %9291 = vmatpush1.bf16.msra.mxu1 %v12526_v11  ;;  %v12572_v11 = vcombine.low %v8910_v3, %v8914_v40 }
 0x5ad   :  { %9251 = vmatprep.subr.bf16.mxu0 %v12533_v20  ;;  %9292 = vmatprep.subr.bf16.mxu1 %v12535_v21 }
 0x5ae   :  { %9281 = vmatprep.mubr.bf16.mxu0 %v13536_v54  ;;  %9322 = vmatprep.mubr.bf16.mxu1 %v13536_v54 }
 0x5b0   :  { %9252 = vmatpush1.bf16.msra.mxu0 %v12532_v9  ;;  %9293 = vmatpush1.bf16.msra.mxu1 %v12534_v10  ;;  %v12583_v9 = vcombine.high %v8919_v28, %v8923_v12  ;;  %v8864_v10 = vld [vmem:[#allocation9 + $0x1a10] sm:$0xff] }
 0x5b1   :  { %9253 = vmatprep.subr.bf16.mxu0 %v12541_v0  ;;  %9294 = vmatprep.subr.bf16.mxu1 %v12543_v30  ;;  %v8868_v0 = vld [vmem:[#allocation9 + $0x1a30] sm:$0xff]  ;;  %v8865_v30 = vld [vmem:[#allocation9 + $0x1a18] sm:$0xff] }
 0x5b2   :  { %v12529_v23 = vcombine.high %v8864_v10, %v8868_v0  ;;  %v12531_v39 = vcombine.high %v8865_v30, %v8869_v38  ;;  %v12530_v44 = vcombine.low %v8865_v30, %v8869_v38  ;;  %v8920_v38 = vld [vmem:[#allocation9 + $0x1bd0] sm:$0xff] }
 0x5b4   :  { %9254 = vmatpush1.bf16.msra.mxu0 %v12540_v5  ;;  %9295 = vmatpush1.bf16.msra.mxu1 %v12542_v31  ;;  %v8876_v5 = vld [vmem:[#allocation9 + $0x1a70] sm:$0xff]  ;;  %v8873_v31 = vld [vmem:[#allocation9 + $0x1a58] sm:$0xff] }
 0x5b5   :  { %9255 = vmatprep.subr.bf16.mxu0 %v12549_v2  ;;  %9296 = vmatprep.subr.bf16.mxu1 %v12551_v29  ;;  %v8877_v2 = vld [vmem:[#allocation9 + $0x1a78] sm:$0xff]  ;;  %v12528_v29 = vcombine.low %v8864_v10, %v8868_v0  ;;  %v12537_v53 = vcombine.high %v8872_v57, %v8876_v5  ;;  %v12536_v63 = vcombine.low %v8872_v57, %v8876_v5 }
 0x5b6   :  { %v12539_v33 = vcombine.high %v8873_v31, %v8877_v2  ;;  %v12538_v24 = vcombine.low %v8873_v31, %v8877_v2  ;;  %v8925_v57 = vld [vmem:[#allocation9 + $0x1bf8] sm:$0xff] }
 0x5b8   :  { %9256 = vmatpush1.bf16.msra.mxu0 %v12548_v61  ;;  %9297 = vmatpush1.bf16.msra.mxu1 %v12550_v55  ;;  %v8880_v61 = vld [vmem:[#allocation9 + $0x1a90] sm:$0xff] }
 0x5b9   :  { %9257 = vmatprep.subr.bf16.mxu0 %v12557_v17  ;;  %9298 = vmatprep.subr.bf16.mxu1 %v12559_v35  ;;  %v8884_v55 = vld [vmem:[#allocation9 + $0x1ab0] sm:$0xff]  ;;  %v8881_v17 = vld [vmem:[#allocation9 + $0x1a98] sm:$0xff] }
 0x5ba   :  { %v8885_v35 = vld [vmem:[#allocation9 + $0x1ab8] sm:$0xff]  ;;  %v12545_v15 = vcombine.high %v8880_v61, %v8884_v55 }
 0x5bb   :  { %v12547_v4 = vcombine.high %v8881_v17, %v8885_v35  ;;  %v12546_v3 = vcombine.low %v8881_v17, %v8885_v35 }
 0x5bc   :  { %9258 = vmatpush1.bf16.msra.mxu0 %v12556_v37  ;;  %9299 = vmatpush1.bf16.msra.mxu1 %v12558_v34  ;;  %v8892_v37 = vld [vmem:[#allocation9 + $0x1af0] sm:$0xff]  ;;  %v8889_v34 = vld [vmem:[#allocation9 + $0x1ad8] sm:$0xff] }
 0x5bd   :  { %9259 = vmatprep.subr.bf16.mxu0 %v12565_v13  ;;  %9300 = vmatprep.subr.bf16.mxu1 %v12567_v42  ;;  %v8893_v13 = vld [vmem:[#allocation9 + $0x1af8] sm:$0xff]  ;;  %v12544_v42 = vcombine.low %v8880_v61, %v8884_v55  ;;  %v12553_v40 = vcombine.high %v8888_v7, %v8892_v37 }
 0x5be   :  { %v7135_v8 = vpop.f32.mrb[140].mxu0  ;;  %v7176_v52 = vpop.f32.mrb[140].mxu1  ;;  %v12555_v62 = vcombine.high %v8889_v34, %v8893_v13 }
 0x5bf   :  { %v14518_v41 = vadd.f32 %v7135_v8, %v14486_v27  ;;  %v14521_v59 = vadd.f32 %v7176_v52, %v14489_v25  ;;  %v7137_v36 = vpop.f32.mrb[141].mxu0  ;;  %v7178_v46 = vpop.f32.mrb[141].mxu1  ;;  %v12581_v25 = vcombine.high %v8918_v50, %v8922_v51 }
 0x5c0   :  { %v14524_v20 = vadd.f32 %v7137_v36, %v14492_v19  ;;  %v14527_v21 = vadd.f32 %v7178_v46, %v14495_v32  ;;  %v7139_v22 = vpop.f32.mrb[142].mxu0  ;;  %v7180_v26 = vpop.f32.mrb[142].mxu1  ;;  %9260 = vmatpush1.bf16.msra.mxu0 %v12564_v56  ;;  %9301 = vmatpush1.bf16.msra.mxu1 %v12566_v48  ;;  %v12580_v19 = vcombine.low %v8918_v50, %v8922_v51  ;;  %v8900_v56 = vld [vmem:[#allocation9 + $0x1b30] sm:$0xff]  ;;  %v8897_v48 = vld [vmem:[#allocation9 + $0x1b18] sm:$0xff] }
 0x5c1   :  { %v7140_v58 = vpop.f32.mrb[143].mxu0  ;;  %v7181_v27 = vpop.f32.mrb[143].mxu1  ;;  %9261 = vmatprep.subr.bf16.mxu0 %v12573_v1  ;;  %9302 = vmatprep.subr.bf16.mxu1 %v12575_v47  ;;  %v12582_v32 = vcombine.low %v8919_v28, %v8923_v12  ;;  %v8901_v1 = vld [vmem:[#allocation9 + $0x1b38] sm:$0xff]  ;;  %v12552_v47 = vcombine.low %v8888_v7, %v8892_v37  ;;  %v12554_v50 = vcombine.low %v8889_v34, %v8893_v13  ;;  %v8904_v51 = vld [vmem:[#allocation9 + $0x1b50] sm:$0xff]  ;;  %v9426_v7 = vld [vmem:[#allocation9 + $0x1c28] sm:$0xff] }
 0x5c2   :  { %v12561_v8 = vcombine.high %v8896_v6, %v8900_v56  ;;  %v12563_v52 = vcombine.high %v8897_v48, %v8901_v1  ;;  %v8908_v28 = vld [vmem:[#allocation9 + $0x1b70] sm:$0xff]  ;;  %v8905_v12 = vld [vmem:[#allocation9 + $0x1b58] sm:$0xff]  ;;  %v12560_v46 = vcombine.low %v8896_v6, %v8900_v56  ;;  %v9429_v13 = vld [vmem:[#allocation9 + $0x1c40] sm:$0xff] }
 0x5c3   :  { %v8909_v36 = vld [vmem:[#allocation9 + $0x1b78] sm:$0xff]  ;;  %v12569_v22 = vcombine.high %v8904_v51, %v8908_v28  ;;  %v8916_v58 = vld [vmem:[#allocation9 + $0x1bb0] sm:$0xff] }
 0x5c4   :  { %9262 = vmatpush1.bf16.msra.mxu0 %v12572_v11  ;;  %9303 = vmatpush1.bf16.msra.mxu1 %v12574_v60  ;;  %v12562_v11 = vcombine.low %v8897_v48, %v8901_v1  ;;  %v12571_v26 = vcombine.high %v8905_v12, %v8909_v36  ;;  %v8912_v60 = vld [vmem:[#allocation9 + $0x1b90] sm:$0xff]  ;;  %v8913_v27 = vld [vmem:[#allocation9 + $0x1b98] sm:$0xff]  ;;  %v12570_v10 = vcombine.low %v8905_v12, %v8909_v36  ;;  %v9437_v1 = vld [vmem:[#allocation9 + $0x1c80] sm:$0xff] }
 0x5c5   :  { %9263 = vmatprep.subr.bf16.mxu0 %v12581_v25  ;;  %9304 = vmatprep.subr.bf16.mxu1 %v12583_v9  ;;  %v8917_v25 = vld [vmem:[#allocation9 + $0x1bb8] sm:$0xff]  ;;  %v12568_v9 = vcombine.low %v8904_v51, %v8908_v28  ;;  %v12577_v0 = vcombine.high %v8912_v60, %v8916_v58  ;;  %v9445_v36 = vld [vmem:[#allocation9 + $0x1cc0] sm:$0xff] }
 0x5c6   :  { %v12579_v30 = vcombine.high %v8913_v27, %v8917_v25  ;;  %v12578_v17 = vcombine.low %v8913_v27, %v8917_v25  ;;  %v9453_v27 = vld [vmem:[#allocation9 + $0x1d00] sm:$0xff] }
 0x5c7   :  { %v9457_v25 = vld [vmem:[#allocation9 + $0x1d20] sm:$0xff] }
 0x5c8   :  { %9264 = vmatpush1.bf16.msra.mxu0 %v12580_v19  ;;  %9305 = vmatpush1.bf16.msra.mxu1 %v12582_v32 }
 0x5c9   :  { %9331 = vmatprep.subr.bf16.mxu0 %v12529_v23  ;;  %9372 = vmatprep.subr.bf16.mxu1 %v12531_v39  ;;  %v8924_v23 = vld [vmem:[#allocation9 + $0x1bf0] sm:$0xff]  ;;  %v8921_v39 = vld [vmem:[#allocation9 + $0x1bd8] sm:$0xff] }
 0x5cb   :  { %9282 = vmatmul.mubr.bf16.vlgmr.msra.gmra.mrb[168].mxu0 %v14530_v43  ;;  %9323 = vmatmul.mubr.bf16.vlgmr.msra.gmra.mrb[168].mxu1 %v14530_v43 }
 0x5cc   :  { %9332 = vmatpush1.bf16.msra.mxu0 %v12528_v29  ;;  %9373 = vmatpush1.bf16.msra.mxu1 %v12530_v44  ;;  %v12576_v44 = vcombine.low %v8912_v60, %v8916_v58 }
 0x5cd   :  { %9333 = vmatprep.subr.bf16.mxu0 %v12537_v53  ;;  %9374 = vmatprep.subr.bf16.mxu1 %v12539_v33 }
 0x5ce   :  { %9363 = vmatprep.mubr.bf16.mxu0 %v13536_v54  ;;  %9404 = vmatprep.mubr.bf16.mxu1 %v13536_v54 }
 0x5d0   :  { %9334 = vmatpush1.bf16.msra.mxu0 %v12536_v63  ;;  %9375 = vmatpush1.bf16.msra.mxu1 %v12538_v24  ;;  %v12587_v63 = vcombine.high %v8921_v39, %v8925_v57  ;;  %v9421_v24 = vld [vmem:[#allocation9 + $0x1c00] sm:$0xff] }
 0x5d1   :  { %9335 = vmatprep.subr.bf16.mxu0 %v12545_v15  ;;  %9376 = vmatprep.subr.bf16.mxu1 %v12547_v4  ;;  %v9425_v15 = vld [vmem:[#allocation9 + $0x1c20] sm:$0xff]  ;;  %v9422_v4 = vld [vmem:[#allocation9 + $0x1c08] sm:$0xff] }
 0x5d2   :  { %v12589_v37 = vcombine.high %v9421_v24, %v9425_v15  ;;  %v12591_v34 = vcombine.high %v9422_v4, %v9426_v7  ;;  %v12590_v6 = vcombine.low %v9422_v4, %v9426_v7  ;;  %v9477_v4 = vld [vmem:[#allocation9 + $0x1dc0] sm:$0xff] }
 0x5d4   :  { %9336 = vmatpush1.bf16.msra.mxu0 %v12544_v42  ;;  %9377 = vmatpush1.bf16.msra.mxu1 %v12546_v3  ;;  %v9433_v42 = vld [vmem:[#allocation9 + $0x1c60] sm:$0xff]  ;;  %v9430_v3 = vld [vmem:[#allocation9 + $0x1c48] sm:$0xff] }
 0x5d5   :  { %9337 = vmatprep.subr.bf16.mxu0 %v12553_v40  ;;  %9378 = vmatprep.subr.bf16.mxu1 %v12555_v62  ;;  %v9434_v40 = vld [vmem:[#allocation9 + $0x1c68] sm:$0xff]  ;;  %v12588_v62 = vcombine.low %v9421_v24, %v9425_v15  ;;  %v12597_v56 = vcombine.high %v9429_v13, %v9433_v42 }
 0x5d6   :  { %v12599_v48 = vcombine.high %v9430_v3, %v9434_v40  ;;  %v12598_v51 = vcombine.low %v9430_v3, %v9434_v40 }
 0x5d8   :  { %9338 = vmatpush1.bf16.msra.mxu0 %v12552_v47  ;;  %9379 = vmatpush1.bf16.msra.mxu1 %v12554_v50  ;;  %v9441_v47 = vld [vmem:[#allocation9 + $0x1ca0] sm:$0xff]  ;;  %v9438_v50 = vld [vmem:[#allocation9 + $0x1c88] sm:$0xff] }
 0x5d9   :  { %9339 = vmatprep.subr.bf16.mxu0 %v12561_v8  ;;  %9380 = vmatprep.subr.bf16.mxu1 %v12563_v52  ;;  %v9442_v8 = vld [vmem:[#allocation9 + $0x1ca8] sm:$0xff]  ;;  %v12596_v52 = vcombine.low %v9429_v13, %v9433_v42  ;;  %v12605_v28 = vcombine.high %v9437_v1, %v9441_v47 }
 0x5da   :  { %v12607_v12 = vcombine.high %v9438_v50, %v9442_v8 }
 0x5dc   :  { %9340 = vmatpush1.bf16.msra.mxu0 %v12560_v46  ;;  %9381 = vmatpush1.bf16.msra.mxu1 %v12562_v11  ;;  %v9449_v46 = vld [vmem:[#allocation9 + $0x1ce0] sm:$0xff]  ;;  %v9446_v11 = vld [vmem:[#allocation9 + $0x1cc8] sm:$0xff] }
 0x5dd   :  { %9341 = vmatprep.subr.bf16.mxu0 %v12569_v22  ;;  %9382 = vmatprep.subr.bf16.mxu1 %v12571_v26  ;;  %v9450_v22 = vld [vmem:[#allocation9 + $0x1ce8] sm:$0xff]  ;;  %v12604_v26 = vcombine.low %v9437_v1, %v9441_v47  ;;  %v12613_v60 = vcombine.high %v9445_v36, %v9449_v46 }
 0x5de   :  { %v7609_v19 = vpop.f32.mrb[144].mxu0  ;;  %v7650_v32 = vpop.f32.mrb[144].mxu1  ;;  %v12615_v58 = vcombine.high %v9446_v11, %v9450_v22 }
 0x5df   :  { %v14537_v5 = vadd.f32 %v7609_v19, %v14502_v45  ;;  %v14540_v31 = vadd.f32 %v7650_v32, %v14505_v18  ;;  %v7611_v2 = vpop.f32.mrb[145].mxu0  ;;  %v7652_v29 = vpop.f32.mrb[145].mxu1  ;;  %v12585_v18 = vcombine.high %v8920_v38, %v8924_v23  ;;  %v9461_v32 = vld [vmem:[#allocation9 + $0x1d40] sm:$0xff] }
 0x5e0   :  { %v14543_v53 = vadd.f32 %v7611_v2, %v14508_v14  ;;  %v14546_v33 = vadd.f32 %v7652_v29, %v14511_v49  ;;  %v7613_v61 = vpop.f32.mrb[146].mxu0  ;;  %v7654_v55 = vpop.f32.mrb[146].mxu1  ;;  %9342 = vmatpush1.bf16.msra.mxu0 %v12568_v9  ;;  %9383 = vmatpush1.bf16.msra.mxu1 %v12570_v10  ;;  %v12584_v14 = vcombine.low %v8920_v38, %v8924_v23  ;;  %v9454_v9 = vld [vmem:[#allocation9 + $0x1d08] sm:$0xff]  ;;  %v9465_v23 = vld [vmem:[#allocation9 + $0x1d60] sm:$0xff] }
 0x5e1   :  { %v7614_v35 = vpop.f32.mrb[147].mxu0  ;;  %v7655_v45 = vpop.f32.mrb[147].mxu1  ;;  %9343 = vmatprep.subr.bf16.mxu0 %v12577_v0  ;;  %9384 = vmatprep.subr.bf16.mxu1 %v12579_v30  ;;  %v12586_v49 = vcombine.low %v8921_v39, %v8925_v57  ;;  %v9458_v10 = vld [vmem:[#allocation9 + $0x1d28] sm:$0xff]  ;;  %v12612_v0 = vcombine.low %v9445_v36, %v9449_v46  ;;  %v12614_v30 = vcombine.low %v9446_v11, %v9450_v22  ;;  %v9469_v55 = vld [vmem:[#allocation9 + $0x1d80] sm:$0xff]  ;;  %v9431_v11 = vld [vmem:[#allocation9 + $0x1c50] sm:$0xff] }
 0x5e2   :  { %v12621_v38 = vcombine.high %v9453_v27, %v9457_v25  ;;  %v12623_v19 = vcombine.high %v9454_v9, %v9458_v10  ;;  %v9462_v39 = vld [vmem:[#allocation9 + $0x1d48] sm:$0xff]  ;;  %v12620_v2 = vcombine.low %v9453_v27, %v9457_v25  ;;  %v12622_v29 = vcombine.low %v9454_v9, %v9458_v10  ;;  %v9435_v22 = vld [vmem:[#allocation9 + $0x1c70] sm:$0xff] }
 0x5e3   :  { %v9466_v57 = vld [vmem:[#allocation9 + $0x1d68] sm:$0xff]  ;;  %v12601_v27 = vcombine.high %v9431_v11, %v9435_v22  ;;  %v9439_v9 = vld [vmem:[#allocation9 + $0x1c90] sm:$0xff] }
 0x5e4   :  { %9344 = vmatpush1.bf16.msra.mxu0 %v12576_v44  ;;  %9385 = vmatpush1.bf16.msra.mxu1 %v12578_v17  ;;  %v12629_v44 = vcombine.high %v9461_v32, %v9465_v23  ;;  %v12631_v61 = vcombine.high %v9462_v39, %v9466_v57  ;;  %v9473_v17 = vld [vmem:[#allocation9 + $0x1da0] sm:$0xff]  ;;  %v9470_v35 = vld [vmem:[#allocation9 + $0x1d88] sm:$0xff]  ;;  %v9443_v10 = vld [vmem:[#allocation9 + $0x1cb0] sm:$0xff] }
 0x5e5   :  { %9345 = vmatprep.subr.bf16.mxu0 %v12585_v18  ;;  %9386 = vmatprep.subr.bf16.mxu1 %v12587_v63  ;;  %v9474_v45 = vld [vmem:[#allocation9 + $0x1da8] sm:$0xff]  ;;  %v12628_v18 = vcombine.low %v9461_v32, %v9465_v23  ;;  %v12630_v63 = vcombine.low %v9462_v39, %v9466_v57  ;;  %v12637_v24 = vcombine.high %v9469_v55, %v9473_v17  ;;  %v9447_v39 = vld [vmem:[#allocation9 + $0x1cd0] sm:$0xff] }
 0x5e6   :  { %v12639_v15 = vcombine.high %v9470_v35, %v9474_v45  ;;  %v12638_v47 = vcombine.low %v9470_v35, %v9474_v45  ;;  %v12609_v32 = vcombine.high %v9439_v9, %v9443_v10  ;;  %v9451_v57 = vld [vmem:[#allocation9 + $0x1cf0] sm:$0xff] }
 0x5e7   :  { %v9455_v35 = vld [vmem:[#allocation9 + $0x1d10] sm:$0xff] }
 0x5e8   :  { %9346 = vmatpush1.bf16.msra.mxu0 %v12584_v14  ;;  %9387 = vmatpush1.bf16.msra.mxu1 %v12586_v49  ;;  %v9481_v49 = vld [vmem:[#allocation9 + $0x1de0] sm:$0xff]  ;;  %v9459_v45 = vld [vmem:[#allocation9 + $0x1d30] sm:$0xff] }
 0x5e9   :  { %9805 = vmatprep.subr.bf16.mxu0 %v12589_v37  ;;  %9846 = vmatprep.subr.bf16.mxu1 %v12591_v34  ;;  %v9478_v37 = vld [vmem:[#allocation9 + $0x1dc8] sm:$0xff] }
 0x5ea   :  { %v9482_v34 = vld [vmem:[#allocation9 + $0x1de8] sm:$0xff] }
 0x5eb   :  { %9364 = vmatmul.mubr.bf16.vlgmr.msra.gmra.mrb[172].mxu0 %v14530_v43  ;;  %9405 = vmatmul.mubr.bf16.vlgmr.msra.gmra.mrb[172].mxu1 %v14530_v43  ;;  %v12606_v43 = vcombine.low %v9438_v50, %v9442_v8  ;;  %v12647_v8 = vcombine.high %v9478_v37, %v9482_v34 }
 0x5ec   :  { %9806 = vmatpush1.bf16.msra.mxu0 %v12588_v62  ;;  %9847 = vmatpush1.bf16.msra.mxu1 %v12590_v6  ;;  %v12636_v62 = vcombine.low %v9469_v55, %v9473_v17  ;;  %v12617_v55 = vcombine.high %v9447_v39, %v9451_v57 }
 0x5ed   :  { %9807 = vmatprep.subr.bf16.mxu0 %v12597_v56  ;;  %9848 = vmatprep.subr.bf16.mxu1 %v12599_v48 }
 0x5ee   :  { %9837 = vmatprep.mubr.bf16.mxu0 %v13536_v54  ;;  %9878 = vmatprep.mubr.bf16.mxu1 %v13536_v54 }
 0x5f0   :  { %9808 = vmatpush1.bf16.msra.mxu0 %v12596_v52  ;;  %9849 = vmatpush1.bf16.msra.mxu1 %v12598_v51  ;;  %v9423_v52 = vld [vmem:[#allocation9 + $0x1c10] sm:$0xff] }
 0x5f1   :  { %9809 = vmatprep.subr.bf16.mxu0 %v12605_v28  ;;  %9850 = vmatprep.subr.bf16.mxu1 %v12607_v12  ;;  %v9427_v51 = vld [vmem:[#allocation9 + $0x1c30] sm:$0xff]  ;;  %v9424_v28 = vld [vmem:[#allocation9 + $0x1c18] sm:$0xff] }
 0x5f2   :  { %v9428_v12 = vld [vmem:[#allocation9 + $0x1c38] sm:$0xff]  ;;  %v12593_v36 = vcombine.high %v9423_v52, %v9427_v51 }
 0x5f3   :  { %v12595_v46 = vcombine.high %v9424_v28, %v9428_v12 }
 0x5f4   :  { %9810 = vmatpush1.bf16.msra.mxu0 %v12604_v26  ;;  %9851 = vmatpush1.bf16.msra.mxu1 %v12606_v43  ;;  %v9432_v26 = vld [vmem:[#allocation9 + $0x1c58] sm:$0xff] }
 0x5f5   :  { %9811 = vmatprep.subr.bf16.mxu0 %v12613_v60  ;;  %9852 = vmatprep.subr.bf16.mxu1 %v12615_v58  ;;  %v9436_v43 = vld [vmem:[#allocation9 + $0x1c78] sm:$0xff]  ;;  %v12592_v60 = vcombine.low %v9423_v52, %v9427_v51  ;;  %v12594_v58 = vcombine.low %v9424_v28, %v9428_v12  ;;  %v9479_v28 = vld [vmem:[#allocation9 + $0x1dd0] sm:$0xff] }
 0x5f6   :  { %v12603_v25 = vcombine.high %v9432_v26, %v9436_v43 }
 0x5f8   :  { %9812 = vmatpush1.bf16.msra.mxu0 %v12612_v0  ;;  %9853 = vmatpush1.bf16.msra.mxu1 %v12614_v30  ;;  %v9440_v0 = vld [vmem:[#allocation9 + $0x1c98] sm:$0xff] }
 0x5f9   :  { %9813 = vmatprep.subr.bf16.mxu0 %v12621_v38  ;;  %9854 = vmatprep.subr.bf16.mxu1 %v12623_v19  ;;  %v9444_v30 = vld [vmem:[#allocation9 + $0x1cb8] sm:$0xff]  ;;  %v12600_v38 = vcombine.low %v9431_v11, %v9435_v22  ;;  %v12602_v19 = vcombine.low %v9432_v26, %v9436_v43 }
 0x5fa   :  { %v12611_v23 = vcombine.high %v9440_v0, %v9444_v30 }
 0x5fc   :  { %9814 = vmatpush1.bf16.msra.mxu0 %v12620_v2  ;;  %9855 = vmatpush1.bf16.msra.mxu1 %v12622_v29  ;;  %v9448_v2 = vld [vmem:[#allocation9 + $0x1cd8] sm:$0xff] }
 0x5fd   :  { %9815 = vmatprep.subr.bf16.mxu0 %v12629_v44  ;;  %9856 = vmatprep.subr.bf16.mxu1 %v12631_v61  ;;  %v9452_v29 = vld [vmem:[#allocation9 + $0x1cf8] sm:$0xff]  ;;  %v12608_v44 = vcombine.low %v9439_v9, %v9443_v10  ;;  %v12610_v61 = vcombine.low %v9440_v0, %v9444_v30 }
 0x5fe   :  { %v7691_v7 = vpop.f32.mrb[148].mxu0  ;;  %v7732_v14 = vpop.f32.mrb[148].mxu1  ;;  %v12619_v17 = vcombine.high %v9448_v2, %v9452_v29 }
 0x5ff   :  { %v14553_v13 = vadd.f32 %v7691_v7, %v14518_v41  ;;  %v14556_v42 = vadd.f32 %v7732_v14, %v14521_v59  ;;  %v7693_v3 = vpop.f32.mrb[149].mxu0  ;;  %v7734_v40 = vpop.f32.mrb[149].mxu1  ;;  %v12645_v59 = vcombine.high %v9477_v4, %v9481_v49  ;;  %v9463_v14 = vld [vmem:[#allocation9 + $0x1d50] sm:$0xff] }
 0x600   :  { %v14559_v6 = vadd.f32 %v7693_v3, %v14524_v20  ;;  %v14562_v56 = vadd.f32 %v7734_v40, %v14527_v21  ;;  %v7695_v48 = vpop.f32.mrb[150].mxu0  ;;  %v7736_v1 = vpop.f32.mrb[150].mxu1  ;;  %9816 = vmatpush1.bf16.msra.mxu0 %v12628_v18  ;;  %9857 = vmatpush1.bf16.msra.mxu1 %v12630_v63  ;;  %v12644_v20 = vcombine.low %v9477_v4, %v9481_v49  ;;  %v9456_v18 = vld [vmem:[#allocation9 + $0x1d18] sm:$0xff]  ;;  %v9467_v49 = vld [vmem:[#allocation9 + $0x1d70] sm:$0xff] }
 0x601   :  { %v7696_v50 = vpop.f32.mrb[151].mxu0  ;;  %v7737_v41 = vpop.f32.mrb[151].mxu1  ;;  %9817 = vmatprep.subr.bf16.mxu0 %v12637_v24  ;;  %9858 = vmatprep.subr.bf16.mxu1 %v12639_v15  ;;  %v12646_v21 = vcombine.low %v9478_v37, %v9482_v34  ;;  %v9460_v63 = vld [vmem:[#allocation9 + $0x1d38] sm:$0xff]  ;;  %v12616_v24 = vcombine.low %v9447_v39, %v9451_v57  ;;  %v12618_v15 = vcombine.low %v9448_v2, %v9452_v29  ;;  %v9471_v1 = vld [vmem:[#allocation9 + $0x1d90] sm:$0xff]  ;;  %v9985_v2 = vld [vmem:[#allocation9 + $0x1e40] sm:$0xff] }
 0x602   :  { %v12625_v4 = vcombine.high %v9455_v35, %v9459_v45  ;;  %v12627_v7 = vcombine.high %v9456_v18, %v9460_v63  ;;  %v9464_v37 = vld [vmem:[#allocation9 + $0x1d58] sm:$0xff]  ;;  %v12624_v3 = vcombine.low %v9455_v35, %v9459_v45  ;;  %v12626_v40 = vcombine.low %v9456_v18, %v9460_v63  ;;  %v9989_v29 = vld [vmem:[#allocation9 + $0x1e60] sm:$0xff] }
 0x603   :  { %v9468_v34 = vld [vmem:[#allocation9 + $0x1d78] sm:$0xff]  ;;  %v12661_v35 = vcombine.high %v9985_v2, %v9989_v29  ;;  %v9993_v18 = vld [vmem:[#allocation9 + $0x1e80] sm:$0xff] }
 0x604   :  { %9818 = vmatpush1.bf16.msra.mxu0 %v12636_v62  ;;  %9859 = vmatpush1.bf16.msra.mxu1 %v12638_v47  ;;  %v12633_v62 = vcombine.high %v9463_v14, %v9467_v49  ;;  %v12635_v48 = vcombine.high %v9464_v37, %v9468_v34  ;;  %v9475_v47 = vld [vmem:[#allocation9 + $0x1db0] sm:$0xff]  ;;  %v9472_v50 = vld [vmem:[#allocation9 + $0x1d98] sm:$0xff]  ;;  %v9997_v63 = vld [vmem:[#allocation9 + $0x1ea0] sm:$0xff] }
 0x605   :  { %9819 = vmatprep.subr.bf16.mxu0 %v12645_v59  ;;  %9860 = vmatprep.subr.bf16.mxu1 %v12647_v8  ;;  %v9476_v41 = vld [vmem:[#allocation9 + $0x1db8] sm:$0xff]  ;;  %v12632_v59 = vcombine.low %v9463_v14, %v9467_v49  ;;  %v12634_v8 = vcombine.low %v9464_v37, %v9468_v34  ;;  %v12641_v52 = vcombine.high %v9471_v1, %v9475_v47  ;;  %v10001_v37 = vld [vmem:[#allocation9 + $0x1ec0] sm:$0xff] }
 0x606   :  { %v12643_v51 = vcombine.high %v9472_v50, %v9476_v41  ;;  %v12642_v10 = vcombine.low %v9472_v50, %v9476_v41  ;;  %v12669_v14 = vcombine.high %v9993_v18, %v9997_v63  ;;  %v10005_v34 = vld [vmem:[#allocation9 + $0x1ee0] sm:$0xff] }
 0x607   :  { %v10009_v50 = vld [vmem:[#allocation9 + $0x1f00] sm:$0xff] }
 0x608   :  { %9820 = vmatpush1.bf16.msra.mxu0 %v12644_v20  ;;  %9861 = vmatpush1.bf16.msra.mxu1 %v12646_v21  ;;  %v9483_v21 = vld [vmem:[#allocation9 + $0x1df0] sm:$0xff]  ;;  %v10013_v41 = vld [vmem:[#allocation9 + $0x1f20] sm:$0xff] }
 0x609   :  { %9887 = vmatprep.subr.bf16.mxu0 %v12593_v36  ;;  %9928 = vmatprep.subr.bf16.mxu1 %v12595_v46  ;;  %v9480_v36 = vld [vmem:[#allocation9 + $0x1dd8] sm:$0xff] }
 0x60a   :  { %v9484_v46 = vld [vmem:[#allocation9 + $0x1df8] sm:$0xff] }
 0x60b   :  { %9838 = vmatmul.mubr.bf16.vlgmr.msra.gmra.mrb[176].mxu0 %v14180_v16  ;;  %9879 = vmatmul.mubr.bf16.vlgmr.msra.gmra.mrb[176].mxu1 %v14180_v16  ;;  %v12651_v30 = vcombine.high %v9480_v36, %v9484_v46 }
 0x60c   :  { %9888 = vmatpush1.bf16.msra.mxu0 %v12592_v60  ;;  %9929 = vmatpush1.bf16.msra.mxu1 %v12594_v58  ;;  %v12640_v60 = vcombine.low %v9471_v1, %v9475_v47  ;;  %v12677_v1 = vcombine.high %v10001_v37, %v10005_v34 }
 0x60d   :  { %9889 = vmatprep.subr.bf16.mxu0 %v12601_v27  ;;  %9930 = vmatprep.subr.bf16.mxu1 %v12603_v25 }
 0x60e   :  { %9919 = vmatprep.mubr.bf16.mxu0 %v13536_v54  ;;  %9960 = vmatprep.mubr.bf16.mxu1 %v13536_v54 }
 0x610   :  { %9890 = vmatpush1.bf16.msra.mxu0 %v12600_v38  ;;  %9931 = vmatpush1.bf16.msra.mxu1 %v12602_v19  ;;  %v9977_v38 = vld [vmem:[#allocation9 + $0x1e00] sm:$0xff] }
 0x611   :  { %9891 = vmatprep.subr.bf16.mxu0 %v12609_v32  ;;  %9932 = vmatprep.subr.bf16.mxu1 %v12611_v23  ;;  %v9981_v19 = vld [vmem:[#allocation9 + $0x1e20] sm:$0xff]  ;;  %v9978_v32 = vld [vmem:[#allocation9 + $0x1e08] sm:$0xff] }
 0x612   :  { %v9982_v23 = vld [vmem:[#allocation9 + $0x1e28] sm:$0xff]  ;;  %v12653_v39 = vcombine.high %v9977_v38, %v9981_v19 }
 0x613   :  { %v12655_v57 = vcombine.high %v9978_v32, %v9982_v23 }
 0x614   :  { %9892 = vmatpush1.bf16.msra.mxu0 %v12608_v44  ;;  %9933 = vmatpush1.bf16.msra.mxu1 %v12610_v61  ;;  %v9986_v44 = vld [vmem:[#allocation9 + $0x1e48] sm:$0xff] }
 0x615   :  { %9893 = vmatprep.subr.bf16.mxu0 %v12617_v55  ;;  %9934 = vmatprep.subr.bf16.mxu1 %v12619_v17  ;;  %v9990_v61 = vld [vmem:[#allocation9 + $0x1e68] sm:$0xff]  ;;  %v12652_v55 = vcombine.low %v9977_v38, %v9981_v19  ;;  %v12654_v17 = vcombine.low %v9978_v32, %v9982_v23  ;;  %v10033_v32 = vld [vmem:[#allocation9 + $0x1fc0] sm:$0xff] }
 0x616   :  { %v12663_v45 = vcombine.high %v9986_v44, %v9990_v61 }
 0x618   :  { %9894 = vmatpush1.bf16.msra.mxu0 %v12616_v24  ;;  %9935 = vmatpush1.bf16.msra.mxu1 %v12618_v15  ;;  %v9994_v24 = vld [vmem:[#allocation9 + $0x1e88] sm:$0xff] }
 0x619   :  { %9895 = vmatprep.subr.bf16.mxu0 %v12625_v4  ;;  %9936 = vmatprep.subr.bf16.mxu1 %v12627_v7  ;;  %v9998_v15 = vld [vmem:[#allocation9 + $0x1ea8] sm:$0xff]  ;;  %v12660_v4 = vcombine.low %v9985_v2, %v9989_v29  ;;  %v12662_v7 = vcombine.low %v9986_v44, %v9990_v61 }
 0x61a   :  { %v12671_v49 = vcombine.high %v9994_v24, %v9998_v15 }
 0x61c   :  { %9896 = vmatpush1.bf16.msra.mxu0 %v12624_v3  ;;  %9937 = vmatpush1.bf16.msra.mxu1 %v12626_v40  ;;  %v10002_v3 = vld [vmem:[#allocation9 + $0x1ec8] sm:$0xff] }
 0x61d   :  { %9897 = vmatprep.subr.bf16.mxu0 %v12633_v62  ;;  %9938 = vmatprep.subr.bf16.mxu1 %v12635_v48  ;;  %v10006_v40 = vld [vmem:[#allocation9 + $0x1ee8] sm:$0xff]  ;;  %v12668_v62 = vcombine.low %v9993_v18, %v9997_v63  ;;  %v12670_v48 = vcombine.low %v9994_v24, %v9998_v15 }
 0x61e   :  { %v8168_v12 = vpop.f32.mrb[152].mxu0  ;;  %v8209_v20 = vpop.f32.mrb[152].mxu1  ;;  %v12679_v47 = vcombine.high %v10002_v3, %v10006_v40 }
 0x61f   :  { %v14569_v11 = vadd.f32 %v8168_v12, %v14537_v5  ;;  %v14572_v22 = vadd.f32 %v8209_v20, %v14540_v31  ;;  %v8170_v26 = vpop.f32.mrb[153].mxu0  ;;  %v8211_v43 = vpop.f32.mrb[153].mxu1  ;;  %v12649_v31 = vcombine.high %v9479_v28, %v9483_v21  ;;  %v10017_v20 = vld [vmem:[#allocation9 + $0x1f40] sm:$0xff] }
 0x620   :  { %v14575_v58 = vadd.f32 %v8170_v26, %v14543_v53  ;;  %v14578_v27 = vadd.f32 %v8211_v43, %v14546_v33  ;;  %v8172_v25 = vpop.f32.mrb[154].mxu0  ;;  %v8213_v9 = vpop.f32.mrb[154].mxu1  ;;  %9898 = vmatpush1.bf16.msra.mxu0 %v12632_v59  ;;  %9939 = vmatpush1.bf16.msra.mxu1 %v12634_v8  ;;  %v12648_v53 = vcombine.low %v9479_v28, %v9483_v21  ;;  %v10010_v59 = vld [vmem:[#allocation9 + $0x1f08] sm:$0xff]  ;;  %v10021_v21 = vld [vmem:[#allocation9 + $0x1f60] sm:$0xff] }
 0x621   :  { %v8173_v0 = vpop.f32.mrb[155].mxu0  ;;  %v8214_v5 = vpop.f32.mrb[155].mxu1  ;;  %9899 = vmatprep.subr.bf16.mxu0 %v12641_v52  ;;  %9940 = vmatprep.subr.bf16.mxu1 %v12643_v51  ;;  %v12650_v33 = vcombine.low %v9480_v36, %v9484_v46  ;;  %v10014_v8 = vld [vmem:[#allocation9 + $0x1f28] sm:$0xff]  ;;  %v12676_v52 = vcombine.low %v10001_v37, %v10005_v34  ;;  %v12678_v51 = vcombine.low %v10002_v3, %v10006_v40  ;;  %v10025_v9 = vld [vmem:[#allocation9 + $0x1f80] sm:$0xff]  ;;  %v9987_v3 = vld [vmem:[#allocation9 + $0x1e50] sm:$0xff] }
 0x622   :  { %v12685_v28 = vcombine.high %v10009_v50, %v10013_v41  ;;  %v12687_v12 = vcombine.high %v10010_v59, %v10014_v8  ;;  %v10018_v36 = vld [vmem:[#allocation9 + $0x1f48] sm:$0xff]  ;;  %v12684_v26 = vcombine.low %v10009_v50, %v10013_v41  ;;  %v12686_v43 = vcombine.low %v10010_v59, %v10014_v8  ;;  %v9991_v40 = vld [vmem:[#allocation9 + $0x1e70] sm:$0xff] }
 0x623   :  { %v10022_v46 = vld [vmem:[#allocation9 + $0x1f68] sm:$0xff]  ;;  %v14597_v50 = vrot.slane %v14180_v16, 4  ;;  %v12665_v41 = vcombine.high %v9987_v3, %v9991_v40  ;;  %v9995_v8 = vld [vmem:[#allocation9 + $0x1e90] sm:$0xff] }
 0x624   :  { %9900 = vmatpush1.bf16.msra.mxu0 %v12640_v60  ;;  %9941 = vmatpush1.bf16.msra.mxu1 %v12642_v10  ;;  %v12693_v60 = vcombine.high %v10017_v20, %v10021_v21  ;;  %v12695_v25 = vcombine.high %v10018_v36, %v10022_v46  ;;  %v10029_v10 = vld [vmem:[#allocation9 + $0x1fa0] sm:$0xff]  ;;  %v10026_v0 = vld [vmem:[#allocation9 + $0x1f88] sm:$0xff] }
 0x625   :  { %9901 = vmatprep.subr.bf16.mxu0 %v12649_v31  ;;  %9942 = vmatprep.subr.bf16.mxu1 %v12651_v30  ;;  %v10030_v5 = vld [vmem:[#allocation9 + $0x1fa8] sm:$0xff]  ;;  %v12692_v31 = vcombine.low %v10017_v20, %v10021_v21  ;;  %v12694_v30 = vcombine.low %v10018_v36, %v10022_v46  ;;  %v12701_v38 = vcombine.high %v10025_v9, %v10029_v10  ;;  %v10003_v36 = vld [vmem:[#allocation9 + $0x1ed0] sm:$0xff] }
 0x626   :  { %v12703_v19 = vcombine.high %v10026_v0, %v10030_v5  ;;  %v12702_v63 = vcombine.low %v10026_v0, %v10030_v5  ;;  %v10007_v46 = vld [vmem:[#allocation9 + $0x1ef0] sm:$0xff] }
 0x627   :  { %v10011_v0 = vld [vmem:[#allocation9 + $0x1f10] sm:$0xff] }
 0x628   :  { %9902 = vmatpush1.bf16.msra.mxu0 %v12648_v53  ;;  %9943 = vmatpush1.bf16.msra.mxu1 %v12650_v33  ;;  %v10037_v33 = vld [vmem:[#allocation9 + $0x1fe0] sm:$0xff]  ;;  %v10015_v5 = vld [vmem:[#allocation9 + $0x1f30] sm:$0xff] }
 0x629   :  { %10364 = vmatprep.subr.bf16.mxu0 %v12653_v39  ;;  %10405 = vmatprep.subr.bf16.mxu1 %v12655_v57  ;;  %v10034_v39 = vld [vmem:[#allocation9 + $0x1fc8] sm:$0xff] }
 0x62a   :  { %v10038_v57 = vld [vmem:[#allocation9 + $0x1fe8] sm:$0xff] }
 0x62b   :  { %9920 = vmatmul.mubr.bf16.vlgmr.msra.gmra.mrb[180].mxu0 %v14180_v16  ;;  %9961 = vmatmul.mubr.bf16.vlgmr.msra.gmra.mrb[180].mxu1 %v14180_v16  ;;  %v12711_v15 = vcombine.high %v10034_v39, %v10038_v57 }
 0x62c   :  { %10365 = vmatpush1.bf16.msra.mxu0 %v12652_v55  ;;  %10406 = vmatpush1.bf16.msra.mxu1 %v12654_v17  ;;  %v12700_v55 = vcombine.low %v10025_v9, %v10029_v10  ;;  %v12681_v9 = vcombine.high %v10003_v36, %v10007_v46 }
 0x62d   :  { %10366 = vmatprep.subr.bf16.mxu0 %v12661_v35  ;;  %10407 = vmatprep.subr.bf16.mxu1 %v12663_v45 }
 0x62e   :  { %10396 = vmatprep.mubr.bf16.mxu0 %v13536_v54  ;;  %10437 = vmatprep.mubr.bf16.mxu1 %v13536_v54 }
 0x630   :  { %10367 = vmatpush1.bf16.msra.mxu0 %v12660_v4  ;;  %10408 = vmatpush1.bf16.msra.mxu1 %v12662_v7  ;;  %v9979_v4 = vld [vmem:[#allocation9 + $0x1e10] sm:$0xff] }
 0x631   :  { %10368 = vmatprep.subr.bf16.mxu0 %v12669_v14  ;;  %10409 = vmatprep.subr.bf16.mxu1 %v12671_v49  ;;  %v9983_v7 = vld [vmem:[#allocation9 + $0x1e30] sm:$0xff]  ;;  %v9980_v14 = vld [vmem:[#allocation9 + $0x1e18] sm:$0xff] }
 0x632   :  { %v9984_v49 = vld [vmem:[#allocation9 + $0x1e38] sm:$0xff]  ;;  %v12657_v37 = vcombine.high %v9979_v4, %v9983_v7 }
 0x633   :  { %v12659_v34 = vcombine.high %v9980_v14, %v9984_v49 }
 0x634   :  { %10369 = vmatpush1.bf16.msra.mxu0 %v12668_v62  ;;  %10410 = vmatpush1.bf16.msra.mxu1 %v12670_v48  ;;  %v9988_v62 = vld [vmem:[#allocation9 + $0x1e58] sm:$0xff] }
 0x635   :  { %10370 = vmatprep.subr.bf16.mxu0 %v12677_v1  ;;  %10411 = vmatprep.subr.bf16.mxu1 %v12679_v47  ;;  %v9992_v48 = vld [vmem:[#allocation9 + $0x1e78] sm:$0xff]  ;;  %v12656_v1 = vcombine.low %v9979_v4, %v9983_v7  ;;  %v12658_v47 = vcombine.low %v9980_v14, %v9984_v49  ;;  %v10035_v7 = vld [vmem:[#allocation9 + $0x1fd0] sm:$0xff] }
 0x636   :  { %v12667_v59 = vcombine.high %v9988_v62, %v9992_v48  ;;  %v12666_v20 = vcombine.low %v9988_v62, %v9992_v48 }
 0x638   :  { %10371 = vmatpush1.bf16.msra.mxu0 %v12676_v52  ;;  %10412 = vmatpush1.bf16.msra.mxu1 %v12678_v51  ;;  %v9999_v52 = vld [vmem:[#allocation9 + $0x1eb0] sm:$0xff]  ;;  %v9996_v51 = vld [vmem:[#allocation9 + $0x1e98] sm:$0xff] }
 0x639   :  { %10372 = vmatprep.subr.bf16.mxu0 %v12685_v28  ;;  %10413 = vmatprep.subr.bf16.mxu1 %v12687_v12  ;;  %v10000_v28 = vld [vmem:[#allocation9 + $0x1eb8] sm:$0xff]  ;;  %v12664_v12 = vcombine.low %v9987_v3, %v9991_v40  ;;  %v12673_v16 = vcombine.high %v9995_v8, %v9999_v52 }
 0x63a   :  { %v12675_v21 = vcombine.high %v9996_v51, %v10000_v28 }
 0x63c   :  { %10373 = vmatpush1.bf16.msra.mxu0 %v12684_v26  ;;  %10414 = vmatpush1.bf16.msra.mxu1 %v12686_v43  ;;  %v10004_v26 = vld [vmem:[#allocation9 + $0x1ed8] sm:$0xff] }
 0x63d   :  { %10374 = vmatprep.subr.bf16.mxu0 %v12693_v60  ;;  %10415 = vmatprep.subr.bf16.mxu1 %v12695_v25  ;;  %v10008_v43 = vld [vmem:[#allocation9 + $0x1ef8] sm:$0xff]  ;;  %v12672_v60 = vcombine.low %v9995_v8, %v9999_v52  ;;  %v12674_v25 = vcombine.low %v9996_v51, %v10000_v28 }
 0x63e   :  { %v8250_v23 = vpop.f32.mrb[156].mxu0  ;;  %v8291_v53 = vpop.f32.mrb[156].mxu1  ;;  %v12683_v10 = vcombine.high %v10004_v26, %v10008_v43 }
 0x63f   :  { %v14585_v2 = vadd.f32 %v8250_v23, %v14553_v13  ;;  %v14588_v29 = vadd.f32 %v8291_v53, %v14556_v42  ;;  %v8252_v44 = vpop.f32.mrb[157].mxu0  ;;  %v8293_v61 = vpop.f32.mrb[157].mxu1  ;;  %v12709_v42 = vcombine.high %v10033_v32, %v10037_v33  ;;  %v10019_v23 = vld [vmem:[#allocation9 + $0x1f50] sm:$0xff] }
 0x640   :  { %v14591_v17 = vadd.f32 %v8252_v44, %v14559_v6  ;;  %v14594_v35 = vadd.f32 %v8293_v61, %v14562_v56  ;;  %v8254_v45 = vpop.f32.mrb[158].mxu0  ;;  %v8295_v18 = vpop.f32.mrb[158].mxu1  ;;  %10375 = vmatpush1.bf16.msra.mxu0 %v12692_v31  ;;  %10416 = vmatpush1.bf16.msra.mxu1 %v12694_v30  ;;  %v12708_v6 = vcombine.low %v10033_v32, %v10037_v33  ;;  %v10012_v31 = vld [vmem:[#allocation9 + $0x1f18] sm:$0xff]  ;;  %v10023_v53 = vld [vmem:[#allocation9 + $0x1f70] sm:$0xff] }
 0x641   :  { %v8255_v24 = vpop.f32.mrb[159].mxu0  ;;  %v8296_v13 = vpop.f32.mrb[159].mxu1  ;;  %10376 = vmatprep.subr.bf16.mxu0 %v12701_v38  ;;  %10417 = vmatprep.subr.bf16.mxu1 %v12703_v19  ;;  %v12710_v56 = vcombine.low %v10034_v39, %v10038_v57  ;;  %v10016_v30 = vld [vmem:[#allocation9 + $0x1f38] sm:$0xff]  ;;  %v12680_v38 = vcombine.low %v10003_v36, %v10007_v46  ;;  %v12682_v19 = vcombine.low %v10004_v26, %v10008_v43  ;;  %v10027_v45 = vld [vmem:[#allocation9 + $0x1f90] sm:$0xff] }
 0x642   :  { %v12689_v32 = vcombine.high %v10011_v0, %v10015_v5  ;;  %v10020_v33 = vld [vmem:[#allocation9 + $0x1f58] sm:$0xff]  ;;  %v12688_v57 = vcombine.low %v10011_v0, %v10015_v5  ;;  %v12690_v44 = vcombine.low %v10012_v31, %v10016_v30  ;;  %v12697_v61 = vcombine.high %v10019_v23, %v10023_v53  ;;  %v10031_v18 = vld [vmem:[#allocation9 + $0x1fb0] sm:$0xff] }
 0x643   :  { %v10024_v39 = vld [vmem:[#allocation9 + $0x1f78] sm:$0xff]  ;;  %v12696_v13 = vcombine.low %v10019_v23, %v10023_v53  ;;  %v12704_v48 = vcombine.low %v10027_v45, %v10031_v18 }
 0x644   :  { %10377 = vmatpush1.bf16.msra.mxu0 %v12700_v55  ;;  %10418 = vmatpush1.bf16.msra.mxu1 %v12702_v63  ;;  %v12699_v55 = vcombine.high %v10020_v33, %v10024_v39  ;;  %v10028_v63 = vld [vmem:[#allocation9 + $0x1f98] sm:$0xff] }
 0x645   :  { %10378 = vmatprep.subr.bf16.mxu0 %v12709_v42  ;;  %10419 = vmatprep.subr.bf16.mxu1 %v12711_v15  ;;  %v10032_v24 = vld [vmem:[#allocation9 + $0x1fb8] sm:$0xff]  ;;  %v12698_v42 = vcombine.low %v10020_v33, %v10024_v39  ;;  %v12705_v15 = vcombine.high %v10027_v45, %v10031_v18 }
 0x646   :  { %v12707_v4 = vcombine.high %v10028_v63, %v10032_v24  ;;  %v12706_v8 = vcombine.low %v10028_v63, %v10032_v24  ;;  %v13204_v63 = vld [vmem:[#allocation15 + $0x40] sm:$0xff]  }
 0x647   :  { %v13205_v24 = vld [vmem:[#allocation15 + $0xc0] sm:$0xff]  }
 0x648   :  { %10379 = vmatpush1.bf16.msra.mxu0 %v12708_v6  ;;  %10420 = vmatpush1.bf16.msra.mxu1 %v12710_v56  ;;  %v10039_v6 = vld [vmem:[#allocation9 + $0x1ff0] sm:$0xff]  ;;  %v10036_v56 = vld [vmem:[#allocation9 + $0x1fd8] sm:$0xff] }
 0x649   :  { %10446 = vmatprep.subr.bf16.mxu0 %v12657_v37  ;;  %10487 = vmatprep.subr.bf16.mxu1 %v12659_v34  ;;  %v10040_v37 = vld [vmem:[#allocation9 + $0x1ff8] sm:$0xff]  ;;  %v12713_v28 = vcombine.high %v10035_v7, %v10039_v6 }
 0x64b   :  { %10397 = vmatmul.mubr.bf16.vlgmr.msra.gmra.mrb[184].mxu0 %v14597_v50  ;;  %10438 = vmatmul.mubr.bf16.vlgmr.msra.gmra.mrb[184].mxu1 %v14597_v50 }
 0x64c   :  { %10447 = vmatpush1.bf16.msra.mxu0 %v12656_v1  ;;  %10488 = vmatpush1.bf16.msra.mxu1 %v12658_v47 }
 0x64d   :  { %10448 = vmatprep.subr.bf16.mxu0 %v12665_v41  ;;  %10489 = vmatprep.subr.bf16.mxu1 %v12667_v59 }
 0x64e   :  { %10478 = vmatprep.mubr.bf16.mxu0 %v13536_v54  ;;  %10519 = vmatprep.mubr.bf16.mxu1 %v13536_v54  ;;  %v12691_v54 = vcombine.high %v10012_v31, %v10016_v30 }
 0x650   :  { %10449 = vmatpush1.bf16.msra.mxu0 %v12664_v12  ;;  %10490 = vmatpush1.bf16.msra.mxu1 %v12666_v20  ;;  %v12714_v12 = vcombine.low %v10036_v56, %v10040_v37 }
 0x651   :  { %10450 = vmatprep.subr.bf16.mxu0 %v12673_v16  ;;  %10491 = vmatprep.subr.bf16.mxu1 %v12675_v21 }
 0x654   :  { %10451 = vmatpush1.bf16.msra.mxu0 %v12672_v60  ;;  %10492 = vmatpush1.bf16.msra.mxu1 %v12674_v25 }
 0x655   :  { %10452 = vmatprep.subr.bf16.mxu0 %v12681_v9  ;;  %10493 = vmatprep.subr.bf16.mxu1 %v12683_v10 }
 0x658   :  { %10453 = vmatpush1.bf16.msra.mxu0 %v12680_v38  ;;  %10494 = vmatpush1.bf16.msra.mxu1 %v12682_v19 }
 0x659   :  { %10454 = vmatprep.subr.bf16.mxu0 %v12689_v32  ;;  %10495 = vmatprep.subr.bf16.mxu1 %v12691_v54 }
 0x65c   :  { %10455 = vmatpush1.bf16.msra.mxu0 %v12688_v57  ;;  %10496 = vmatpush1.bf16.msra.mxu1 %v12690_v44 }
 0x65d   :  { %10456 = vmatprep.subr.bf16.mxu0 %v12697_v61  ;;  %10497 = vmatprep.subr.bf16.mxu1 %v12699_v55 }
 0x65e   :  { %v8724_v14 = vpop.f32.mrb[160].mxu0  ;;  %v8765_v49 = vpop.f32.mrb[160].mxu1 }
 0x65f   :  { %v8854_v34 = vadd.f32 %v8724_v14, %v14569_v11  ;;  %v8856_v3 = vadd.f32 %v8765_v49, %v14572_v22  ;;  %v8726_v40 = vpop.f32.mrb[161].mxu0  ;;  %v8767_v62 = vpop.f32.mrb[161].mxu1  ;;  %v12715_v11 = vcombine.high %v10036_v56, %v10040_v37  ;;  %v12712_v22 = vcombine.low %v10035_v7, %v10039_v6  ;;  %v13210_v7 = vld [vmem:[#allocation15 + $0x8] sm:$0xff]   ;;  %v13212_v49 = vld [vmem:[#allocation15 + $0x50] sm:$0xff]  }
 0x660   :  { %v8855_v1 = vadd.f32 %v8726_v40, %v14575_v58  ;;  %v8857_v47 = vadd.f32 %v8767_v62, %v14578_v27  ;;  %v8728_v41 = vpop.f32.mrb[162].mxu0  ;;  %v8769_v59 = vpop.f32.mrb[162].mxu1  ;;  %10457 = vmatpush1.bf16.msra.mxu0 %v12696_v13  ;;  %10498 = vmatpush1.bf16.msra.mxu1 %v12698_v42  ;;  %v13206_v13 = vld [vmem:[#allocation15] sm:$0xff]   ;;  %v13211_v14 = vld [vmem:[#allocation15 + $0x88] sm:$0xff]   ;;  %v13213_v6 = vld [vmem:[#allocation15 + $0xd0] sm:$0xff]  }
 0x661   :  { %v8729_v52 = vpop.f32.mrb[163].mxu0  ;;  %v8770_v51 = vpop.f32.mrb[163].mxu1  ;;  %10458 = vmatprep.subr.bf16.mxu0 %v12705_v15  ;;  %10499 = vmatprep.subr.bf16.mxu1 %v12707_v4  ;;  %v13207_v42 = vld [vmem:[#allocation15 + $0x80] sm:$0xff]   ;;  %v13208_v15 = vld [vmem:[#allocation15 + $0x48] sm:$0xff]   ;;  %v13214_v56 = vld [vmem:[#allocation15 + $0x10] sm:$0xff]  }
 0x662   :  { %v13209_v4 = vld [vmem:[#allocation15 + $0xc8] sm:$0xff]   ;;  %v13215_v37 = vld [vmem:[#allocation15 + $0x90] sm:$0xff]   ;;  %v13217_v41 = vld [vmem:[#allocation15 + $0xd8] sm:$0xff]  }
 0x664   :  { %10459 = vmatpush1.bf16.msra.mxu0 %v12704_v48  ;;  %10500 = vmatpush1.bf16.msra.mxu1 %v12706_v8 }
 0x665   :  { %10460 = vmatprep.subr.bf16.mxu0 %v12713_v28  ;;  %10501 = vmatprep.subr.bf16.mxu1 %v12715_v11  ;;  %v13218_v28 = vld [vmem:[#allocation15 + $0x18] sm:$0xff]  }
 0x666   :  { %v13219_v11 = vld [vmem:[#allocation15 + $0x98] sm:$0xff]  }
 0x668   :  { %10461 = vmatpush1.bf16.msra.mxu0 %v12712_v22  ;;  %10502 = vmatpush1.bf16.msra.mxu1 %v12714_v12 }
 0x669   :  { %13037 = vmatprep.subr.bf16.mxu0 %v13204_v63  ;;  %13059 = vmatprep.subr.bf16.mxu1 %v13205_v24  ;;  %v14650_v63 = vld [vmem:[#allocation10] sm:$0xff] }
 0x66b   :  { %10479 = vmatmul.mubr.bf16.vlgmr.msra.gmra.mrb[188].mxu0 %v14597_v50  ;;  %10520 = vmatmul.mubr.bf16.vlgmr.msra.gmra.mrb[188].mxu1 %v14597_v50 }
 0x66c   :  { %13038 = vmatpush3.bf16.msra.mxu0 %v13206_v13  ;;  %13060 = vmatpush3.bf16.msra.mxu1 %v13207_v42 }
 0x66d   :  { %13039 = vmatprep.subr.bf16.mxu0 %v13208_v15  ;;  %13061 = vmatprep.subr.bf16.mxu1 %v13209_v4 }
 0x670   :  { %13040 = vmatpush3.bf16.msra.mxu0 %v13210_v7  ;;  %13062 = vmatpush3.bf16.msra.mxu1 %v13211_v14 }
 0x671   :  { %13041 = vmatprep.subr.bf16.mxu0 %v13212_v49  ;;  %13063 = vmatprep.subr.bf16.mxu1 %v13213_v6 }
 0x674   :  { %13042 = vmatpush3.bf16.msra.mxu0 %v13214_v56  ;;  %13064 = vmatpush3.bf16.msra.mxu1 %v13215_v37 }
 0x675   :  { %13065 = vmatprep.subr.bf16.mxu1 %v13217_v41 }
 0x678   :  { %13066 = vmatpush3.bf16.msra.mxu1 %v13219_v11 }
 0x67e   :  { %v8806_v58 = vpop.f32.mrb[164].mxu0  ;;  %v8847_v27 = vpop.f32.mrb[164].mxu1 }
 0x67f   :  { %v8858_v20 = vadd.f32 %v8806_v58, %v14585_v2  ;;  %v8860_v16 = vadd.f32 %v8847_v27, %v14588_v29  ;;  %v8808_v21 = vpop.f32.mrb[165].mxu0  ;;  %v8849_v36 = vpop.f32.mrb[165].mxu1  ;;  %v13220_v58 = vld [vmem:[#allocation15 + $0x60] sm:$0xff]  }
 0x680   :  { %v8859_v46 = vadd.f32 %v8808_v21, %v14591_v17  ;;  %v8861_v26 = vadd.f32 %v8849_v36, %v14594_v35  ;;  %v8810_v43 = vpop.f32.mrb[166].mxu0  ;;  %v8851_v60 = vpop.f32.mrb[166].mxu1  ;;  %v13221_v27 = vld [vmem:[#allocation15 + $0xe0] sm:$0xff]   ;;  %v13224_v21 = vld [vmem:[#allocation15 + $0x68] sm:$0xff]  }
 0x681   :  { %v8811_v25 = vpop.f32.mrb[167].mxu0  ;;  %v8852_v9 = vpop.f32.mrb[167].mxu1  ;;  %13067 = vmatprep.subr.bf16.mxu1 %v13221_v27  ;;  %v13225_v36 = vld [vmem:[#allocation15 + $0xe8] sm:$0xff]   ;;  %v13228_v43 = vld [vmem:[#allocation15 + $0x70] sm:$0xff]  }
 0x682   :  { %v13229_v60 = vld [vmem:[#allocation15 + $0xf0] sm:$0xff]  }
 0x683   :  { %v13230_v25 = vld [vmem:[#allocation15 + $0x30] sm:$0xff]  }
 0x684   :  { %v13231_v9 = vld [vmem:[#allocation15 + $0xb0] sm:$0xff]  }
 0x69e   :  { %v9283_v10 = vpop.f32.mrb[168].mxu0  ;;  %v9324_v0 = vpop.f32.mrb[168].mxu1 }
 0x69f   :  { %v9413_v5 = vadd.f32 %v9283_v10, %v8854_v34  ;;  %v9415_v50 = vadd.f32 %v9324_v0, %v8856_v3  ;;  %v9285_v31 = vpop.f32.mrb[169].mxu0  ;;  %v9326_v30 = vpop.f32.mrb[169].mxu1  ;;  %v13232_v10 = vld [vmem:[#allocation15 + $0x78] sm:$0xff]  }
 0x6a0   :  { %v9414_v38 = vadd.f32 %v9285_v31, %v8855_v1  ;;  %v9416_v2 = vadd.f32 %v9326_v30, %v8857_v47  ;;  %v9287_v19 = vpop.f32.mrb[170].mxu0  ;;  %v9328_v29 = vpop.f32.mrb[170].mxu1  ;;  %v13216_v47 = vld [vmem:[#allocation15 + $0x58] sm:$0xff]   ;;  %v13236_v31 = vld [vmem:[#allocation15 + $0x140] sm:$0xff]  }
 0x6a1   :  { %v9288_v32 = vpop.f32.mrb[171].mxu0  ;;  %v9329_v54 = vpop.f32.mrb[171].mxu1  ;;  %13043 = vmatprep.subr.bf16.mxu0 %v13216_v47  ;;  %v13233_v0 = vld [vmem:[#allocation15 + $0xf8] sm:$0xff]   ;;  %v13237_v30 = vld [vmem:[#allocation15 + $0x1c0] sm:$0xff]  }
 0x6a2   :  { %13044 = vmatpush3.bf16.msra.mxu0 %v13218_v28 }
 0x6a3   :  { %13045 = vmatprep.subr.bf16.mxu0 %v13220_v58 }
 0x6be   :  { %v9365_v23 = vpop.f32.mrb[172].mxu0  ;;  %v9406_v17 = vpop.f32.mrb[172].mxu1 }
 0x6bf   :  { %v14613_v53 = vadd.f32 %v9365_v23, %v8858_v20  ;;  %v14615_v35 = vadd.f32 %v9406_v17, %v8860_v16  ;;  %v9367_v33 = vpop.f32.mrb[173].mxu0  ;;  %v9408_v39 = vpop.f32.mrb[173].mxu1  ;;  %v13222_v20 = vld [vmem:[#allocation15 + $0x20] sm:$0xff]  }
 0x6c0   :  { %v14617_v57 = vadd.f32 %v9367_v33, %v8859_v46  ;;  %v14619_v44 = vadd.f32 %v9408_v39, %v8861_v26  ;;  %v9369_v61 = vpop.f32.mrb[174].mxu0  ;;  %v9410_v55 = vpop.f32.mrb[174].mxu1  ;;  %v13223_v16 = vld [vmem:[#allocation15 + $0xa0] sm:$0xff]   ;;  %13046 = vmatpush3.bf16.msra.mxu0 %v13222_v20  ;;  %v13226_v46 = vld [vmem:[#allocation15 + $0x28] sm:$0xff]  }
 0x6c1   :  { %v9370_v45 = vpop.f32.mrb[175].mxu0  ;;  %v9411_v18 = vpop.f32.mrb[175].mxu1  ;;  %13068 = vmatpush3.bf16.msra.mxu1 %v13223_v16  ;;  %v13227_v26 = vld [vmem:[#allocation15 + $0xa8] sm:$0xff]   ;;  %13047 = vmatprep.subr.bf16.mxu0 %v13224_v21 }
 0x6c2   :  { %13069 = vmatprep.subr.bf16.mxu1 %v13225_v36  ;;  %v10538_v45 = vlaneseq }
 0x6c4   :  { %13048 = vmatpush3.bf16.msra.mxu0 %v13226_v46  ;;  %v14642_v18 = vshrl.u32 %v10538_v45, 7 }
 0x6c5   :  { %13070 = vmatpush3.bf16.msra.mxu1 %v13227_v26  ;;  %13049 = vmatprep.subr.bf16.mxu0 %v13228_v43 }
 0x6c6   :  { %13071 = vmatprep.subr.bf16.mxu1 %v13229_v60 }
 0x6c8   :  { %13050 = vmatpush3.bf16.msra.mxu0 %v13230_v25 }
 0x6c9   :  { %13072 = vmatpush3.bf16.msra.mxu1 %v13231_v9  ;;  %13051 = vmatprep.subr.bf16.mxu0 %v13232_v10 }
 0x6ca   :  { %13073 = vmatprep.subr.bf16.mxu1 %v13233_v0 }
 0x6de   :  { %v9839_v34 = vpop.f32.mrb[176].mxu0  ;;  %v9880_v3 = vpop.f32.mrb[176].mxu1 }
 0x6df   :  { %v14621_v40 = vadd.f32 %v9839_v34, %v9413_v5  ;;  %v14623_v62 = vadd.f32 %v9880_v3, %v9415_v50  ;;  %v9841_v48 = vpop.f32.mrb[177].mxu0  ;;  %v9882_v1 = vpop.f32.mrb[177].mxu1  ;;  %v13234_v5 = vld [vmem:[#allocation15 + $0x38] sm:$0xff]  }
 0x6e0   :  { %v14625_v59 = vadd.f32 %v9841_v48, %v9414_v38  ;;  %v14627_v8 = vadd.f32 %v9882_v1, %v9416_v2  ;;  %v9843_v52 = vpop.f32.mrb[178].mxu0  ;;  %v9884_v51 = vpop.f32.mrb[178].mxu1  ;;  %v13235_v50 = vld [vmem:[#allocation15 + $0xb8] sm:$0xff]   ;;  %13052 = vmatpush3.bf16.msra.mxu0 %v13234_v5 }
 0x6e1   :  { %v9844_v22 = vpop.f32.mrb[179].mxu0  ;;  %v9885_v12 = vpop.f32.mrb[179].mxu1  ;;  %13074 = vmatpush3.bf16.msra.mxu1 %v13235_v50  ;;  %13081 = vmatprep.subr.bf16.mxu0 %v13236_v31 }
 0x6e2   :  { %13103 = vmatprep.subr.bf16.mxu1 %v13237_v30 }
 0x6fe   :  { %v9921_v38 = vpop.f32.mrb[180].mxu0  ;;  %v9962_v2 = vpop.f32.mrb[180].mxu1 }
 0x6ff   :  { %v14630_v19 = vadd.f32 %v9921_v38, %v14613_v53  ;;  %v14633_v29 = vadd.f32 %v9962_v2, %v14615_v35  ;;  %v9923_v32 = vpop.f32.mrb[181].mxu0  ;;  %v9964_v54 = vpop.f32.mrb[181].mxu1  ;;  %v14645_v53 = vsub.s32 0, %v14642_v18  ;;  %v14648_v35 = vsub.s32 2, %v14642_v18 }
 0x700   :  { %v14636_v23 = vadd.f32 %v9923_v32, %v14617_v57  ;;  %v14639_v17 = vadd.f32 %v9964_v54, %v14619_v44  ;;  %v9925_v33 = vpop.f32.mrb[182].mxu0  ;;  %v9966_v39 = vpop.f32.mrb[182].mxu1  ;;  %v14653_v57 = vsub.s32 1, %v14642_v18  ;;  %v14656_v44 = vsub.s32 3, %v14642_v18 }
 0x701   :  { %v9926_v61 = vpop.f32.mrb[183].mxu0  ;;  %v9967_v55 = vpop.f32.mrb[183].mxu1  ;;  %v10541_v24 = vrot.slane %v14650_v63, %v14645_v53  ;;  %v10549_v13 = vrot.slane %v14650_v63, %v14648_v35 }
 0x702   :  { %v10545_v4 = vrot.slane %v14650_v63, %v14653_v57  ;;  %v10553_v7 = vrot.slane %v14650_v63, %v14656_v44 }
 0x71e   :  { %v10398_v42 = vpop.f32.mrb[184].mxu0  ;;  %v10439_v15 = vpop.f32.mrb[184].mxu1 }
 0x71f   :  { %v10528_v14 = vadd.f32 %v10398_v42, %v14621_v40  ;;  %v10530_v49 = vadd.f32 %v10439_v15, %v14623_v62  ;;  %v10400_v6 = vpop.f32.mrb[185].mxu0  ;;  %v10441_v56 = vpop.f32.mrb[185].mxu1 }
 0x720   :  { %v10529_v37 = vadd.f32 %v10400_v6, %v14625_v59  ;;  %v10531_v34 = vadd.f32 %v10441_v56, %v14627_v8  ;;  %v10402_v3 = vpop.f32.mrb[186].mxu0  ;;  %v10443_v48 = vpop.f32.mrb[186].mxu1 }
 0x721   :  { %v10578_v1 = vadd.f32 %v10541_v24, %v10528_v14  ;;  %v10580_v47 = vadd.f32 %v10549_v13, %v10530_v49  ;;  %v10403_v41 = vpop.f32.mrb[187].mxu0  ;;  %v10444_v52 = vpop.f32.mrb[187].mxu1  ;;  %v14687_v48 = vsub.s32 4, %v14642_v18 }
 0x722   :  { %v10579_v51 = vadd.f32 %v10545_v4, %v10529_v37  ;;  %v10581_v28 = vadd.f32 %v10553_v7, %v10531_v34  ;;  %v14693_v52 = vsub.s32 5, %v14642_v18 }
 0x723   :  { %v10586_v11 = vrot.slane %v10578_v1, 4  ;;  %v10598_v22 = vrot.slane %v10580_v47, 4 }
 0x724   :  { %v10592_v12 = vrot.slane %v10579_v51, 4  ;;  %v10604_v40 = vrot.slane %v10581_v28, 4 }
 0x725   :  { %v10587_v58 = vadd.f32 %v10586_v11, %v10578_v1  ;;  %v10599_v62 = vadd.f32 %v10598_v22, %v10580_v47 }
 0x726   :  { %v10593_v27 = vadd.f32 %v10592_v12, %v10579_v51  ;;  %v10605_v20 = vadd.f32 %v10604_v40, %v10581_v28 }
 0x727   :  { %v10588_v16 = vrot.slane %v10587_v58, 2  ;;  %v10600_v59 = vrot.slane %v10599_v62, 2 }
 0x728   :  { %v10594_v21 = vrot.slane %v10593_v27, 2  ;;  %v10606_v8 = vrot.slane %v10605_v20, 2 }
 0x729   :  { %v10589_v36 = vadd.f32 %v10588_v16, %v10587_v58  ;;  %v10601_v46 = vadd.f32 %v10600_v59, %v10599_v62  ;;  %v10557_v62 = vrot.slane %v14650_v63, %v14687_v48 }
 0x72a   :  { %v10595_v26 = vadd.f32 %v10594_v21, %v10593_v27  ;;  %v10607_v43 = vadd.f32 %v10606_v8, %v10605_v20 }
 0x72b   :  { %v10590_v60 = vrot.slane %v10589_v36, 1  ;;  %v10602_v25 = vrot.slane %v10601_v46, 1 }
 0x72c   :  { %v10596_v9 = vrot.slane %v10595_v26, 1  ;;  %v10608_v10 = vrot.slane %v10607_v43, 1 }
 0x72d   :  { %v10591_v0 = vadd.f32 %v10590_v60, %v10589_v36  ;;  %v10603_v5 = vadd.f32 %v10602_v25, %v10601_v46 }
 0x72e   :  { %v10597_v50 = vadd.f32 %v10596_v9, %v10595_v26  ;;  %v10609_v31 = vadd.f32 %v10608_v10, %v10607_v43 }
 0x72f   :  { %v10634_v30 = vmul.f32 0.125, %v10591_v0  ;;  %v10636_v38 = vmul.f32 0.125, %v10603_v5 }
 0x730   :  { %v10635_v2 = vmul.f32 0.125, %v10597_v50  ;;  %v10637_v32 = vmul.f32 0.125, %v10609_v31 }
 0x731   :  { %v14670_v54 = vsub.f32 %v10578_v1, %v10634_v30  ;;  %v14672_v33 = vsub.f32 %v10580_v47, %v10636_v38  ;;  %v14690_v1 = vsub.s32 6, %v14642_v18 }
 0x732   :  { %v14674_v39 = vsub.f32 %v10579_v51, %v10635_v2  ;;  %v14676_v61 = vsub.f32 %v10581_v28, %v10637_v32  ;;  %v14696_v51 = vsub.s32 7, %v14642_v18  ;;  %v10561_v18 = vrot.slane %v14650_v63, %v14693_v52 }
 0x733   :  { %v10650_v55 = vmul.f32 %v14670_v54, %v14670_v54  ;;  %v10652_v24 = vmul.f32 %v14672_v33, %v14672_v33  ;;  %v10565_v27 = vrot.slane %v14650_v63, %v14690_v1 }
 0x734   :  { %v10651_v13 = vmul.f32 %v14674_v39, %v14674_v39  ;;  %v10653_v42 = vmul.f32 %v14676_v61, %v14676_v61  ;;  %v10569_v8 = vrot.slane %v14650_v63, %v14696_v51 }
 0x735   :  { %v10658_v15 = vrot.slane %v10650_v55, 4  ;;  %v10670_v4 = vrot.slane %v10652_v24, 4 }
 0x736   :  { %v10664_v7 = vrot.slane %v10651_v13, 4  ;;  %v10676_v14 = vrot.slane %v10653_v42, 4 }
 0x737   :  { %v10659_v49 = vadd.f32 %v10658_v15, %v10650_v55  ;;  %v10671_v6 = vadd.f32 %v10670_v4, %v10652_v24 }
 0x738   :  { %v10665_v56 = vadd.f32 %v10664_v7, %v10651_v13  ;;  %v10677_v37 = vadd.f32 %v10676_v14, %v10653_v42 }
 0x739   :  { %v10660_v34 = vrot.slane %v10659_v49, 2  ;;  %v10672_v3 = vrot.slane %v10671_v6, 2 }
 0x73a   :  { %v10666_v47 = vrot.slane %v10665_v56, 2  ;;  %v10678_v41 = vrot.slane %v10677_v37, 2 }
 0x73b   :  { %v10661_v28 = vadd.f32 %v10660_v34, %v10659_v49  ;;  %v10673_v11 = vadd.f32 %v10672_v3, %v10671_v6 }
 0x73c   :  { %v10667_v22 = vadd.f32 %v10666_v47, %v10665_v56  ;;  %v10679_v12 = vadd.f32 %v10678_v41, %v10677_v37 }
 0x73d   :  { %v10662_v40 = vrot.slane %v10661_v28, 1  ;;  %v10674_v58 = vrot.slane %v10673_v11, 1 }
 0x73e   :  { %v10668_v20 = vrot.slane %v10667_v22, 1  ;;  %v10680_v16 = vrot.slane %v10679_v12, 1  ;;  %v10480_v59 = vpop.f32.mrb[188].mxu0  ;;  %v10521_v21 = vpop.f32.mrb[188].mxu1 }
 0x73f   :  { %v10663_v36 = vadd.f32 %v10662_v40, %v10661_v28  ;;  %v10675_v46 = vadd.f32 %v10674_v58, %v10673_v11  ;;  %v10532_v26 = vadd.f32 %v10480_v59, %v14630_v19  ;;  %v10534_v43 = vadd.f32 %v10521_v21, %v14633_v29  ;;  %v10482_v60 = vpop.f32.mrb[189].mxu0  ;;  %v10523_v25 = vpop.f32.mrb[189].mxu1  ;;  %v14712_v59 = vld [vmem:[#allocation13] sm:$0xff] }
 0x740   :  { %v10669_v9 = vadd.f32 %v10668_v20, %v10667_v22  ;;  %v10681_v10 = vadd.f32 %v10680_v16, %v10679_v12  ;;  %v10533_v0 = vadd.f32 %v10482_v60, %v14636_v23  ;;  %v10535_v5 = vadd.f32 %v10523_v25, %v14639_v17  ;;  %v10484_v50 = vpop.f32.mrb[190].mxu0  ;;  %v10525_v31 = vpop.f32.mrb[190].mxu1  ;;  %v14710_v12 = vld [vmem:[#allocation12] sm:$0xff] }
 0x741   :  { %v10706_v30 = vmul.f32 0.125, %v10663_v36  ;;  %v10708_v38 = vmul.f32 0.125, %v10675_v46  ;;  %v10582_v2 = vadd.f32 %v10557_v62, %v10532_v26  ;;  %v10584_v63 = vadd.f32 %v10565_v27, %v10534_v43  ;;  %v10485_v32 = vpop.f32.mrb[191].mxu0  ;;  %v10526_v55 = vpop.f32.mrb[191].mxu1 }
 0x742   :  { %v10707_v24 = vmul.f32 0.125, %v10669_v9  ;;  %v10709_v19 = vmul.f32 0.125, %v10681_v10  ;;  %v10583_v13 = vadd.f32 %v10561_v18, %v10533_v0  ;;  %v10585_v29 = vadd.f32 %v10569_v8, %v10535_v5 }
 0x743   :  { %v10714_v42 = vadd.f32 1e-05, %v10706_v30  ;;  %v10716_v15 = vadd.f32 1e-05, %v10708_v38  ;;  %v10610_v4 = vrot.slane %v10582_v2, 4  ;;  %v10622_v7 = vrot.slane %v10584_v63, 4 }
 0x744   :  { %v10715_v14 = vadd.f32 1e-05, %v10707_v24  ;;  %v10717_v23 = vadd.f32 1e-05, %v10709_v19  ;;  %v10616_v49 = vrot.slane %v10583_v13, 4  ;;  %v10628_v17 = vrot.slane %v10585_v29, 4 }
 0x745   :  { %13270 = vrsqrt.f32 %v10714_v42  ;;  %v10611_v6 = vadd.f32 %v10610_v4, %v10582_v2  ;;  %v10623_v56 = vadd.f32 %v10622_v7, %v10584_v63  ;;  %v10743_v21 = vrot.slane %v14710_v12, %v14645_v53 }
 0x746   :  { %13272 = vrsqrt.f32 %v10716_v15  ;;  %v10617_v37 = vadd.f32 %v10616_v49, %v10583_v13  ;;  %v10629_v34 = vadd.f32 %v10628_v17, %v10585_v29  ;;  %v10751_v18 = vrot.slane %v14710_v12, %v14648_v35 }
 0x747   :  { %13274 = vrsqrt.f32 %v10715_v14  ;;  %v10612_v3 = vrot.slane %v10611_v6, 2  ;;  %v10624_v47 = vrot.slane %v10623_v56, 2  ;;  %v10747_v43 = vrot.slane %v14710_v12, %v14653_v57 }
 0x748   :  { %13276 = vrsqrt.f32 %v10717_v23  ;;  %v10618_v41 = vrot.slane %v10617_v37, 2  ;;  %v10630_v28 = vrot.slane %v10629_v34, 2  ;;  %v10755_v60 = vrot.slane %v14710_v12, %v14656_v44 }
 0x749   :  { %v10613_v11 = vadd.f32 %v10612_v3, %v10611_v6  ;;  %v10625_v22 = vadd.f32 %v10624_v47, %v10623_v56  ;;  %v10793_v0 = vrot.slane %v14712_v59, %v14645_v53  ;;  %v10801_v5 = vrot.slane %v14712_v59, %v14648_v35 }
 0x74a   :  { %v10619_v40 = vadd.f32 %v10618_v41, %v10617_v37  ;;  %v10631_v58 = vadd.f32 %v10630_v28, %v10629_v34  ;;  %v10797_v32 = vrot.slane %v14712_v59, %v14653_v57  ;;  %v10805_v53 = vrot.slane %v14712_v59, %v14656_v44 }
 0x74b   :  { %v10614_v62 = vrot.slane %v10613_v11, 1  ;;  %v10626_v27 = vrot.slane %v10625_v22, 1 }
 0x74c   :  { %v10620_v20 = vrot.slane %v10619_v40, 1  ;;  %v10632_v16 = vrot.slane %v10631_v58, 1 }
 0x74d   :  { %v10615_v8 = vadd.f32 %v10614_v62, %v10613_v11  ;;  %v10627_v36 = vadd.f32 %v10626_v27, %v10625_v22 }
 0x74e   :  { %v10621_v46 = vadd.f32 %v10620_v20, %v10619_v40  ;;  %v10633_v26 = vadd.f32 %v10632_v16, %v10631_v58 }
 0x74f   :  { %v13271_v25 = vpop.eup %13270  ;;  %v10638_v9 = vmul.f32 0.125, %v10615_v8  ;;  %v10640_v10 = vmul.f32 0.125, %v10627_v36 }
 0x750   :  { %v13273_v50 = vpop.eup %13272  ;;  %v10730_v31 = vmul.f32 %v13271_v25, %v14670_v54  ;;  %v10639_v30 = vmul.f32 0.125, %v10621_v46  ;;  %v10641_v38 = vmul.f32 0.125, %v10633_v26  ;;  %v13238_v25 = vld [vmem:[#allocation15 + $0x100] sm:$0xff]  }
 0x751   :  { %v13275_v55 = vpop.eup %13274  ;;  %v10732_v24 = vmul.f32 %v13273_v50, %v14672_v33  ;;  %v14730_v19 = vsub.f32 %v10582_v2, %v10638_v9  ;;  %v14732_v42 = vsub.f32 %v10584_v63, %v10640_v10  ;;  %v13239_v50 = vld [vmem:[#allocation15 + $0x180] sm:$0xff]  }
 0x752   :  { %v13277_v15 = vpop.eup %13276  ;;  %v10780_v35 = vmul.f32 %v10743_v21, %v10730_v31  ;;  %v10731_v4 = vmul.f32 %v13275_v55, %v14674_v39  ;;  %v14737_v54 = vsub.f32 %v10583_v13, %v10639_v30  ;;  %v14739_v7 = vsub.f32 %v10585_v29, %v10641_v38  ;;  %v13240_v31 = vld [vmem:[#allocation15 + $0x148] sm:$0xff]  }
 0x753   :  { %v10782_v14 = vmul.f32 %v10751_v18, %v10732_v24  ;;  %v10733_v57 = vmul.f32 %v13277_v15, %v14676_v61  ;;  %v10654_v33 = vmul.f32 %v14730_v19, %v14730_v19  ;;  %v10656_v2 = vmul.f32 %v14732_v42, %v14732_v42  ;;  %v13241_v55 = vld [vmem:[#allocation15 + $0x1c8] sm:$0xff]  }
 0x754   :  { %v10655_v44 = vmul.f32 %v14737_v54, %v14737_v54  ;;  %v10657_v63 = vmul.f32 %v14739_v7, %v14739_v7  ;;  %v10781_v39 = vmul.f32 %v10747_v43, %v10731_v4  ;;  %v10830_v13 = vadd.f32 %v10793_v0, %v10780_v35  ;;  %v13242_v4 = vld [vmem:[#allocation15 + $0x108] sm:$0xff]  }
 0x755   :  { %v10682_v23 = vrot.slane %v10654_v33, 4  ;;  %v10694_v29 = vrot.slane %v10656_v2, 4  ;;  %v10783_v49 = vmul.f32 %v10755_v60, %v10733_v57  ;;  %v10832_v17 = vadd.f32 %v10801_v5, %v10782_v14 }
 0x756   :  { %v10688_v6 = vrot.slane %v10655_v44, 4  ;;  %v10700_v61 = vrot.slane %v10657_v63, 4  ;;  %v10831_v56 = vadd.f32 %v10797_v32, %v10781_v39  ;;  %v10838_v37 = vmul.f32 0.2, %v10830_v13  ;;  %v13245_v39 = vld [vmem:[#allocation15 + $0x1d0] sm:$0xff]  }
 0x757   :  { %v10683_v34 = vadd.f32 %v10682_v23, %v10654_v33  ;;  %v10695_v3 = vadd.f32 %v10694_v29, %v10656_v2  ;;  %v10833_v47 = vadd.f32 %v10805_v53, %v10783_v49  ;;  %v10840_v41 = vmul.f32 0.2, %v10832_v17  ;;  %v13243_v33 = vld [vmem:[#allocation15 + $0x188] sm:$0xff]   ;;  %v13244_v2 = vld [vmem:[#allocation15 + $0x150] sm:$0xff]  }
 0x758   :  { %v10689_v28 = vadd.f32 %v10688_v6, %v10655_v44  ;;  %v10701_v11 = vadd.f32 %v10700_v61, %v10657_v63  ;;  %v10839_v22 = vmul.f32 0.2, %v10831_v56  ;;  %v10846_v27 = vmax.f32 %v10830_v13, %v10838_v37  ;;  %v13247_v6 = vld [vmem:[#allocation15 + $0x190] sm:$0xff]   ;;  %v13248_v61 = vld [vmem:[#allocation15 + $0x158] sm:$0xff]  }
 0x759   :  { %v10684_v40 = vrot.slane %v10683_v34, 2  ;;  %v10696_v58 = vrot.slane %v10695_v3, 2  ;;  %v10841_v62 = vmul.f32 0.2, %v10833_v47  ;;  %v10848_v18 = vmax.f32 %v10832_v17, %v10840_v41  ;;  %v13246_v17 = vld [vmem:[#allocation15 + $0x110] sm:$0xff]   ;;  %v13250_v37 = vld [vmem:[#allocation15 + $0x118] sm:$0xff]  }
 0x75a   :  { %v10690_v20 = vrot.slane %v10689_v28, 2  ;;  %v10702_v16 = vrot.slane %v10701_v11, 2  ;;  %v10847_v21 = vmax.f32 %v10831_v56, %v10839_v22  ;;  %v10854_v5 = vpack.c.bf16 %v10846_v27, %v10846_v27  ;;  %v13249_v56 = vld [vmem:[#allocation15 + $0x1d8] sm:$0xff]   ;;  %v13254_v41 = vld [vmem:[#allocation15 + $0x120] sm:$0xff]  }
 0x75b   :  { %v10685_v8 = vadd.f32 %v10684_v40, %v10683_v34  ;;  %v10697_v36 = vadd.f32 %v10696_v58, %v10695_v3  ;;  %v10849_v46 = vmax.f32 %v10833_v47, %v10841_v62  ;;  %v10856_v32 = vpack.c.bf16 %v10848_v18, %v10848_v18  ;;  %v13251_v34 = vld [vmem:[#allocation15 + $0x198] sm:$0xff]   ;;  %v13252_v3 = vld [vmem:[#allocation15 + $0x160] sm:$0xff]   ;;  %v13257_v40 = vld [vmem:[#allocation15 + $0x1e8] sm:$0xff]  }
 0x75c   :  { %v10691_v26 = vadd.f32 %v10690_v20, %v10689_v28  ;;  %v10703_v43 = vadd.f32 %v10702_v16, %v10701_v11  ;;  %v10855_v60 = vpack.c.bf16 %v10847_v21, %v10847_v21  ;;  %v13253_v47 = vld [vmem:[#allocation15 + $0x1e0] sm:$0xff]   ;;  %v13256_v11 = vld [vmem:[#allocation15 + $0x168] sm:$0xff]   ;;  %v10759_v22 = vrot.slane %v14710_v12, %v14687_v48 }
 0x75d   :  { %v10686_v9 = vrot.slane %v10685_v8, 1  ;;  %v10698_v10 = vrot.slane %v10697_v36, 1  ;;  %v10857_v0 = vpack.c.bf16 %v10849_v46, %v10849_v46  ;;  %v13255_v28 = vld [vmem:[#allocation15 + $0x1a0] sm:$0xff]   ;;  %v10767_v62 = vrot.slane %v14710_v12, %v14690_v1  ;;  %v13258_v16 = vld [vmem:[#allocation15 + $0x128] sm:$0xff]  }
 0x75e   :  { %v10692_v30 = vrot.slane %v10691_v26, 1  ;;  %v10704_v38 = vrot.slane %v10703_v43, 1  ;;  %11413 = vmatprep.mubr.bf16.mxu0 %v10855_v60  ;;  %v10763_v21 = vrot.slane %v14710_v12, %v14693_v52  ;;  %v10809_v18 = vrot.slane %v14712_v59, %v14687_v48  ;;  %v13259_v46 = vld [vmem:[#allocation15 + $0x1a8] sm:$0xff]  }
 0x75f   :  { %v10687_v24 = vadd.f32 %v10686_v9, %v10685_v8  ;;  %v10699_v53 = vadd.f32 %v10698_v10, %v10697_v36  ;;  %11453 = vmatprep.mubr.bf16.mxu1 %v10857_v0  ;;  %11414 = vmatmul.mubr.bf16.vlgmr.msra.gmra.mrb[192].mxu0 %v10854_v5  ;;  %v13261_v10 = vld [vmem:[#allocation15 + $0x1f0] sm:$0xff]   ;;  %v10813_v48 = vrot.slane %v14712_v59, %v14693_v52 }
 0x760   :  { %v10693_v15 = vadd.f32 %v10692_v30, %v10691_v26  ;;  %v10705_v35 = vadd.f32 %v10704_v38, %v10703_v43  ;;  %11454 = vmatmul.mubr.bf16.vlgmr.msra.gmra.mrb[192].mxu1 %v10856_v32  ;;  %13082 = vmatpush3.bf16.msra.mxu0 %v13238_v25  ;;  %v13260_v26 = vld [vmem:[#allocation15 + $0x170] sm:$0xff]   ;;  %v10771_v43 = vrot.slane %v14710_v12, %v14696_v51  ;;  %v13264_v30 = vld [vmem:[#allocation15 + $0x178] sm:$0xff]  }
 0x761   :  { %v10710_v14 = vmul.f32 0.125, %v10687_v24  ;;  %v10712_v57 = vmul.f32 0.125, %v10699_v53  ;;  %13104 = vmatpush3.bf16.msra.mxu1 %v13239_v50  ;;  %13083 = vmatprep.subr.bf16.mxu0 %v13240_v31  ;;  %v10821_v5 = vrot.slane %v14712_v59, %v14696_v51  ;;  %v13262_v12 = vld [vmem:[#allocation15 + $0x130] sm:$0xff]   ;;  %v13265_v32 = vld [vmem:[#allocation15 + $0x1f8] sm:$0xff]  }
 0x762   :  { %v10711_v44 = vmul.f32 0.125, %v10693_v15  ;;  %v10713_v63 = vmul.f32 0.125, %v10705_v35  ;;  %13105 = vmatprep.subr.bf16.mxu1 %v13241_v55  ;;  %v13267_v51 = vld [vmem:[#allocation15 + $0x1b8] sm:$0xff]  }
 0x763   :  { %v10718_v13 = vadd.f32 1e-05, %v10710_v14  ;;  %v10720_v23 = vadd.f32 1e-05, %v10712_v57 }
 0x764   :  { %v10719_v29 = vadd.f32 1e-05, %v10711_v44  ;;  %v10721_v49 = vadd.f32 1e-05, %v10713_v63  ;;  %13084 = vmatpush3.bf16.msra.mxu0 %v13242_v4 }
 0x765   :  { %13278 = vrsqrt.f32 %v10718_v13  ;;  %13106 = vmatpush3.bf16.msra.mxu1 %v13243_v33  ;;  %13085 = vmatprep.subr.bf16.mxu0 %v13244_v2 }
 0x766   :  { %13280 = vrsqrt.f32 %v10720_v23  ;;  %13107 = vmatprep.subr.bf16.mxu1 %v13245_v39  ;;  %v12716_v23 = vld [vmem:[#allocation16] ss:$0 sm:$0xff] }
 0x767   :  { %13282 = vrsqrt.f32 %v10719_v29 }
 0x768   :  { %13284 = vrsqrt.f32 %v10721_v49  ;;  %13086 = vmatpush3.bf16.msra.mxu0 %v13246_v17 }
 0x769   :  { %13108 = vmatpush3.bf16.msra.mxu1 %v13247_v6  ;;  %13087 = vmatprep.subr.bf16.mxu0 %v13248_v61 }
 0x76a   :  { %13109 = vmatprep.subr.bf16.mxu1 %v13249_v56 }
 0x76c   :  { %13088 = vmatpush3.bf16.msra.mxu0 %v13250_v37 }
 0x76d   :  { %13110 = vmatpush3.bf16.msra.mxu1 %v13251_v34  ;;  %13089 = vmatprep.subr.bf16.mxu0 %v13252_v3 }
 0x76e   :  { %13111 = vmatprep.subr.bf16.mxu1 %v13253_v47 }
 0x76f   :  { %v13279_v58 = vpop.eup %13278 }
 0x770   :  { %v13281_v27 = vpop.eup %13280  ;;  %v10734_v20 = vmul.f32 %v13279_v58, %v14730_v19  ;;  %13090 = vmatpush3.bf16.msra.mxu0 %v13254_v41  ;;  %v10817_v19 = vrot.slane %v14712_v59, %v14690_v1  ;;  %v13263_v1 = vld [vmem:[#allocation15 + $0x1b0] sm:$0xff]  }
 0x771   :  { %v13283_v8 = vpop.eup %13282  ;;  %v10736_v36 = vmul.f32 %v13281_v27, %v14732_v42  ;;  %13112 = vmatpush3.bf16.msra.mxu1 %v13255_v28  ;;  %13091 = vmatprep.subr.bf16.mxu0 %v13256_v11 }
 0x772   :  { %v13285_v60 = vpop.eup %13284  ;;  %v10784_v25 = vmul.f32 %v10759_v22, %v10734_v20  ;;  %v10735_v9 = vmul.f32 %v13283_v8, %v14737_v54  ;;  %13113 = vmatprep.subr.bf16.mxu1 %v13257_v40 }
 0x773   :  { %v10786_v42 = vmul.f32 %v10767_v62, %v10736_v36  ;;  %v10737_v0 = vmul.f32 %v13285_v60, %v14739_v7  ;;  %v13266_v7 = vld [vmem:[#allocation15 + $0x138] sm:$0xff]  }
 0x774   :  { %13092 = vmatpush3.bf16.msra.mxu0 %v13258_v16  ;;  %v10785_v50 = vmul.f32 %v10763_v21, %v10735_v9  ;;  %v10834_v31 = vadd.f32 %v10809_v18, %v10784_v25 }
 0x775   :  { %13114 = vmatpush3.bf16.msra.mxu1 %v13259_v46  ;;  %13093 = vmatprep.subr.bf16.mxu0 %v13260_v26  ;;  %v10787_v54 = vmul.f32 %v10771_v43, %v10737_v0  ;;  %v10836_v38 = vadd.f32 %v10817_v19, %v10786_v42  ;;  %v11542_v43 = vand.u32 127, %v10538_v45 }
 0x776   :  { %13115 = vmatprep.subr.bf16.mxu1 %v13261_v10  ;;  %v10835_v55 = vadd.f32 %v10813_v48, %v10785_v50  ;;  %v10842_v52 = vmul.f32 0.2, %v10834_v31 }
 0x777   :  { %v10837_v24 = vadd.f32 %v10821_v5, %v10787_v54  ;;  %v10844_v53 = vmul.f32 0.2, %v10836_v38  ;;  %vm11548_vm0 = vcmp.lt.s32.totalorder %v11542_v43, 1 }
 0x778   :  { %13094 = vmatpush3.bf16.msra.mxu0 %v13262_v12  ;;  %v10843_v15 = vmul.f32 0.2, %v10835_v55  ;;  %v10850_v35 = vmax.f32 %v10834_v31, %v10842_v52 }
 0x779   :  { %13116 = vmatpush3.bf16.msra.mxu1 %v13263_v1  ;;  %13095 = vmatprep.subr.bf16.mxu0 %v13264_v30  ;;  %v10845_v59 = vmul.f32 0.2, %v10837_v24  ;;  %v10852_v14 = vmax.f32 %v10836_v38, %v10844_v53 }
 0x77a   :  { %13117 = vmatprep.subr.bf16.mxu1 %v13265_v32  ;;  %v10851_v4 = vmax.f32 %v10835_v55, %v10843_v15  ;;  %v10858_v44 = vpack.c.bf16 %v10850_v35, %v10850_v35 }
 0x77b   :  { %v10853_v57 = vmax.f32 %v10837_v24, %v10845_v59  ;;  %v10860_v63 = vpack.c.bf16 %v10852_v14, %v10852_v14 }
 0x77c   :  { %13096 = vmatpush3.bf16.msra.mxu0 %v13266_v7  ;;  %v10859_v33 = vpack.c.bf16 %v10851_v4, %v10851_v4 }
 0x77d   :  { %13118 = vmatpush3.bf16.msra.mxu1 %v13267_v51  ;;  %v10861_v2 = vpack.c.bf16 %v10853_v57, %v10853_v57 }
 0x77e   :  { %11493 = vmatprep.mubr.bf16.mxu0 %v10859_v33 }
 0x77f   :  { %11533 = vmatprep.mubr.bf16.mxu1 %v10861_v2  ;;  %11494 = vmatmul.mubr.bf16.vlgmr.msra.gmra.mrb[196].mxu0 %v10858_v44 }
 0x780   :  { %11534 = vmatmul.mubr.bf16.vlgmr.msra.gmra.mrb[196].mxu1 %v10860_v63 }
 0x832   :  { %v13053_v39 = vpop.f32.mrb[192].mxu0 }
 0x833   :  { %v13075_v13 = vpop.f32.mrb[192].mxu1  ;;  %v13054_v29 = vpop.f32.mrb[193].mxu0 }
 0x834   :  { %v13055_v49 = vadd.f32 %v13054_v29, %v13053_v39  ;;  %v13076_v17 = vpop.f32.mrb[193].mxu1  ;;  %v13056_v6 = vpop.f32.mrb[194].mxu0 }
 0x835   :  { %v13077_v61 = vadd.f32 %v13076_v17, %v13075_v13  ;;  %v13078_v56 = vpop.f32.mrb[194].mxu1  ;;  %v13057_v37 = vpop.f32.mrb[195].mxu0 }
 0x836   :  { %v11416_v34 = vadd.f32 %v13055_v49, %v12716_v23  ;;  %v13079_v3 = vpop.f32.mrb[195].mxu1 }
 0x838   :  { %v11456_v47 = vadd.f32 %v13077_v61, %v11416_v34 }
 0x852   :  { %v13097_v41 = vpop.f32.mrb[196].mxu0 }
 0x853   :  { %v13119_v28 = vpop.f32.mrb[196].mxu1  ;;  %v13098_v11 = vpop.f32.mrb[197].mxu0 }
 0x854   :  { %v13099_v22 = vadd.f32 %v13098_v11, %v13097_v41  ;;  %v13120_v40 = vpop.f32.mrb[197].mxu1  ;;  %v13100_v58 = vpop.f32.mrb[198].mxu0 }
 0x855   :  { %v13121_v62 = vadd.f32 %v13120_v40, %v13119_v28  ;;  %v13122_v27 = vpop.f32.mrb[198].mxu1  ;;  %v13101_v20 = vpop.f32.mrb[199].mxu0 }
 0x856   :  { %v11496_v16 = vadd.f32 %v13099_v22, %v11456_v47  ;;  %v13123_v21 = vpop.f32.mrb[199].mxu1 }
 0x858   :  { %v11536_v18 = vadd.f32 %v13121_v62, %v11496_v16 }
 0x85a   :  { %v11543_v8 = vsub.f32 0.0, %v11536_v18 }
 0x85c   :  { %v11544_v36 = vmul.f32 1.442695, %v11543_v8 }
 0x85e   :  { %13286 = vpow2.f32 %v11544_v36 }
 0x868   :  { %v13287_v46 = vpop.eup %13286 }
 0x869   :  { %v11546_v26 = vadd.f32 1.0, %v13287_v46 }
 0x86b   :  { %13288 = vrcp.f32 %v11546_v26 }
 0x875   :  { %v13289_v19 = vpop.eup %13288 }
 0x876   :  { %v11549_v60 = vsel %vm11548_vm0, %v13289_v19, %v11536_v18 }
 0x877   :  { %11550 = vst [vmem:[%s14785_s11] sm:$0xff] %v11549_v60 }
 0x878   :  { %11555 = vsyncpa [#allocation3], 1 }
 0x879   :  { %11556 = vsyncpa [#allocation5], 1 }
 0x87a   :  { %11557 = vsyncpa [#allocation8], 1 }
 0x87b   :  { %11558 = vsyncpa [#allocation11], 1 }
 0x87c   :  { %11559 = vsyncpa [#allocation14], 1 }
 0x87d   :  { %11560 = vsyncpa [#allocation17], 1 }

</bundles_post_ra>
